<compile_context>
chip_gen: v5e
topology: v5e:2x2
jax: 0.10.0
libtpu: 0.0.40
codegen_flags: <defaults>
</compile_context>

<pallas_src>
import jax
import jax.numpy as jnp
from jax.experimental import pallas as pl
from jax.experimental.pallas import tpu as pltpu

K = 5                                   # Conv1d kernel width of every Block
_CHANNELS = [(1, 8), (8, 16), (16, 32), (32, 64), (64, 64), (64, 128),
             (128, 256), (256, 512)]
_N_LAYERS = len(_CHANNELS)


# ------------------------------ fused kernel --------------------------------


def _classifier_kernel(x_ref, *rest):
    """Forward pass of the full classifier for one block of `bb` elements.

    x_ref : (bb, 1, L0) f32                      input block (PyTorch NCL)
    rest  : w1, b1, ..., w8, b8                  conv params
              w1 : (K, 8, 1)       f32   (Block 1, VPU path)
              wi : (K*Cin, Cout)   bf16  (Blocks 2..8, im2col layout)
              bi : (1, Cout)       f32
            wl (512, 2) bf16, bl (1, 2) f32      linear head
            o_ref : (1, bb, 2) f32               output block
    """
    conv_refs = rest[:2 * _N_LAYERS]
    wl_ref = rest[2 * _N_LAYERS]
    bl_ref = rest[2 * _N_LAYERS + 1]
    o_ref = rest[2 * _N_LAYERS + 2]

    bb = x_ref.shape[0]
    l0 = x_ref.shape[2]

    act = None                                   # (bb, L_i, Cin_i) bf16, i >= 1
    for i, (cin, cout) in enumerate(_CHANNELS):
        bias = conv_refs[2 * i + 1][...]         # (1, cout) f32

        if i == 0:
            # Block 1 (Cin=1): length stays lane-dense; 5 broadcast FMAs on the
            # VPU, then one (cout, L) -> (L, cout) transpose (XLU).
            l = l0
            w1_ref = conv_refs[0]                # (K, cout, 1) f32
            zl = jnp.zeros((bb, 1, 2), jnp.float32)
            xp = jnp.concatenate([zl, x_ref[...], zl], axis=2)     # (bb, 1, l+4)
            acc_cl = None
            for t in range(K):
                # (bb, 1, l) * (cout, 1) -> (bb, cout, l)
                term = xp[:, :, t:t + l] * w1_ref[t]
                acc_cl = term if acc_cl is None else acc_cl + term
            acc = jnp.swapaxes(acc_cl, 1, 2)                       # (bb, l, cout)
        else:
            # Blocks 2..8: one im2col MXU matmul per layer.
            # LHS (bb*l, 5*cin) = lane-concat of the 5 shifted tap slices.
            l = act.shape[1]
            w_ref = conv_refs[2 * i]                               # (K*cin, cout)
            zp = jnp.zeros((bb, 2, cin), jnp.bfloat16)
            xp = jnp.concatenate([zp, act, zp], axis=1)            # (bb, l+4, cin)
            lhs = jnp.concatenate([xp[:, t:t + l, :] for t in range(K)], axis=2)
            acc = jnp.dot(lhs.reshape(bb * l, K * cin), w_ref[...],
                          preferred_element_type=jnp.float32)
            acc = acc.reshape(bb, l, cout)

        y = jnp.maximum(acc + bias, 0.0)                           # bias + ReLU

        if i < _N_LAYERS - 1:
            # MaxPool1d(kernel_size=2) fused into the conv epilogue.
            pooled = jnp.max(y.reshape(bb, l // 2, 2, cout), axis=2)
            act = pooled.astype(jnp.bfloat16)
        else:
            # Head: global max over length + Linear(512, 2) for the whole block.
            # TODO(synk): nn.Dropout(p=0.5) is identity at inference; omitted.
            feat = jnp.max(y, axis=1).astype(jnp.bfloat16)         # (bb, 512)
            logits = jnp.dot(feat, wl_ref[...],
                             preferred_element_type=jnp.float32) + bl_ref[...]
            o_ref[...] = logits[None]                              # (1, bb, 2)


# ------------------------------ wrapper --------------------------------------


def _resident_spec(a):
    """Whole-array, VMEM-resident BlockSpec (same block every grid step)."""
    nd = a.ndim
    return pl.BlockSpec(a.shape, lambda i, _nd=nd: (0,) * _nd)


def _pick_block_batch(n, target=128):
    """Batch elements folded into one grid step.

    Large enough that the deepest conv's matmul M dim (2*B) fills the MXU
    rows (128 on v5e, 256 on v6e/v7x at B=128), while keeping >= 2 grid steps
    so both v7x TensorCores get work via the parallel grid axis."""
    if n <= 1:
        return 1
    return max(1, min(target, -(-n // 2)))


def _flatten_params(params):
    flat = []
    for w, b in params["convs"]:
        k, cin, cout = w.shape
        if cin == 1:
            # Block 1 runs on the VPU in channels-by-length orientation:
            # ship as (K, Cout, 1) f32 so w[t] broadcasts against (bb,1,L) taps.
            flat.append(jnp.transpose(w, (0, 2, 1)).astype(jnp.float32))
        else:
            # im2col weight: (K, Cin, Cout) -> (K*Cin, Cout), bf16 for the MXU.
            flat.append(w.reshape(k * cin, cout).astype(jnp.bfloat16))
        flat.append(b.astype(jnp.float32))                     # (1, Cout)
    wl, bl = params["head"]
    flat.append(wl.astype(jnp.bfloat16))                       # (512, 2)
    flat.append(bl.astype(jnp.float32))                        # (1, 2)
    return flat


def classifier_forward(x_ncl, params, block_batch=None):
    """x_ncl: (N, 1, L) float32 (PyTorch NCL).  Returns (logits (N, 2), None)."""
    n, c, l0 = x_ncl.shape
    assert c == 1, "Classifier expects a single input channel"
    assert l0 % (2 ** (_N_LAYERS - 1)) == 0, "L must be divisible by 2**7"

    bb = block_batch or _pick_block_batch(n)
    g = pl.cdiv(n, bb)
    n_pad = g * bb

    x = x_ncl.astype(jnp.float32)
    if n_pad != n:                                  # pad batch; padded rows are
        x = jnp.concatenate(                        # computed then sliced off.
            [x, jnp.zeros((n_pad - n, 1, l0), jnp.float32)], axis=0)

    flat = _flatten_params(params)

    in_specs = [pl.BlockSpec((bb, 1, l0), lambda i: (i, 0, 0))]
    in_specs += [_resident_spec(a) for a in flat]

    out = pl.pallas_call(
        _classifier_kernel,
        out_shape=jax.ShapeDtypeStruct((g, bb, 2), jnp.float32),
        grid=(g,),
        in_specs=in_specs,
        out_specs=pl.BlockSpec((1, bb, 2), lambda i: (i, 0, 0)),
        compiler_params=pltpu.CompilerParams(
            dimension_semantics=("parallel",),
            vmem_limit_bytes=48 * 1024 * 1024),
    )(x, *flat)

    return out.reshape(n_pad, 2)[:n], None


# ------------------------------ params & reference ---------------------------


def init_params(key):
    """Deterministic synthetic parameters (PyTorch-default-style uniform init).

    Conv weights are (K, Cin, Cout); Linear weight is (512, 2)."""
    params = {"convs": []}
    for cin, cout in _CHANNELS:
        key, kw, kb = jax.random.split(key, 3)
        bound = 1.0 / (cin * K) ** 0.5
        w = jax.random.uniform(kw, (K, cin, cout), jnp.float32, -bound, bound)
        b = jax.random.uniform(kb, (1, cout), jnp.float32, -bound, bound)
        params["convs"].append((w, b))
    key, kw, kb = jax.random.split(key, 3)
    bound = 1.0 / 512.0 ** 0.5
    wl = jax.random.uniform(kw, (512, 2), jnp.float32, -bound, bound)
    bl = jax.random.uniform(kb, (1, 2), jnp.float32, -bound, bound)
    params["head"] = (wl, bl)
    return params


def _reference_forward(x_ncl, params):
    """Pure-JAX float32 reference of the PyTorch module."""
    x = jnp.transpose(x_ncl, (0, 2, 1)).astype(jnp.float32)      # (N, L, 1)
    for i, (w, b) in enumerate(params["convs"]):
        l = x.shape[1]
        xp = jnp.pad(x, ((0, 0), (2, 2), (0, 0)))
        y = b[None, :, :] + sum(
            jnp.einsum("nlc,co->nlo", xp[:, t:t + l, :], w[t],
                       precision=jax.lax.Precision.HIGHEST)
            for t in range(K))
        y = jnp.maximum(y, 0.0)
        if i < _N_LAYERS - 1:
            y = jnp.maximum(y[:, 0::2, :], y[:, 1::2, :])         # MaxPool1d(2)
        x = y
    feat = jnp.max(x, axis=1)                                     # (N, 512)
    wl, bl = params["head"]
    return feat @ wl + bl


# ------------------------------ main ------------------------------------------

if __name__ == "__main__":
    key = jax.random.PRNGKey(0)
    kx, kp = jax.random.split(key)

    N, L = 2, 256                                   # L divisible by 2**7
    x = jax.random.normal(kx, (N, 1, L), jnp.float32)
    params = init_params(kp)

    logits, aux = jax.jit(classifier_forward)(x, params)
    logits = jax.block_until_ready(logits)

    assert logits.shape == (N, 2), logits.shape
    assert aux is None
    assert bool(jnp.all(jnp.isfinite(logits)))

    ref = _reference_forward(x, params)
    assert bool(jnp.allclose(logits, ref, rtol=1e-1, atol=5e-2)), (logits, ref)

    print("KERNEL_OK")
</pallas_src>

<mosaic_0001>
module attributes {stable_mosaic.version = 11 : i64} {
  func.func @_classifier_kernel(%arg0: i32, %arg1: memref<1x1x256xf32, #tpu.memory_space<vmem>>, %arg2: memref<5x8x1xf32, #tpu.memory_space<vmem>>, %arg3: memref<1x8xf32, #tpu.memory_space<vmem>>, %arg4: memref<40x16xbf16, #tpu.memory_space<vmem>>, %arg5: memref<1x16xf32, #tpu.memory_space<vmem>>, %arg6: memref<80x32xbf16, #tpu.memory_space<vmem>>, %arg7: memref<1x32xf32, #tpu.memory_space<vmem>>, %arg8: memref<160x64xbf16, #tpu.memory_space<vmem>>, %arg9: memref<1x64xf32, #tpu.memory_space<vmem>>, %arg10: memref<320x64xbf16, #tpu.memory_space<vmem>>, %arg11: memref<1x64xf32, #tpu.memory_space<vmem>>, %arg12: memref<320x128xbf16, #tpu.memory_space<vmem>>, %arg13: memref<1x128xf32, #tpu.memory_space<vmem>>, %arg14: memref<640x256xbf16, #tpu.memory_space<vmem>>, %arg15: memref<1x256xf32, #tpu.memory_space<vmem>>, %arg16: memref<1280x512xbf16, #tpu.memory_space<vmem>>, %arg17: memref<1x512xf32, #tpu.memory_space<vmem>>, %arg18: memref<512x2xbf16, #tpu.memory_space<vmem>>, %arg19: memref<1x2xf32, #tpu.memory_space<vmem>>, %arg20: memref<1x1x2xf32, #tpu.memory_space<vmem>>) attributes {dimension_semantics = [#tpu.dimension_semantics<parallel>], iteration_bounds = array<i64: 2>, scalar_prefetch = 0 : i64, scratch_operands = 0 : i64, tpu.core_type = #tpu.core_type<tc>, window_params = [{transform_indices = @transform_0, window_bounds = array<i64: 1, 1, 256>}, {pipeline_mode = #tpu.pipeline_mode<synchronous>, transform_indices = @transform_1, window_bounds = array<i64: 5, 8, 1>}, {pipeline_mode = #tpu.pipeline_mode<synchronous>, transform_indices = @transform_2, window_bounds = array<i64: 1, 8>}, {pipeline_mode = #tpu.pipeline_mode<synchronous>, transform_indices = @transform_3, window_bounds = array<i64: 40, 16>}, {pipeline_mode = #tpu.pipeline_mode<synchronous>, transform_indices = @transform_4, window_bounds = array<i64: 1, 16>}, {pipeline_mode = #tpu.pipeline_mode<synchronous>, transform_indices = @transform_5, window_bounds = array<i64: 80, 32>}, {pipeline_mode = #tpu.pipeline_mode<synchronous>, transform_indices = @transform_6, window_bounds = array<i64: 1, 32>}, {pipeline_mode = #tpu.pipeline_mode<synchronous>, transform_indices = @transform_7, window_bounds = array<i64: 160, 64>}, {pipeline_mode = #tpu.pipeline_mode<synchronous>, transform_indices = @transform_8, window_bounds = array<i64: 1, 64>}, {pipeline_mode = #tpu.pipeline_mode<synchronous>, transform_indices = @transform_9, window_bounds = array<i64: 320, 64>}, {pipeline_mode = #tpu.pipeline_mode<synchronous>, transform_indices = @transform_10, window_bounds = array<i64: 1, 64>}, {pipeline_mode = #tpu.pipeline_mode<synchronous>, transform_indices = @transform_11, window_bounds = array<i64: 320, 128>}, {pipeline_mode = #tpu.pipeline_mode<synchronous>, transform_indices = @transform_12, window_bounds = array<i64: 1, 128>}, {pipeline_mode = #tpu.pipeline_mode<synchronous>, transform_indices = @transform_13, window_bounds = array<i64: 640, 256>}, {pipeline_mode = #tpu.pipeline_mode<synchronous>, transform_indices = @transform_14, window_bounds = array<i64: 1, 256>}, {pipeline_mode = #tpu.pipeline_mode<synchronous>, transform_indices = @transform_15, window_bounds = array<i64: 1280, 512>}, {pipeline_mode = #tpu.pipeline_mode<synchronous>, transform_indices = @transform_16, window_bounds = array<i64: 1, 512>}, {pipeline_mode = #tpu.pipeline_mode<synchronous>, transform_indices = @transform_17, window_bounds = array<i64: 512, 2>}, {pipeline_mode = #tpu.pipeline_mode<synchronous>, transform_indices = @transform_18, window_bounds = array<i64: 1, 2>}, {transform_indices = @transform_19, window_bounds = array<i64: 1, 1, 2>}]} {
    %c0 = arith.constant 0 : index
    %c0_0 = arith.constant 0 : index
    %0 = vector.load %arg3[%c0, %c0_0] : memref<1x8xf32, #tpu.memory_space<vmem>>, vector<1x8xf32>
    %cst = arith.constant 0.000000e+00 : f32
    %1 = vector.broadcast %cst : f32 to vector<1x1x2xf32>
    %c0_1 = arith.constant 0 : index
    %c0_2 = arith.constant 0 : index
    %c0_3 = arith.constant 0 : index
    %2 = vector.load %arg1[%c0_1, %c0_2, %c0_3] : memref<1x1x256xf32, #tpu.memory_space<vmem>>, vector<1x1x256xf32>
    %3 = tpu.concatenate %1, %2, %1 in 2 : vector<1x1x2xf32>, vector<1x1x256xf32>, vector<1x1x2xf32> -> vector<1x1x260xf32>
    %4 = vector.extract_strided_slice %3 {offsets = [0, 0, 0], sizes = [1, 1, 256], strides = [1, 1, 1]} : vector<1x1x260xf32> to vector<1x1x256xf32>
    %c0_4 = arith.constant 0 : index
    %c0_5 = arith.constant 0 : index
    %c0_6 = arith.constant 0 : index
    %5 = vector.load %arg2[%c0_4, %c0_5, %c0_6] : memref<5x8x1xf32, #tpu.memory_space<vmem>>, vector<1x8x1xf32>
    %6 = vector.shape_cast %5 : vector<1x8x1xf32> to vector<8x1xf32>
    %7 = vector.shape_cast %6 : vector<8x1xf32> to vector<1x8x1xf32>
    %8 = vector.broadcast %4 : vector<1x1x256xf32> to vector<1x8x256xf32>
    %9 = vector.broadcast %7 : vector<1x8x1xf32> to vector<1x8x256xf32>
    %10 = arith.mulf %8, %9 : vector<1x8x256xf32>
    %11 = vector.extract_strided_slice %3 {offsets = [0, 0, 1], sizes = [1, 1, 256], strides = [1, 1, 1]} : vector<1x1x260xf32> to vector<1x1x256xf32>
    %c1 = arith.constant 1 : index
    %c0_7 = arith.constant 0 : index
    %c0_8 = arith.constant 0 : index
    %12 = vector.load %arg2[%c1, %c0_7, %c0_8] : memref<5x8x1xf32, #tpu.memory_space<vmem>>, vector<1x8x1xf32>
    %13 = vector.shape_cast %12 : vector<1x8x1xf32> to vector<8x1xf32>
    %14 = vector.shape_cast %13 : vector<8x1xf32> to vector<1x8x1xf32>
    %15 = vector.broadcast %11 : vector<1x1x256xf32> to vector<1x8x256xf32>
    %16 = vector.broadcast %14 : vector<1x8x1xf32> to vector<1x8x256xf32>
    %17 = arith.mulf %15, %16 : vector<1x8x256xf32>
    %18 = arith.addf %10, %17 : vector<1x8x256xf32>
    %19 = vector.extract_strided_slice %3 {offsets = [0, 0, 2], sizes = [1, 1, 256], strides = [1, 1, 1]} : vector<1x1x260xf32> to vector<1x1x256xf32>
    %c2 = arith.constant 2 : index
    %c0_9 = arith.constant 0 : index
    %c0_10 = arith.constant 0 : index
    %20 = vector.load %arg2[%c2, %c0_9, %c0_10] : memref<5x8x1xf32, #tpu.memory_space<vmem>>, vector<1x8x1xf32>
    %21 = vector.shape_cast %20 : vector<1x8x1xf32> to vector<8x1xf32>
    %22 = vector.shape_cast %21 : vector<8x1xf32> to vector<1x8x1xf32>
    %23 = vector.broadcast %19 : vector<1x1x256xf32> to vector<1x8x256xf32>
    %24 = vector.broadcast %22 : vector<1x8x1xf32> to vector<1x8x256xf32>
    %25 = arith.mulf %23, %24 : vector<1x8x256xf32>
    %26 = arith.addf %18, %25 : vector<1x8x256xf32>
    %27 = vector.extract_strided_slice %3 {offsets = [0, 0, 3], sizes = [1, 1, 256], strides = [1, 1, 1]} : vector<1x1x260xf32> to vector<1x1x256xf32>
    %c3 = arith.constant 3 : index
    %c0_11 = arith.constant 0 : index
    %c0_12 = arith.constant 0 : index
    %28 = vector.load %arg2[%c3, %c0_11, %c0_12] : memref<5x8x1xf32, #tpu.memory_space<vmem>>, vector<1x8x1xf32>
    %29 = vector.shape_cast %28 : vector<1x8x1xf32> to vector<8x1xf32>
    %30 = vector.shape_cast %29 : vector<8x1xf32> to vector<1x8x1xf32>
    %31 = vector.broadcast %27 : vector<1x1x256xf32> to vector<1x8x256xf32>
    %32 = vector.broadcast %30 : vector<1x8x1xf32> to vector<1x8x256xf32>
    %33 = arith.mulf %31, %32 : vector<1x8x256xf32>
    %34 = arith.addf %26, %33 : vector<1x8x256xf32>
    %35 = vector.extract_strided_slice %3 {offsets = [0, 0, 4], sizes = [1, 1, 256], strides = [1, 1, 1]} : vector<1x1x260xf32> to vector<1x1x256xf32>
    %c4 = arith.constant 4 : index
    %c0_13 = arith.constant 0 : index
    %c0_14 = arith.constant 0 : index
    %36 = vector.load %arg2[%c4, %c0_13, %c0_14] : memref<5x8x1xf32, #tpu.memory_space<vmem>>, vector<1x8x1xf32>
    %37 = vector.shape_cast %36 : vector<1x8x1xf32> to vector<8x1xf32>
    %38 = vector.shape_cast %37 : vector<8x1xf32> to vector<1x8x1xf32>
    %39 = vector.broadcast %35 : vector<1x1x256xf32> to vector<1x8x256xf32>
    %40 = vector.broadcast %38 : vector<1x8x1xf32> to vector<1x8x256xf32>
    %41 = arith.mulf %39, %40 : vector<1x8x256xf32>
    %42 = arith.addf %34, %41 : vector<1x8x256xf32>
    %43 = tpu.transpose %42, [0, 2, 1] : vector<1x8x256xf32> -> vector<1x256x8xf32>
    %44 = vector.shape_cast %0 : vector<1x8xf32> to vector<1x1x8xf32>
    %45 = vector.broadcast %44 : vector<1x1x8xf32> to vector<1x256x8xf32>
    %46 = arith.addf %43, %45 : vector<1x256x8xf32>
    %cst_15 = arith.constant 0.000000e+00 : f32
    %47 = vector.broadcast %cst_15 : f32 to vector<1x256x8xf32>
    %48 = arith.maximumf %46, %47 : vector<1x256x8xf32>
    %49 = vector.shape_cast %48 : vector<1x256x8xf32> to vector<1x128x2x8xf32>
    %cst_16 = arith.constant dense<0xFF800000> : vector<1x128x8xf32>
    %50 = vector.multi_reduction <maximumf>, %49, %cst_16 [2] : vector<1x128x2x8xf32> to vector<1x128x8xf32>
    %51 = arith.truncf %50 : vector<1x128x8xf32> to vector<1x128x8xbf16>
    %c0_17 = arith.constant 0 : index
    %c0_18 = arith.constant 0 : index
    %52 = vector.load %arg5[%c0_17, %c0_18] : memref<1x16xf32, #tpu.memory_space<vmem>>, vector<1x16xf32>
    %cst_19 = arith.constant 0.000000e+00 : bf16
    %53 = vector.broadcast %cst_19 : bf16 to vector<1x2x8xbf16>
    %54 = tpu.concatenate %53, %51, %53 in 1 : vector<1x2x8xbf16>, vector<1x128x8xbf16>, vector<1x2x8xbf16> -> vector<1x132x8xbf16>
    %55 = vector.extract_strided_slice %54 {offsets = [0, 0, 0], sizes = [1, 128, 8], strides = [1, 1, 1]} : vector<1x132x8xbf16> to vector<1x128x8xbf16>
    %56 = vector.extract_strided_slice %54 {offsets = [0, 1, 0], sizes = [1, 128, 8], strides = [1, 1, 1]} : vector<1x132x8xbf16> to vector<1x128x8xbf16>
    %57 = vector.extract_strided_slice %54 {offsets = [0, 2, 0], sizes = [1, 128, 8], strides = [1, 1, 1]} : vector<1x132x8xbf16> to vector<1x128x8xbf16>
    %58 = vector.extract_strided_slice %54 {offsets = [0, 3, 0], sizes = [1, 128, 8], strides = [1, 1, 1]} : vector<1x132x8xbf16> to vector<1x128x8xbf16>
    %59 = vector.extract_strided_slice %54 {offsets = [0, 4, 0], sizes = [1, 128, 8], strides = [1, 1, 1]} : vector<1x132x8xbf16> to vector<1x128x8xbf16>
    %60 = tpu.concatenate %55, %56, %57, %58, %59 in 2 : vector<1x128x8xbf16>, vector<1x128x8xbf16>, vector<1x128x8xbf16>, vector<1x128x8xbf16>, vector<1x128x8xbf16> -> vector<1x128x40xbf16>
    %61 = vector.shape_cast %60 : vector<1x128x40xbf16> to vector<128x40xbf16>
    %c0_20 = arith.constant 0 : index
    %c0_21 = arith.constant 0 : index
    %62 = vector.load %arg4[%c0_20, %c0_21] : memref<40x16xbf16, #tpu.memory_space<vmem>>, vector<40x16xbf16>
    %cst_22 = arith.constant dense<0.000000e+00> : vector<128x16xf32>
    %63 = tpu.matmul %61, %62, %cst_22 {dimension_numbers = #tpu.dot_dimension_numbers<[1], [0], [0], [1], [0, 0, 1, 1], [], []>} : vector<128x40xbf16>, vector<40x16xbf16>, vector<128x16xf32> -> vector<128x16xf32>
    %64 = vector.shape_cast %63 : vector<128x16xf32> to vector<1x128x16xf32>
    %65 = vector.shape_cast %52 : vector<1x16xf32> to vector<1x1x16xf32>
    %66 = vector.broadcast %65 : vector<1x1x16xf32> to vector<1x128x16xf32>
    %67 = arith.addf %64, %66 : vector<1x128x16xf32>
    %cst_23 = arith.constant 0.000000e+00 : f32
    %68 = vector.broadcast %cst_23 : f32 to vector<1x128x16xf32>
    %69 = arith.maximumf %67, %68 : vector<1x128x16xf32>
    %70 = vector.shape_cast %69 : vector<1x128x16xf32> to vector<1x64x2x16xf32>
    %cst_24 = arith.constant dense<0xFF800000> : vector<1x64x16xf32>
    %71 = vector.multi_reduction <maximumf>, %70, %cst_24 [2] : vector<1x64x2x16xf32> to vector<1x64x16xf32>
    %72 = arith.truncf %71 : vector<1x64x16xf32> to vector<1x64x16xbf16>
    %c0_25 = arith.constant 0 : index
    %c0_26 = arith.constant 0 : index
    %73 = vector.load %arg7[%c0_25, %c0_26] : memref<1x32xf32, #tpu.memory_space<vmem>>, vector<1x32xf32>
    %cst_27 = arith.constant 0.000000e+00 : bf16
    %74 = vector.broadcast %cst_27 : bf16 to vector<1x2x16xbf16>
    %75 = tpu.concatenate %74, %72, %74 in 1 : vector<1x2x16xbf16>, vector<1x64x16xbf16>, vector<1x2x16xbf16> -> vector<1x68x16xbf16>
    %76 = vector.extract_strided_slice %75 {offsets = [0, 0, 0], sizes = [1, 64, 16], strides = [1, 1, 1]} : vector<1x68x16xbf16> to vector<1x64x16xbf16>
    %77 = vector.extract_strided_slice %75 {offsets = [0, 1, 0], sizes = [1, 64, 16], strides = [1, 1, 1]} : vector<1x68x16xbf16> to vector<1x64x16xbf16>
    %78 = vector.extract_strided_slice %75 {offsets = [0, 2, 0], sizes = [1, 64, 16], strides = [1, 1, 1]} : vector<1x68x16xbf16> to vector<1x64x16xbf16>
    %79 = vector.extract_strided_slice %75 {offsets = [0, 3, 0], sizes = [1, 64, 16], strides = [1, 1, 1]} : vector<1x68x16xbf16> to vector<1x64x16xbf16>
    %80 = vector.extract_strided_slice %75 {offsets = [0, 4, 0], sizes = [1, 64, 16], strides = [1, 1, 1]} : vector<1x68x16xbf16> to vector<1x64x16xbf16>
    %81 = tpu.concatenate %76, %77, %78, %79, %80 in 2 : vector<1x64x16xbf16>, vector<1x64x16xbf16>, vector<1x64x16xbf16>, vector<1x64x16xbf16>, vector<1x64x16xbf16> -> vector<1x64x80xbf16>
    %82 = vector.shape_cast %81 : vector<1x64x80xbf16> to vector<64x80xbf16>
    %c0_28 = arith.constant 0 : index
    %c0_29 = arith.constant 0 : index
    %83 = vector.load %arg6[%c0_28, %c0_29] : memref<80x32xbf16, #tpu.memory_space<vmem>>, vector<80x32xbf16>
    %cst_30 = arith.constant dense<0.000000e+00> : vector<64x32xf32>
    %84 = tpu.matmul %82, %83, %cst_30 {dimension_numbers = #tpu.dot_dimension_numbers<[1], [0], [0], [1], [0, 0, 1, 1], [], []>} : vector<64x80xbf16>, vector<80x32xbf16>, vector<64x32xf32> -> vector<64x32xf32>
    %85 = vector.shape_cast %84 : vector<64x32xf32> to vector<1x64x32xf32>
    %86 = vector.shape_cast %73 : vector<1x32xf32> to vector<1x1x32xf32>
    %87 = vector.broadcast %86 : vector<1x1x32xf32> to vector<1x64x32xf32>
    %88 = arith.addf %85, %87 : vector<1x64x32xf32>
    %cst_31 = arith.constant 0.000000e+00 : f32
    %89 = vector.broadcast %cst_31 : f32 to vector<1x64x32xf32>
    %90 = arith.maximumf %88, %89 : vector<1x64x32xf32>
    %91 = vector.shape_cast %90 : vector<1x64x32xf32> to vector<1x32x2x32xf32>
    %cst_32 = arith.constant dense<0xFF800000> : vector<1x32x32xf32>
    %92 = vector.multi_reduction <maximumf>, %91, %cst_32 [2] : vector<1x32x2x32xf32> to vector<1x32x32xf32>
    %93 = arith.truncf %92 : vector<1x32x32xf32> to vector<1x32x32xbf16>
    %c0_33 = arith.constant 0 : index
    %c0_34 = arith.constant 0 : index
    %94 = vector.load %arg9[%c0_33, %c0_34] : memref<1x64xf32, #tpu.memory_space<vmem>>, vector<1x64xf32>
    %cst_35 = arith.constant 0.000000e+00 : bf16
    %95 = vector.broadcast %cst_35 : bf16 to vector<1x2x32xbf16>
    %96 = tpu.concatenate %95, %93, %95 in 1 : vector<1x2x32xbf16>, vector<1x32x32xbf16>, vector<1x2x32xbf16> -> vector<1x36x32xbf16>
    %97 = vector.extract_strided_slice %96 {offsets = [0, 0, 0], sizes = [1, 32, 32], strides = [1, 1, 1]} : vector<1x36x32xbf16> to vector<1x32x32xbf16>
    %98 = vector.extract_strided_slice %96 {offsets = [0, 1, 0], sizes = [1, 32, 32], strides = [1, 1, 1]} : vector<1x36x32xbf16> to vector<1x32x32xbf16>
    %99 = vector.extract_strided_slice %96 {offsets = [0, 2, 0], sizes = [1, 32, 32], strides = [1, 1, 1]} : vector<1x36x32xbf16> to vector<1x32x32xbf16>
    %100 = vector.extract_strided_slice %96 {offsets = [0, 3, 0], sizes = [1, 32, 32], strides = [1, 1, 1]} : vector<1x36x32xbf16> to vector<1x32x32xbf16>
    %101 = vector.extract_strided_slice %96 {offsets = [0, 4, 0], sizes = [1, 32, 32], strides = [1, 1, 1]} : vector<1x36x32xbf16> to vector<1x32x32xbf16>
    %102 = tpu.concatenate %97, %98, %99, %100, %101 in 2 : vector<1x32x32xbf16>, vector<1x32x32xbf16>, vector<1x32x32xbf16>, vector<1x32x32xbf16>, vector<1x32x32xbf16> -> vector<1x32x160xbf16>
    %103 = vector.shape_cast %102 : vector<1x32x160xbf16> to vector<32x160xbf16>
    %c0_36 = arith.constant 0 : index
    %c0_37 = arith.constant 0 : index
    %104 = vector.load %arg8[%c0_36, %c0_37] : memref<160x64xbf16, #tpu.memory_space<vmem>>, vector<160x64xbf16>
    %cst_38 = arith.constant dense<0.000000e+00> : vector<32x64xf32>
    %105 = tpu.matmul %103, %104, %cst_38 {dimension_numbers = #tpu.dot_dimension_numbers<[1], [0], [0], [1], [0, 0, 1, 1], [], []>} : vector<32x160xbf16>, vector<160x64xbf16>, vector<32x64xf32> -> vector<32x64xf32>
    %106 = vector.shape_cast %105 : vector<32x64xf32> to vector<1x32x64xf32>
    %107 = vector.shape_cast %94 : vector<1x64xf32> to vector<1x1x64xf32>
    %108 = vector.broadcast %107 : vector<1x1x64xf32> to vector<1x32x64xf32>
    %109 = arith.addf %106, %108 : vector<1x32x64xf32>
    %cst_39 = arith.constant 0.000000e+00 : f32
    %110 = vector.broadcast %cst_39 : f32 to vector<1x32x64xf32>
    %111 = arith.maximumf %109, %110 : vector<1x32x64xf32>
    %112 = vector.shape_cast %111 : vector<1x32x64xf32> to vector<1x16x2x64xf32>
    %cst_40 = arith.constant dense<0xFF800000> : vector<1x16x64xf32>
    %113 = vector.multi_reduction <maximumf>, %112, %cst_40 [2] : vector<1x16x2x64xf32> to vector<1x16x64xf32>
    %114 = arith.truncf %113 : vector<1x16x64xf32> to vector<1x16x64xbf16>
    %c0_41 = arith.constant 0 : index
    %c0_42 = arith.constant 0 : index
    %115 = vector.load %arg11[%c0_41, %c0_42] : memref<1x64xf32, #tpu.memory_space<vmem>>, vector<1x64xf32>
    %cst_43 = arith.constant 0.000000e+00 : bf16
    %116 = vector.broadcast %cst_43 : bf16 to vector<1x2x64xbf16>
    %117 = tpu.concatenate %116, %114, %116 in 1 : vector<1x2x64xbf16>, vector<1x16x64xbf16>, vector<1x2x64xbf16> -> vector<1x20x64xbf16>
    %118 = vector.extract_strided_slice %117 {offsets = [0, 0, 0], sizes = [1, 16, 64], strides = [1, 1, 1]} : vector<1x20x64xbf16> to vector<1x16x64xbf16>
    %119 = vector.extract_strided_slice %117 {offsets = [0, 1, 0], sizes = [1, 16, 64], strides = [1, 1, 1]} : vector<1x20x64xbf16> to vector<1x16x64xbf16>
    %120 = vector.extract_strided_slice %117 {offsets = [0, 2, 0], sizes = [1, 16, 64], strides = [1, 1, 1]} : vector<1x20x64xbf16> to vector<1x16x64xbf16>
    %121 = vector.extract_strided_slice %117 {offsets = [0, 3, 0], sizes = [1, 16, 64], strides = [1, 1, 1]} : vector<1x20x64xbf16> to vector<1x16x64xbf16>
    %122 = vector.extract_strided_slice %117 {offsets = [0, 4, 0], sizes = [1, 16, 64], strides = [1, 1, 1]} : vector<1x20x64xbf16> to vector<1x16x64xbf16>
    %123 = tpu.concatenate %118, %119, %120, %121, %122 in 2 : vector<1x16x64xbf16>, vector<1x16x64xbf16>, vector<1x16x64xbf16>, vector<1x16x64xbf16>, vector<1x16x64xbf16> -> vector<1x16x320xbf16>
    %124 = vector.shape_cast %123 : vector<1x16x320xbf16> to vector<16x320xbf16>
    %c0_44 = arith.constant 0 : index
    %c0_45 = arith.constant 0 : index
    %125 = vector.load %arg10[%c0_44, %c0_45] : memref<320x64xbf16, #tpu.memory_space<vmem>>, vector<320x64xbf16>
    %cst_46 = arith.constant dense<0.000000e+00> : vector<16x64xf32>
    %126 = tpu.matmul %124, %125, %cst_46 {dimension_numbers = #tpu.dot_dimension_numbers<[1], [0], [0], [1], [0, 0, 1, 1], [], []>} : vector<16x320xbf16>, vector<320x64xbf16>, vector<16x64xf32> -> vector<16x64xf32>
    %127 = vector.shape_cast %126 : vector<16x64xf32> to vector<1x16x64xf32>
    %128 = vector.shape_cast %115 : vector<1x64xf32> to vector<1x1x64xf32>
    %129 = vector.broadcast %128 : vector<1x1x64xf32> to vector<1x16x64xf32>
    %130 = arith.addf %127, %129 : vector<1x16x64xf32>
    %cst_47 = arith.constant 0.000000e+00 : f32
    %131 = vector.broadcast %cst_47 : f32 to vector<1x16x64xf32>
    %132 = arith.maximumf %130, %131 : vector<1x16x64xf32>
    %133 = vector.shape_cast %132 : vector<1x16x64xf32> to vector<1x8x2x64xf32>
    %cst_48 = arith.constant dense<0xFF800000> : vector<1x8x64xf32>
    %134 = vector.multi_reduction <maximumf>, %133, %cst_48 [2] : vector<1x8x2x64xf32> to vector<1x8x64xf32>
    %135 = arith.truncf %134 : vector<1x8x64xf32> to vector<1x8x64xbf16>
    %c0_49 = arith.constant 0 : index
    %c0_50 = arith.constant 0 : index
    %136 = vector.load %arg13[%c0_49, %c0_50] : memref<1x128xf32, #tpu.memory_space<vmem>>, vector<1x128xf32>
    %cst_51 = arith.constant 0.000000e+00 : bf16
    %137 = vector.broadcast %cst_51 : bf16 to vector<1x2x64xbf16>
    %138 = tpu.concatenate %137, %135, %137 in 1 : vector<1x2x64xbf16>, vector<1x8x64xbf16>, vector<1x2x64xbf16> -> vector<1x12x64xbf16>
    %139 = vector.extract_strided_slice %138 {offsets = [0, 0, 0], sizes = [1, 8, 64], strides = [1, 1, 1]} : vector<1x12x64xbf16> to vector<1x8x64xbf16>
    %140 = vector.extract_strided_slice %138 {offsets = [0, 1, 0], sizes = [1, 8, 64], strides = [1, 1, 1]} : vector<1x12x64xbf16> to vector<1x8x64xbf16>
    %141 = vector.extract_strided_slice %138 {offsets = [0, 2, 0], sizes = [1, 8, 64], strides = [1, 1, 1]} : vector<1x12x64xbf16> to vector<1x8x64xbf16>
    %142 = vector.extract_strided_slice %138 {offsets = [0, 3, 0], sizes = [1, 8, 64], strides = [1, 1, 1]} : vector<1x12x64xbf16> to vector<1x8x64xbf16>
    %143 = vector.extract_strided_slice %138 {offsets = [0, 4, 0], sizes = [1, 8, 64], strides = [1, 1, 1]} : vector<1x12x64xbf16> to vector<1x8x64xbf16>
    %144 = tpu.concatenate %139, %140, %141, %142, %143 in 2 : vector<1x8x64xbf16>, vector<1x8x64xbf16>, vector<1x8x64xbf16>, vector<1x8x64xbf16>, vector<1x8x64xbf16> -> vector<1x8x320xbf16>
    %145 = vector.shape_cast %144 : vector<1x8x320xbf16> to vector<8x320xbf16>
    %c0_52 = arith.constant 0 : index
    %c0_53 = arith.constant 0 : index
    %146 = vector.load %arg12[%c0_52, %c0_53] : memref<320x128xbf16, #tpu.memory_space<vmem>>, vector<320x128xbf16>
    %cst_54 = arith.constant dense<0.000000e+00> : vector<8x128xf32>
    %147 = tpu.matmul %145, %146, %cst_54 {dimension_numbers = #tpu.dot_dimension_numbers<[1], [0], [0], [1], [0, 0, 1, 1], [], []>} : vector<8x320xbf16>, vector<320x128xbf16>, vector<8x128xf32> -> vector<8x128xf32>
    %148 = vector.shape_cast %147 : vector<8x128xf32> to vector<1x8x128xf32>
    %149 = vector.shape_cast %136 : vector<1x128xf32> to vector<1x1x128xf32>
    %150 = vector.broadcast %149 : vector<1x1x128xf32> to vector<1x8x128xf32>
    %151 = arith.addf %148, %150 : vector<1x8x128xf32>
    %cst_55 = arith.constant 0.000000e+00 : f32
    %152 = vector.broadcast %cst_55 : f32 to vector<1x8x128xf32>
    %153 = arith.maximumf %151, %152 : vector<1x8x128xf32>
    %154 = vector.shape_cast %153 : vector<1x8x128xf32> to vector<1x4x2x128xf32>
    %cst_56 = arith.constant dense<0xFF800000> : vector<1x4x128xf32>
    %155 = vector.multi_reduction <maximumf>, %154, %cst_56 [2] : vector<1x4x2x128xf32> to vector<1x4x128xf32>
    %156 = arith.truncf %155 : vector<1x4x128xf32> to vector<1x4x128xbf16>
    %c0_57 = arith.constant 0 : index
    %c0_58 = arith.constant 0 : index
    %157 = vector.load %arg15[%c0_57, %c0_58] : memref<1x256xf32, #tpu.memory_space<vmem>>, vector<1x256xf32>
    %cst_59 = arith.constant 0.000000e+00 : bf16
    %158 = vector.broadcast %cst_59 : bf16 to vector<1x2x128xbf16>
    %159 = tpu.concatenate %158, %156, %158 in 1 : vector<1x2x128xbf16>, vector<1x4x128xbf16>, vector<1x2x128xbf16> -> vector<1x8x128xbf16>
    %160 = vector.extract_strided_slice %159 {offsets = [0, 0, 0], sizes = [1, 4, 128], strides = [1, 1, 1]} : vector<1x8x128xbf16> to vector<1x4x128xbf16>
    %161 = vector.extract_strided_slice %159 {offsets = [0, 1, 0], sizes = [1, 4, 128], strides = [1, 1, 1]} : vector<1x8x128xbf16> to vector<1x4x128xbf16>
    %162 = vector.extract_strided_slice %159 {offsets = [0, 2, 0], sizes = [1, 4, 128], strides = [1, 1, 1]} : vector<1x8x128xbf16> to vector<1x4x128xbf16>
    %163 = vector.extract_strided_slice %159 {offsets = [0, 3, 0], sizes = [1, 4, 128], strides = [1, 1, 1]} : vector<1x8x128xbf16> to vector<1x4x128xbf16>
    %164 = vector.extract_strided_slice %159 {offsets = [0, 4, 0], sizes = [1, 4, 128], strides = [1, 1, 1]} : vector<1x8x128xbf16> to vector<1x4x128xbf16>
    %165 = tpu.concatenate %160, %161, %162, %163, %164 in 2 : vector<1x4x128xbf16>, vector<1x4x128xbf16>, vector<1x4x128xbf16>, vector<1x4x128xbf16>, vector<1x4x128xbf16> -> vector<1x4x640xbf16>
    %166 = vector.shape_cast %165 : vector<1x4x640xbf16> to vector<4x640xbf16>
    %c0_60 = arith.constant 0 : index
    %c0_61 = arith.constant 0 : index
    %167 = vector.load %arg14[%c0_60, %c0_61] : memref<640x256xbf16, #tpu.memory_space<vmem>>, vector<640x256xbf16>
    %cst_62 = arith.constant dense<0.000000e+00> : vector<4x256xf32>
    %168 = tpu.matmul %166, %167, %cst_62 {dimension_numbers = #tpu.dot_dimension_numbers<[1], [0], [0], [1], [0, 0, 1, 1], [], []>} : vector<4x640xbf16>, vector<640x256xbf16>, vector<4x256xf32> -> vector<4x256xf32>
    %169 = vector.shape_cast %168 : vector<4x256xf32> to vector<1x4x256xf32>
    %170 = vector.shape_cast %157 : vector<1x256xf32> to vector<1x1x256xf32>
    %171 = vector.broadcast %170 : vector<1x1x256xf32> to vector<1x4x256xf32>
    %172 = arith.addf %169, %171 : vector<1x4x256xf32>
    %cst_63 = arith.constant 0.000000e+00 : f32
    %173 = vector.broadcast %cst_63 : f32 to vector<1x4x256xf32>
    %174 = arith.maximumf %172, %173 : vector<1x4x256xf32>
    %175 = vector.shape_cast %174 : vector<1x4x256xf32> to vector<1x2x2x256xf32>
    %cst_64 = arith.constant dense<0xFF800000> : vector<1x2x256xf32>
    %176 = vector.multi_reduction <maximumf>, %175, %cst_64 [2] : vector<1x2x2x256xf32> to vector<1x2x256xf32>
    %177 = arith.truncf %176 : vector<1x2x256xf32> to vector<1x2x256xbf16>
    %c0_65 = arith.constant 0 : index
    %c0_66 = arith.constant 0 : index
    %178 = vector.load %arg17[%c0_65, %c0_66] : memref<1x512xf32, #tpu.memory_space<vmem>>, vector<1x512xf32>
    %cst_67 = arith.constant 0.000000e+00 : bf16
    %179 = vector.broadcast %cst_67 : bf16 to vector<1x2x256xbf16>
    %180 = tpu.concatenate %179, %177, %179 in 1 : vector<1x2x256xbf16>, vector<1x2x256xbf16>, vector<1x2x256xbf16> -> vector<1x6x256xbf16>
    %181 = vector.extract_strided_slice %180 {offsets = [0, 0, 0], sizes = [1, 2, 256], strides = [1, 1, 1]} : vector<1x6x256xbf16> to vector<1x2x256xbf16>
    %182 = vector.extract_strided_slice %180 {offsets = [0, 1, 0], sizes = [1, 2, 256], strides = [1, 1, 1]} : vector<1x6x256xbf16> to vector<1x2x256xbf16>
    %183 = vector.extract_strided_slice %180 {offsets = [0, 2, 0], sizes = [1, 2, 256], strides = [1, 1, 1]} : vector<1x6x256xbf16> to vector<1x2x256xbf16>
    %184 = vector.extract_strided_slice %180 {offsets = [0, 3, 0], sizes = [1, 2, 256], strides = [1, 1, 1]} : vector<1x6x256xbf16> to vector<1x2x256xbf16>
    %185 = vector.extract_strided_slice %180 {offsets = [0, 4, 0], sizes = [1, 2, 256], strides = [1, 1, 1]} : vector<1x6x256xbf16> to vector<1x2x256xbf16>
    %186 = tpu.concatenate %181, %182, %183, %184, %185 in 2 : vector<1x2x256xbf16>, vector<1x2x256xbf16>, vector<1x2x256xbf16>, vector<1x2x256xbf16>, vector<1x2x256xbf16> -> vector<1x2x1280xbf16>
    %187 = vector.shape_cast %186 : vector<1x2x1280xbf16> to vector<2x1280xbf16>
    %c0_68 = arith.constant 0 : index
    %c0_69 = arith.constant 0 : index
    %188 = vector.load %arg16[%c0_68, %c0_69] : memref<1280x512xbf16, #tpu.memory_space<vmem>>, vector<1280x512xbf16>
    %cst_70 = arith.constant dense<0.000000e+00> : vector<2x512xf32>
    %189 = tpu.matmul %187, %188, %cst_70 {dimension_numbers = #tpu.dot_dimension_numbers<[1], [0], [0], [1], [0, 0, 1, 1], [], []>} : vector<2x1280xbf16>, vector<1280x512xbf16>, vector<2x512xf32> -> vector<2x512xf32>
    %190 = vector.shape_cast %189 : vector<2x512xf32> to vector<1x2x512xf32>
    %191 = vector.shape_cast %178 : vector<1x512xf32> to vector<1x1x512xf32>
    %192 = vector.broadcast %191 : vector<1x1x512xf32> to vector<1x2x512xf32>
    %193 = arith.addf %190, %192 : vector<1x2x512xf32>
    %cst_71 = arith.constant 0.000000e+00 : f32
    %194 = vector.broadcast %cst_71 : f32 to vector<1x2x512xf32>
    %195 = arith.maximumf %193, %194 : vector<1x2x512xf32>
    %cst_72 = arith.constant dense<0xFF800000> : vector<1x512xf32>
    %196 = vector.multi_reduction <maximumf>, %195, %cst_72 [1] : vector<1x2x512xf32> to vector<1x512xf32>
    %197 = arith.truncf %196 : vector<1x512xf32> to vector<1x512xbf16>
    %c0_73 = arith.constant 0 : index
    %c0_74 = arith.constant 0 : index
    %198 = vector.load %arg18[%c0_73, %c0_74] : memref<512x2xbf16, #tpu.memory_space<vmem>>, vector<512x2xbf16>
    %cst_75 = arith.constant dense<0.000000e+00> : vector<1x2xf32>
    %199 = tpu.matmul %197, %198, %cst_75 {dimension_numbers = #tpu.dot_dimension_numbers<[1], [0], [0], [1], [0, 0, 1, 1], [], []>} : vector<1x512xbf16>, vector<512x2xbf16>, vector<1x2xf32> -> vector<1x2xf32>
    %c0_76 = arith.constant 0 : index
    %c0_77 = arith.constant 0 : index
    %200 = vector.load %arg19[%c0_76, %c0_77] : memref<1x2xf32, #tpu.memory_space<vmem>>, vector<1x2xf32>
    %201 = arith.addf %199, %200 : vector<1x2xf32>
    %202 = vector.shape_cast %201 : vector<1x2xf32> to vector<1x1x2xf32>
    %c0_78 = arith.constant 0 : index
    %c0_79 = arith.constant 0 : index
    %c0_80 = arith.constant 0 : index
    %203 = vector.load %arg20[%c0_78, %c0_79, %c0_80] : memref<1x1x2xf32, #tpu.memory_space<vmem>>, vector<1x1x2xf32>
    tpu.vector_store %arg20[%c0_78, %c0_79, %c0_80], %202 {strides = array<i32>} : memref<1x1x2xf32, #tpu.memory_space<vmem>>, vector<1x1x2xf32>,
    return
  }
  func.func @transform_0(%arg0: i32) -> (i32, i32, i32) {
    %c0_i32 = arith.constant 0 : i32
    %c0_i32_0 = arith.constant 0 : i32
    %c0_i32_1 = arith.constant 0 : i32
    return %arg0, %c0_i32, %c0_i32_0 : i32, i32, i32
  }
  func.func @transform_1(%arg0: i32) -> (i32, i32, i32) {
    %c0_i32 = arith.constant 0 : i32
    %c0_i32_0 = arith.constant 0 : i32
    %c0_i32_1 = arith.constant 0 : i32
    %c0_i32_2 = arith.constant 0 : i32
    return %c0_i32, %c0_i32_0, %c0_i32_1 : i32, i32, i32
  }
  func.func @transform_2(%arg0: i32) -> (i32, i32) {
    %c0_i32 = arith.constant 0 : i32
    %c0_i32_0 = arith.constant 0 : i32
    %c0_i32_1 = arith.constant 0 : i32
    return %c0_i32, %c0_i32_0 : i32, i32
  }
  func.func @transform_3(%arg0: i32) -> (i32, i32) {
    %c0_i32 = arith.constant 0 : i32
    %c0_i32_0 = arith.constant 0 : i32
    %c0_i32_1 = arith.constant 0 : i32
    return %c0_i32, %c0_i32_0 : i32, i32
  }
  func.func @transform_4(%arg0: i32) -> (i32, i32) {
    %c0_i32 = arith.constant 0 : i32
    %c0_i32_0 = arith.constant 0 : i32
    %c0_i32_1 = arith.constant 0 : i32
    return %c0_i32, %c0_i32_0 : i32, i32
  }
  func.func @transform_5(%arg0: i32) -> (i32, i32) {
    %c0_i32 = arith.constant 0 : i32
    %c0_i32_0 = arith.constant 0 : i32
    %c0_i32_1 = arith.constant 0 : i32
    return %c0_i32, %c0_i32_0 : i32, i32
  }
  func.func @transform_6(%arg0: i32) -> (i32, i32) {
    %c0_i32 = arith.constant 0 : i32
    %c0_i32_0 = arith.constant 0 : i32
    %c0_i32_1 = arith.constant 0 : i32
    return %c0_i32, %c0_i32_0 : i32, i32
  }
  func.func @transform_7(%arg0: i32) -> (i32, i32) {
    %c0_i32 = arith.constant 0 : i32
    %c0_i32_0 = arith.constant 0 : i32
    %c0_i32_1 = arith.constant 0 : i32
    return %c0_i32, %c0_i32_0 : i32, i32
  }
  func.func @transform_8(%arg0: i32) -> (i32, i32) {
    %c0_i32 = arith.constant 0 : i32
    %c0_i32_0 = arith.constant 0 : i32
    %c0_i32_1 = arith.constant 0 : i32
    return %c0_i32, %c0_i32_0 : i32, i32
  }
  func.func @transform_9(%arg0: i32) -> (i32, i32) {
    %c0_i32 = arith.constant 0 : i32
    %c0_i32_0 = arith.constant 0 : i32
    %c0_i32_1 = arith.constant 0 : i32
    return %c0_i32, %c0_i32_0 : i32, i32
  }
  func.func @transform_10(%arg0: i32) -> (i32, i32) {
    %c0_i32 = arith.constant 0 : i32
    %c0_i32_0 = arith.constant 0 : i32
    %c0_i32_1 = arith.constant 0 : i32
    return %c0_i32, %c0_i32_0 : i32, i32
  }
  func.func @transform_11(%arg0: i32) -> (i32, i32) {
    %c0_i32 = arith.constant 0 : i32
    %c0_i32_0 = arith.constant 0 : i32
    %c0_i32_1 = arith.constant 0 : i32
    return %c0_i32, %c0_i32_0 : i32, i32
  }
  func.func @transform_12(%arg0: i32) -> (i32, i32) {
    %c0_i32 = arith.constant 0 : i32
    %c0_i32_0 = arith.constant 0 : i32
    %c0_i32_1 = arith.constant 0 : i32
    return %c0_i32, %c0_i32_0 : i32, i32
  }
  func.func @transform_13(%arg0: i32) -> (i32, i32) {
    %c0_i32 = arith.constant 0 : i32
    %c0_i32_0 = arith.constant 0 : i32
    %c0_i32_1 = arith.constant 0 : i32
    return %c0_i32, %c0_i32_0 : i32, i32
  }
  func.func @transform_14(%arg0: i32) -> (i32, i32) {
    %c0_i32 = arith.constant 0 : i32
    %c0_i32_0 = arith.constant 0 : i32
    %c0_i32_1 = arith.constant 0 : i32
    return %c0_i32, %c0_i32_0 : i32, i32
  }
  func.func @transform_15(%arg0: i32) -> (i32, i32) {
    %c0_i32 = arith.constant 0 : i32
    %c0_i32_0 = arith.constant 0 : i32
    %c0_i32_1 = arith.constant 0 : i32
    return %c0_i32, %c0_i32_0 : i32, i32
  }
  func.func @transform_16(%arg0: i32) -> (i32, i32) {
    %c0_i32 = arith.constant 0 : i32
    %c0_i32_0 = arith.constant 0 : i32
    %c0_i32_1 = arith.constant 0 : i32
    return %c0_i32, %c0_i32_0 : i32, i32
  }
  func.func @transform_17(%arg0: i32) -> (i32, i32) {
    %c0_i32 = arith.constant 0 : i32
    %c0_i32_0 = arith.constant 0 : i32
    %c0_i32_1 = arith.constant 0 : i32
    return %c0_i32, %c0_i32_0 : i32, i32
  }
  func.func @transform_18(%arg0: i32) -> (i32, i32) {
    %c0_i32 = arith.constant 0 : i32
    %c0_i32_0 = arith.constant 0 : i32
    %c0_i32_1 = arith.constant 0 : i32
    return %c0_i32, %c0_i32_0 : i32, i32
  }
  func.func @transform_19(%arg0: i32) -> (i32, i32, i32) {
    %c0_i32 = arith.constant 0 : i32
    %c0_i32_0 = arith.constant 0 : i32
    %c0_i32_1 = arith.constant 0 : i32
    return %arg0, %c0_i32, %c0_i32_0 : i32, i32, i32
  }
}

</mosaic_0001>

<bundles_post_ra>
// kernel: classifier_forward.1
= control target key start
LH: loop header
LB: loop body
LE: loop exit
PB: predicated region body
PF: predicated region fallthrough
CT: control target
= control target key end

     0   :  { %s16636_s0 = inlined_call_operand.vmem [shape: f32[2,1,256], index: 0, kind: input, shape index: {}]   ;;  %s16637_s1 = inlined_call_operand.vmem [shape: f32[5,8,1], index: 1, kind: input, shape index: {}]   ;;  %s16638_s2 = inlined_call_operand.vmem [shape: f32[1,8], index: 2, kind: input, shape index: {}]   ;;  %s16639_s3 = inlined_call_operand.vmem [shape: bf16[40,16], index: 3, kind: input, shape index: {}]   ;;  %s16640_s4 = inlined_call_operand.vmem [shape: f32[1,16], index: 4, kind: input, shape index: {}]   ;;  %s16641_s5 = inlined_call_operand.vmem [shape: bf16[80,32], index: 5, kind: input, shape index: {}]   ;;  %s16642_s6 = inlined_call_operand.vmem [shape: f32[1,32], index: 6, kind: input, shape index: {}]   ;;  %s16643_s7 = inlined_call_operand.vmem [shape: bf16[160,64], index: 7, kind: input, shape index: {}]   ;;  %s16644_s8 = inlined_call_operand.vmem [shape: f32[1,64], index: 8, kind: input, shape index: {}]   ;;  %s16645_s9 = inlined_call_operand.vmem [shape: bf16[320,64], index: 9, kind: input, shape index: {}]   ;;  %s16646_s10 = inlined_call_operand.vmem [shape: f32[1,64], index: 10, kind: input, shape index: {}]   ;;  %s16647_s11 = inlined_call_operand.vmem [shape: bf16[320,128], index: 11, kind: input, shape index: {}]   ;;  %s16648_s12 = inlined_call_operand.vmem [shape: f32[1,128], index: 12, kind: input, shape index: {}]   ;;  %s16649_s13 = inlined_call_operand.vmem [shape: bf16[640,256], index: 13, kind: input, shape index: {}]   ;;  %s16650_s14 = inlined_call_operand.vmem [shape: f32[1,256], index: 14, kind: input, shape index: {}]   ;;  %s16651_s15 = inlined_call_operand.vmem [shape: bf16[1280,512], index: 15, kind: input, shape index: {}]   ;;  %s16652_s16 = inlined_call_operand.vmem [shape: f32[1,512], index: 16, kind: input, shape index: {}]   ;;  %s16653_s17 = inlined_call_operand.vmem [shape: bf16[512,2], index: 17, kind: input, shape index: {}]   ;;  %s16654_s18 = inlined_call_operand.vmem [shape: f32[1,2], index: 18, kind: input, shape index: {}]   ;;  %s16655_s19 = inlined_call_operand.hbm [shape: f32[2,1,2], index: 19, kind: output, shape index: {}]  }
   0x1   :  { %16686 = sst [smem:[#allocation16_spill]] %s16636_s0 }
   0x2   :  { %16687 = sst [smem:[#allocation17_spill]] %s16637_s1 }
   0x3   :  { %16688 = sst [smem:[#allocation18_spill]] %s16638_s2 }
   0x4   :  { %16689 = sst [smem:[#allocation19_spill]] %s16639_s3 }
   0x5   :  { %16690 = sst [smem:[#allocation20_spill]] %s16640_s4 }
   0x6   :  { %16691 = sst [smem:[#allocation21_spill]] %s16641_s5 }
   0x7   :  { %16692 = sst [smem:[#allocation22_spill]] %s16642_s6 }
   0x8   :  { %24 = vsyncpa [#allocation3], 0 }
   0x9   :  { %26 = vsyncpa [#allocation3 + $0x1], 0  ;;  %s12007_s0 = smov 0   ;;  %s12009_s30 = smov 0  }
   0xa   :  { %s12011_s20 = smov 0   ;;  %s12013_s21 = smov 0  }
   0xb LB: > { %16693 = sst [smem:[#allocation5_spill]] %s11880_s0  ;;  %s12028_s1 = sadd.s32 4294967295, %s11892_s21   ;;  %s11892_s21 = sphi %s12013_s21, %s16774_s21   ;;  %s11888_s20 = sphi %s12011_s20, %s16776_s20   ;;  %s11884_s30 = sphi %s12009_s30, %s16778_s30   ;;  %s11880_s0 = sphi %s12007_s0, %s16777_s0  }
   0xc   : > { %16694 = sst [smem:[#allocation6_spill]] %s11888_s20  ;;  %s9283_s22 = sadd.s32 4294967294, %s11892_s21  }
   0xd   : > { %16695 = sst [smem:[#allocation7_spill]] %s11892_s21  ;;  %s12032_s2 = sadd.s32 1, %s11892_s21  }
   0xe   : > { %16696 = sst [smem:[#allocation8_spill]] %s12032_s2  ;;  %s443_s23 = sadd.s32 1, %s11888_s20 }
   0xf   : > { %s440_s24 = ssub.s32 %s11892_s21, %s12032_s2  ;;  %p453_p0 = scmp.ne.s32.totalorder %s11888_s20, %s11884_s30 }
  0x10   : > { %p441_p1 = scmp.eq.s32.totalorder %s440_s24, 0  ;;  %p454_p2 = scmp.eq.s32.totalorder %s12028_s1, 1 }
  0x11   : > { %p459_p3 = scmp.ne.s32.totalorder %s11884_s30, %s11880_s0  ;;  %p460_p4 = scmp.eq.s32.totalorder %s9283_s22, 1 }
  0x12   : > { %s12043_s25 = scalar_select %p441_p1, %s11888_s20, %s443_s23  }
  0x13   : > { %p12045_p5 = por %p454_p2, %p453_p0  ;;  %p12049_p6 = por %p460_p4, %p459_p3 }
  0x14   : > { %16697 = sst [smem:[#allocation9_spill]] %s12043_s25  ;;  %p9286_p7 = scmp.ge.s32.totalorder %s11892_s21, 1 }
  0x15   : > { %s16698_s3 = scalar_select %p12045_p5, 1, 0 }
  0x16   : > { %s16700_s26 = scalar_select %p12049_p6, 1, 0 }
  0x17   : > { %16699 = sst [smem:[#allocation10_spill]] %s16698_s3  ;;  %p539_p8 = scmp.lt.s32.totalorder %s11892_s21, 3 }
  0x18   : > { %16701 = sst [smem:[#allocation11_spill]] %s16700_s26 }
  0x19   : > { %p540_p9 = pnand %p9286_p7, %p539_p8 }
  0x1b   : > { %543 = sbr.rel (%p540_p9) target bundleno = 3317 (0xcf5), region = 96 }
  0x20   : > { %s16702_s29 = sld [smem:[#allocation17_spill]]  ;;  %p593_p10 = scmp.lt.s32.totalorder %s12028_s1, 1  ;;  %v11894_v1 = vmov 0   ;;  %vm607_vm0 = vcmask 15360   ;;  %vm644_vm1 = vcmask 1039360   ;;  %vm670_vm2 = vcmask 1031168  }
  0x21   : > { %11818 = vset.pattern.permute.xlu1 %v11894_v1  ;;  %11820 = vset.pattern.permute.xlu0 %v11894_v1  ;;  %s16703_s26 = sld [smem:[#allocation16_spill]]  ;;  %s11895_s22 = smov 2   ;;  %vm696_vm3 = vcmask 1022976   ;;  %vm722_vm4 = vcmask 1014784   ;;  %vm1084_vm5 = vcmask 58368   ;;  %vm2504_vm6 = vcmask 1041409  }
  0x22   : > { %s594_s24 = scalar_select %p593_p10, %s12028_s1, 1  ;;  %11819 = vset.pattern.permute.xlu2 %v11894_v1  ;;  %vm2494_vm7 = vcmask 1043459   ;;  %vm2496_vm8 = vcmask 1044484   ;;  %vm2506_vm9 = vcmask 1042434   ;;  %vm2498_vm10 = vcmask 1045509  }
  0x23   : > { %s11896_s0 = smov 125   ;;  %s11897_s20 = smov 127   ;;  %vm2500_vm11 = vcmask 1046534   ;;  %vm16681_vm12 = vcmask 1047559   ;;  %vm2621_vm13 = vcmask 1040384   ;;  %vm2712_vm14 = vcmask 1046528  }
  0x24   : > { %s9287_s25 = sshll.u32 %s594_s24, 1  ;;  %s11898_s21 = smov 126   ;;  %vm2800_vm15 = vcmask 1045504  }
  0x25   : > { %s11899_s2 = smov 124   ;;  %s16741_s3 = sld [smem:[#allocation19_spill]] }
  0x26   : > { %v9288_v0 = vld [vmem:[%s16702_s29 + $0x8] sm:$0xff]  ;;  %v9290_v2 = vld [vmem:[%s16702_s29 + $0x18] sm:$0xff]  ;;  %v9289_v5 = vld [vmem:[%s16702_s29 + $0x10] sm:$0xff]  ;;  %s16747_s4 = sld [smem:[#allocation20_spill]]  ;;  %s11905_s28 = smov 48  }
  0x27   : > { %629 = vperm.xlu1 %11818, %v9288_v0   ;;  %681 = vperm.xlu2 %11819, %v9290_v2   ;;  %s596_s27 = scalar_lea.vmem %s16703_s26, %s9287_s25  ;;  %v9291_v6 = vld [vmem:[%s16702_s29 + $0x20] sm:$0xff]  ;;  %s16704_s26 = sld [smem:[#allocation18_spill]] }
  0x28   : > { %v599_v3 = vld [vmem:[%s596_s27] sm:$0x3]  ;;  %s16683_s27 = smov 64   ;;  %s16754_s5 = sld [smem:[#allocation21_spill]] }
  0x29   : > { %v601_v4 = vperm.slane %v599_v3, 0  ;;  %v602_v7 = vperm.slane %v599_v3, 1  ;;  %v614_v8 = vld [vmem:[%s16702_s29] sm:$0xff]  ;;  %s16758_s6 = sld [smem:[#allocation22_spill]]  ;;  %s11850_s25 = scalar_lea.hbm %s16655_s19, 2 }
  0x2b   : > { %603 = vrot.lane.b32.xlu0 %v601_v4, %s11895_s22 }
  0x2d   : > { %v12086_v1 = vld [vmem:[%s16704_s26] ss:$0 sm:$0xff] }
  0x2f   : > { %655 = vperm.xlu1 %11818, %v9289_v5   ;;  %707 = vperm.xlu2 %11819, %v9291_v6  }
  0x33   : > { %605 = vrot.lane.b32.xlu0 %v602_v7, %s11895_s22  ;;  %s11900_s22 = smov 16  }
  0x3b   : > { %619 = vperm.xlu0 %11820, %v614_v8  }
  0x81   : > { %v682_v11 = vpop.permute.xlu2 %681 }
  0x89   : > { %v708_v20 = vpop.permute.xlu2 %707 }
  0x99   : > { %v630_v9 = vpop.permute.xlu1 %629 }
  0x9d   : > { %v604_v10 = vpop.permute.xlu0 %603 }
  0x9e   : > { %v612_v12 = vsel %vm607_vm0, 0.0, %v604_v10 }
  0x9f   : > { %v615_v13 = vperm.slane %v612_v12, 0 }
  0xa1   : > { %v684_v14 = vmul.f32 %v682_v11, %v615_v13  ;;  %v632_v15 = vmul.f32 %v630_v9, %v615_v13  ;;  %v656_v17 = vpop.permute.xlu1 %655  ;;  %v710_v30 = vmul.f32 %v708_v20, %v615_v13 }
  0xa2   : > { %v658_v21 = vmul.f32 %v656_v17, %v615_v13 }
  0xa3   : > { %690 = vrot.lane.b32.xlu0 %v684_v14, %s11896_s0  ;;  %638 = vrot.lane.b32.xlu1 %v632_v15, %s11897_s20 }
  0xa5   : > { %v606_v16 = vpop.permute.xlu0 %605 }
  0xa6   : > { %v608_v18 = vsel %vm607_vm0, %v604_v10, %v606_v16  ;;  %v613_v24 = vsel %vm607_vm0, %v606_v16, 0.0  ;;  %vm2627_vm0 = vsmask.f32 7424 }
  0xa7   : > { %v616_v19 = vperm.slane %v608_v18, 0  ;;  %v626_v25 = vperm.slane %v613_v24, 0 }
  0xa9   : > { %v711_v22 = vmul.f32 %v708_v20, %v616_v19  ;;  %v633_v23 = vmul.f32 %v630_v9, %v616_v19  ;;  %v660_v26 = vmul.f32 %v656_v17, %v626_v25  ;;  %v685_v27 = vmul.f32 %v682_v11, %v616_v19 }
  0xaa   : > { %v659_v28 = vmul.f32 %v656_v17, %v616_v19  ;;  %v712_v29 = vmul.f32 %v708_v20, %v626_v25  ;;  %v634_v31 = vmul.f32 %v630_v9, %v626_v25  ;;  %v686_v32 = vmul.f32 %v682_v11, %v626_v25 }
  0xab   : > { %664 = vrot.lane.b32.xlu1 %v658_v21, %s11898_s21  ;;  %718 = vrot.lane.b32.xlu0 %v711_v22, %s11899_s2 }
  0xac   : > { %640 = vrot.lane.b32.xlu2 %v633_v23, %s11897_s20 }
  0xad   : > { %v620_v34 = vpop.permute.xlu0 %619 }
  0xae   : > { %v622_v43 = vmul.f32 %v620_v34, %v615_v13  ;;  %v623_v47 = vmul.f32 %v620_v34, %v616_v19 }
  0xb3   : > { %668 = vrot.lane.b32.xlu0 %v660_v26, %s11898_s21  ;;  %692 = vrot.lane.b32.xlu1 %v685_v27, %s11896_s0 }
  0xb4   : > { %666 = vrot.lane.b32.xlu2 %v659_v28, %s11898_s21  ;;  %s11903_s21 = smov 24  }
  0xbb   : > { %720 = vrot.lane.b32.xlu0 %v712_v29, %s11899_s2 }
  0xbc   : > { %716 = vrot.lane.b32.xlu2 %v710_v30, %s11899_s2  ;;  %s591_s2 = sand.u32 1, %s11884_s30  }
  0xc4   : > { %642 = vrot.lane.b32.xlu2 %v634_v31, %s11897_s20  ;;  %s11902_s20 = smov 8  }
  0xcc   : > { %694 = vrot.lane.b32.xlu2 %v686_v32, %s11896_s0  ;;  %s11901_s0 = smov 32  }
 0x106   : > { %v641_v33 = vpop.permute.xlu2 %640 }
 0x10e   : > { %v667_v35 = vpop.permute.xlu2 %666 }
 0x115   : > { %v639_v36 = vpop.permute.xlu1 %638  ;;  %v691_v37 = vpop.permute.xlu0 %690 }
 0x116   : > { %v717_v38 = vpop.permute.xlu2 %716  ;;  %v645_v42 = vsel %vm644_vm1, %v639_v36, %v641_v33 }
 0x117   : > { %v649_v45 = vadd.f32 %v645_v42, %v622_v43 }
 0x11d   : > { %v665_v39 = vpop.permute.xlu1 %664  ;;  %v719_v40 = vpop.permute.xlu0 %718 }
 0x11e   : > { %v643_v41 = vpop.permute.xlu2 %642  ;;  %v671_v44 = vsel %vm670_vm2, %v665_v39, %v667_v35  ;;  %v723_v55 = vsel %vm722_vm4, %v717_v38, %v719_v40 }
 0x11f   : > { %v646_v46 = vsel %vm644_vm1, %v641_v33, %v643_v41  ;;  %v675_v48 = vadd.f32 %v671_v44, %v649_v45  ;;  %vm16682_vm1 = vsmask.f32 6400 }
 0x120   : > { %v650_v53 = vadd.f32 %v646_v46, %v623_v47 }
 0x125   : > { %v693_v49 = vpop.permute.xlu1 %692  ;;  %v669_v50 = vpop.permute.xlu0 %668 }
 0x126   : > { %v697_v51 = vsel %vm696_vm3, %v691_v37, %v693_v49  ;;  %v672_v52 = vsel %vm670_vm2, %v667_v35, %v669_v50  ;;  %v695_v56 = vpop.permute.xlu2 %694  ;;  %vm2939_vm2 = vcmask 1043456  }
 0x127   : > { %v701_v54 = vadd.f32 %v697_v51, %v675_v48  ;;  %v676_v57 = vadd.f32 %v672_v52, %v650_v53  ;;  %v698_v59 = vsel %vm696_vm3, %v693_v49, %v695_v56  ;;  %vm2834_vm3 = vcmask 64512  }
 0x129   : > { %v727_v58 = vadd.f32 %v723_v55, %v701_v54  ;;  %v702_v60 = vadd.f32 %v698_v59, %v676_v57 }
 0x12b   : > { %729 = vxpose.xlu1.b32.start.end [1/1] (short) %v727_v58, 128 }
 0x12d   : > { %v721_v61 = vpop.permute.xlu0 %720 }
 0x12e   : > { %v724_v62 = vsel %vm722_vm4, %v719_v40, %v721_v61  ;;  %vm2851_vm4 = vcmask 130048  }
 0x12f   : > { %v728_v63 = vadd.f32 %v724_v62, %v702_v60 }
 0x131   : > { %761 = vxpose.xlu2.b32.start.end [1/1] (short) %v728_v63, 128 }
 0x1ca   : > { %v777_v0 = vpop.trf.xlu2 }
 0x1cb   : > { %v812_v9 = vadd.f32 %v12086_v1, %v777_v0 }
 0x1cd   : > { %v844_v12 = vmax.f32 %v812_v9, 0.0 }
 0x1cf   : > { %v1533_v15 = vsel %vm1084_vm5, %v844_v12, -inf  ;;  %v940_v18 = vrot.slane %v844_v12, 2  ;;  %v941_v19 = vrot.slane %v844_v12, 4  ;;  %v942_v20 = vrot.slane %v844_v12, 6  ;;  %v745_v22 = vpop.trf.xlu1 }
 0x1d0   : > { %v1534_v21 = vrot.slane %v1533_v15, 4  ;;  %v796_v28 = vadd.f32 %v12086_v1, %v745_v22 }
 0x1d1   : > { %v1540_v26 = vsel %vm1084_vm5, %v940_v18, -inf  ;;  %v1547_v27 = vsel %vm1084_vm5, %v941_v19, -inf  ;;  %v1554_v30 = vsel %vm1084_vm5, %v942_v20, -inf }
 0x1d2   : > { %v778_v2 = vpop.trf.xlu2  ;;  %v1535_v29 = vmax.f32 %v1533_v15, %v1534_v21  ;;  %v1541_v32 = vrot.slane %v1540_v26, 4  ;;  %v1548_v35 = vrot.slane %v1547_v27, 4  ;;  %v1555_v37 = vrot.slane %v1554_v30, 4 }
 0x1d3   : > { %v813_v3 = vadd.f32 %v12086_v1, %v778_v2  ;;  %v828_v38 = vmax.f32 %v796_v28, 0.0 }
 0x1d4   : > { %v1536_v39 = vrot.slane %v1535_v29, 2  ;;  %v1542_v43 = vmax.f32 %v1540_v26, %v1541_v32  ;;  %v1549_v47 = vmax.f32 %v1547_v27, %v1548_v35  ;;  %v1556_v51 = vmax.f32 %v1554_v30, %v1555_v37 }
 0x1d5   : > { %v12089_v4 = vmax.f32 %v813_v3, 0.0  ;;  %v892_v52 = vrot.slane %v828_v38, 2  ;;  %v893_v53 = vrot.slane %v828_v38, 4  ;;  %v1085_v55 = vsel %vm1084_vm5, %v828_v38, -inf }
 0x1d6   : > { %v1537_v63 = vmax.f32 %v1535_v29, %v1536_v39  ;;  %v894_v0 = vrot.slane %v828_v38, 6  ;;  %v1557_v9 = vrot.slane %v1556_v51, 2 }
 0x1d7   : > { %v944_v5 = vrot.slane %v12089_v4, 4  ;;  %v945_v6 = vrot.slane %v12089_v4, 6  ;;  %v1099_v18 = vsel %vm1084_vm5, %v893_v53, -inf  ;;  %v746_v27 = vpop.trf.xlu1 }
 0x1d8   : > { %v1538_v21 = vrot.slane %v1537_v63, 1  ;;  %v1106_v22 = vsel %vm1084_vm5, %v894_v0, -inf  ;;  %v1100_v39 = vrot.slane %v1099_v18, 4 }
 0x1d9   : > { %v1575_v7 = vsel %vm1084_vm5, %v944_v5, -inf  ;;  %v1582_v8 = vsel %vm1084_vm5, %v945_v6, -inf  ;;  %v1543_v5 = vrot.slane %v1542_v43, 2  ;;  %v1550_v6 = vrot.slane %v1549_v47, 2 }
 0x1da   : > { %v1576_v10 = vrot.slane %v1575_v7, 4  ;;  %v1583_v11 = vrot.slane %v1582_v8, 4  ;;  %v779_v25 = vpop.trf.xlu2 }
 0x1db   : > { %v814_v31 = vadd.f32 %v12086_v1, %v779_v25  ;;  %v1544_v25 = vmax.f32 %v1542_v43, %v1543_v5  ;;  %v1551_v26 = vmax.f32 %v1549_v47, %v1550_v6  ;;  %v1107_v43 = vrot.slane %v1106_v22, 4 }
 0x1dc   : > { %v1577_v13 = vmax.f32 %v1575_v7, %v1576_v10  ;;  %v1584_v14 = vmax.f32 %v1582_v8, %v1583_v11  ;;  %v1086_v10 = vrot.slane %v1085_v55, 4  ;;  %v1101_v5 = vmax.f32 %v1099_v18, %v1100_v39 }
 0x1dd   : > { %v846_v36 = vmax.f32 %v814_v31, 0.0 }
 0x1de   : > { %v1578_v16 = vrot.slane %v1577_v13, 2  ;;  %v1585_v17 = vrot.slane %v1584_v14, 2  ;;  %v1087_v35 = vmax.f32 %v1085_v55, %v1086_v10  ;;  %v1552_v55 = vrot.slane %v1551_v26, 1 }
 0x1df   : > { %v946_v40 = vrot.slane %v846_v36, 2  ;;  %v947_v41 = vrot.slane %v846_v36, 4  ;;  %v948_v42 = vrot.slane %v846_v36, 6  ;;  %v1589_v46 = vsel %vm1084_vm5, %v846_v36, -inf  ;;  %v747_v6 = vpop.trf.xlu1 }
 0x1e0   : > { %v1579_v23 = vmax.f32 %v1577_v13, %v1578_v16  ;;  %v1586_v24 = vmax.f32 %v1584_v14, %v1585_v17  ;;  %v1590_v48 = vrot.slane %v1589_v46, 4  ;;  %v1092_v17 = vsel %vm1084_vm5, %v892_v52, -inf }
 0x1e1   : > { %v1596_v49 = vsel %vm1084_vm5, %v946_v40, -inf  ;;  %v1603_v50 = vsel %vm1084_vm5, %v947_v41, -inf  ;;  %v1610_v58 = vsel %vm1084_vm5, %v948_v42, -inf  ;;  %v1093_v38 = vrot.slane %v1092_v17, 4 }
 0x1e2   : > { %v1580_v33 = vrot.slane %v1579_v23, 1  ;;  %v1587_v34 = vrot.slane %v1586_v24, 1  ;;  %v1597_v54 = vrot.slane %v1596_v49, 4  ;;  %v1591_v56 = vmax.f32 %v1589_v46, %v1590_v48  ;;  %v780_v42 = vpop.trf.xlu2 }
 0x1e3   : > { %v1604_v57 = vrot.slane %v1603_v50, 4  ;;  %v1611_v62 = vrot.slane %v1610_v58, 4  ;;  %v815_v53 = vadd.f32 %v12086_v1, %v780_v42  ;;  %v1094_v0 = vmax.f32 %v1092_v17, %v1093_v38 }
 0x1e4   : > { %v1581_v44 = vmax.f32 %v1579_v23, %v1580_v33  ;;  %v1588_v45 = vmax.f32 %v1586_v24, %v1587_v34  ;;  %v1598_v61 = vmax.f32 %v1596_v49, %v1597_v54  ;;  %v1592_v2 = vrot.slane %v1591_v56, 2 }
 0x1e5   : > { %v1605_v3 = vmax.f32 %v1603_v50, %v1604_v57  ;;  %v1612_v8 = vmax.f32 %v1610_v58, %v1611_v62  ;;  %v1558_v34 = vmax.f32 %v1556_v51, %v1557_v9  ;;  %v1539_v50 = vmax.f32 %v1537_v63, %v1538_v21 }
 0x1e6   : > { %v2051_v59 = vpack.c.bf16 %v1581_v44, %v1581_v44  ;;  %v2052_v60 = vpack.c.bf16 %v1588_v45, %v1588_v45  ;;  %v1599_v7 = vrot.slane %v1598_v61, 2  ;;  %v1593_v11 = vmax.f32 %v1591_v56, %v1592_v2 }
 0x1e7   : > { %v1606_v12 = vrot.slane %v1605_v3, 2  ;;  %v1613_v16 = vrot.slane %v1612_v8, 2  ;;  %v797_v44 = vadd.f32 %v12086_v1, %v746_v27  ;;  %v1545_v54 = vrot.slane %v1544_v25, 1 }
 0x1e8   : > { %v2308_v13 = vperm.slane %v2051_v59, 0  ;;  %v2309_v14 = vperm.slane %v2052_v60, 0  ;;  %v1600_v15 = vmax.f32 %v1598_v61, %v1599_v7  ;;  %v1594_v19 = vrot.slane %v1593_v11, 1 }
 0x1e9   : > { %v1607_v20 = vmax.f32 %v1605_v3, %v1606_v12  ;;  %v1614_v24 = vmax.f32 %v1612_v8, %v1613_v16  ;;  %v1559_v58 = vrot.slane %v1558_v34, 1  ;;  %v829_v59 = vmax.f32 %v797_v44, 0.0 }
 0x1ea   : > { %v1601_v23 = vrot.slane %v1600_v15, 1  ;;  %v1595_v28 = vmax.f32 %v1593_v11, %v1594_v19  ;;  %v2436_v30 = vunpack.c.l.b16 %v2308_v13  ;;  %v2437_v31 = vunpack.c.l.b16 %v2309_v14 }
 0x1eb   : > { %v1608_v29 = vrot.slane %v1607_v20, 1  ;;  %v1615_v33 = vrot.slane %v1614_v24, 1  ;;  %v1088_v62 = vrot.slane %v1087_v35, 2  ;;  %v12116_v7 = vmax.f32 %v815_v53, 0.0 }
 0x1ec   : > { %v1602_v32 = vmax.f32 %v1600_v15, %v1601_v23  ;;  %v2053_v37 = vpack.c.bf16 %v1595_v28, %v1595_v28  ;;  %v2562_v47 = vsel %vm2504_vm6, %v2437_v31, %v2436_v30  ;;  %v1546_v8 = vmax.f32 %v1544_v25, %v1545_v54 }
 0x1ed   : > { %v1609_v36 = vmax.f32 %v1607_v20, %v1608_v29  ;;  %v1616_v40 = vmax.f32 %v1614_v24, %v1615_v33  ;;  %v1553_v9 = vmax.f32 %v1551_v26, %v1552_v55  ;;  %v1108_v10 = vmax.f32 %v1106_v22, %v1107_v43 }
 0x1ee   : > { %v2054_v41 = vpack.c.bf16 %v1602_v32, %v1602_v32  ;;  %v2310_v46 = vperm.slane %v2053_v37, 0  ;;  %v1560_v12 = vmax.f32 %v1558_v34, %v1559_v58  ;;  %v2045_v13 = vpack.c.bf16 %v1539_v50, %v1539_v50 }
 0x1ef   : > { %v2055_v45 = vpack.c.bf16 %v1609_v36, %v1609_v36  ;;  %v2056_v48 = vpack.c.bf16 %v1616_v40, %v1616_v40  ;;  %v896_v14 = vrot.slane %v829_v59, 4  ;;  %v1089_v15 = vmax.f32 %v1087_v35, %v1088_v62 }
 0x1f0   : > { %v2311_v49 = vperm.slane %v2054_v41, 0  ;;  %v2438_v52 = vunpack.c.l.b16 %v2310_v46  ;;  %v897_v16 = vrot.slane %v829_v59, 6  ;;  %v798_v17 = vadd.f32 %v12086_v1, %v747_v6 }
 0x1f1   : > { %v2312_v51 = vperm.slane %v2055_v45, 0  ;;  %v2313_v56 = vperm.slane %v2056_v48, 0  ;;  %v1617_v18 = vsel %vm1084_vm5, %v12116_v7, -inf  ;;  %v1095_v19 = vrot.slane %v1094_v0, 2 }
 0x1f2   : > { %v2439_v57 = vunpack.c.l.b16 %v2311_v49  ;;  %v2563_v61 = vsel %vm2506_vm9, %v2438_v52, %v2562_v47  ;;  %v1102_v20 = vrot.slane %v1101_v5, 2  ;;  %v1618_v21 = vrot.slane %v1617_v18, 4 }
 0x1f3   : > { %v2440_v60 = vunpack.c.l.b16 %v2312_v51  ;;  %v2441_v2 = vunpack.c.l.b16 %v2313_v56  ;;  %v2046_v23 = vpack.c.bf16 %v1546_v8, %v1546_v8  ;;  %v2047_v24 = vpack.c.bf16 %v1553_v9, %v1553_v9 }
 0x1f4   : > { %v2564_v3 = vsel %vm2494_vm7, %v2439_v57, %v2563_v61  ;;  %v1109_v25 = vrot.slane %v1108_v10, 2  ;;  %v895_v22 = vrot.slane %v829_v59, 2  ;;  %v2048_v26 = vpack.c.bf16 %v1560_v12, %v1560_v12 }
 0x1f5   : > { %v2565_v63 = vsel %vm2496_vm8, %v2440_v60, %v2564_v3  ;;  %v12124_v27 = vperm.slane %v2045_v13, 0  ;;  %v1127_v28 = vsel %vm1084_vm5, %v896_v14, -inf  ;;  %v1619_v29 = vmax.f32 %v1617_v18, %v1618_v21 }
 0x1f6   : > { %v12119_v11 = vsel %vm2498_vm10, %v2441_v2, %v2565_v63  ;;  %v1090_v30 = vrot.slane %v1089_v15, 1  ;;  %v943_v31 = vrot.slane %v12089_v4, 2  ;;  %v1134_v32 = vsel %vm1084_vm5, %v897_v16, -inf }
 0x1f7   : > { %v830_v33 = vmax.f32 %v798_v17, 0.0  ;;  %v1096_v34 = vmax.f32 %v1094_v0, %v1095_v19  ;;  %v1561_v35 = vsel %vm1084_vm5, %v12089_v4, -inf  ;;  %v1113_v36 = vsel %vm1084_vm5, %v829_v59, -inf }
 0x1f8   : > { %v1620_v37 = vrot.slane %v1619_v29, 2  ;;  %v1103_v38 = vmax.f32 %v1101_v5, %v1102_v20  ;;  %v1110_v39 = vmax.f32 %v1108_v10, %v1109_v25  ;;  %v1120_v40 = vsel %vm1084_vm5, %v895_v22, -inf }
 0x1f9   : > { %v1128_v41 = vrot.slane %v1127_v28, 4  ;;  %v12133_v42 = vperm.slane %v2046_v23, 0  ;;  %v12135_v43 = vperm.slane %v2047_v24, 0  ;;  %v1135_v44 = vrot.slane %v1134_v32, 4 }
 0x1fa   : > { %v1621_v45 = vmax.f32 %v1619_v29, %v1620_v37  ;;  %v1562_v46 = vrot.slane %v1561_v35, 4  ;;  %v1568_v47 = vsel %vm1084_vm5, %v943_v31, -inf  ;;  %v1114_v48 = vrot.slane %v1113_v36, 4 }
 0x1fb   : > { %16705 = vst [vmem:[#allocation12_spill] sm:$0xff] %v12133_v42  ;;  %v898_v49 = vrot.slane %v830_v33, 2  ;;  %v12138_v4 = vperm.slane %v2048_v26, 0  ;;  %v1121_v51 = vrot.slane %v1120_v40, 4  ;;  %v1091_v53 = vmax.f32 %v1089_v15, %v1090_v30 }
 0x1fc   : > { %16706 = vst [vmem:[#allocation13_spill] sm:$0xff] %v12135_v43  ;;  %v1622_v52 = vrot.slane %v1621_v45, 1  ;;  %v1097_v54 = vrot.slane %v1096_v34, 1  ;;  %v1104_v55 = vrot.slane %v1103_v38, 1  ;;  %v1129_v56 = vmax.f32 %v1127_v28, %v1128_v41 }
 0x1fd   : > { %16707 = vst [vmem:[#allocation14_spill] sm:$0xff] %v12138_v4  ;;  %v1569_v57 = vrot.slane %v1568_v47, 4  ;;  %v1136_v58 = vmax.f32 %v1134_v32, %v1135_v44  ;;  %v1141_v59 = vsel %vm1084_vm5, %v830_v33, -inf  ;;  %v1111_v61 = vrot.slane %v1110_v39, 1 }
 0x1fe   : > { %v1623_v60 = vmax.f32 %v1621_v45, %v1622_v52  ;;  %v1563_v62 = vmax.f32 %v1561_v35, %v1562_v46  ;;  %v1115_v0 = vmax.f32 %v1113_v36, %v1114_v48  ;;  %v1148_v2 = vsel %vm1084_vm5, %v898_v49, -inf }
 0x1ff   : > { %v1122_v3 = vmax.f32 %v1120_v40, %v1121_v51  ;;  %v899_v5 = vrot.slane %v830_v33, 4  ;;  %v900_v63 = vrot.slane %v830_v33, 6  ;;  %v1098_v8 = vmax.f32 %v1096_v34, %v1097_v54 }
 0x200   : > { %v2057_v6 = vpack.c.bf16 %v1623_v60, %v1623_v60  ;;  %v1105_v9 = vmax.f32 %v1103_v38, %v1104_v55  ;;  %v1130_v10 = vrot.slane %v1129_v56, 2  ;;  %v1142_v12 = vrot.slane %v1141_v59, 4 }
 0x201   : > { %v1570_v13 = vmax.f32 %v1568_v47, %v1569_v57  ;;  %v1137_v14 = vrot.slane %v1136_v58, 2  ;;  %v1149_v15 = vrot.slane %v1148_v2, 4  ;;  %v1112_v17 = vmax.f32 %v1110_v39, %v1111_v61 }
 0x202   : > { %v2314_v16 = vperm.slane %v2057_v6, 0  ;;  %v1981_v18 = vpack.c.bf16 %v1091_v53, %v1091_v53  ;;  %v1564_v19 = vrot.slane %v1563_v62, 2  ;;  %v1116_v20 = vrot.slane %v1115_v0, 2 }
 0x203   : > { %v1123_v21 = vrot.slane %v1122_v3, 2  ;;  %v1155_v23 = vsel %vm1084_vm5, %v899_v5, -inf  ;;  %v1162_v24 = vsel %vm1084_vm5, %v900_v63, -inf  ;;  %v1982_v22 = vpack.c.bf16 %v1098_v8, %v1098_v8 }
 0x204   : > { %v2442_v25 = vunpack.c.l.b16 %v2314_v16  ;;  %v1131_v26 = vmax.f32 %v1129_v56, %v1130_v10  ;;  %v1143_v28 = vmax.f32 %v1141_v59, %v1142_v12  ;;  %v1571_v29 = vrot.slane %v1570_v13, 2 }
 0x205   : > { %v1138_v30 = vmax.f32 %v1136_v58, %v1137_v14  ;;  %v1150_v31 = vmax.f32 %v1148_v2, %v1149_v15  ;;  %v1983_v33 = vpack.c.bf16 %v1105_v9, %v1105_v9  ;;  %v1565_v34 = vmax.f32 %v1563_v62, %v1564_v19 }
 0x206   : > { %v12147_v32 = vsel %vm2500_vm11, %v2442_v25, %v12119_v11  ;;  %v1156_v35 = vrot.slane %v1155_v23, 4  ;;  %v1163_v36 = vrot.slane %v1162_v24, 4  ;;  %v1984_v38 = vpack.c.bf16 %v1112_v17, %v1112_v17 }
 0x207   : > { %v1117_v39 = vmax.f32 %v1115_v0, %v1116_v20  ;;  %v1124_v40 = vmax.f32 %v1122_v3, %v1123_v21  ;;  %v2238_v44 = vperm.slane %v1981_v18, 0  ;;  %v1132_v45 = vrot.slane %v1131_v26, 1  ;;  %v748_v0 = vpop.trf.xlu1 }
 0x208   : > { %v1144_v46 = vrot.slane %v1143_v28, 2  ;;  %v2239_v47 = vperm.slane %v1982_v22, 0  ;;  %v1572_v48 = vmax.f32 %v1570_v13, %v1571_v29  ;;  %v1139_v49 = vrot.slane %v1138_v30, 1 }
 0x209   : > { %v1151_v51 = vrot.slane %v1150_v31, 2  ;;  %v2240_v11 = vperm.slane %v1983_v33, 0  ;;  %v1566_v52 = vrot.slane %v1565_v34, 1  ;;  %v1157_v53 = vmax.f32 %v1155_v23, %v1156_v35 }
 0x20a   : > { %v1164_v54 = vmax.f32 %v1162_v24, %v1163_v36  ;;  %v12152_v56 = vperm.slane %v1984_v38, 0  ;;  %v1118_v57 = vrot.slane %v1117_v39, 1  ;;  %v1125_v58 = vrot.slane %v1124_v40, 1 }
 0x20b   : > { %v2366_v59 = vunpack.c.l.b16 %v2238_v44  ;;  %v1133_v60 = vmax.f32 %v1131_v26, %v1132_v45  ;;  %v1145_v61 = vmax.f32 %v1143_v28, %v1144_v46  ;;  %v950_v62 = vrot.slane %v12116_v7, 4  ;;  %v781_v45 = vpop.trf.xlu2 }
 0x20c   : > { %v2367_v2 = vunpack.c.l.b16 %v2239_v47  ;;  %v1573_v3 = vrot.slane %v1572_v48, 1  ;;  %v1140_v5 = vmax.f32 %v1138_v30, %v1139_v49  ;;  %v1152_v63 = vmax.f32 %v1150_v31, %v1151_v51 }
 0x20d   : > { %v2368_v6 = vunpack.c.l.b16 %v2240_v11  ;;  %v1567_v8 = vmax.f32 %v1565_v34, %v1566_v52  ;;  %v1158_v9 = vrot.slane %v1157_v53, 2  ;;  %v1165_v10 = vrot.slane %v1164_v54, 2 }
 0x20e   : > { %v1119_v12 = vmax.f32 %v1117_v39, %v1118_v57  ;;  %v1126_v13 = vmax.f32 %v1124_v40, %v1125_v58  ;;  %v949_v14 = vrot.slane %v12116_v7, 2  ;;  %v799_v15 = vadd.f32 %v12086_v1, %v748_v0 }
 0x20f   : > { %v1987_v16 = vpack.c.bf16 %v1133_v60, %v1133_v60  ;;  %v1146_v17 = vrot.slane %v1145_v61, 1  ;;  %v951_v18 = vrot.slane %v12116_v7, 6  ;;  %v1631_v19 = vsel %vm1084_vm5, %v950_v62, -inf  ;;  %v749_v60 = vpop.trf.xlu1 }
 0x210   : > { %v12160_v21 = vmax.f32 %v1572_v48, %v1573_v3  ;;  %v1988_v23 = vpack.c.bf16 %v1140_v5, %v1140_v5  ;;  %v1153_v24 = vrot.slane %v1152_v63, 1  ;;  %v2495_v25 = vsel %vm2494_vm7, %v2367_v2, %v2366_v59 }
 0x211   : > { %v2049_v22 = vpack.c.bf16 %v1567_v8, %v1567_v8  ;;  %v1159_v26 = vmax.f32 %v1157_v53, %v1158_v9  ;;  %v1166_v28 = vmax.f32 %v1164_v54, %v1165_v10  ;;  %v1985_v29 = vpack.c.bf16 %v1119_v12, %v1119_v12 }
 0x212   : > { %v1624_v30 = vsel %vm1084_vm5, %v949_v14, -inf  ;;  %v1632_v31 = vrot.slane %v1631_v19, 4  ;;  %v831_v33 = vmax.f32 %v799_v15, 0.0  ;;  %v1986_v34 = vpack.c.bf16 %v1126_v13, %v1126_v13 }
 0x213   : > { %v2244_v7 = vperm.slane %v1987_v16, 0  ;;  %v1147_v35 = vmax.f32 %v1145_v61, %v1146_v17  ;;  %v1638_v36 = vsel %vm1084_vm5, %v951_v18, -inf  ;;  %v12166_v38 = vsel %vm2496_vm8, %v2368_v6, %v2495_v25 }
 0x214   : > { %v2245_v40 = vperm.slane %v1988_v23, 0  ;;  %v1154_v44 = vmax.f32 %v1152_v63, %v1153_v24  ;;  %v12170_v46 = vperm.slane %v2049_v22, 0  ;;  %v1160_v47 = vrot.slane %v1159_v26, 1 }
 0x215   : > { %v1167_v48 = vrot.slane %v1166_v28, 1  ;;  %v1625_v49 = vrot.slane %v1624_v30, 4  ;;  %v12172_v51 = vperm.slane %v1985_v29, 0  ;;  %v1633_v11 = vmax.f32 %v1631_v19, %v1632_v31 }
 0x216   : > { %v1639_v52 = vrot.slane %v1638_v36, 4  ;;  %v902_v53 = vrot.slane %v831_v33, 4  ;;  %v12174_v54 = vperm.slane %v1986_v34, 0  ;;  %v2372_v57 = vunpack.c.l.b16 %v2244_v7 }
 0x217   : > { %v1989_v58 = vpack.c.bf16 %v1147_v35, %v1147_v35  ;;  %v816_v59 = vadd.f32 %v12086_v1, %v781_v45  ;;  %v2373_v61 = vunpack.c.l.b16 %v2245_v40  ;;  %v1990_v62 = vpack.c.bf16 %v1154_v44, %v1154_v44 }
 0x218   : > { %v903_v0 = vrot.slane %v831_v33, 6  ;;  %v1169_v2 = vsel %vm1084_vm5, %v831_v33, -inf  ;;  %v1161_v3 = vmax.f32 %v1159_v26, %v1160_v47  ;;  %v1168_v5 = vmax.f32 %v1166_v28, %v1167_v48 }
 0x219   : > { %v1626_v63 = vmax.f32 %v1624_v30, %v1625_v49  ;;  %v901_v6 = vrot.slane %v831_v33, 2  ;;  %v1634_v8 = vrot.slane %v1633_v11, 2  ;;  %v1640_v9 = vmax.f32 %v1638_v36, %v1639_v52 }
 0x21a   : > { %v1183_v10 = vsel %vm1084_vm5, %v902_v53, -inf  ;;  %v800_v12 = vadd.f32 %v12086_v1, %v749_v60  ;;  %v2246_v14 = vperm.slane %v1989_v58, 0  ;;  %v1170_v15 = vrot.slane %v1169_v2, 4 }
 0x21b   : > { %v848_v16 = vmax.f32 %v816_v59, 0.0  ;;  %v2505_v18 = vsel %vm2504_vm6, %v2373_v61, %v2372_v57  ;;  %v12183_v19 = vperm.slane %v1990_v62, 0  ;;  %v1190_v23 = vsel %vm1084_vm5, %v903_v0, -inf }
 0x21c   : > { %v1991_v24 = vpack.c.bf16 %v1161_v3, %v1161_v3  ;;  %v1992_v25 = vpack.c.bf16 %v1168_v5, %v1168_v5  ;;  %v1176_v22 = vsel %vm1084_vm5, %v901_v6, -inf  ;;  %v1184_v26 = vrot.slane %v1183_v10, 4 }
 0x21d   : > { %v1627_v28 = vrot.slane %v1626_v63, 2  ;;  %v1635_v29 = vmax.f32 %v1633_v11, %v1634_v8  ;;  %v1641_v30 = vrot.slane %v1640_v9, 2  ;;  %v832_v31 = vmax.f32 %v800_v12, 0.0 }
 0x21e   : > { %v2374_v33 = vunpack.c.l.b16 %v2246_v14  ;;  %v1171_v34 = vmax.f32 %v1169_v2, %v1170_v15  ;;  %v1191_v7 = vrot.slane %v1190_v23, 4  ;;  %v952_v35 = vrot.slane %v848_v16, 2 }
 0x21f   : > { %v2375_v36 = vunpack.c.l.b16 %v12183_v19  ;;  %v1177_v40 = vrot.slane %v1176_v22, 4  ;;  %v953_v44 = vrot.slane %v848_v16, 4  ;;  %v954_v45 = vrot.slane %v848_v16, 6 }
 0x220   : > { %v12188_v47 = vperm.slane %v1991_v24, 0  ;;  %v12190_v48 = vperm.slane %v1992_v25, 0  ;;  %v1185_v49 = vmax.f32 %v1183_v10, %v1184_v26  ;;  %v1645_v52 = vsel %vm1084_vm5, %v848_v16, -inf }
 0x221   : > { %v1628_v53 = vmax.f32 %v1626_v63, %v1627_v28  ;;  %v1636_v11 = vrot.slane %v1635_v29, 1  ;;  %v1642_v57 = vmax.f32 %v1640_v9, %v1641_v30  ;;  %v904_v58 = vrot.slane %v832_v31, 2 }
 0x222   : > { %v1172_v59 = vrot.slane %v1171_v34, 2  ;;  %v1192_v60 = vmax.f32 %v1190_v23, %v1191_v7  ;;  %v1652_v61 = vsel %vm1084_vm5, %v952_v35, -inf  ;;  %v1197_v62 = vsel %vm1084_vm5, %v832_v31, -inf }
 0x223   : > { %v1178_v0 = vmax.f32 %v1176_v22, %v1177_v40  ;;  %v1646_v2 = vrot.slane %v1645_v52, 4  ;;  %v1659_v3 = vsel %vm1084_vm5, %v953_v44, -inf  ;;  %v1666_v5 = vsel %vm1084_vm5, %v954_v45, -inf }
 0x224   : > { %v2376_v6 = vunpack.c.l.b16 %v12188_v47  ;;  %v2507_v8 = vsel %vm2506_vm9, %v2374_v33, %v2505_v18  ;;  %v1186_v63 = vrot.slane %v1185_v49, 2  ;;  %v905_v10 = vrot.slane %v832_v31, 4 }
 0x225   : > { %v1643_v9 = vrot.slane %v1642_v57, 1  ;;  %v1653_v12 = vrot.slane %v1652_v61, 4  ;;  %v1198_v14 = vrot.slane %v1197_v62, 4  ;;  %v1204_v15 = vsel %vm1084_vm5, %v904_v58, -inf }
 0x226   : > { %v1629_v16 = vrot.slane %v1628_v53, 1  ;;  %v1193_v19 = vrot.slane %v1192_v60, 2  ;;  %v1660_v23 = vrot.slane %v1659_v3, 4  ;;  %v1667_v24 = vrot.slane %v1666_v5, 4 }
 0x227   : > { %v1637_v25 = vmax.f32 %v1635_v29, %v1636_v11  ;;  %v1173_v22 = vmax.f32 %v1171_v34, %v1172_v59  ;;  %v1179_v26 = vrot.slane %v1178_v0, 2  ;;  %v1647_v28 = vmax.f32 %v1645_v52, %v1646_v2 }
 0x228   : > { %v1187_v30 = vmax.f32 %v1185_v49, %v1186_v63  ;;  %v906_v7 = vrot.slane %v832_v31, 6  ;;  %v1205_v35 = vrot.slane %v1204_v15, 4  ;;  %v1211_v18 = vsel %vm1084_vm5, %v905_v10, -inf }
 0x229   : > { %v1644_v40 = vmax.f32 %v1642_v57, %v1643_v9  ;;  %v1654_v44 = vmax.f32 %v1652_v61, %v1653_v12  ;;  %v1199_v45 = vmax.f32 %v1197_v62, %v1198_v14  ;;  %v1630_v55 = vmax.f32 %v1628_v53, %v1629_v16 }
 0x22a   : > { %v1194_v58 = vmax.f32 %v1192_v60, %v1193_v19  ;;  %v1661_v41 = vmax.f32 %v1659_v3, %v1660_v23  ;;  %v1668_v37 = vmax.f32 %v1666_v5, %v1667_v24  ;;  %v2059_v39 = vpack.c.bf16 %v1637_v25, %v1637_v25  ;;  %v782_v3 = vpop.trf.xlu2 }
 0x22b   : > { %v1174_v50 = vrot.slane %v1173_v22, 1  ;;  %v1648_v29 = vrot.slane %v1647_v28, 2  ;;  %v1212_v34 = vrot.slane %v1211_v18, 4  ;;  %v1180_v11 = vmax.f32 %v1178_v0, %v1179_v26 }
 0x22c   : > { %v1188_v52 = vrot.slane %v1187_v30, 1  ;;  %v1206_v49 = vmax.f32 %v1204_v15, %v1205_v35  ;;  %v1218_v31 = vsel %vm1084_vm5, %v906_v7, -inf  ;;  %v2508_v59 = vsel %vm2494_vm7, %v2375_v36, %v2507_v8 }
 0x22d   : > { %v2060_v2 = vpack.c.bf16 %v1644_v40, %v1644_v40  ;;  %v1655_v63 = vrot.slane %v1654_v44, 2  ;;  %v1200_v57 = vrot.slane %v1199_v45, 2  ;;  %v2058_v61 = vpack.c.bf16 %v1630_v55, %v1630_v55 }
 0x22e   : > { %v1195_v62 = vrot.slane %v1194_v58, 1  ;;  %v1662_v53 = vrot.slane %v1661_v41, 2  ;;  %v1669_v60 = vrot.slane %v1668_v37, 2  ;;  %v2316_v5 = vperm.slane %v2059_v39, 0 }
 0x22f   : > { %v1649_v10 = vmax.f32 %v1647_v28, %v1648_v29  ;;  %v1213_v9 = vmax.f32 %v1211_v18, %v1212_v34  ;;  %v1219_v12 = vrot.slane %v1218_v31, 4  ;;  %v1175_v14 = vmax.f32 %v1173_v22, %v1174_v50 }
 0x230   : > { %v1181_v0 = vrot.slane %v1180_v11, 1  ;;  %v1189_v16 = vmax.f32 %v1187_v30, %v1188_v52  ;;  %v1207_v15 = vrot.slane %v1206_v49, 2  ;;  %v2317_v19 = vperm.slane %v2060_v2, 0 }
 0x231   : > { %v1656_v23 = vmax.f32 %v1654_v44, %v1655_v63  ;;  %v1201_v24 = vmax.f32 %v1199_v45, %v1200_v57  ;;  %v817_v36 = vadd.f32 %v12086_v1, %v782_v3  ;;  %v12205_v8 = vperm.slane %v2058_v61, 0 }
 0x232   : > { %v1196_v55 = vmax.f32 %v1194_v58, %v1195_v62  ;;  %v1663_v25 = vmax.f32 %v1661_v41, %v1662_v53  ;;  %v1670_v26 = vmax.f32 %v1668_v37, %v1669_v60  ;;  %v2444_v7 = vunpack.c.l.b16 %v2316_v5 }
 0x233   : > { %v1650_v35 = vrot.slane %v1649_v10, 1  ;;  %v1214_v39 = vrot.slane %v1213_v9, 2  ;;  %v1220_v28 = vmax.f32 %v1218_v31, %v1219_v12  ;;  %v1182_v18 = vmax.f32 %v1180_v11, %v1181_v0 }
 0x234   : > { %v1993_v40 = vpack.c.bf16 %v1175_v14, %v1175_v14  ;;  %v1995_v50 = vpack.c.bf16 %v1189_v16, %v1189_v16  ;;  %v1208_v22 = vmax.f32 %v1206_v49, %v1207_v15  ;;  %v2445_v30 = vunpack.c.l.b16 %v2317_v19 }
 0x235   : > { %v1657_v29 = vrot.slane %v1656_v23, 1  ;;  %v1202_v34 = vrot.slane %v1201_v24, 1  ;;  %v849_v44 = vmax.f32 %v817_v36, 0.0  ;;  %v12210_v45 = vsel %vm2496_vm8, %v2376_v6, %v2508_v59  ;;  %v750_v6 = vpop.trf.xlu1 }
 0x236   : > { %v1996_v58 = vpack.c.bf16 %v1196_v55, %v1196_v55  ;;  %v1664_v41 = vrot.slane %v1663_v25, 1  ;;  %v1671_v37 = vrot.slane %v1670_v26, 1  ;;  %v1651_v2 = vmax.f32 %v1649_v10, %v1650_v35 }
 0x237   : > { %v1215_v31 = vmax.f32 %v1213_v9, %v1214_v39  ;;  %v1221_v11 = vrot.slane %v1220_v28, 2  ;;  %v1994_v63 = vpack.c.bf16 %v1182_v18, %v1182_v18  ;;  %v12213_v57 = vperm.slane %v1993_v40, 0 }
 0x238   : > { %v2252_v49 = vperm.slane %v1995_v50, 0  ;;  %v1209_v61 = vrot.slane %v1208_v22, 1  ;;  %v2569_v62 = vsel %vm2504_vm6, %v2445_v30, %v2444_v7  ;;  %v1658_v53 = vmax.f32 %v1656_v23, %v1657_v29 }
 0x239   : > { %v1203_v47 = vmax.f32 %v1201_v24, %v1202_v34  ;;  %v955_v60 = vrot.slane %v849_v44, 2  ;;  %v2253_v59 = vperm.slane %v1996_v58, 0  ;;  %v1665_v3 = vmax.f32 %v1663_v25, %v1664_v41 }
 0x23a   : > { %v1672_v5 = vmax.f32 %v1670_v26, %v1671_v37  ;;  %v956_v12 = vrot.slane %v849_v44, 4  ;;  %v2061_v14 = vpack.c.bf16 %v1651_v2, %v1651_v2  ;;  %v1216_v0 = vrot.slane %v1215_v31, 1 }
 0x23b   : > { %v1222_v10 = vmax.f32 %v1220_v28, %v1221_v11  ;;  %v957_v9 = vrot.slane %v849_v44, 6  ;;  %v12216_v16 = vperm.slane %v1994_v63, 0  ;;  %v2380_v15 = vunpack.c.l.b16 %v2252_v49 }
 0x23c   : > { %v1210_v19 = vmax.f32 %v1208_v22, %v1209_v61  ;;  %v801_v36 = vadd.f32 %v12086_v1, %v750_v6  ;;  %v2062_v55 = vpack.c.bf16 %v1658_v53, %v1658_v53  ;;  %v1997_v7 = vpack.c.bf16 %v1203_v47, %v1203_v47 }
 0x23d   : > { %v1673_v23 = vsel %vm1084_vm5, %v849_v44, -inf  ;;  %v1680_v24 = vsel %vm1084_vm5, %v955_v60, -inf  ;;  %v2381_v35 = vunpack.c.l.b16 %v2253_v59  ;;  %v2063_v25 = vpack.c.bf16 %v1665_v3, %v1665_v3  ;;  %v783_v60 = vpop.trf.xlu2 }
 0x23e   : > { %v2064_v26 = vpack.c.bf16 %v1672_v5, %v1672_v5  ;;  %v1687_v39 = vsel %vm1084_vm5, %v956_v12, -inf  ;;  %v2318_v18 = vperm.slane %v2061_v14, 0  ;;  %v1217_v28 = vmax.f32 %v1215_v31, %v1216_v0 }
 0x23f   : > { %v1223_v40 = vrot.slane %v1222_v10, 1  ;;  %v1694_v50 = vsel %vm1084_vm5, %v957_v9, -inf  ;;  %v1998_v30 = vpack.c.bf16 %v1210_v19, %v1210_v19  ;;  %v1674_v22 = vrot.slane %v1673_v23, 4 }
 0x240   : > { %v1681_v29 = vrot.slane %v1680_v24, 4  ;;  %v833_v34 = vmax.f32 %v801_v36, 0.0  ;;  %v2319_v41 = vperm.slane %v2062_v55, 0  ;;  %v2254_v44 = vperm.slane %v1997_v7, 0 }
 0x241   : > { %v1688_v37 = vrot.slane %v1687_v39, 4  ;;  %v2513_v11 = vsel %vm2504_vm6, %v2381_v35, %v2380_v15  ;;  %v2320_v63 = vperm.slane %v2063_v25, 0  ;;  %v1695_v49 = vrot.slane %v1694_v50, 4 }
 0x242   : > { %v12226_v61 = vperm.slane %v2064_v26, 0  ;;  %v2446_v31 = vunpack.c.l.b16 %v2318_v18  ;;  %v1224_v53 = vmax.f32 %v1222_v10, %v1223_v40  ;;  %v1999_v47 = vpack.c.bf16 %v1217_v28, %v1217_v28  ;;  %v751_v28 = vpop.trf.xlu1 }
 0x243   : > { %v2255_v6 = vperm.slane %v1998_v30, 0  ;;  %v1675_v59 = vmax.f32 %v1673_v23, %v1674_v22  ;;  %v1682_v3 = vmax.f32 %v1680_v24, %v1681_v29  ;;  %v908_v5 = vrot.slane %v833_v34, 4 }
 0x244   : > { %v2447_v12 = vunpack.c.l.b16 %v2319_v41  ;;  %v2382_v14 = vunpack.c.l.b16 %v2254_v44  ;;  %v1689_v0 = vmax.f32 %v1687_v39, %v1688_v37  ;;  %v907_v9 = vrot.slane %v833_v34, 2  ;;  %v12240_v37 = vld [vmem:[%s16704_s26] ss:$0 sm:$0xff] }
 0x245   : > { %v1696_v19 = vmax.f32 %v1694_v50, %v1695_v49  ;;  %v909_v36 = vrot.slane %v833_v34, 6  ;;  %v1225_v15 = vsel %vm1084_vm5, %v833_v34, -inf  ;;  %v818_v55 = vadd.f32 %v12086_v1, %v783_v60 }
 0x246   : > { %v2448_v7 = vunpack.c.l.b16 %v2320_v63  ;;  %v2570_v35 = vsel %vm2506_vm9, %v2446_v31, %v2569_v62  ;;  %v2000_v10 = vpack.c.bf16 %v1224_v53, %v1224_v53  ;;  %v2256_v25 = vperm.slane %v1999_v47, 0 }
 0x247   : > { %v2383_v26 = vunpack.c.l.b16 %v2255_v6  ;;  %v1676_v18 = vrot.slane %v1675_v59, 2  ;;  %v1683_v23 = vrot.slane %v1682_v3, 2  ;;  %v1239_v24 = vsel %vm1084_vm5, %v908_v5, -inf }
 0x248   : > { %v2514_v39 = vsel %vm2506_vm9, %v2382_v14, %v2513_v11  ;;  %v1690_v40 = vrot.slane %v1689_v0, 2  ;;  %v1226_v50 = vrot.slane %v1225_v15, 4  ;;  %v1232_v30 = vsel %vm1084_vm5, %v907_v9, -inf }
 0x249   : > { %v2449_v22 = vunpack.c.l.b16 %v12226_v61  ;;  %v1697_v1 = vrot.slane %v1696_v19, 2  ;;  %v1246_v29 = vsel %vm1084_vm5, %v909_v36, -inf  ;;  %v850_v62 = vmax.f32 %v818_v55, 0.0 }
 0x24a   : > { %v2571_v34 = vsel %vm2494_vm7, %v2447_v12, %v2570_v35  ;;  %v2384_v41 = vunpack.c.l.b16 %v2256_v25  ;;  %v1240_v44 = vrot.slane %v1239_v24, 4  ;;  %v802_v11 = vadd.f32 %v12240_v37, %v751_v28 }
 0x24b   : > { %v2515_v63 = vsel %vm2494_vm7, %v2383_v26, %v2514_v39  ;;  %v1677_v49 = vmax.f32 %v1675_v59, %v1676_v18  ;;  %v1684_v31 = vmax.f32 %v1682_v3, %v1683_v23  ;;  %v1233_v61 = vrot.slane %v1232_v30, 4 }
 0x24c   : > { %v2257_v53 = vperm.slane %v2000_v10, 0  ;;  %v1691_v47 = vmax.f32 %v1689_v0, %v1690_v40  ;;  %v1227_v60 = vmax.f32 %v1225_v15, %v1226_v50  ;;  %v1247_v6 = vrot.slane %v1246_v29, 4 }
 0x24d   : > { %v2572_v5 = vsel %vm2496_vm8, %v2448_v7, %v2571_v34  ;;  %v1698_v12 = vmax.f32 %v1696_v19, %v1697_v1  ;;  %v958_v14 = vrot.slane %v850_v62, 2  ;;  %v959_v9 = vrot.slane %v850_v62, 4 }
 0x24e   : > { %v2516_v36 = vsel %vm2496_vm8, %v2384_v41, %v2515_v63  ;;  %v1241_v55 = vmax.f32 %v1239_v24, %v1240_v44  ;;  %v1701_v35 = vsel %vm1084_vm5, %v850_v62, -inf  ;;  %v834_v25 = vmax.f32 %v802_v11, 0.0 }
 0x24f   : > { %v1678_v28 = vrot.slane %v1677_v49, 1  ;;  %v1685_v26 = vrot.slane %v1684_v31, 1  ;;  %v1234_v59 = vmax.f32 %v1232_v30, %v1233_v61  ;;  %v960_v3 = vrot.slane %v850_v62, 6 }
 0x250   : > { %v2385_v18 = vunpack.c.l.b16 %v2257_v53  ;;  %v1692_v10 = vrot.slane %v1691_v47, 1  ;;  %v1228_v0 = vrot.slane %v1227_v60, 2  ;;  %v1248_v15 = vmax.f32 %v1246_v29, %v1247_v6 }
 0x251   : > { %v1699_v23 = vrot.slane %v1698_v12, 1  ;;  %v1702_v39 = vrot.slane %v1701_v35, 4  ;;  %v1708_v19 = vsel %vm1084_vm5, %v958_v14, -inf  ;;  %v1715_v7 = vsel %vm1084_vm5, %v959_v9, -inf }
 0x252   : > { %v12250_v40 = vsel %vm2498_vm10, %v2449_v22, %v2572_v5  ;;  %v12253_v24 = vsel %vm2498_vm10, %v2385_v18, %v2516_v36  ;;  %v1242_v50 = vrot.slane %v1241_v55, 2  ;;  %v910_v1 = vrot.slane %v834_v25, 2 }
 0x253   : > { %v1679_v30 = vmax.f32 %v1677_v49, %v1678_v28  ;;  %v1686_v62 = vmax.f32 %v1684_v31, %v1685_v26  ;;  %v1235_v34 = vrot.slane %v1234_v59, 2  ;;  %v1722_v41 = vsel %vm1084_vm5, %v960_v3, -inf }
 0x254   : > { %v1249_v29 = vrot.slane %v1248_v15, 2  ;;  %v1709_v44 = vrot.slane %v1708_v19, 4  ;;  %v1716_v11 = vrot.slane %v1715_v7, 4  ;;  %v1253_v63 = vsel %vm1084_vm5, %v834_v25, -inf }
 0x255   : > { %v1693_v61 = vmax.f32 %v1691_v47, %v1692_v10  ;;  %v1700_v53 = vmax.f32 %v1698_v12, %v1699_v23  ;;  %v1229_v6 = vmax.f32 %v1227_v60, %v1228_v0  ;;  %v1703_v22 = vmax.f32 %v1701_v35, %v1702_v39 }
 0x256   : > { %v1243_v5 = vmax.f32 %v1241_v55, %v1242_v50  ;;  %v1723_v14 = vrot.slane %v1722_v41, 4  ;;  %v911_v9 = vrot.slane %v834_v25, 4  ;;  %v1260_v36 = vsel %vm1084_vm5, %v910_v1, -inf }
 0x257   : > { %v2065_v18 = vpack.c.bf16 %v1679_v30, %v1679_v30  ;;  %v2066_v49 = vpack.c.bf16 %v1686_v62, %v1686_v62  ;;  %v1236_v31 = vmax.f32 %v1234_v59, %v1235_v34  ;;  %v1254_v28 = vrot.slane %v1253_v63, 4 }
 0x258   : > { %v1250_v26 = vmax.f32 %v1248_v15, %v1249_v29  ;;  %v1710_v3 = vmax.f32 %v1708_v19, %v1709_v44  ;;  %v1717_v52 = vmax.f32 %v1715_v7, %v1716_v11  ;;  %v912_v2 = vrot.slane %v834_v25, 6  ;;  %v784_v25 = vpop.trf.xlu2 }
 0x259   : > { %v2067_v17 = vpack.c.bf16 %v1693_v61, %v1693_v61  ;;  %v1230_v58 = vrot.slane %v1229_v6, 1  ;;  %v1704_v33 = vrot.slane %v1703_v22, 2  ;;  %v1261_v47 = vrot.slane %v1260_v36, 4 }
 0x25a   : > { %v2068_v12 = vpack.c.bf16 %v1700_v53, %v1700_v53  ;;  %v1244_v60 = vrot.slane %v1243_v5, 1  ;;  %v1724_v35 = vmax.f32 %v1722_v41, %v1723_v14  ;;  %v1267_v55 = vsel %vm1084_vm5, %v911_v9, -inf }
 0x25b   : > { %v2322_v10 = vperm.slane %v2065_v18, 0  ;;  %v12259_v0 = vperm.slane %v2066_v49, 0  ;;  %v1237_v23 = vrot.slane %v1236_v31, 1  ;;  %v1255_v39 = vmax.f32 %v1253_v63, %v1254_v28 }
 0x25c   : > { %v1251_v59 = vrot.slane %v1250_v26, 1  ;;  %v1711_v50 = vrot.slane %v1710_v3, 2  ;;  %v1718_v15 = vrot.slane %v1717_v52, 2  ;;  %v1274_v19 = vsel %vm1084_vm5, %v912_v2, -inf }
 0x25d   : > { %v2324_v7 = vperm.slane %v2067_v17, 0  ;;  %v1705_v1 = vmax.f32 %v1703_v22, %v1704_v33  ;;  %v1262_v30 = vmax.f32 %v1260_v36, %v1261_v47  ;;  %v1268_v62 = vrot.slane %v1267_v55, 4 }
 0x25e   : > { %v2325_v34 = vperm.slane %v2068_v12, 0  ;;  %v1231_v29 = vmax.f32 %v1229_v6, %v1230_v58  ;;  %v1245_v41 = vmax.f32 %v1243_v5, %v1244_v60  ;;  %v1725_v44 = vrot.slane %v1724_v35, 2 }
 0x25f   : > { %v2450_v11 = vunpack.c.l.b16 %v2322_v10  ;;  %v1256_v61 = vrot.slane %v1255_v39, 2  ;;  %v1275_v53 = vrot.slane %v1274_v19, 4  ;;  %v819_v14 = vadd.f32 %v12240_v37, %v784_v25 }
 0x260   : > { %v1238_v63 = vmax.f32 %v1236_v31, %v1237_v23  ;;  %v1252_v9 = vmax.f32 %v1250_v26, %v1251_v59  ;;  %v1712_v18 = vmax.f32 %v1710_v3, %v1711_v50  ;;  %v1719_v49 = vmax.f32 %v1717_v52, %v1718_v15 }
 0x261   : > { %v2452_v28 = vunpack.c.l.b16 %v2324_v7  ;;  %v1706_v2 = vrot.slane %v1705_v1, 1  ;;  %v1263_v13 = vrot.slane %v1262_v30, 2  ;;  %v1269_v17 = vmax.f32 %v1267_v55, %v1268_v62  ;;  %v752_v7 = vpop.trf.xlu1 }
 0x262   : > { %v2453_v33 = vunpack.c.l.b16 %v2325_v34  ;;  %v2001_v22 = vpack.c.bf16 %v1231_v29, %v1231_v29  ;;  %v2003_v36 = vpack.c.bf16 %v1245_v41, %v1245_v41  ;;  %v1726_v47 = vmax.f32 %v1724_v35, %v1725_v44 }
 0x263   : > { %v1257_v6 = vmax.f32 %v1255_v39, %v1256_v61  ;;  %v1276_v5 = vmax.f32 %v1274_v19, %v1275_v53  ;;  %v851_v12 = vmax.f32 %v819_v14, 0.0  ;;  %v12266_v60 = vsel %vm2500_vm11, %v2450_v11, %v12250_v40 }
 0x264   : > { %v2004_v31 = vpack.c.bf16 %v1252_v9, %v1252_v9  ;;  %v1713_v26 = vrot.slane %v1712_v18, 1  ;;  %v1720_v52 = vrot.slane %v1719_v49, 1  ;;  %v2002_v3 = vpack.c.bf16 %v1238_v63, %v1238_v63 }
 0x265   : > { %v1707_v10 = vmax.f32 %v1705_v1, %v1706_v2  ;;  %v1264_v23 = vmax.f32 %v1262_v30, %v1263_v13  ;;  %v1270_v55 = vrot.slane %v1269_v17, 2  ;;  %v12269_v59 = vsel %vm2504_vm6, %v2453_v33, %v2452_v28 }
 0x266   : > { %v12271_v35 = vperm.slane %v2001_v22, 0  ;;  %v2260_v50 = vperm.slane %v2003_v36, 0  ;;  %v1727_v39 = vrot.slane %v1726_v47, 1  ;;  %v1258_v15 = vrot.slane %v1257_v6, 1 }
 0x267   : > { %v1277_v19 = vrot.slane %v1276_v5, 2  ;;  %v961_v25 = vrot.slane %v851_v12, 2  ;;  %v1729_v40 = vsel %vm1084_vm5, %v851_v12, -inf  ;;  %v2261_v62 = vperm.slane %v2004_v31, 0 }
 0x268   : > { %v1714_v34 = vmax.f32 %v1712_v18, %v1713_v26  ;;  %v1721_v29 = vmax.f32 %v1719_v49, %v1720_v52  ;;  %v962_v41 = vrot.slane %v851_v12, 4  ;;  %v2069_v1 = vpack.c.bf16 %v1707_v10, %v1707_v10 }
 0x269   : > { %v1265_v13 = vrot.slane %v1264_v23, 1  ;;  %v1271_v30 = vmax.f32 %v1269_v17, %v1270_v55  ;;  %v963_v44 = vrot.slane %v851_v12, 6  ;;  %v12274_v11 = vperm.slane %v2002_v3, 0 }
 0x26a   : > { %v2388_v61 = vunpack.c.l.b16 %v2260_v50  ;;  %v1730_v53 = vrot.slane %v1729_v40, 4  ;;  %v803_v14 = vadd.f32 %v12240_v37, %v752_v7  ;;  %v1728_v63 = vmax.f32 %v1726_v47, %v1727_v39 }
 0x26b   : > { %v1259_v9 = vmax.f32 %v1257_v6, %v1258_v15  ;;  %v1278_v28 = vmax.f32 %v1276_v5, %v1277_v19  ;;  %v1736_v2 = vsel %vm1084_vm5, %v961_v25, -inf  ;;  %v2389_v33 = vunpack.c.l.b16 %v2261_v62 }
 0x26c   : > { %v2070_v22 = vpack.c.bf16 %v1714_v34, %v1714_v34  ;;  %v2071_v18 = vpack.c.bf16 %v1721_v29, %v1721_v29  ;;  %v1743_v49 = vsel %vm1084_vm5, %v962_v41, -inf  ;;  %v2326_v36 = vperm.slane %v2069_v1, 0 }
 0x26d   : > { %v1266_v31 = vmax.f32 %v1264_v23, %v1265_v13  ;;  %v1272_v17 = vrot.slane %v1271_v30, 1  ;;  %v1750_v12 = vsel %vm1084_vm5, %v963_v44, -inf  ;;  %v2386_v26 = vunpack.c.l.b16 %v12271_v35 }
 0x26e   : > { %v1731_v52 = vmax.f32 %v1729_v40, %v1730_v53  ;;  %v1737_v3 = vrot.slane %v1736_v2, 4  ;;  %v835_v10 = vmax.f32 %v803_v14, 0.0  ;;  %v2072_v47 = vpack.c.bf16 %v1728_v63, %v1728_v63 }
 0x26f   : > { %v1279_v6 = vrot.slane %v1278_v28, 1  ;;  %v2005_v5 = vpack.c.bf16 %v1259_v9, %v1259_v9  ;;  %v1744_v55 = vrot.slane %v1743_v49, 4  ;;  %v2327_v39 = vperm.slane %v2070_v22, 0  ;;  %v785_v22 = vpop.trf.xlu2 }
 0x270   : > { %v2328_v15 = vperm.slane %v2071_v18, 0  ;;  %v1751_v19 = vrot.slane %v1750_v12, 4  ;;  %v2520_v25 = vsel %vm2504_vm6, %v2389_v33, %v2388_v61  ;;  %v2454_v23 = vunpack.c.l.b16 %v2326_v36 }
 0x271   : > { %v1273_v7 = vmax.f32 %v1271_v30, %v1272_v17  ;;  %v2006_v62 = vpack.c.bf16 %v1266_v31, %v1266_v31  ;;  %v1732_v34 = vrot.slane %v1731_v52, 2  ;;  %v1738_v29 = vmax.f32 %v1736_v2, %v1737_v3  ;;  %v753_v17 = vpop.trf.xlu1 }
 0x272   : > { %v913_v41 = vrot.slane %v835_v10, 2  ;;  %v914_v40 = vrot.slane %v835_v10, 4  ;;  %v2329_v1 = vperm.slane %v2072_v47, 0  ;;  %v1280_v13 = vmax.f32 %v1278_v28, %v1279_v6 }
 0x273   : > { %v2262_v44 = vperm.slane %v2005_v5, 0  ;;  %v1745_v53 = vmax.f32 %v1743_v49, %v1744_v55  ;;  %v2455_v14 = vunpack.c.l.b16 %v2327_v39  ;;  %v2456_v63 = vunpack.c.l.b16 %v2328_v15 }
 0x274   : > { %v1752_v9 = vmax.f32 %v1750_v12, %v1751_v19  ;;  %v915_v58 = vrot.slane %v835_v10, 6  ;;  %v2577_v18 = vsel %vm2506_vm9, %v2454_v23, %v12269_v59  ;;  %v2007_v61 = vpack.c.bf16 %v1273_v7, %v1273_v7 }
 0x275   : > { %v2263_v33 = vperm.slane %v2006_v62, 0  ;;  %v1281_v30 = vsel %vm1084_vm5, %v835_v10, -inf  ;;  %v1733_v36 = vmax.f32 %v1731_v52, %v1732_v34  ;;  %v1739_v2 = vrot.slane %v1738_v29, 2 }
 0x276   : > { %v1288_v31 = vsel %vm1084_vm5, %v913_v41, -inf  ;;  %v1295_v28 = vsel %vm1084_vm5, %v914_v40, -inf  ;;  %v2008_v49 = vpack.c.bf16 %v1280_v13, %v1280_v13  ;;  %v2390_v3 = vunpack.c.l.b16 %v2262_v44 }
 0x277   : > { %v1746_v47 = vrot.slane %v1745_v53, 2  ;;  %v820_v12 = vadd.f32 %v12240_v37, %v785_v22  ;;  %v2578_v6 = vsel %vm2494_vm7, %v2455_v14, %v2577_v18  ;;  %v1753_v5 = vrot.slane %v1752_v9, 2 }
 0x278   : > { %v1282_v59 = vrot.slane %v1281_v30, 4  ;;  %v1302_v55 = vsel %vm1084_vm5, %v915_v58, -inf  ;;  %v2264_v39 = vperm.slane %v2007_v61, 0  ;;  %v1289_v10 = vrot.slane %v1288_v31, 4 }
 0x279   : > { %v1296_v52 = vrot.slane %v1295_v28, 4  ;;  %v804_v15 = vadd.f32 %v12240_v37, %v753_v17  ;;  %v2457_v19 = vunpack.c.l.b16 %v2329_v1  ;;  %v2391_v23 = vunpack.c.l.b16 %v2263_v33 }
 0x27a   : > { %v1734_v7 = vrot.slane %v1733_v36, 1  ;;  %v1740_v62 = vmax.f32 %v1738_v29, %v1739_v2  ;;  %v2521_v34 = vsel %vm2506_vm9, %v2390_v3, %v2520_v25  ;;  %v1747_v41 = vmax.f32 %v1745_v53, %v1746_v47 }
 0x27b   : > { %v1303_v40 = vrot.slane %v1302_v55, 4  ;;  %v852_v13 = vmax.f32 %v820_v12, 0.0  ;;  %v2579_v44 = vsel %vm2496_vm8, %v2456_v63, %v2578_v6  ;;  %v2265_v14 = vperm.slane %v2008_v49, 0 }
 0x27c   : > { %v1754_v22 = vmax.f32 %v1752_v9, %v1753_v5  ;;  %v1283_v18 = vmax.f32 %v1281_v30, %v1282_v59  ;;  %v2392_v58 = vunpack.c.l.b16 %v2264_v39  ;;  %v1290_v61 = vmax.f32 %v1288_v31, %v1289_v10 }
 0x27d   : > { %v1297_v50 = vmax.f32 %v1295_v28, %v1296_v52  ;;  %v836_v20 = vmax.f32 %v804_v15, 0.0  ;;  %v12298_v1 = vsel %vm2500_vm11, %v2386_v26, %v12253_v24  ;;  %v2522_v25 = vsel %vm2494_vm7, %v2391_v23, %v2521_v34 }
 0x27e   : > { %v1735_v29 = vmax.f32 %v1733_v36, %v1734_v7  ;;  %v1741_v53 = vrot.slane %v1740_v62, 1  ;;  %v1748_v33 = vrot.slane %v1747_v41, 1  ;;  %v1304_v2 = vmax.f32 %v1302_v55, %v1303_v40 }
 0x27f   : > { %v964_v63 = vrot.slane %v852_v13, 2  ;;  %v1757_v9 = vsel %vm1084_vm5, %v852_v13, -inf  ;;  %v12303_v30 = vsel %vm2498_vm10, %v2457_v19, %v2579_v44  ;;  %v2393_v31 = vunpack.c.l.b16 %v2265_v14 }
 0x280   : > { %v1755_v28 = vrot.slane %v1754_v22, 1  ;;  %v1284_v17 = vrot.slane %v1283_v18, 2  ;;  %v2523_v35 = vsel %vm2496_vm8, %v2392_v58, %v2522_v25  ;;  %v1291_v49 = vrot.slane %v1290_v61, 2 }
 0x281   : > { %v1298_v24 = vrot.slane %v1297_v50, 2  ;;  %v916_v26 = vrot.slane %v836_v20, 2  ;;  %v1742_v3 = vmax.f32 %v1740_v62, %v1741_v53  ;;  %v965_v47 = vrot.slane %v852_v13, 4 }
 0x282   : > { %v1758_v36 = vrot.slane %v1757_v9, 4  ;;  %v1309_v12 = vsel %vm1084_vm5, %v836_v20, -inf  ;;  %v1749_v6 = vmax.f32 %v1747_v41, %v1748_v33  ;;  %v2073_v5 = vpack.c.bf16 %v1735_v29, %v1735_v29 }
 0x283   : > { %v1305_v59 = vrot.slane %v1304_v2, 2  ;;  %v1764_v55 = vsel %vm1084_vm5, %v964_v63, -inf  ;;  %v12309_v39 = vsel %vm2498_vm10, %v2393_v31, %v2523_v35  ;;  %v1756_v10 = vmax.f32 %v1754_v22, %v1755_v28  ;;  %v786_v28 = vpop.trf.xlu2 }
 0x284   : > { %v1285_v52 = vmax.f32 %v1283_v18, %v1284_v17  ;;  %v917_v15 = vrot.slane %v836_v20, 4  ;;  %v1292_v19 = vmax.f32 %v1290_v61, %v1291_v49  ;;  %v966_v23 = vrot.slane %v852_v13, 6 }
 0x285   : > { %v1310_v7 = vrot.slane %v1309_v12, 4  ;;  %v1316_v62 = vsel %vm1084_vm5, %v916_v26, -inf  ;;  %v1299_v34 = vmax.f32 %v1297_v50, %v1298_v24  ;;  %v1759_v40 = vmax.f32 %v1757_v9, %v1758_v36 }
 0x286   : > { %v1765_v44 = vrot.slane %v1764_v55, 4  ;;  %v1771_v41 = vsel %vm1084_vm5, %v965_v47, -inf  ;;  %v2074_v14 = vpack.c.bf16 %v1742_v3, %v1742_v3  ;;  %v2075_v58 = vpack.c.bf16 %v1749_v6, %v1749_v6 }
 0x287   : > { %v2330_v25 = vperm.slane %v2073_v5, 0  ;;  %v1306_v29 = vmax.f32 %v1304_v2, %v1305_v59  ;;  %v1286_v53 = vrot.slane %v1285_v52, 1  ;;  %v918_v33 = vrot.slane %v836_v20, 6 }
 0x288   : > { %v1317_v63 = vrot.slane %v1316_v62, 4  ;;  %v1323_v22 = vsel %vm1084_vm5, %v917_v15, -inf  ;;  %v2076_v18 = vpack.c.bf16 %v1756_v10, %v1756_v10  ;;  %v1772_v61 = vrot.slane %v1771_v41, 4 }
 0x289   : > { %v1778_v13 = vsel %vm1084_vm5, %v966_v23, -inf  ;;  %v1311_v31 = vmax.f32 %v1309_v12, %v1310_v7  ;;  %v1293_v50 = vrot.slane %v1292_v19, 1  ;;  %v1300_v9 = vrot.slane %v1299_v34, 1 }
 0x28a   : > { %v1760_v17 = vrot.slane %v1759_v40, 2  ;;  %v1766_v35 = vmax.f32 %v1764_v55, %v1765_v44  ;;  %v12315_v49 = vperm.slane %v2074_v14, 0  ;;  %v2332_v24 = vperm.slane %v2075_v58, 0 }
 0x28b   : > { %v1307_v26 = vrot.slane %v1306_v29, 1  ;;  %v1324_v2 = vrot.slane %v1323_v22, 4  ;;  %v1779_v3 = vrot.slane %v1778_v13, 4  ;;  %v1318_v20 = vmax.f32 %v1316_v62, %v1317_v63 }
 0x28c   : > { %v1330_v47 = vsel %vm1084_vm5, %v918_v33, -inf  ;;  %v821_v36 = vadd.f32 %v12240_v37, %v786_v28  ;;  %v2458_v6 = vunpack.c.l.b16 %v2330_v25  ;;  %v1287_v5 = vmax.f32 %v1285_v52, %v1286_v53 }
 0x28d   : > { %v1773_v59 = vmax.f32 %v1771_v41, %v1772_v61  ;;  %v1312_v12 = vrot.slane %v1311_v31, 2  ;;  %v2333_v10 = vperm.slane %v2076_v18, 0  ;;  %v12319_v15 = vmax.f32 %v1292_v19, %v1293_v50  ;;  %v754_v61 = vpop.trf.xlu1 }
 0x28e   : > { %v1761_v23 = vmax.f32 %v1759_v40, %v1760_v17  ;;  %v1767_v55 = vrot.slane %v1766_v35, 2  ;;  %v1301_v44 = vmax.f32 %v1299_v34, %v1300_v9  ;;  %v1325_v14 = vmax.f32 %v1323_v22, %v1324_v2 }
 0x28f   : > { %v1331_v58 = vrot.slane %v1330_v47, 4  ;;  %v1308_v4 = vmax.f32 %v1306_v29, %v1307_v26  ;;  %v1780_v62 = vmax.f32 %v1778_v13, %v1779_v3  ;;  %v1319_v63 = vrot.slane %v1318_v20, 2 }
 0x290   : > { %v853_v33 = vmax.f32 %v821_v36, 0.0  ;;  %v2460_v43 = vunpack.c.l.b16 %v2332_v24  ;;  %v2009_v28 = vpack.c.bf16 %v1287_v5, %v1287_v5  ;;  %v1774_v25 = vrot.slane %v1773_v59, 2 }
 0x291   : > { %v1313_v52 = vmax.f32 %v1311_v31, %v1312_v12  ;;  %v2461_v41 = vunpack.c.l.b16 %v2333_v10  ;;  %v12324_v19 = vsel %vm2500_vm11, %v2458_v6, %v12303_v30  ;;  %v1762_v40 = vrot.slane %v1761_v23, 1 }
 0x292   : > { %v1768_v53 = vmax.f32 %v1766_v35, %v1767_v55  ;;  %v2010_v34 = vpack.c.bf16 %v12319_v15, %v12319_v15  ;;  %v2011_v22 = vpack.c.bf16 %v1301_v44, %v1301_v44  ;;  %v1326_v18 = vrot.slane %v1325_v14, 2 }
 0x293   : > { %v1332_v29 = vmax.f32 %v1330_v47, %v1331_v58  ;;  %v2012_v13 = vpack.c.bf16 %v1308_v4, %v1308_v4  ;;  %v1781_v50 = vrot.slane %v1780_v62, 2  ;;  %v1320_v9 = vmax.f32 %v1318_v20, %v1319_v63 }
 0x294   : > { %v967_v17 = vrot.slane %v853_v33, 2  ;;  %v12328_v24 = vperm.slane %v2009_v28, 0  ;;  %v1775_v31 = vmax.f32 %v1773_v59, %v1774_v25  ;;  %v1314_v26 = vrot.slane %v1313_v52, 1 }
 0x295   : > { %v968_v2 = vrot.slane %v853_v33, 4  ;;  %v1763_v30 = vmax.f32 %v1761_v23, %v1762_v40  ;;  %v1769_v3 = vrot.slane %v1768_v53, 1  ;;  %v1785_v35 = vsel %vm1084_vm5, %v853_v33, -inf }
 0x296   : > { %v805_v36 = vadd.f32 %v12240_v37, %v754_v61  ;;  %v2268_v6 = vperm.slane %v2011_v22, 0  ;;  %v1327_v5 = vmax.f32 %v1325_v14, %v1326_v18  ;;  %v1333_v12 = vrot.slane %v1332_v29, 2 }
 0x297   : > { %v969_v47 = vrot.slane %v853_v33, 6  ;;  %v2269_v10 = vperm.slane %v2012_v13, 0  ;;  %v1782_v4 = vmax.f32 %v1780_v62, %v1781_v50  ;;  %v1321_v15 = vrot.slane %v1320_v9, 1 }
 0x298   : > { %v1792_v20 = vsel %vm1084_vm5, %v967_v17, -inf  ;;  %v1776_v55 = vrot.slane %v1775_v31, 1  ;;  %v1315_v44 = vmax.f32 %v1313_v52, %v1314_v26  ;;  %v1786_v59 = vrot.slane %v1785_v35, 4 }
 0x299   : > { %v1799_v58 = vsel %vm1084_vm5, %v968_v2, -inf  ;;  %v2583_v23 = vsel %vm2504_vm6, %v2461_v41, %v2460_v43  ;;  %v1770_v63 = vmax.f32 %v1768_v53, %v1769_v3  ;;  %v2077_v28 = vpack.c.bf16 %v1763_v30, %v1763_v30 }
 0x29a   : > { %v837_v25 = vmax.f32 %v805_v36, 0.0  ;;  %v1328_v40 = vrot.slane %v1327_v5, 1  ;;  %v1334_v22 = vmax.f32 %v1332_v29, %v1333_v12  ;;  %v1793_v14 = vrot.slane %v1792_v20, 4 }
 0x29b   : > { %v1806_v33 = vsel %vm1084_vm5, %v969_v47, -inf  ;;  %v2396_v18 = vunpack.c.l.b16 %v2268_v6  ;;  %v2397_v62 = vunpack.c.l.b16 %v2269_v10  ;;  %v1322_v61 = vmax.f32 %v1320_v9, %v1321_v15 }
 0x29c   : > { %v1800_v13 = vrot.slane %v1799_v58, 4  ;;  %v1777_v50 = vmax.f32 %v1775_v31, %v1776_v55  ;;  %v1783_v17 = vrot.slane %v1782_v4, 1  ;;  %v2013_v52 = vpack.c.bf16 %v1315_v44, %v1315_v44 }
 0x29d   : > { %v1787_v26 = vmax.f32 %v1785_v35, %v1786_v59  ;;  %v2078_v7 = vpack.c.bf16 %v1770_v63, %v1770_v63  ;;  %v2334_v2 = vperm.slane %v2077_v28, 0  ;;  %v1807_v42 = vrot.slane %v1806_v33, 4 }
 0x29e   : > { %v920_v43 = vrot.slane %v837_v25, 4  ;;  %v12336_v41 = vperm.slane %v2010_v34, 0  ;;  %v1329_v53 = vmax.f32 %v1327_v5, %v1328_v40  ;;  %v1335_v30 = vrot.slane %v1334_v22, 1 }
 0x29f   : > { %v1794_v29 = vmax.f32 %v1792_v20, %v1793_v14  ;;  %v2527_v3 = vsel %vm2504_vm6, %v2397_v62, %v2396_v18  ;;  %v2014_v36 = vpack.c.bf16 %v1322_v61, %v1322_v61  ;;  %v1801_v6 = vmax.f32 %v1799_v58, %v1800_v13 }
 0x2a0   : > { %v919_v12 = vrot.slane %v837_v25, 2  ;;  %v1784_v9 = vmax.f32 %v1782_v4, %v1783_v17  ;;  %v2079_v47 = vpack.c.bf16 %v1777_v50, %v1777_v50  ;;  %v2270_v31 = vperm.slane %v2013_v52, 0 }
 0x2a1   : > { %v1788_v10 = vrot.slane %v1787_v26, 2  ;;  %v2335_v15 = vperm.slane %v2078_v7, 0  ;;  %v2462_v35 = vunpack.c.l.b16 %v2334_v2  ;;  %v1808_v55 = vmax.f32 %v1806_v33, %v1807_v42 }
 0x2a2   : > { %v1351_v44 = vsel %vm1084_vm5, %v920_v43, -inf  ;;  %v1336_v59 = vmax.f32 %v1334_v22, %v1335_v30  ;;  %v2015_v34 = vpack.c.bf16 %v1329_v53, %v1329_v53  ;;  %v1795_v63 = vrot.slane %v1794_v29, 2 }
 0x2a3   : > { %v1337_v5 = vsel %vm1084_vm5, %v837_v25, -inf  ;;  %v2271_v20 = vperm.slane %v2014_v36, 0  ;;  %v1802_v28 = vrot.slane %v1801_v6, 2  ;;  %v921_v40 = vrot.slane %v837_v25, 6 }
 0x2a4   : > { %v1344_v58 = vsel %vm1084_vm5, %v919_v12, -inf  ;;  %v2080_v14 = vpack.c.bf16 %v1784_v9, %v1784_v9  ;;  %v2398_v4 = vunpack.c.l.b16 %v2270_v31  ;;  %v1789_v18 = vmax.f32 %v1787_v26, %v1788_v10  ;;  %v787_v12 = vpop.trf.xlu2 }
 0x2a5   : > { %v1352_v62 = vrot.slane %v1351_v44, 4  ;;  %v2336_v61 = vperm.slane %v2079_v47, 0  ;;  %v2463_v7 = vunpack.c.l.b16 %v2335_v15  ;;  %v1809_v13 = vrot.slane %v1808_v55, 2 }
 0x2a6   : > { %v1338_v42 = vrot.slane %v1337_v5, 4  ;;  %v2584_v33 = vsel %vm2506_vm9, %v2462_v35, %v2583_v23  ;;  %v2272_v22 = vperm.slane %v2015_v34, 0  ;;  %v1796_v50 = vmax.f32 %v1794_v29, %v1795_v63 }
 0x2a7   : > { %v1345_v17 = vrot.slane %v1344_v58, 4  ;;  %v2016_v52 = vpack.c.bf16 %v1336_v59, %v1336_v59  ;;  %v2399_v2 = vunpack.c.l.b16 %v2271_v20  ;;  %v1803_v43 = vmax.f32 %v1801_v6, %v1802_v28  ;;  %v755_v59 = vpop.trf.xlu1 }
 0x2a8   : > { %v1358_v25 = vsel %vm1084_vm5, %v921_v40, -inf  ;;  %v2337_v53 = vperm.slane %v2080_v14, 0  ;;  %v2528_v30 = vsel %vm2506_vm9, %v2398_v4, %v2527_v3  ;;  %v1790_v36 = vrot.slane %v1789_v18, 1 }
 0x2a9   : > { %v1353_v26 = vmax.f32 %v1351_v44, %v1352_v62  ;;  %v2464_v9 = vunpack.c.l.b16 %v2336_v61  ;;  %v2585_v47 = vsel %vm2494_vm7, %v2463_v7, %v2584_v33  ;;  %v1810_v31 = vmax.f32 %v1808_v55, %v1809_v13 }
 0x2aa   : > { %v1339_v10 = vmax.f32 %v1337_v5, %v1338_v42  ;;  %v2400_v23 = vunpack.c.l.b16 %v2272_v22  ;;  %v1797_v15 = vrot.slane %v1796_v50, 1  ;;  %v1346_v29 = vmax.f32 %v1344_v58, %v1345_v17 }
 0x2ab   : > { %v1359_v35 = vrot.slane %v1358_v25, 4  ;;  %v2273_v34 = vperm.slane %v2016_v52, 0  ;;  %v2529_v6 = vsel %vm2494_vm7, %v2399_v2, %v2528_v30  ;;  %v1804_v63 = vrot.slane %v1803_v43, 1 }
 0x2ac   : > { %v822_v20 = vadd.f32 %v12240_v37, %v787_v12  ;;  %v2394_v3 = vunpack.c.l.b16 %v12328_v24  ;;  %v2465_v44 = vunpack.c.l.b16 %v2337_v53  ;;  %v1791_v28 = vmax.f32 %v1789_v18, %v1790_v36 }
 0x2ad   : > { %v1354_v40 = vrot.slane %v1353_v26, 2  ;;  %v2586_v14 = vsel %vm2496_vm8, %v2464_v9, %v2585_v47  ;;  %v1811_v55 = vrot.slane %v1810_v31, 1  ;;  %v1340_v5 = vrot.slane %v1339_v10, 2 }
 0x2ae   : > { %v806_v4 = vadd.f32 %v12240_v37, %v755_v59  ;;  %v2530_v58 = vsel %vm2496_vm8, %v2400_v23, %v2529_v6  ;;  %v1798_v62 = vmax.f32 %v1796_v50, %v1797_v15  ;;  %v1347_v61 = vrot.slane %v1346_v29, 2 }
 0x2af   : > { %v1360_v7 = vmax.f32 %v1358_v25, %v1359_v35  ;;  %v2395_v13 = vunpack.c.l.b16 %v12336_v41  ;;  %v2401_v42 = vunpack.c.l.b16 %v2273_v34  ;;  %v1805_v33 = vmax.f32 %v1803_v43, %v1804_v63 }
 0x2b0   : > { %v854_v22 = vmax.f32 %v822_v20, 0.0  ;;  %v2525_v24 = vsel %vm2500_vm11, %v2394_v3, %v12309_v39  ;;  %v12356_v18 = vsel %vm2498_vm10, %v2465_v44, %v2586_v14  ;;  %v2081_v17 = vpack.c.bf16 %v1791_v28, %v1791_v28 }
 0x2b1   : > { %v1355_v52 = vmax.f32 %v1353_v26, %v1354_v40  ;;  %v12359_v2 = vsel %vm2498_vm10, %v2401_v42, %v2530_v58  ;;  %v12361_v53 = vmax.f32 %v1810_v31, %v1811_v55  ;;  %v1341_v50 = vmax.f32 %v1339_v10, %v1340_v5 }
 0x2b2   : > { %v12363_v25 = vmax.f32 %v806_v4, 0.0  ;;  %v2082_v41 = vpack.c.bf16 %v1798_v62, %v1798_v62  ;;  %v12365_v30 = vmax.f32 %v1346_v29, %v1347_v61  ;;  %v1361_v43 = vrot.slane %v1360_v7, 2 }
 0x2b3   : > { %v16708_v39 = vunpack.c.l.b16 %v12152_v56  ;;  %v2083_v12 = vpack.c.bf16 %v1805_v33, %v1805_v33  ;;  %v1813_v26 = vsel %vm1084_vm5, %v854_v22, -inf  ;;  %v16709_v9 = vunpack.c.l.b16 %v12172_v51  ;;  %v788_v33 = vpop.trf.xlu2 }
 0x2b4   : > { %v12375_v31 = vperm.slane %v2081_v17, 0  ;;  %v1356_v10 = vrot.slane %v1355_v52, 1  ;;  %v970_v23 = vrot.slane %v854_v22, 2  ;;  %v16710_v15 = vunpack.c.l.b16 %v12190_v48 }
 0x2b5   : > { %v2499_v36 = vsel %vm2498_vm10, %v16708_v39, %v12166_v38  ;;  %v971_v56 = vrot.slane %v854_v22, 4  ;;  %v922_v38 = vrot.slane %v12363_v25, 2  ;;  %v16711_v35 = vunpack.c.l.b16 %v12213_v57 }
 0x2b6   : > { %v2501_v47 = vsel %vm2500_vm11, %v16709_v9, %v2499_v36  ;;  %v2510_v29 = vsel %vm2498_vm10, %v16710_v15, %v12210_v45  ;;  %v2526_v51 = vsel %vm16681_vm12, %v2395_v13, %v2525_v24  ;;  %v1814_v34 = vrot.slane %v1813_v26, 4 }
 0x2b7   : > { %v2511_v59 = vsel %vm2500_vm11, %v16711_v35, %v2510_v29  ;;  %v16712_v6 = vunpack.c.l.b16 %v12174_v54  ;;  %v16713_v20 = vunpack.c.l.b16 %v12216_v16  ;;  %v16714_v45 = vunpack.c.l.b16 %v12274_v11 }
 0x2b8   : > { %v1365_v57 = vsel %vm1084_vm5, %v12363_v25, -inf  ;;  %v1362_v40 = vmax.f32 %v1360_v7, %v1361_v43  ;;  %v972_v54 = vrot.slane %v854_v22, 6  ;;  %v1820_v14 = vsel %vm1084_vm5, %v970_v23, -inf }
 0x2b9   : > { %v2503_v63 = vsel %vm16681_vm12, %v16712_v6, %v2501_v47  ;;  %v2512_v48 = vsel %vm16681_vm12, %v16713_v20, %v2511_v59  ;;  %v2519_v3 = vsel %vm16681_vm12, %v16714_v45, %v12298_v1  ;;  %v923_v16 = vrot.slane %v12363_v25, 4 }
 0x2ba   : > { %v2612_v44 = vpack.c.b16 %v2512_v48, %v2503_v63  ;;  %v12398_v28 = vpack.c.b16 %v2526_v51, %v2519_v3  ;;  %v1372_v55 = vsel %vm1084_vm5, %v922_v38, -inf  ;;  %v1342_v1 = vrot.slane %v1341_v50, 1 }
 0x2bb   : > { %v1827_v4 = vsel %vm1084_vm5, %v971_v56, -inf  ;;  %v1366_v58 = vrot.slane %v1365_v57, 4  ;;  %v2084_v61 = vpack.c.bf16 %v12361_v53, %v12361_v53  ;;  %v1349_v7 = vrot.slane %v12365_v30, 1 }
 0x2bc   : > { %v12404_v5 = vsel %vm2621_vm13, 0, %v2612_v44  ;;  %v16670_v11 = vrot.slane %v12398_v28, 1  ;;  %v1815_v13 = vmax.f32 %v1813_v26, %v1814_v34  ;;  %v1821_v42 = vrot.slane %v1820_v14, 4 }
 0x2bd   : > { %16715 = vst [vmem:[#allocation15_spill] sm:$0xff] %v12404_v5  ;;  %v2713_v62 = vrot.slane %v12404_v5, 1  ;;  %v12412_v22 = vperm.slane %v2082_v41, 0  ;;  %v1363_v24 = vrot.slane %v1362_v40, 1  ;;  %v1373_v17 = vrot.slane %v1372_v55, 4 }
 0x2be   : > { %v1357_v39 = vmax.f32 %v1355_v52, %v1356_v10  ;;  %v1828_v36 = vrot.slane %v1827_v4, 4  ;;  %v1834_v9 = vsel %vm1084_vm5, %v972_v54, -inf  ;;  %v1379_v47 = vsel %vm1084_vm5, %v923_v16, -inf }
 0x2bf   : > { %v2715_v43 = vsel %vm2712_vm14, %v2713_v62, %v16670_v11  ;;  %v2340_v53 = vperm.slane %v2083_v12, 0  ;;  %v2466_v26 = vunpack.c.l.b16 %v12375_v31  ;;  %v1367_v41 = vmax.f32 %v1365_v57, %v1366_v58 }
 0x2c0   : > { %2730 = vrot.lane.b32.xlu0 %v2715_v43, %s11900_s22  ;;  %v823_v23 = vadd.f32 %v12240_v37, %v788_v33  ;;  %v1343_v15 = vmax.f32 %v1341_v50, %v1342_v1  ;;  %v1816_v29 = vrot.slane %v1815_v13, 2  ;;  %v1822_v56 = vmax.f32 %v1820_v14, %v1821_v42 }
 0x2c1   : > { %v924_v38 = vrot.slane %v12363_v25, 6  ;;  %v1364_v52 = vmax.f32 %v1362_v40, %v1363_v24  ;;  %v1835_v10 = vrot.slane %v1834_v9, 4  ;;  %v1374_v35 = vmax.f32 %v1372_v55, %v1373_v17 }
 0x2c2   : > { %v1380_v59 = vrot.slane %v1379_v47, 4  ;;  %v2341_v51 = vperm.slane %v2084_v61, 0  ;;  %v12424_v34 = vmax.f32 %v12365_v30, %v1349_v7  ;;  %v2019_v6 = vpack.c.bf16 %v1357_v39, %v1357_v39 }
 0x2c3   : > { %v1829_v12 = vmax.f32 %v1827_v4, %v1828_v36  ;;  %v2468_v63 = vunpack.c.l.b16 %v2340_v53  ;;  %v1368_v20 = vrot.slane %v1367_v41, 2  ;;  %v855_v37 = vmax.f32 %v823_v23, 0.0 }
 0x2c4   : > { %v12429_v50 = vsel %vm2500_vm11, %v2466_v26, %v12356_v18  ;;  %v1817_v25 = vmax.f32 %v1815_v13, %v1816_v29  ;;  %v1823_v48 = vrot.slane %v1822_v56, 2  ;;  %v1386_v45 = vsel %vm1084_vm5, %v924_v38, -inf }
 0x2c5   : > { %v2020_v3 = vpack.c.bf16 %v1364_v52, %v1364_v52  ;;  %v1836_v57 = vmax.f32 %v1834_v9, %v1835_v10  ;;  %v1375_v44 = vrot.slane %v1374_v35, 2  ;;  %v1381_v30 = vmax.f32 %v1379_v47, %v1380_v59 }
 0x2c6   : > { %v2469_v40 = vunpack.c.l.b16 %v2341_v51  ;;  %v2017_v54 = vpack.c.bf16 %v1343_v15, %v1343_v15  ;;  %v12432_v14 = vperm.slane %v2019_v6, 0  ;;  %v1830_v16 = vrot.slane %v1829_v12, 2  ;;  %v12449_v6 = vld [vmem:[%s16704_s26] ss:$0 sm:$0xff] }
 0x2c7   : > { %v2018_v55 = vpack.c.bf16 %v12424_v34, %v12424_v34  ;;  %v1369_v1 = vmax.f32 %v1367_v41, %v1368_v20  ;;  %v1387_v4 = vrot.slane %v1386_v45, 4  ;;  %v973_v18 = vrot.slane %v855_v37, 2  ;;  %v756_v41 = vpop.trf.xlu1 }
 0x2c8   : > { %v1818_v58 = vrot.slane %v1817_v25, 1  ;;  %v1824_v62 = vmax.f32 %v1822_v56, %v1823_v48  ;;  %v974_v61 = vrot.slane %v855_v37, 4  ;;  %v975_v7 = vrot.slane %v855_v37, 6 }
 0x2c9   : > { %v2277_v13 = vperm.slane %v2020_v3, 0  ;;  %v1837_v42 = vrot.slane %v1836_v57, 2  ;;  %v1376_v33 = vmax.f32 %v1374_v35, %v1375_v44  ;;  %v1382_v24 = vrot.slane %v1381_v30, 2 }
 0x2ca   : > { %v12437_v17 = vsel %vm2504_vm6, %v2469_v40, %v2468_v63  ;;  %v12439_v43 = vperm.slane %v2017_v54, 0  ;;  %v2404_v39 = vunpack.c.l.b16 %v12432_v14  ;;  %v1831_v36 = vmax.f32 %v1829_v12, %v1830_v16 }
 0x2cb   : > { %v1370_v9 = vrot.slane %v1369_v1, 1  ;;  %v1388_v47 = vmax.f32 %v1386_v45, %v1387_v4  ;;  %v1841_v53 = vsel %vm1084_vm5, %v855_v37, -inf  ;;  %v1848_v26 = vsel %vm1084_vm5, %v973_v18, -inf }
 0x2cc   : > { %v1819_v23 = vmax.f32 %v1817_v25, %v1818_v58  ;;  %v1825_v15 = vrot.slane %v1824_v62, 1  ;;  %v1855_v29 = vsel %vm1084_vm5, %v974_v61, -inf  ;;  %v1862_v56 = vsel %vm1084_vm5, %v975_v7, -inf }
 0x2cd   : > { %v2405_v38 = vunpack.c.l.b16 %v2277_v13  ;;  %v1838_v52 = vmax.f32 %v1836_v57, %v1837_v42  ;;  %v1377_v10 = vrot.slane %v1376_v33, 1  ;;  %v1383_v35 = vmax.f32 %v1381_v30, %v1382_v24 }
 0x2ce   : > { %v1832_v59 = vrot.slane %v1831_v36, 1  ;;  %v1842_v51 = vrot.slane %v1841_v53, 4  ;;  %v1849_v34 = vrot.slane %v1848_v26, 4  ;;  %v807_v12 = vadd.f32 %v12449_v6, %v756_v41 }
 0x2cf   : > { %v1371_v63 = vmax.f32 %v1369_v1, %v1370_v9  ;;  %v1856_v20 = vrot.slane %v1855_v29, 4  ;;  %v1863_v37 = vrot.slane %v1862_v56, 4  ;;  %v16671_v25 = vrot.slane %v12398_v28, 2 }
 0x2d0   : > { %v1826_v48 = vmax.f32 %v1824_v62, %v1825_v15  ;;  %v2085_v45 = vpack.c.bf16 %v1819_v23, %v1819_v23  ;;  %v1389_v3 = vrot.slane %v1388_v47, 2  ;;  %v1839_v57 = vrot.slane %v1838_v52, 1 }
 0x2d1   : > { %v1378_v44 = vmax.f32 %v1376_v33, %v1377_v10  ;;  %v1384_v30 = vrot.slane %v1383_v35, 1  ;;  %v2801_v40 = vrot.slane %v12404_v5, 2  ;;  %v12454_v54 = vperm.slane %v2018_v55, 0 }
 0x2d2   : > { %v1843_v14 = vmax.f32 %v1841_v53, %v1842_v51  ;;  %v1850_v16 = vmax.f32 %v1848_v26, %v1849_v34  ;;  %v839_v4 = vmax.f32 %v807_v12, 0.0  ;;  %v2021_v18 = vpack.c.bf16 %v1371_v63, %v1371_v63 }
 0x2d3   : > { %v1857_v1 = vmax.f32 %v1855_v29, %v1856_v20  ;;  %v1864_v58 = vmax.f32 %v1862_v56, %v1863_v37  ;;  %v2803_v62 = vsel %vm2800_vm15, %v2801_v40, %v16671_v25  ;;  %v1833_v61 = vmax.f32 %v1831_v36, %v1832_v59 }
 0x2d4   : > { %v2086_v7 = vpack.c.bf16 %v1826_v48, %v1826_v48  ;;  %v2342_v13 = vperm.slane %v2085_v45, 0  ;;  %v1390_v42 = vmax.f32 %v1388_v47, %v1389_v3  ;;  %2818 = vrot.lane.b32.xlu0 %v2803_v62, %s11901_s0  ;;  %v2534_v55 = vsel %vm2504_vm6, %v2405_v38, %v2404_v39 }
 0x2d5   : > { %v1840_v33 = vmax.f32 %v1838_v52, %v1839_v57  ;;  %v1385_v24 = vmax.f32 %v1383_v35, %v1384_v30  ;;  %v2022_v9 = vpack.c.bf16 %v1378_v44, %v1378_v44  ;;  %v1844_v53 = vrot.slane %v1843_v14, 2 }
 0x2d6   : > { %v1851_v26 = vrot.slane %v1850_v16, 2  ;;  %v925_v41 = vrot.slane %v839_v4, 2  ;;  %v1393_v23 = vsel %vm1084_vm5, %v839_v4, -inf  ;;  %v2278_v15 = vperm.slane %v2021_v18, 0  ;;  %v789_v18 = vpop.trf.xlu2 }
 0x2d7   : > { %v1858_v29 = vrot.slane %v1857_v1, 2  ;;  %v1865_v56 = vrot.slane %v1864_v58, 2  ;;  %v926_v36 = vrot.slane %v839_v4, 4  ;;  %v2087_v10 = vpack.c.bf16 %v1833_v61, %v1833_v61 }
 0x2d8   : > { %v2343_v59 = vperm.slane %v2086_v7, 0  ;;  %v2470_v47 = vunpack.c.l.b16 %v2342_v13  ;;  %v1391_v51 = vrot.slane %v1390_v42, 1  ;;  %v2088_v34 = vpack.c.bf16 %v1840_v33, %v1840_v33 }
 0x2d9   : > { %v2023_v12 = vpack.c.bf16 %v1385_v24, %v1385_v24  ;;  %v2279_v63 = vperm.slane %v2022_v9, 0  ;;  %v1394_v39 = vrot.slane %v1393_v23, 4  ;;  %v1845_v38 = vmax.f32 %v1843_v14, %v1844_v53 }
 0x2da   : > { %v1852_v52 = vmax.f32 %v1850_v16, %v1851_v26  ;;  %v927_v35 = vrot.slane %v839_v4, 6  ;;  %v1400_v20 = vsel %vm1084_vm5, %v925_v41, -inf  ;;  %v2406_v37 = vunpack.c.l.b16 %v2278_v15  ;;  %v757_v41 = vpop.trf.xlu1 }
 0x2db   : > { %v1859_v48 = vmax.f32 %v1857_v1, %v1858_v29  ;;  %v1866_v45 = vmax.f32 %v1864_v58, %v1865_v56  ;;  %v1407_v3 = vsel %vm1084_vm5, %v926_v36, -inf  ;;  %v2344_v57 = vperm.slane %v2087_v10, 0 }
 0x2dc   : > { %v2471_v44 = vunpack.c.l.b16 %v2343_v59  ;;  %v2591_v30 = vsel %vm2506_vm9, %v2470_v47, %v12437_v17  ;;  %v1392_v40 = vmax.f32 %v1390_v42, %v1391_v51  ;;  %v2280_v62 = vperm.slane %v2023_v12, 0 }
 0x2dd   : > { %v2407_v61 = vunpack.c.l.b16 %v2279_v63  ;;  %v1395_v7 = vmax.f32 %v1393_v23, %v1394_v39  ;;  %v1401_v14 = vrot.slane %v1400_v20, 4  ;;  %v1846_v16 = vrot.slane %v1845_v38, 1 }
 0x2de   : > { %v1853_v4 = vrot.slane %v1852_v52, 1  ;;  %v1408_v13 = vrot.slane %v1407_v3, 4  ;;  %v1414_v33 = vsel %vm1084_vm5, %v927_v35, -inf  ;;  %v2535_v1 = vsel %vm2506_vm9, %v2406_v37, %v2534_v55 }
 0x2df   : > { %v1860_v58 = vrot.slane %v1859_v48, 1  ;;  %v1867_v24 = vrot.slane %v1866_v45, 1  ;;  %v824_v9 = vadd.f32 %v12449_v6, %v789_v18  ;;  %v2345_v53 = vperm.slane %v2088_v34, 0 }
 0x2e0   : > { %v2472_v26 = vunpack.c.l.b16 %v2344_v57  ;;  %v2592_v17 = vsel %vm2494_vm7, %v2471_v44, %v2591_v30  ;;  %v2024_v42 = vpack.c.bf16 %v1392_v40, %v1392_v40  ;;  %v2408_v15 = vunpack.c.l.b16 %v2280_v62 }
 0x2e1   : > { %v1396_v23 = vrot.slane %v1395_v7, 2  ;;  %v1402_v29 = vmax.f32 %v1400_v20, %v1401_v14  ;;  %v1415_v56 = vrot.slane %v1414_v33, 4  ;;  %v2536_v36 = vsel %vm2494_vm7, %v2407_v61, %v2535_v1 }
 0x2e2   : > { %v1847_v10 = vmax.f32 %v1845_v38, %v1846_v16  ;;  %v1854_v59 = vmax.f32 %v1852_v52, %v1853_v4  ;;  %v1409_v47 = vmax.f32 %v1407_v3, %v1408_v13  ;;  %v1861_v55 = vmax.f32 %v1859_v48, %v1860_v58 }
 0x2e3   : > { %v1868_v51 = vmax.f32 %v1866_v45, %v1867_v24  ;;  %v856_v12 = vmax.f32 %v824_v9, 0.0  ;;  %v808_v63 = vadd.f32 %v12449_v6, %v757_v41  ;;  %v2402_v34 = vunpack.c.l.b16 %v12439_v43 }
 0x2e4   : > { %v2473_v35 = vunpack.c.l.b16 %v2345_v53  ;;  %v2281_v37 = vperm.slane %v2024_v42, 0  ;;  %v2593_v57 = vsel %vm2496_vm8, %v2472_v26, %v2592_v17  ;;  %v1397_v20 = vmax.f32 %v1395_v7, %v1396_v23 }
 0x2e5   : > { %v1403_v44 = vrot.slane %v1402_v29, 2  ;;  %v1416_v30 = vmax.f32 %v1414_v33, %v1415_v56  ;;  %v2537_v38 = vsel %vm2496_vm8, %v2408_v15, %v2536_v36  ;;  %v2089_v52 = vpack.c.bf16 %v1847_v10, %v1847_v10 }
 0x2e6   : > { %v2090_v3 = vpack.c.bf16 %v1854_v59, %v1854_v59  ;;  %v1410_v48 = vrot.slane %v1409_v47, 2  ;;  %v2091_v45 = vpack.c.bf16 %v1861_v55, %v1861_v55  ;;  %v2092_v40 = vpack.c.bf16 %v1868_v51, %v1868_v51 }
 0x2e7   : > { %v976_v18 = vrot.slane %v856_v12, 2  ;;  %v840_v62 = vmax.f32 %v808_v63, 0.0  ;;  %v12478_v43 = vsel %vm2500_vm11, %v2402_v34, %v12359_v2  ;;  %v12481_v61 = vsel %vm2498_vm10, %v2473_v35, %v2593_v57 }
 0x2e8   : > { %v2409_v14 = vunpack.c.l.b16 %v2281_v37  ;;  %v977_v7 = vrot.slane %v856_v12, 4  ;;  %v1398_v16 = vrot.slane %v1397_v20, 1  ;;  %v1404_v4 = vmax.f32 %v1402_v29, %v1403_v44 }
 0x2e9   : > { %v1417_v13 = vrot.slane %v1416_v30, 2  ;;  %v1869_v33 = vsel %vm1084_vm5, %v856_v12, -inf  ;;  %v12487_v58 = vperm.slane %v2089_v52, 0  ;;  %v12489_v24 = vperm.slane %v2090_v3, 0  ;;  %v790_v52 = vpop.trf.xlu2 }
 0x2ea   : > { %v12485_v1 = vsel %vm2498_vm10, %v2409_v14, %v2537_v38  ;;  %v1411_v9 = vmax.f32 %v1409_v47, %v1410_v48  ;;  %v12491_v2 = vperm.slane %v2091_v45, 0  ;;  %v12493_v53 = vperm.slane %v2092_v40, 0 }
 0x2eb   : > { %v1876_v26 = vsel %vm1084_vm5, %v976_v18, -inf  ;;  %v928_v17 = vrot.slane %v840_v62, 2  ;;  %v978_v42 = vrot.slane %v856_v12, 6  ;;  %v1870_v41 = vrot.slane %v1869_v33, 4 }
 0x2ec   : > { %v1883_v15 = vsel %vm1084_vm5, %v977_v7, -inf  ;;  %v1421_v23 = vsel %vm1084_vm5, %v840_v62, -inf  ;;  %v1399_v29 = vmax.f32 %v1397_v20, %v1398_v16  ;;  %v1405_v56 = vrot.slane %v1404_v4, 1 }
 0x2ed   : > { %v1418_v36 = vmax.f32 %v1416_v30, %v1417_v13  ;;  %v929_v10 = vrot.slane %v840_v62, 4  ;;  %v1412_v59 = vrot.slane %v1411_v9, 1  ;;  %v1877_v55 = vrot.slane %v1876_v26, 4 }
 0x2ee   : > { %v930_v47 = vrot.slane %v840_v62, 6  ;;  %v2630_v51 = vshll.u32 %v12404_v5, 16  ;;  %v1884_v63 = vrot.slane %v1883_v15, 4  ;;  %v1422_v34 = vrot.slane %v1421_v23, 4 }
 0x2ef   : > { %v1428_v35 = vsel %vm1084_vm5, %v928_v17, -inf  ;;  %v2635_v12 = vshll.u32 %v12398_v28, 16  ;;  %v1871_v37 = vmax.f32 %v1869_v33, %v1870_v41  ;;  %v1890_v57 = vsel %vm1084_vm5, %v978_v42, -inf }
 0x2f0   : > { %v2628_v44 = vshrl.u32 %v12404_v5, 16  ;;  %v2632_v20 = vrot.slane %v2630_v51, 1  ;;  %v1419_v30 = vrot.slane %v1418_v36, 1  ;;  %v1435_v38 = vsel %vm1084_vm5, %v929_v10, -inf }
 0x2f1   : > { %v12508_v3 = vrot.slane %v2635_v12, 1  ;;  %v1878_v48 = vmax.f32 %v1876_v26, %v1877_v55  ;;  %v1429_v45 = vrot.slane %v1428_v35, 4  ;;  %v1442_v40 = vsel %vm1084_vm5, %v930_v47, -inf }
 0x2f2   : > { %v2633_v18 = vor.u32 %v2632_v20, %v2628_v44  ;;  %v1406_v62 = vmax.f32 %v1404_v4, %v1405_v56  ;;  %v1885_v14 = vmax.f32 %v1883_v15, %v1884_v63  ;;  %v1891_v7 = vrot.slane %v1890_v57, 4 }
 0x2f3   : > { %v1423_v16 = vmax.f32 %v1421_v23, %v1422_v34  ;;  %v1872_v13 = vrot.slane %v1871_v37, 2  ;;  %v1436_v33 = vrot.slane %v1435_v38, 4  ;;  %v825_v17 = vadd.f32 %v12449_v6, %v790_v52 }
 0x2f4   : > { %v2638_v42 = vsel %vm2627_vm0, %v2633_v18, %v12508_v3  ;;  %v2474_v41 = vunpack.c.l.b16 %v12487_v58  ;;  %v1413_v26 = vmax.f32 %v1411_v9, %v1412_v59  ;;  %v1420_v10 = vmax.f32 %v1418_v36, %v1419_v30  ;;  %v758_v9 = vpop.trf.xlu1 }
 0x2f5   : > { %v1443_v55 = vrot.slane %v1442_v40, 4  ;;  %2694 = vrot.lane.b32.xlu0 %v2638_v42, %s11902_s20  ;;  %v2476_v4 = vunpack.c.l.b16 %v12491_v2  ;;  %v2477_v15 = vunpack.c.l.b16 %v12493_v53  ;;  %v1879_v23 = vrot.slane %v1878_v48, 2 }
 0x2f6   : > { %v1430_v56 = vmax.f32 %v1428_v35, %v1429_v45  ;;  %v2025_v47 = vpack.c.bf16 %v1399_v29, %v1399_v29  ;;  %v1886_v63 = vrot.slane %v1885_v14, 2  ;;  %v1892_v34 = vmax.f32 %v1890_v57, %v1891_v7 }
 0x2f7   : > { %v1424_v20 = vrot.slane %v1423_v16, 2  ;;  %v2026_v52 = vpack.c.bf16 %v1406_v62, %v1406_v62  ;;  %v1873_v18 = vmax.f32 %v1871_v37, %v1872_v13  ;;  %v1437_v31 = vmax.f32 %v1435_v38, %v1436_v33 }
 0x2f8   : > { %v857_v58 = vmax.f32 %v825_v17, 0.0  ;;  %v2027_v36 = vpack.c.bf16 %v1413_v26, %v1413_v26  ;;  %v2028_v59 = vpack.c.bf16 %v1420_v10, %v1420_v10  ;;  %v1444_v30 = vmax.f32 %v1442_v40, %v1443_v55 }
 0x2f9   : > { %v12523_v2 = vsel %vm2500_vm11, %v2474_v41, %v12481_v61  ;;  %v1880_v53 = vmax.f32 %v1878_v48, %v1879_v23  ;;  %v1431_v42 = vrot.slane %v1430_v56, 2  ;;  %v2282_v29 = vperm.slane %v2025_v47, 0 }
 0x2fa   : > { %v980_v35 = vrot.slane %v857_v58, 4  ;;  %v1887_v45 = vmax.f32 %v1885_v14, %v1886_v63  ;;  %v1893_v57 = vrot.slane %v1892_v34, 2  ;;  %v1425_v7 = vmax.f32 %v1423_v16, %v1424_v20 }
 0x2fb   : > { %v12526_v37 = vsel %vm2504_vm6, %v2477_v15, %v2476_v4  ;;  %v12528_v38 = vperm.slane %v2026_v52, 0  ;;  %v1874_v62 = vrot.slane %v1873_v18, 1  ;;  %v1438_v13 = vrot.slane %v1437_v31, 2 }
 0x2fc   : > { %v2284_v33 = vperm.slane %v2027_v36, 0  ;;  %v2285_v40 = vperm.slane %v2028_v59, 0  ;;  %v1445_v17 = vrot.slane %v1444_v30, 2  ;;  %v981_v26 = vrot.slane %v857_v58, 6 }
 0x2fd   : > { %v1881_v61 = vrot.slane %v1880_v53, 1  ;;  %v1432_v41 = vmax.f32 %v1430_v56, %v1431_v42  ;;  %v979_v48 = vrot.slane %v857_v58, 2  ;;  %v1911_v10 = vsel %vm1084_vm5, %v980_v35, -inf }
 0x2fe   : > { %v2410_v55 = vunpack.c.l.b16 %v2282_v29  ;;  %v1888_v14 = vrot.slane %v1887_v45, 1  ;;  %v1894_v23 = vmax.f32 %v1892_v34, %v1893_v57  ;;  %v1426_v16 = vrot.slane %v1425_v7, 1 }
 0x2ff   : > { %v2411_v4 = vunpack.c.l.b16 %v12528_v38  ;;  %v1875_v15 = vmax.f32 %v1873_v18, %v1874_v62  ;;  %v1439_v47 = vmax.f32 %v1437_v31, %v1438_v13  ;;  %v1897_v63 = vsel %vm1084_vm5, %v857_v58, -inf }
 0x300   : > { %v2412_v20 = vunpack.c.l.b16 %v2284_v33  ;;  %v1446_v52 = vmax.f32 %v1444_v30, %v1445_v17  ;;  %v1912_v36 = vrot.slane %v1911_v10, 4  ;;  %v1918_v59 = vsel %vm1084_vm5, %v981_v26, -inf }
 0x301   : > { %v2413_v56 = vunpack.c.l.b16 %v2285_v40  ;;  %v1882_v42 = vmax.f32 %v1880_v53, %v1881_v61  ;;  %v1433_v11 = vrot.slane %v1432_v41, 1  ;;  %v1904_v35 = vsel %vm1084_vm5, %v979_v48, -inf }
 0x302   : > { %v12535_v29 = vmax.f32 %v1887_v45, %v1888_v14  ;;  %v1895_v34 = vrot.slane %v1894_v23, 1  ;;  %v1427_v57 = vmax.f32 %v1425_v7, %v1426_v16  ;;  %v1898_v25 = vrot.slane %v1897_v63, 4 }
 0x303   : > { %v2093_v18 = vpack.c.bf16 %v1875_v15, %v1875_v15  ;;  %v1440_v31 = vrot.slane %v1439_v47, 1  ;;  %v1919_v62 = vrot.slane %v1918_v59, 4  ;;  %v809_v58 = vadd.f32 %v12449_v6, %v758_v9 }
 0x304   : > { %v12540_v30 = vsel %vm2500_vm11, %v2410_v55, %v12485_v1  ;;  %v1447_v13 = vrot.slane %v1446_v52, 1  ;;  %v1905_v33 = vrot.slane %v1904_v35, 4  ;;  %v1913_v53 = vmax.f32 %v1911_v10, %v1912_v36 }
 0x305   : > { %v2541_v40 = vsel %vm2504_vm6, %v2413_v56, %v2412_v20  ;;  %v2094_v17 = vpack.c.bf16 %v1882_v42, %v1882_v42  ;;  %v1434_v45 = vmax.f32 %v1432_v41, %v1433_v11  ;;  %v16672_v26 = vshrl.u32 %v12398_v28, 16 }
 0x306   : > { %v12544_v7 = vmax.f32 %v1894_v23, %v1895_v34  ;;  %v2029_v48 = vpack.c.bf16 %v1427_v57, %v1427_v57  ;;  %v1899_v9 = vmax.f32 %v1897_v63, %v1898_v25  ;;  %v12548_v14 = vperm.slane %v2093_v18, 0 }
 0x307   : > { %v1441_v1 = vmax.f32 %v1439_v47, %v1440_v31  ;;  %v1920_v55 = vmax.f32 %v1918_v59, %v1919_v62  ;;  %v841_v16 = vmax.f32 %v809_v58, 0.0  ;;  %v1448_v15 = vmax.f32 %v1446_v52, %v1447_v13  ;;  %v791_v47 = vpop.trf.xlu2 }
 0x308   : > { %v1906_v10 = vmax.f32 %v1904_v35, %v1905_v33  ;;  %v1914_v36 = vrot.slane %v1913_v53, 2  ;;  %v2747_v11 = vrot.slane %v2628_v44, 1  ;;  %v2030_v41 = vpack.c.bf16 %v1434_v45, %v1434_v45  ;;  %v759_v33 = vpop.trf.xlu1 }
 0x309   : > { %v932_v20 = vrot.slane %v841_v16, 4  ;;  %v2748_v23 = vrot.slane %v2630_v51, 2  ;;  %v2750_v56 = vrot.slane %v16672_v26, 1  ;;  %v2286_v25 = vperm.slane %v2029_v48, 0 }
 0x30a   : > { %v1900_v63 = vrot.slane %v1899_v9, 2  ;;  %v933_v42 = vrot.slane %v841_v16, 6  ;;  %v2751_v52 = vrot.slane %v2635_v12, 2  ;;  %v2031_v59 = vpack.c.bf16 %v1441_v1, %v1441_v1 }
 0x30b   : > { %v1921_v35 = vrot.slane %v1920_v55, 2  ;;  %v826_v34 = vadd.f32 %v12449_v6, %v791_v47  ;;  %v1915_v44 = vmax.f32 %v1913_v53, %v1914_v36  ;;  %v931_v57 = vrot.slane %v841_v16, 2 }
 0x30c   : > { %v2749_v18 = vor.u32 %v2748_v23, %v2747_v11  ;;  %v12559_v31 = vor.u32 %v2751_v52, %v2750_v56  ;;  %v2032_v51 = vpack.c.bf16 %v1448_v15, %v1448_v15  ;;  %v2287_v62 = vperm.slane %v2030_v41, 0 }
 0x30d   : > { %v1907_v58 = vrot.slane %v1906_v10, 2  ;;  %v1463_v13 = vsel %vm1084_vm5, %v932_v20, -inf  ;;  %v2414_v45 = vunpack.c.l.b16 %v2286_v25  ;;  %v1470_v48 = vsel %vm1084_vm5, %v933_v42, -inf }
 0x30e   : > { %v2753_v12 = vsel %vm16682_vm1, %v2749_v18, %v12559_v31  ;;  %v810_v1 = vadd.f32 %v12449_v6, %v759_v33  ;;  %v12566_v47 = vperm.slane %v2094_v17, 0  ;;  %v2288_v53 = vperm.slane %v2031_v59, 0 }
 0x30f   : > { %v1449_v36 = vsel %vm1084_vm5, %v841_v16, -inf  ;;  %v12569_v11 = vmax.f32 %v826_v34, 0.0  ;;  %2784 = vrot.lane.b32.xlu0 %v2753_v12, %s11903_s21  ;;  %v1916_v15 = vrot.slane %v1915_v44, 1  ;;  %v1922_v41 = vmax.f32 %v1920_v55, %v1921_v35 }
 0x310   : > { %v1456_v20 = vsel %vm1084_vm5, %v931_v57, -inf  ;;  %v1464_v23 = vrot.slane %v1463_v13, 4  ;;  %v2415_v56 = vunpack.c.l.b16 %v2287_v62  ;;  %v12573_v25 = vmax.f32 %v1899_v9, %v1900_v63  ;;  %v760_v5 = vpop.trf.xlu1 }
 0x311   : > { %v12575_v42 = vmax.f32 %v1906_v10, %v1907_v58  ;;  %v1471_v17 = vrot.slane %v1470_v48, 4  ;;  %v2289_v52 = vperm.slane %v2032_v51, 0  ;;  %v2542_v59 = vsel %vm2506_vm9, %v2414_v45, %v2541_v40 }
 0x312   : > { %v1450_v16 = vrot.slane %v1449_v36, 4  ;;  %v842_v34 = vmax.f32 %v810_v1, 0.0  ;;  %v2416_v33 = vunpack.c.l.b16 %v2288_v53  ;;  %v1457_v12 = vrot.slane %v1456_v20, 4 }
 0x313   : > { %v982_v55 = vrot.slane %v12569_v11, 2  ;;  %v1917_v35 = vmax.f32 %v1915_v44, %v1916_v15  ;;  %v1923_v57 = vrot.slane %v1922_v41, 1  ;;  %v1465_v61 = vmax.f32 %v1463_v13, %v1464_v23 }
 0x314   : > { %v1925_v9 = vsel %vm1084_vm5, %v12569_v11, -inf  ;;  %v2543_v10 = vsel %vm2494_vm7, %v2415_v56, %v2542_v59  ;;  %v1472_v51 = vmax.f32 %v1470_v48, %v1471_v17  ;;  %v983_v40 = vrot.slane %v12569_v11, 4 }
 0x315   : > { %v2417_v62 = vunpack.c.l.b16 %v2289_v52  ;;  %v1451_v45 = vmax.f32 %v1449_v36, %v1450_v16  ;;  %v934_v1 = vrot.slane %v842_v34, 2  ;;  %v1458_v53 = vmax.f32 %v1456_v20, %v1457_v12 }
 0x316   : > { %v1926_v18 = vrot.slane %v1925_v9, 4  ;;  %v1932_v44 = vsel %vm1084_vm5, %v982_v55, -inf  ;;  %v1477_v13 = vsel %vm1084_vm5, %v842_v34, -inf  ;;  %v2544_v15 = vsel %vm2496_vm8, %v2416_v33, %v2543_v10 }
 0x317   : > { %v1924_v23 = vmax.f32 %v1922_v41, %v1923_v57  ;;  %v2099_v56 = vpack.c.bf16 %v1917_v35, %v1917_v35  ;;  %v1466_v59 = vrot.slane %v1465_v61, 2  ;;  %v1473_v63 = vrot.slane %v1472_v51, 2 }
 0x318   : > { %v984_v48 = vrot.slane %v12569_v11, 6  ;;  %v1939_v17 = vsel %vm1084_vm5, %v983_v40, -inf  ;;  %v935_v52 = vrot.slane %v842_v34, 4  ;;  %v1452_v58 = vrot.slane %v1451_v45, 2 }
 0x319   : > { %v1933_v36 = vrot.slane %v1932_v44, 4  ;;  %v1478_v16 = vrot.slane %v1477_v13, 4  ;;  %v1484_v20 = vsel %vm1084_vm5, %v934_v1, -inf  ;;  %v12593_v12 = vsel %vm2498_vm10, %v2417_v62, %v2544_v15 }
 0x31a   : > { %v1459_v55 = vrot.slane %v1458_v53, 2  ;;  %v1927_v26 = vmax.f32 %v1925_v9, %v1926_v18  ;;  %v936_v33 = vrot.slane %v842_v34, 6  ;;  %v2100_v41 = vpack.c.bf16 %v1924_v23, %v1924_v23 }
 0x31b   : > { %v12595_v35 = vperm.slane %v2099_v56, 0  ;;  %v1467_v57 = vmax.f32 %v1465_v61, %v1466_v59  ;;  %v1940_v10 = vrot.slane %v1939_v17, 4  ;;  %v1474_v11 = vmax.f32 %v1472_v51, %v1473_v63 }
 0x31c   : > { %v1485_v39 = vrot.slane %v1484_v20, 4  ;;  %v1491_v40 = vsel %vm1084_vm5, %v935_v52, -inf  ;;  %v2540_v1 = vsel %vm16681_vm12, %v2411_v4, %v12540_v30  ;;  %v12602_v62 = vmax.f32 %v1451_v45, %v1452_v58 }
 0x31d   : > { %v12604_v15 = vmax.f32 %v1932_v44, %v1933_v36  ;;  %v1946_v34 = vsel %vm1084_vm5, %v984_v48, -inf  ;;  %v1479_v18 = vmax.f32 %v1477_v13, %v1478_v16  ;;  %v12607_v9 = vmax.f32 %v1458_v53, %v1459_v55 }
 0x31e   : > { %v1928_v61 = vrot.slane %v1927_v26, 2  ;;  %v1498_v63 = vsel %vm1084_vm5, %v936_v33, -inf  ;;  %v16716_v51 = vunpack.c.l.b16 %v12454_v54  ;;  %v12614_v23 = vperm.slane %v2100_v41, 0 }
 0x31f   : > { %v1492_v4 = vrot.slane %v1491_v40, 4  ;;  %v811_v58 = vadd.f32 %v12449_v6, %v760_v5  ;;  %v1468_v45 = vrot.slane %v1467_v57, 1  ;;  %v1475_v44 = vrot.slane %v1474_v11, 1 }
 0x320   : > { %v2533_v38 = vsel %vm16681_vm12, %v16716_v51, %v12478_v43  ;;  %v12619_v13 = vmax.f32 %v1939_v17, %v1940_v10  ;;  %v1486_v53 = vmax.f32 %v1484_v20, %v1485_v39  ;;  %v1947_v59 = vrot.slane %v1946_v34, 4 }
 0x321   : > { %v12616_v30 = vpack.c.b16 %v2540_v1, %v2533_v38  ;;  %v1480_v48 = vrot.slane %v1479_v18, 2  ;;  %v1499_v52 = vrot.slane %v1498_v63, 4  ;;  %v1454_v54 = vrot.slane %v12602_v62, 1 }
 0x322   : > { %v1461_v43 = vrot.slane %v12607_v9, 1  ;;  %v12624_v36 = vmax.f32 %v1927_v26, %v1928_v61  ;;  %v1935_v16 = vrot.slane %v12604_v15, 2  ;;  %v1493_v55 = vmax.f32 %v1491_v40, %v1492_v4 }
 0x323   : > { %v16674_v5 = vrot.slane %v12616_v30, 2  ;;  %v843_v33 = vmax.f32 %v811_v58, 0.0  ;;  %v16675_v17 = vrot.slane %v12616_v30, 1  ;;  %v12629_v39 = vmax.f32 %v1467_v57, %v1468_v45 }
 0x324   : > { %v12631_v20 = vmax.f32 %v1474_v11, %v1475_v44  ;;  %v1942_v41 = vrot.slane %v12619_v13, 2  ;;  %v1487_v10 = vrot.slane %v1486_v53, 2  ;;  %v1481_v1 = vmax.f32 %v1479_v18, %v1480_v48 }
 0x325   : > { %v1500_v51 = vmax.f32 %v1498_v63, %v1499_v52  ;;  %v16717_v26 = vrot.slane %v12398_v28, 2  ;;  %v937_v61 = vrot.slane %v843_v33, 2  ;;  %v938_v38 = vrot.slane %v843_v33, 4 }
 0x326   : > { %v939_v4 = vrot.slane %v843_v33, 6  ;;  %v1505_v57 = vsel %vm1084_vm5, %v843_v33, -inf  ;;  %v16718_v11 = vrot.slane %v12398_v28, 1  ;;  %v1494_v63 = vrot.slane %v1493_v55, 2 }
 0x327   : > { %v2805_v40 = vsel %vm2800_vm15, %v16717_v26, %v16674_v5  ;;  %v1506_v58 = vrot.slane %v1505_v57, 4  ;;  %v1512_v45 = vsel %vm1084_vm5, %v937_v61, -inf  ;;  %v2643_v44 = vshll.u32 %v12616_v30, 16 }
 0x328   : > { %2820 = vrot.lane.b32.xlu0 %v2805_v40, %s11901_s0  ;;  %v2717_v18 = vsel %vm2712_vm14, %v16718_v11, %v16675_v17  ;;  %v1488_v48 = vmax.f32 %v1486_v53, %v1487_v10  ;;  %v16719_v52 = vshrl.u32 %v12398_v28, 16  ;;  %v16720_v33 = vunpack.c.l.b16 %v12259_v0  ;;  %v792_v10 = vpop.trf.xlu2 }
 0x329   : > { %2732 = vrot.lane.b32.xlu2 %v2717_v18, %s11900_s22  ;;  %v16721_v11 = vunpack.c.l.b16 %v12315_v49  ;;  %v1513_v61 = vrot.slane %v1512_v45, 4  ;;  %v1519_v18 = vsel %vm1084_vm5, %v938_v38, -inf  ;;  %v1526_v17 = vsel %vm1084_vm5, %v939_v4, -inf }
 0x32a   : > { %v2641_v26 = vor.u32 %v16719_v52, %v12508_v3  ;;  %v2575_v40 = vsel %vm16681_vm12, %v16720_v33, %v12266_v60  ;;  %v12664_v53 = vrot.slane %v2643_v44, 1  ;;  %v1482_v3 = vrot.slane %v1481_v1, 1 }
 0x32b   : > { %v2582_v5 = vsel %vm16681_vm12, %v16721_v11, %v12324_v19  ;;  %v1507_v52 = vmax.f32 %v1505_v57, %v1506_v58  ;;  %v16722_v0 = vunpack.c.l.b16 %v12489_v24  ;;  %v1495_v19 = vmax.f32 %v1493_v55, %v1494_v63 }
 0x32c   : > { %v12670_v49 = vpack.c.b16 %v2582_v5, %v2575_v40  ;;  %v1501_v33 = vrot.slane %v1500_v51, 2  ;;  %v2646_v38 = vsel %vm2627_vm0, %v2641_v26, %v12664_v53  ;;  %v16723_v4 = vunpack.c.l.b16 %v12412_v22 }
 0x32d   : > { %v2596_v60 = vsel %vm16681_vm12, %v16722_v0, %v12523_v2  ;;  %v12678_v56 = vmax.f32 %v1946_v34, %v1947_v59  ;;  %v1520_v57 = vrot.slane %v1519_v18, 4  ;;  %v1527_v58 = vrot.slane %v1526_v17, 4  ;;  %2696 = vrot.lane.b32.xlu1 %v2646_v38, %s11902_s20 }
 0x32e   : > { %v2589_v11 = vsel %vm16681_vm12, %v16723_v4, %v12429_v50  ;;  %v12684_v2 = vmax.f32 %v12602_v62, %v1454_v54  ;;  %v1489_v55 = vrot.slane %v1488_v48, 1  ;;  %v827_v5 = vadd.f32 %v12449_v6, %v792_v10 }
 0x32f   : > { %v12681_v24 = vpack.c.b16 %v2596_v60, %v2589_v11  ;;  %v1514_v63 = vmax.f32 %v1512_v45, %v1513_v61  ;;  %v1483_v26 = vmax.f32 %v1481_v1, %v1482_v3  ;;  %v1508_v40 = vrot.slane %v1507_v52, 2 }
 0x330   : > { %v16679_v22 = vrot.slane %v12670_v49, 1  ;;  %v2035_v34 = vpack.c.bf16 %v12629_v39, %v12629_v39  ;;  %v2036_v59 = vpack.c.bf16 %v12631_v20, %v12631_v20  ;;  %v1496_v0 = vrot.slane %v1495_v19, 1 }
 0x331   : > { %v16677_v50 = vrot.slane %v12681_v24, 1  ;;  %v1502_v60 = vmax.f32 %v1500_v51, %v1501_v33  ;;  %v12694_v62 = vmax.f32 %v12604_v15, %v1935_v16  ;;  %v1521_v54 = vmax.f32 %v1519_v18, %v1520_v57 }
 0x332   : > { %v1528_v6 = vmax.f32 %v1526_v17, %v1527_v58  ;;  %v12704_v39 = vmax.f32 %v12607_v9, %v1461_v43  ;;  %v1490_v45 = vmax.f32 %v1488_v48, %v1489_v55  ;;  %v12706_v20 = vmax.f32 %v827_v5, 0.0 }
 0x333   : > { %v2725_v1 = vsel %vm2712_vm14, %v16679_v22, %v16677_v50  ;;  %v1515_v51 = vrot.slane %v1514_v63, 2  ;;  %v1930_v15 = vrot.slane %v12624_v36, 1  ;;  %v12711_v16 = vmax.f32 %v12619_v13, %v1942_v41 }
 0x334   : > { %2740 = vrot.lane.b32.xlu0 %v2725_v1, %s11900_s22  ;;  %v2037_v17 = vpack.c.bf16 %v1483_v26, %v1483_v26  ;;  %v1509_v61 = vmax.f32 %v1507_v52, %v1508_v40  ;;  %v2292_v18 = vperm.slane %v2035_v34, 0  ;;  %v2293_v3 = vperm.slane %v2036_v59, 0 }
 0x335   : > { %v1497_v10 = vmax.f32 %v1495_v19, %v1496_v0  ;;  %v1503_v33 = vrot.slane %v1502_v60, 1  ;;  %v1949_v9 = vrot.slane %v12678_v56, 2  ;;  %v1522_v43 = vrot.slane %v1521_v54, 2 }
 0x336   : > { %v1529_v48 = vrot.slane %v1528_v6, 2  ;;  %v16676_v38 = vrot.slane %v12681_v24, 2  ;;  %v2038_v4 = vpack.c.bf16 %v1490_v45, %v1490_v45  ;;  %v985_v11 = vrot.slane %v12706_v20, 2 }
 0x337   : > { %v1953_v57 = vsel %vm1084_vm5, %v12706_v20, -inf  ;;  %v1516_v13 = vmax.f32 %v1514_v63, %v1515_v51  ;;  %v2294_v41 = vperm.slane %v2037_v17, 0  ;;  %v1510_v58 = vrot.slane %v1509_v61, 1 }
 0x338   : > { %v16678_v52 = vrot.slane %v12670_v49, 2  ;;  %v16680_v19 = vshll.u32 %v12670_v49, 16  ;;  %v2420_v55 = vunpack.c.l.b16 %v2292_v18  ;;  %v2421_v5 = vunpack.c.l.b16 %v2293_v3 }
 0x339   : > { %v1504_v26 = vmax.f32 %v1502_v60, %v1503_v33  ;;  %v2039_v40 = vpack.c.bf16 %v1497_v10, %v1497_v10  ;;  %v1523_v34 = vmax.f32 %v1521_v54, %v1522_v43  ;;  %v1530_v59 = vmax.f32 %v1528_v6, %v1529_v48 }
 0x33a   : > { %v2813_v0 = vsel %vm2800_vm15, %v16678_v52, %v16676_v38  ;;  %v2675_v63 = vshll.u32 %v12681_v24, 16  ;;  %v2295_v1 = vperm.slane %v2038_v4, 0  ;;  %v1954_v45 = vrot.slane %v1953_v57, 4 }
 0x33b   : > { %v1517_v51 = vrot.slane %v1516_v13, 1  ;;  %v16724_v17 = vunpack.c.l.b16 %v12205_v8  ;;  %v2422_v54 = vunpack.c.l.b16 %v2294_v41  ;;  %v1960_v6 = vsel %vm1084_vm5, %v985_v11, -inf }
 0x33c   : > { %2828 = vrot.lane.b32.xlu0 %v2813_v0, %s11901_s0  ;;  %v1511_v18 = vmax.f32 %v1509_v61, %v1510_v58  ;;  %v12736_v3 = vrot.slane %v16680_v19, 1  ;;  %v2548_v10 = vsel %vm2504_vm6, %v2421_v5, %v2420_v55  ;;  %v2040_v33 = vpack.c.bf16 %v1504_v26, %v1504_v26 }
 0x33d   : > { %v12731_v60 = vsel %vm16681_vm12, %v16724_v17, %v12147_v32  ;;  %v2296_v43 = vperm.slane %v2039_v40, 0  ;;  %v2671_v48 = vshrl.u32 %v12670_v49, 16  ;;  %v1524_v4 = vrot.slane %v1523_v34, 1 }
 0x33e   : > { %v1531_v0 = vrot.slane %v1530_v59, 1  ;;  %v12742_v32 = vrot.slane %v2675_v63, 1  ;;  %v2647_v8 = vshrl.u32 %v12616_v30, 16  ;;  %v2033_v61 = vpack.c.bf16 %v12684_v2, %v12684_v2 }
 0x33f   : > { %v2423_v11 = vunpack.c.l.b16 %v2295_v1  ;;  %v1961_v41 = vrot.slane %v1960_v6, 4  ;;  %v1518_v58 = vmax.f32 %v1516_v13, %v1517_v51  ;;  %v2549_v55 = vsel %vm2506_vm9, %v2422_v54, %v2548_v10 }
 0x340   : > { %v1955_v5 = vmax.f32 %v1953_v57, %v1954_v45  ;;  %v2041_v26 = vpack.c.bf16 %v1511_v18, %v1511_v18  ;;  %v2673_v40 = vor.u32 %v2671_v48, %v12736_v3  ;;  %v1937_v17 = vrot.slane %v12694_v62, 1 }
 0x341   : > { %v2297_v38 = vperm.slane %v2040_v33, 0  ;;  %v2424_v50 = vunpack.c.l.b16 %v2296_v43  ;;  %v2755_v52 = vrot.slane %v2643_v44, 2  ;;  %v1525_v22 = vmax.f32 %v1523_v34, %v1524_v4 }
 0x342   : > { %v1532_v19 = vmax.f32 %v1530_v59, %v1531_v0  ;;  %v2678_v2 = vsel %vm2627_vm0, %v2673_v40, %v12742_v32  ;;  %v2754_v13 = vrot.slane %v2647_v8, 1  ;;  %v1931_v57 = vmax.f32 %v12624_v36, %v1930_v15 }
 0x343   : > { %v2550_v1 = vsel %vm2494_vm7, %v2423_v11, %v2549_v55  ;;  %v1962_v45 = vmax.f32 %v1960_v6, %v1961_v41  ;;  %v2042_v51 = vpack.c.bf16 %v1518_v58, %v1518_v58  ;;  %v2034_v54 = vpack.c.bf16 %v12704_v39, %v12704_v39 }
 0x344   : > { %2704 = vrot.lane.b32.xlu0 %v2678_v2, %s11902_s20  ;;  %v1944_v44 = vrot.slane %v12711_v16, 1  ;;  %v1956_v34 = vrot.slane %v1955_v5, 2  ;;  %v2298_v59 = vperm.slane %v2041_v26, 0  ;;  %v2290_v18 = vperm.slane %v2033_v61, 0 }
 0x345   : > { %v1950_v10 = vmax.f32 %v12678_v56, %v1949_v9  ;;  %v2425_v33 = vunpack.c.l.b16 %v2297_v38  ;;  %v2679_v36 = vshrl.u32 %v12681_v24, 16  ;;  %v2551_v15 = vsel %vm2496_vm8, %v2424_v50, %v2550_v1 }
 0x346   : > { %v2043_v6 = vpack.c.bf16 %v1525_v22, %v1525_v22  ;;  %v2044_v43 = vpack.c.bf16 %v1532_v19, %v1532_v19  ;;  %v12767_v4 = vor.u32 %v2755_v52, %v2754_v13  ;;  %v1938_v39 = vmax.f32 %v12694_v62, %v1937_v17 }
 0x347   : > { %v2101_v0 = vpack.c.bf16 %v1931_v57, %v1931_v57  ;;  %v1963_v11 = vrot.slane %v1962_v45, 2  ;;  %v2299_v41 = vperm.slane %v2042_v51, 0  ;;  %v2291_v58 = vperm.slane %v2034_v54, 0 }
 0x348   : > { %v1945_v61 = vmax.f32 %v12711_v16, %v1944_v44  ;;  %v1957_v55 = vmax.f32 %v1955_v5, %v1956_v34  ;;  %v2426_v26 = vunpack.c.l.b16 %v2298_v59  ;;  %v2418_v56 = vunpack.c.l.b16 %v2290_v18 }
 0x349   : > { %v1951_v9 = vrot.slane %v1950_v10, 1  ;;  %v2552_v38 = vsel %vm2498_vm10, %v2425_v33, %v2551_v15  ;;  %v2770_v22 = vrot.slane %v2679_v36, 1  ;;  %v2300_v50 = vperm.slane %v2043_v6, 0 }
 0x34a   : > { %v2301_v52 = vperm.slane %v2044_v43, 0  ;;  %v2757_v62 = vsel %vm16682_vm1, %v12559_v31, %v12767_v4  ;;  %v2771_v19 = vrot.slane %v2675_v63, 2  ;;  %v2102_v40 = vpack.c.bf16 %v1938_v39, %v1938_v39 }
 0x34b   : > { %v2358_v16 = vperm.slane %v2101_v0, 0  ;;  %v1964_v5 = vmax.f32 %v1962_v45, %v1963_v11  ;;  %v2427_v17 = vunpack.c.l.b16 %v2299_v41  ;;  %v1958_v2 = vrot.slane %v1957_v55, 1 }
 0x34c   : > { %2786 = vrot.lane.b32.xlu0 %v2757_v62, %s11903_s21  ;;  %v2553_v13 = vsel %vm2500_vm11, %v2426_v26, %v2552_v38  ;;  %v2766_v57 = vrot.slane %v2671_v48, 1  ;;  %v16725_v1 = vshll.u32 %v12670_v49, 16  ;;  %v2485_v54 = vunpack.c.l.b16 %v12614_v23 }
 0x34d   : > { %v2419_v44 = vunpack.c.l.b16 %v2291_v58  ;;  %v1952_v31 = vmax.f32 %v1950_v10, %v1951_v9  ;;  %v2103_v34 = vpack.c.bf16 %v1945_v61, %v1945_v61  ;;  %v2546_v63 = vsel %vm2500_vm11, %v2418_v56, %v12593_v12 }
 0x34e   : > { %v2767_v51 = vrot.slane %v16725_v1, 2  ;;  %v2428_v59 = vunpack.c.l.b16 %v2300_v50  ;;  %v2429_v45 = vunpack.c.l.b16 %v2301_v52  ;;  %v12786_v18 = vor.u32 %v2771_v19, %v2770_v22 }
 0x34f   : > { %v2359_v33 = vperm.slane %v2102_v40, 0  ;;  %v2486_v15 = vunpack.c.l.b16 %v2358_v16  ;;  %v1965_v6 = vrot.slane %v1964_v5, 1  ;;  %v2554_v48 = vsel %vm16681_vm12, %v2427_v17, %v2553_v13 }
 0x350   : > { %v986_v43 = vrot.slane %v12706_v20, 4  ;;  %v987_v39 = vrot.slane %v12706_v20, 6  ;;  %v1959_v23 = vmax.f32 %v1957_v55, %v1958_v2  ;;  %v12791_v0 = vor.u32 %v2767_v51, %v2766_v57 }
 0x351   : > { %v16726_v10 = vrot.slane %v12573_v25, 1  ;;  %v16727_v11 = vunpack.c.l.b16 %v12595_v35  ;;  %v2104_v58 = vpack.c.bf16 %v1952_v31, %v1952_v31  ;;  %v2547_v61 = vsel %vm16681_vm12, %v2419_v44, %v2546_v63 }
 0x352   : > { %v2360_v26 = vperm.slane %v2103_v34, 0  ;;  %v2555_v56 = vsel %vm2504_vm6, %v2429_v45, %v2428_v59  ;;  %v2773_v20 = vsel %vm16682_vm1, %v12791_v0, %v12786_v18  ;;  %v12804_v55 = vpack.c.b16 %v2554_v48, %v2547_v61  ;;  %v16733_v59 = vld [vmem:[#allocation12_spill] sm:$0xff] }
 0x353   : > { %v1903_v12 = vmax.f32 %v12573_v25, %v16726_v10  ;;  %v2604_v41 = vsel %vm2504_vm6, %v2485_v54, %v16727_v11  ;;  %v2096_v9 = vpack.c.bf16 %v12544_v7, %v12544_v7  ;;  %v16728_v25 = vpack.c.bf16 %v12535_v29, %v12535_v29  ;;  %v16736_v11 = vld [vmem:[#allocation13_spill] sm:$0xff] }
 0x354   : > { %v2487_v38 = vunpack.c.l.b16 %v2359_v33  ;;  %v1966_v22 = vmax.f32 %v1964_v5, %v1965_v6  ;;  %2794 = vrot.lane.b32.xlu0 %v2773_v20, %s11903_s21  ;;  %v2605_v50 = vsel %vm2506_vm9, %v2486_v15, %v2604_v41  ;;  %v1967_v52 = vsel %vm1084_vm5, %v986_v43, -inf }
 0x355   : > { %v2352_v35 = vperm.slane %v16728_v25, 0  ;;  %v1974_v62 = vsel %vm1084_vm5, %v987_v39, -inf  ;;  %v2105_v19 = vpack.c.bf16 %v1959_v23, %v1959_v23  ;;  %v2479_v40 = vunpack.c.l.b16 %v12566_v47 }
 0x356   : > { %v16729_v16 = vrot.slane %v12575_v42, 1  ;;  %v2361_v17 = vperm.slane %v2104_v58, 0  ;;  %v16730_v29 = vunpack.c.l.b16 %v12124_v27  ;;  %v16731_v2 = vunpack.c.l.b16 %v12548_v14 }
 0x357   : > { %v2097_v57 = vpack.c.bf16 %v1903_v12, %v1903_v12  ;;  %v2488_v1 = vunpack.c.l.b16 %v2360_v26  ;;  %v2718_v51 = vrot.slane %v12804_v55, 1  ;;  %v2606_v47 = vsel %vm2494_vm7, %v2487_v38, %v2605_v50 }
 0x358   : > { %v1910_v7 = vmax.f32 %v12575_v42, %v16729_v16  ;;  %v2556_v5 = vsel %vm2506_vm9, %v16730_v29, %v2555_v56  ;;  %v2598_v13 = vsel %vm2506_vm9, %v16731_v2, %v12526_v37  ;;  %v1968_v54 = vrot.slane %v1967_v52, 4  ;;  %v16738_v56 = vld [vmem:[#allocation14_spill] sm:$0xff] }
 0x359   : > { %v1975_v44 = vrot.slane %v1974_v62, 4  ;;  %v2106_v31 = vpack.c.bf16 %v1966_v22, %v1966_v22  ;;  %v16732_v42 = vpack.c.bf16 %v12160_v21, %v12160_v21  ;;  %v2434_v34 = vunpack.c.l.b16 %v12170_v46 }
 0x35a   : > { %v2362_v63 = vperm.slane %v2105_v19, 0  ;;  %v16734_v14 = vunpack.c.l.b16 %v16733_v59  ;;  %v2353_v45 = vperm.slane %v2096_v9, 0  ;;  %v2480_v33 = vunpack.c.l.b16 %v2352_v35 }
 0x35b   : > { %v2307_v27 = vperm.slane %v16732_v42, 0  ;;  %v2098_v15 = vpack.c.bf16 %v1910_v7, %v1910_v7  ;;  %v2489_v6 = vunpack.c.l.b16 %v2361_v17  ;;  %v2599_v48 = vsel %vm2494_vm7, %v2479_v40, %v2598_v13 }
 0x35c   : > { %v2557_v37 = vsel %vm2494_vm7, %v16734_v14, %v2556_v5  ;;  %v2354_v43 = vperm.slane %v2097_v57, 0  ;;  %v2607_v39 = vsel %vm2496_vm8, %v2488_v1, %v2606_v47  ;;  %v16735_v21 = vrot.slane %v12616_v30, 1 }
 0x35d   : > { %v1969_v23 = vmax.f32 %v1967_v52, %v1968_v54  ;;  %v1976_v10 = vmax.f32 %v1974_v62, %v1975_v44  ;;  %v2363_v12 = vperm.slane %v2106_v31, 0  ;;  %v16737_v41 = vunpack.c.l.b16 %v16736_v11  ;;  %v2731_v31 = vpop.permute.xlu0 %2730 }
 0x35e   : > { %v2719_v46 = vsel %vm2712_vm14, %v16735_v21, %v2718_v51  ;;  %v2435_v61 = vunpack.c.l.b16 %v2307_v27  ;;  %v2490_v26 = vunpack.c.l.b16 %v2362_v63  ;;  %v16739_v20 = vunpack.c.l.b16 %v16738_v56 }
 0x35f   : > { %2734 = vrot.lane.b32.xlu0 %v2719_v46, %s11900_s22  ;;  %v2558_v58 = vsel %vm2496_vm8, %v16737_v41, %v2557_v37  ;;  %v2481_v25 = vunpack.c.l.b16 %v2353_v45  ;;  %v2355_v35 = vperm.slane %v2098_v15, 0  ;;  %v2608_v38 = vsel %vm2498_vm10, %v2489_v6, %v2607_v39  ;;  %v2906_v6 = vld [vmem:[%s16741_s3 + $0x10] sm:$0xf] }
 0x360   : > { %v2559_v9 = vsel %vm2498_vm10, %v16739_v20, %v2558_v58  ;;  %v2600_v50 = vsel %vm2496_vm8, %v2480_v33, %v2599_v48  ;;  %v2482_v52 = vunpack.c.l.b16 %v2354_v43  ;;  %v2806_v62 = vrot.slane %v12804_v55, 2 }
 0x361   : > { %v2560_v22 = vsel %vm2500_vm11, %v2434_v34, %v2559_v9  ;;  %v1970_v40 = vrot.slane %v1969_v23, 2  ;;  %v1977_v16 = vrot.slane %v1976_v10, 2  ;;  %v2491_v7 = vunpack.c.l.b16 %v2363_v12  ;;  %v11277_v12 = vld [vmem:[%s16741_s3 + $0x8] sm:$0xff] }
 0x362   : > { %v2561_v19 = vsel %vm16681_vm12, %v2435_v61, %v2560_v22  ;;  %v2609_v29 = vsel %vm2500_vm11, %v2490_v26, %v2608_v38  ;;  %v2601_v5 = vsel %vm2498_vm10, %v2481_v25, %v2600_v50  ;;  %v2483_v2 = vunpack.c.l.b16 %v2355_v35  ;;  %v16742_v50 = vld [vmem:[#allocation15_spill] sm:$0xff] }
 0x363   : > { %v12855_v17 = vpack.c.b16 %v12731_v60, %v2561_v19  ;;  %v2602_v13 = vsel %vm2500_vm11, %v2482_v52, %v2601_v5  ;;  %v16740_v57 = vrot.slane %v12616_v30, 2  ;;  %v2651_v47 = vshll.u32 %v12804_v55, 16 }
 0x364   : > { %v1971_v54 = vmax.f32 %v1969_v23, %v1970_v40  ;;  %v1978_v44 = vmax.f32 %v1976_v10, %v1977_v16  ;;  %v2610_v60 = vsel %vm16681_vm12, %v2491_v7, %v2609_v29  ;;  %v2603_v42 = vsel %vm16681_vm12, %v2483_v2, %v2602_v13 }
 0x365   : > { %v2807_v1 = vsel %vm2800_vm15, %v16740_v57, %v2806_v62  ;;  %v12869_v27 = vrot.slane %v2651_v47, 1  ;;  %v12871_v34 = vpack.c.b16 %v2610_v60, %v2603_v42  ;;  %v2649_v14 = vor.u32 %v2647_v8, %v12664_v53  ;;  %v2819_v21 = vpop.permute.xlu0 %2818 }
 0x366   : > { %v1972_v63 = vrot.slane %v1971_v54, 1  ;;  %v1979_v59 = vrot.slane %v1978_v44, 1  ;;  %v2916_v48 = vunpack.c.l.b16 %v2906_v6  ;;  %v2655_v39 = vshrl.u32 %v12804_v55, 16 }
 0x367   : > { %2822 = vrot.lane.b32.xlu0 %v2807_v1, %s11901_s0  ;;  %v2654_v37 = vsel %vm2627_vm0, %v2649_v14, %v12869_v27  ;;  %v2683_v45 = vshll.u32 %v12871_v34, 16  ;;  %v2681_v23 = vor.u32 %v2679_v36, %v12742_v32  ;;  %v2759_v58 = vrot.slane %v2651_v47, 2  ;;  %v11276_v32 = vld [vmem:[%s16741_s3] sm:$0xff]  ;;  %s9224_s3 = scalar_lea.hbm %s16655_s19, %s12028_s1 }
 0x368   : > { %v1973_v33 = vmax.f32 %v1971_v54, %v1972_v63  ;;  %v1980_v15 = vmax.f32 %v1978_v44, %v1979_v59  ;;  %v2919_v53 = vpack.c.b16 %v2916_v48, %v2916_v48  ;;  %v2758_v41 = vrot.slane %v2655_v39, 1  ;;  %s9228_s24 = sshll.u32 %s9224_s3, 4  ;;  %s9229_s24 = int_to_ptr.hbm [resolvable:$true] %s9228_s24 }
 0x369   : > { %v2685_v43 = vrot.slane %v2683_v45, 1  ;;  %v2720_v38 = vrot.slane %v12855_v17, 1  ;;  %v2687_v19 = vshrl.u32 %v12871_v34, 16  ;;  %vm2868_vm5 = vcmask 195584  }
 0x36a   : > { %v2107_v8 = vpack.c.bf16 %v1973_v33, %v1973_v33  ;;  %v2108_v46 = vpack.c.bf16 %v1980_v15, %v1980_v15  ;;  %v2941_v10 = vsel %vm2939_vm2, %v2919_v53, 0  ;;  %v2760_v36 = vor.u32 %v2759_v58, %v2758_v41 }
 0x36b   : > { %2948 = vmatpush.bf16.msra.mxu0 %v2941_v10  ;;  %v2686_v11 = vsel %vm2627_vm0, %v2681_v23, %v2685_v43  ;;  %v2721_v7 = vsel %vm2712_vm14, %v2718_v51, %v2720_v38  ;;  %v2774_v29 = vrot.slane %v2687_v19, 1  ;;  %v2775_v5 = vrot.slane %v2683_v45, 2 }
 0x36c   : > { %v2364_v61 = vperm.slane %v2107_v8, 0  ;;  %v2365_v26 = vperm.slane %v2108_v46, 0  ;;  %v2761_v25 = vsel %vm16682_vm1, %v12767_v4, %v2760_v36  ;;  %vm2885_vm2 = vcmask 261120  }
 0x36d   : > { %v2695_v9 = vpop.permute.xlu0 %2694  ;;  %vm2922_vm12 = vcmask 326656   ;;  %v2776_v1 = vor.u32 %v2775_v5, %v2774_v29  ;;  %v2689_v47 = vor.u32 %v2687_v19, %v2685_v43  ;;  %v16744_v33 = vrot.slane %v12670_v49, 2 }
 0x36e   : > { %v2492_v56 = vunpack.c.l.b16 %v2364_v61  ;;  %v2493_v20 = vunpack.c.l.b16 %v2365_v26  ;;  %v2836_v52 = vsel %vm2834_vm3, %v16742_v50, %v2695_v9  ;;  %v2659_v6 = vshll.u32 %v12855_v17, 16 }
 0x36f   : > { %2698 = vrot.lane.b32.xlu0 %v2654_v37, %s11902_s20  ;;  %2949 = vmatpush.bf16.msra.mxu0 %v11277_v12  ;;  %v2853_v2 = vsel %vm2851_vm4, %v2836_v52, %v2731_v31  ;;  %v2808_v31 = vrot.slane %v12855_v17, 2  ;;  %v16743_v37 = vrot.slane %v12670_v49, 1  ;;  %v2814_v52 = vrot.slane %v12871_v34, 2 }
 0x370   : > { %v2611_v35 = vsel %vm2504_vm6, %v2493_v20, %v2492_v56  ;;  %v2661_v43 = vrot.slane %v2659_v6, 1  ;;  %v2763_v46 = vrot.slane %v2659_v6, 2  ;;  %v16746_v19 = vrot.slane %v12681_v24, 2 }
 0x371   : > { %v2620_v22 = vpack.c.b16 %v2611_v35, %v2611_v35  ;;  %v2809_v14 = vsel %vm2800_vm15, %v2806_v62, %v2808_v31  ;;  %v2723_v45 = vsel %vm2712_vm14, %v2720_v38, %v16743_v37  ;;  %v2811_v15 = vsel %vm2800_vm15, %v2808_v31, %v16744_v33 }
 0x372   : > { %v2663_v62 = vshrl.u32 %v12855_v17, 16  ;;  %v16745_v35 = vrot.slane %v12681_v24, 1 }
 0x373   : > { %2950 = vmatpush.bf16.msra.mxu0 %v11276_v32  ;;  %v12906_v40 = vsel %vm2621_vm13, %v2620_v22, 0  ;;  %v2777_v22 = vsel %vm16682_vm1, %v12786_v18, %v2776_v1 }
 0x374   : > { %v2690_v16 = vshll.u32 %v12906_v40, 16  ;;  %v2778_v4 = vshrl.u32 %v12906_v40, 16  ;;  %v2762_v8 = vrot.slane %v2663_v62, 1  ;;  %v2665_v41 = vor.u32 %v2663_v62, %v2661_v43  ;;  %v13002_v62 = vld [vmem:[%s16747_s4] ss:$0 sm:$0xff] }
 0x375   : > { %v2728_v29 = vrot.slane %v12906_v40, 1 }
 0x376   : > { %v2780_v13 = vrot.slane %v2778_v4, 1  ;;  %v2692_v54 = vrot.slane %v2690_v16, 1  ;;  %v2781_v44 = vrot.slane %v2690_v16, 2  ;;  %v2764_v10 = vor.u32 %v2763_v46, %v2762_v8 }
 0x377   : > { %2706 = vrot.lane.b32.xlu0 %v2686_v11, %s11902_s20  ;;  %v2670_v58 = vsel %vm2627_vm0, %v2665_v41, %v12736_v3  ;;  %v2815_v16 = vsel %vm2800_vm15, %v16746_v19, %v2814_v52 }
 0x378   : > { %v2693_v51 = vsel %vm2627_vm0, %v2689_v47, %v2692_v54  ;;  %v2782_v63 = vor.u32 %v2781_v44, %v2780_v13  ;;  %v2765_v12 = vsel %vm16682_vm1, %v2760_v36, %v2764_v10  ;;  %v2769_v36 = vsel %vm16682_vm1, %v2764_v10, %v12791_v0 }
 0x379   : > { %v2816_v47 = vrot.slane %v12906_v40, 2 }
 0x37a   : > { %v2783_v59 = vsel %vm16682_vm1, %v2776_v1, %v2782_v63  ;;  %vm3139_vm1 = vcmask 123904  }
 0x37b   : > { %v2817_v44 = vsel %vm2800_vm15, %v2814_v52, %v2816_v47 }
 0x37f   : > { %2788 = vrot.lane.b32.xlu0 %v2761_v25, %s11903_s21  ;;  %v2726_v25 = vrot.slane %v12871_v34, 1 }
 0x381   : > { %v2785_v57 = vpop.permute.xlu0 %2784  ;;  %v2729_v5 = vsel %vm2712_vm14, %v2726_v25, %v2728_v29 }
 0x382   : > { %v2870_v60 = vsel %vm2868_vm5, %v2853_v2, %v2785_v57 }
 0x383   : > { %v2887_v42 = vsel %vm2885_vm2, %v2870_v60, %v2819_v21  ;;  %v2657_v21 = vor.u32 %v2655_v39, %v12869_v27  ;;  %v2733_v56 = vpop.permute.xlu2 %2732 }
 0x384   : > { %9300 = vmatmul.msk.bf16.vlgmr.msra.gmra.mxu0 %vm2922_vm12, %v2887_v42 }
 0x385   : > { %v2662_v53 = vsel %vm2627_vm0, %v2657_v21, %v2661_v43 }
 0x387   : > { %2736 = vrot.lane.b32.xlu0 %v2721_v7, %s11900_s22 }
 0x38f   : > { %2824 = vrot.lane.b32.xlu0 %v2809_v14, %s11901_s0 }
 0x397   : > { %2738 = vrot.lane.b32.xlu0 %v2723_v45, %s11900_s22 }
 0x39a   : > { %v2821_v48 = vpop.permute.xlu0 %2820 }
 0x39f   : > { %2826 = vrot.lane.b32.xlu0 %v2811_v15, %s11901_s0  ;;  %v2697_v61 = vpop.permute.xlu1 %2696 }
 0x3a0   : > { %v2838_v32 = vsel %vm2834_vm3, %v12398_v28, %v2697_v61  ;;  %v2727_v28 = vsel %vm2712_vm14, %v16745_v35, %v2726_v25 }
 0x3a1   : > { %v2855_v3 = vsel %vm2851_vm4, %v2838_v32, %v2733_v56 }
 0x3a6   : > { %v2741_v23 = vpop.permute.xlu0 %2740 }
 0x3a7   : > { %2700 = vrot.lane.b32.xlu0 %v2662_v53, %s11902_s20 }
 0x3ae   : > { %v12942_v11 = vpop.permute.xlu0 %2828 }
 0x3af   : > { %2790 = vrot.lane.b32.xlu0 %v2765_v12, %s11903_s21 }
 0x3b6   : > { %v2705_v27 = vpop.permute.xlu0 %2704 }
 0x3b7   : > { %2702 = vrot.lane.b32.xlu0 %v2670_v58, %s11902_s20  ;;  %v2846_v39 = vsel %vm2834_vm3, %v12670_v49, %v2705_v27 }
 0x3b8   : > { %v2863_v26 = vsel %vm2851_vm4, %v2846_v39, %v2741_v23 }
 0x3be   : > { %v2787_v20 = vpop.permute.xlu0 %2786 }
 0x3bf   : > { %2792 = vrot.lane.b32.xlu0 %v2769_v36, %s11903_s21  ;;  %v2872_v9 = vsel %vm2868_vm5, %v2855_v3, %v2787_v20 }
 0x3c0   : > { %v2889_v49 = vsel %vm2885_vm2, %v2872_v9, %v2821_v48 }
 0x3c1   : > { %9301 = vmatmul.msk.bf16.gmra.mxu0 %vm2922_vm12, %v2889_v49 }
 0x3c6   : > { %v2795_v0 = vpop.permute.xlu0 %2794 }
 0x3c7   : > { %2742 = vrot.lane.b32.xlu0 %v2727_v28, %s11900_s22  ;;  %v2880_v38 = vsel %vm2868_vm5, %v2863_v26, %v2795_v0 }
 0x3cf   : > { %2796 = vrot.lane.b32.xlu0 %v2777_v22, %s11903_s21 }
 0x3d1   : > { %v2735_v50 = vpop.permute.xlu0 %2734 }
 0x3d7   : > { %2830 = vrot.lane.b32.xlu0 %v2815_v16, %s11901_s0 }
 0x3d9   : > { %v2823_v4 = vpop.permute.xlu0 %2822 }
 0x3df   : > { %2708 = vrot.lane.b32.xlu0 %v2693_v51, %s11902_s20  ;;  %s9216_s20 = scalar_lea.sflag [#allocation3], %s591_s2 }
 0x3e1   : > { %v2699_v7 = vpop.permute.xlu0 %2698 }
 0x3e2   : > { %v2840_v2 = vsel %vm2834_vm3, %v12616_v30, %v2699_v7 }
 0x3e3   : > { %v2857_v13 = vsel %vm2851_vm4, %v2840_v2, %v2735_v50 }
 0x3e7   : > { %2744 = vrot.lane.b32.xlu0 %v2729_v5, %s11900_s22 }
 0x3e9   : > { %v2707_v18 = vpop.permute.xlu0 %2706 }
 0x3ea   : > { %v2848_v58 = vsel %vm2834_vm3, %v12681_v24, %v2707_v18 }
 0x3ef   : > { %2798 = vrot.lane.b32.xlu0 %v2783_v59, %s11903_s21 }
 0x3f1   : > { %v2789_v57 = vpop.permute.xlu0 %2788 }
 0x3f2   : > { %v2874_v1 = vsel %vm2868_vm5, %v2857_v13, %v2789_v57 }
 0x3f3   : > { %v2891_v54 = vsel %vm2885_vm2, %v2874_v1, %v2823_v4 }
 0x3f4   : > { %9302 = vmatmul.msk.bf16.gmra.mxu0 %vm2922_vm12, %v2891_v54 }
 0x3f7   : > { %2832 = vrot.lane.b32.xlu0 %v2817_v44, %s11901_s0 }
 0x3f9   : > { %v2737_v60 = vpop.permute.xlu0 %2736 }
 0x401   : > { %v2825_v42 = vpop.permute.xlu0 %2824  ;;  %v2952_v21 = vpop.f32.mrf.mxu0 }
 0x402   : > { %v2995_v8 = vadd.f32 %v13002_v62, %v2952_v21 }
 0x404   : > { %v3011_v46 = vmax.f32 %v2995_v8, 0.0 }
 0x406   : > { %v3043_v10 = vrot.slane %v3011_v46, 2  ;;  %v3044_v12 = vrot.slane %v3011_v46, 4  ;;  %v3140_v39 = vsel %vm3139_vm1, %v3011_v46, -inf  ;;  %v3045_v32 = vrot.slane %v3011_v46, 6 }
 0x407   : > { %v3141_v9 = vrot.slane %v3140_v39, 4 }
 0x408   : > { %v3147_v27 = vsel %vm3139_vm1, %v3043_v10, -inf  ;;  %v3154_v36 = vsel %vm3139_vm1, %v3044_v12, -inf  ;;  %v3161_v49 = vsel %vm3139_vm1, %v3045_v32, -inf }
 0x409   : > { %v2739_v30 = vpop.permute.xlu0 %2738  ;;  %v2954_v41 = vpop.f32.mrf.mxu0  ;;  %v3148_v3 = vrot.slane %v3147_v27, 4  ;;  %v3155_v24 = vrot.slane %v3154_v36, 4  ;;  %v3142_v28 = vmax.f32 %v3140_v39, %v3141_v9 }
 0x40a   : > { %v2996_v61 = vadd.f32 %v13002_v62, %v2954_v41 }
 0x40b   : > { %v3149_v35 = vmax.f32 %v3147_v27, %v3148_v3  ;;  %v3156_v0 = vmax.f32 %v3154_v36, %v3155_v24  ;;  %v3143_v4 = vrot.slane %v3142_v28, 2 }
 0x40c   : > { %v3012_v25 = vmax.f32 %v2996_v61, 0.0 }
 0x40d   : > { %v3150_v19 = vrot.slane %v3149_v35, 2  ;;  %v3157_v29 = vrot.slane %v3156_v0, 2  ;;  %v3144_v47 = vmax.f32 %v3142_v28, %v3143_v4 }
 0x40e   : > { %v3046_v22 = vrot.slane %v3012_v25, 2  ;;  %v3047_v52 = vrot.slane %v3012_v25, 4  ;;  %v3168_v16 = vsel %vm3139_vm1, %v3012_v25, -inf  ;;  %v3048_v7 = vrot.slane %v3012_v25, 6 }
 0x40f   : > { %v3169_v13 = vrot.slane %v3168_v16, 4  ;;  %v3151_v1 = vmax.f32 %v3149_v35, %v3150_v19 }
 0x410   : > { %v3175_v18 = vsel %vm3139_vm1, %v3046_v22, -inf  ;;  %v3182_v57 = vsel %vm3139_vm1, %v3047_v52, -inf  ;;  %v3189_v44 = vsel %vm3139_vm1, %v3048_v7, -inf }
 0x411   : > { %v2827_v51 = vpop.permute.xlu0 %2826  ;;  %v3176_v54 = vrot.slane %v3175_v18, 4 }
 0x419   : > { %v2701_v63 = vpop.permute.xlu0 %2700 }
 0x41a   : > { %v2842_v31 = vsel %vm2834_vm3, %v12804_v55, %v2701_v63  ;;  %v3170_v63 = vmax.f32 %v3168_v16, %v3169_v13 }
 0x41b   : > { %v2859_v59 = vsel %vm2851_vm4, %v2842_v31, %v2737_v60  ;;  %v3158_v60 = vmax.f32 %v3156_v0, %v3157_v29  ;;  %v3152_v31 = vrot.slane %v3151_v1, 1 }
 0x421   : > { %v2791_v14 = vpop.permute.xlu0 %2790 }
 0x422   : > { %v2876_v40 = vsel %vm2868_vm5, %v2859_v59, %v2791_v14  ;;  %v3190_v59 = vrot.slane %v3189_v44, 4  ;;  %v3145_v14 = vrot.slane %v3144_v47, 1 }
 0x423   : > { %v2893_v37 = vsel %vm2885_vm2, %v2876_v40, %v2825_v42  ;;  %v3177_v40 = vmax.f32 %v3175_v18, %v3176_v54 }
 0x424   : > { %9303 = vmatmul.msk.bf16.gmra.mxu0 %vm2922_vm12, %v2893_v37  ;;  %v3159_v37 = vrot.slane %v3158_v60, 1  ;;  %v3146_v21 = vmax.f32 %v3144_v47, %v3145_v14 }
 0x426   : > { %v3160_v8 = vmax.f32 %v3158_v60, %v3159_v37  ;;  %v3588_v32 = vpack.c.bf16 %v3146_v21, %v3146_v21 }
 0x428   : > { %v3590_v36 = vpack.c.bf16 %v3160_v8, %v3160_v8  ;;  %v3717_v28 = vperm.slane %v3588_v32, 0 }
 0x429   : > { %v2703_v45 = vpop.permute.xlu0 %2702 }
 0x42a   : > { %v2844_v33 = vsel %vm2834_vm3, %v12855_v17, %v2703_v45  ;;  %v2897_v17 = vsel %vm2885_vm2, %v2880_v38, %v12942_v11  ;;  %v3162_v38 = vrot.slane %v3161_v49, 4  ;;  %v3719_v0 = vperm.slane %v3590_v36, 0 }
 0x42b   : > { %v2861_v15 = vsel %vm2851_vm4, %v2844_v33, %v2739_v30  ;;  %v3183_v30 = vrot.slane %v3182_v57, 4 }
 0x42c   : > { %v3163_v5 = vmax.f32 %v3161_v49, %v3162_v38  ;;  %v3783_v54 = vunpack.c.l.b16 %v3719_v0 }
 0x42d   : > { %v3184_v33 = vmax.f32 %v3182_v57, %v3183_v30  ;;  %v3781_v57 = vunpack.c.l.b16 %v3717_v28 }
 0x42e   : > { %v3164_v42 = vrot.slane %v3163_v5, 2 }
 0x430   : > { %v3165_v45 = vmax.f32 %v3163_v5, %v3164_v42 }
 0x431   : > { %v2793_v6 = vpop.permute.xlu0 %2792 }
 0x432   : > { %v2878_v48 = vsel %vm2868_vm5, %v2861_v15, %v2793_v6  ;;  %v3171_v15 = vrot.slane %v3170_v63, 2  ;;  %v3153_v6 = vmax.f32 %v3151_v1, %v3152_v31  ;;  %v3166_v46 = vrot.slane %v3165_v45, 1 }
 0x433   : > { %v2895_v55 = vsel %vm2885_vm2, %v2878_v48, %v2827_v51  ;;  %v3191_v48 = vmax.f32 %v3189_v44, %v3190_v59 }
 0x434   : > { %9304 = vmatmul.msk.bf16.gmra.mxu0 %vm2922_vm12, %v2895_v55  ;;  %v3172_v41 = vmax.f32 %v3170_v63, %v3171_v15  ;;  %v3589_v39 = vpack.c.bf16 %v3153_v6, %v3153_v6 }
 0x435   : > { %v3192_v61 = vrot.slane %v3191_v48, 2 }
 0x436   : > { %v3173_v3 = vrot.slane %v3172_v41, 1  ;;  %v3718_v9 = vperm.slane %v3589_v39, 0 }
 0x437   : > { %v3193_v24 = vmax.f32 %v3191_v48, %v3192_v61 }
 0x438   : > { %v3782_v4 = vunpack.c.l.b16 %v3718_v9 }
 0x439   : > { %v2743_v43 = vpop.permute.xlu0 %2742  ;;  %v3194_v7 = vrot.slane %v3193_v24, 1 }
 0x43a   : > { %v2865_v11 = vsel %vm2851_vm4, %v2848_v58, %v2743_v43  ;;  %v3845_v30 = vsel %vm2494_vm7, %v3782_v4, %v3781_v57 }
 0x43e   : > { %v2957_v2 = vpop.f32.mrf.mxu0 }
 0x441   : > { %v2797_v53 = vpop.permute.xlu0 %2796 }
 0x442   : > { %v2882_v56 = vsel %vm2868_vm5, %v2865_v11, %v2797_v53  ;;  %v3178_v53 = vrot.slane %v3177_v40, 2  ;;  %v2997_v11 = vadd.f32 %v13002_v62, %v2957_v2 }
 0x444   : > { %9305 = vmatmul.msk.bf16.gmra.mxu0 %vm2922_vm12, %v2897_v17  ;;  %v3013_v49 = vmax.f32 %v2997_v11, 0.0 }
 0x446   : > { %v2959_v55 = vpop.f32.mrf.mxu0  ;;  %v3049_v5 = vrot.slane %v3013_v49, 2  ;;  %v3196_v18 = vsel %vm3139_vm1, %v3013_v49, -inf  ;;  %v3050_v47 = vrot.slane %v3013_v49, 4  ;;  %v3051_v14 = vrot.slane %v3013_v49, 6 }
 0x447   : > { %v2998_v58 = vadd.f32 %v13002_v62, %v2959_v55  ;;  %v3197_v63 = vrot.slane %v3196_v18, 4  ;;  %v13047_v55 = vsel %vm2496_vm8, %v3783_v54, %v3845_v30 }
 0x449   : > { %v2831_v23 = vpop.permute.xlu0 %2830 }
 0x44a   : > { %v2899_v20 = vsel %vm2885_vm2, %v2882_v56, %v2831_v23  ;;  %v3185_v23 = vrot.slane %v3184_v33, 2 }
 0x44c   : > { %v3186_v56 = vmax.f32 %v3184_v33, %v3185_v23  ;;  %v3210_v33 = vsel %vm3139_vm1, %v3050_v47, -inf }
 0x44e   : > { %v3187_v38 = vrot.slane %v3186_v56, 1 }
 0x450   : > { %v3188_v1 = vmax.f32 %v3186_v56, %v3187_v38 }
 0x451   : > { %v2709_v26 = vpop.permute.xlu0 %2708 }
 0x452   : > { %v2850_v43 = vsel %vm2834_vm3, %v12871_v34, %v2709_v26  ;;  %v3179_v34 = vmax.f32 %v3177_v40, %v3178_v53  ;;  %v3167_v26 = vmax.f32 %v3165_v45, %v3166_v46  ;;  %v3203_v40 = vsel %vm3139_vm1, %v3049_v5, -inf }
 0x453   : > { %v3594_v45 = vpack.c.bf16 %v3188_v1, %v3188_v1  ;;  %v3198_v53 = vmax.f32 %v3196_v18, %v3197_v63 }
 0x454   : > { %9306 = vmatmul.msk.bf16.gmra.mxu0 %vm2922_vm12, %v2899_v20  ;;  %v13031_v20 = vmax.f32 %v2998_v58, 0.0  ;;  %v3180_v25 = vrot.slane %v3179_v34, 1  ;;  %v3591_v35 = vpack.c.bf16 %v3167_v26, %v3167_v26  ;;  %v3217_v58 = vsel %vm3139_vm1, %v3051_v14, -inf }
 0x455   : > { %v3199_v56 = vrot.slane %v3198_v53, 2  ;;  %v3218_v9 = vrot.slane %v3217_v58, 4 }
 0x456   : > { %v3053_v52 = vrot.slane %v13031_v20, 4  ;;  %v3054_v19 = vrot.slane %v13031_v20, 6  ;;  %v3181_v29 = vmax.f32 %v3179_v34, %v3180_v25  ;;  %v13037_v13 = vperm.slane %v3591_v35, 0 }
 0x457   : > { %v3052_v39 = vrot.slane %v13031_v20, 2  ;;  %v3224_v0 = vsel %vm3139_vm1, %v13031_v20, -inf  ;;  %v3219_v5 = vmax.f32 %v3217_v58, %v3218_v9 }
 0x458   : > { %v3238_v60 = vsel %vm3139_vm1, %v3053_v52, -inf  ;;  %v3245_v42 = vsel %vm3139_vm1, %v3054_v19, -inf  ;;  %v3593_v59 = vpack.c.bf16 %v3181_v29, %v3181_v29  ;;  %v3784_v48 = vunpack.c.l.b16 %v13037_v13 }
 0x459   : > { %v2745_v50 = vpop.permute.xlu0 %2744  ;;  %v3239_v15 = vrot.slane %v3238_v60, 4  ;;  %v3246_v6 = vrot.slane %v3245_v42, 4  ;;  %v3231_v38 = vsel %vm3139_vm1, %v3052_v39, -inf  ;;  %v3225_v1 = vrot.slane %v3224_v0, 4 }
 0x45a   : > { %v2867_v17 = vsel %vm2851_vm4, %v2850_v43, %v2745_v50  ;;  %v3174_v50 = vmax.f32 %v3172_v41, %v3173_v3  ;;  %v3211_v41 = vrot.slane %v3210_v33, 4  ;;  %v3232_v47 = vrot.slane %v3231_v38, 4 }
 0x45b   : > { %v3240_v61 = vmax.f32 %v3238_v60, %v3239_v15  ;;  %v3247_v34 = vmax.f32 %v3245_v42, %v3246_v6  ;;  %v3220_v14 = vrot.slane %v3219_v5, 2 }
 0x45c   : > { %v3592_v44 = vpack.c.bf16 %v3174_v50, %v3174_v50  ;;  %v3212_v28 = vmax.f32 %v3210_v33, %v3211_v41 }
 0x45d   : > { %v3248_v52 = vrot.slane %v3247_v34, 2  ;;  %v3221_v58 = vmax.f32 %v3219_v5, %v3220_v14 }
 0x45e   : > { %v13049_v43 = vperm.slane %v3592_v44, 0  ;;  %v3213_v20 = vrot.slane %v3212_v28, 2 }
 0x45f   : > { %v3249_v42 = vmax.f32 %v3247_v34, %v3248_v52 }
 0x460   : > { %v3785_v49 = vunpack.c.l.b16 %v13049_v43  ;;  %v3214_v6 = vmax.f32 %v3212_v28, %v3213_v20 }
 0x461   : > { %v2799_v51 = vpop.permute.xlu0 %2798 }
 0x462   : > { %v2884_v10 = vsel %vm2868_vm5, %v2867_v17, %v2799_v51  ;;  %v3195_v51 = vmax.f32 %v3193_v24, %v3194_v7  ;;  %v3204_v17 = vrot.slane %v3203_v40, 4  ;;  %v3200_v7 = vmax.f32 %v3198_v53, %v3199_v56 }
 0x464   : > { %v3205_v3 = vmax.f32 %v3203_v40, %v3204_v17 }
 0x466   : > { %v3206_v29 = vrot.slane %v3205_v3, 2 }
 0x469   : > { %v2833_v12 = vpop.permute.xlu0 %2832 }
 0x46a   : > { %v2901_v27 = vsel %vm2885_vm2, %v2884_v10, %v2833_v12  ;;  %v3595_v10 = vpack.c.bf16 %v3195_v51, %v3195_v51  ;;  %v13052_v12 = vperm.slane %v3593_v59, 0  ;;  %v3207_v59 = vmax.f32 %v3205_v3, %v3206_v29 }
 0x46b   : > { %9307 = vmatmul.msk.bf16.gmra.mxu0 %vm2922_vm12, %v2901_v27  ;;  %v13055_v27 = vperm.slane %v3594_v45, 0  ;;  %v3233_v45 = vmax.f32 %v3231_v38, %v3232_v47  ;;  %vm16748_vm12 = vcmask 1047559  }
 0x46c   : > { %v13060_v25 = vperm.slane %v3595_v10, 0  ;;  %v3786_v35 = vunpack.c.l.b16 %v13052_v12  ;;  %v3208_v34 = vrot.slane %v3207_v59, 1  ;;  %vm16749_vm3 = vmmov %vm16748_vm12 }
 0x46d   : > { %vm16750_vm5 = vmmov %vm16749_vm3 }
 0x46e   : > { %v3788_v57 = vunpack.c.l.b16 %v13060_v25 }
 0x471   : > { %v2962_v22 = vpop.f32.mrf.mxu0 }
 0x472   : > { %v2999_v16 = vadd.f32 %v13002_v62, %v2962_v22  ;;  %v3241_v22 = vrot.slane %v3240_v61, 2 }
 0x474   : > { %v3015_v2 = vmax.f32 %v2999_v16, 0.0  ;;  %v3242_v54 = vmax.f32 %v3240_v61, %v3241_v22  ;;  %v3222_v22 = vrot.slane %v3221_v58, 1 }
 0x476   : > { %v3055_v31 = vrot.slane %v3015_v2, 2  ;;  %v3252_v37 = vsel %vm3139_vm1, %v3015_v2, -inf  ;;  %v3056_v21 = vrot.slane %v3015_v2, 4  ;;  %v3057_v11 = vrot.slane %v3015_v2, 6 }
 0x477   : > { %v3253_v8 = vrot.slane %v3252_v37, 4  ;;  %v3787_v2 = vunpack.c.l.b16 %v13055_v27 }
 0x478   : > { %v3259_v46 = vsel %vm3139_vm1, %v3055_v31, -inf  ;;  %v3266_v32 = vsel %vm3139_vm1, %v3056_v21, -inf  ;;  %v3273_v16 = vsel %vm3139_vm1, %v3057_v11, -inf  ;;  %v3201_v31 = vrot.slane %v3200_v7, 1 }
 0x479   : > { %v2964_v23 = vpop.f32.mrf.mxu0  ;;  %v3260_v26 = vrot.slane %v3259_v46, 4  ;;  %v3254_v24 = vmax.f32 %v3252_v37, %v3253_v8  ;;  %v3267_v50 = vrot.slane %v3266_v32, 4  ;;  %v3274_v60 = vrot.slane %v3273_v16, 4 }
 0x47a   : > { %v3000_v36 = vadd.f32 %v13002_v62, %v2964_v23  ;;  %v3226_v37 = vmax.f32 %v3224_v0, %v3225_v1  ;;  %v3243_v21 = vrot.slane %v3242_v54, 1  ;;  %v3250_v8 = vrot.slane %v3249_v42, 1 }
 0x47b   : > { %v3261_v19 = vmax.f32 %v3259_v46, %v3260_v26  ;;  %v3255_v18 = vrot.slane %v3254_v24, 2  ;;  %v3268_v44 = vmax.f32 %v3266_v32, %v3267_v50  ;;  %v3275_v17 = vmax.f32 %v3273_v16, %v3274_v60 }
 0x47c   : > { %v3016_v4 = vmax.f32 %v3000_v36, 0.0  ;;  %v3202_v41 = vmax.f32 %v3200_v7, %v3201_v31  ;;  %v3227_v11 = vrot.slane %v3226_v37, 2  ;;  %v3234_v26 = vrot.slane %v3233_v45, 2 }
 0x47d   : > { %v3262_v30 = vrot.slane %v3261_v19, 2  ;;  %v3256_v40 = vmax.f32 %v3254_v24, %v3255_v18  ;;  %v3269_v53 = vrot.slane %v3268_v44, 2  ;;  %v3276_v56 = vrot.slane %v3275_v17, 2 }
 0x47e   : > { %v3058_v51 = vrot.slane %v3016_v4, 2  ;;  %v3059_v63 = vrot.slane %v3016_v4, 4  ;;  %v3060_v33 = vrot.slane %v3016_v4, 6  ;;  %v3280_v15 = vsel %vm3139_vm1, %v3016_v4, -inf }
 0x47f   : > { %v3263_v46 = vmax.f32 %v3261_v19, %v3262_v30  ;;  %v3257_v39 = vrot.slane %v3256_v40, 1  ;;  %v3281_v61 = vrot.slane %v3280_v15, 4  ;;  %v3270_v36 = vmax.f32 %v3268_v44, %v3269_v53 }
 0x480   : > { %v3287_v23 = vsel %vm3139_vm1, %v3058_v51, -inf  ;;  %v3294_v10 = vsel %vm3139_vm1, %v3059_v63, -inf  ;;  %v3301_v32 = vsel %vm3139_vm1, %v3060_v33, -inf  ;;  %v3215_v24 = vrot.slane %v3214_v6, 1 }
 0x481   : > { %v3288_v3 = vrot.slane %v3287_v23, 4  ;;  %v3295_v9 = vrot.slane %v3294_v10, 4  ;;  %v3244_v28 = vmax.f32 %v3242_v54, %v3243_v21  ;;  %v3251_v0 = vmax.f32 %v3249_v42, %v3250_v8 }
 0x482   : > { %v3264_v38 = vrot.slane %v3263_v46, 1  ;;  %v3258_v50 = vmax.f32 %v3256_v40, %v3257_v39  ;;  %v3282_v52 = vmax.f32 %v3280_v15, %v3281_v61  ;;  %v3302_v19 = vrot.slane %v3301_v32, 4 }
 0x483   : > { %v3209_v16 = vmax.f32 %v3207_v59, %v3208_v34  ;;  %v3596_v4 = vpack.c.bf16 %v3202_v41, %v3202_v41  ;;  %v3228_v7 = vmax.f32 %v3226_v37, %v3227_v11  ;;  %v3235_v29 = vmax.f32 %v3233_v45, %v3234_v26 }
 0x484   : > { %v3271_v5 = vrot.slane %v3270_v36, 1  ;;  %v3277_v18 = vmax.f32 %v3275_v17, %v3276_v56  ;;  %v3289_v1 = vmax.f32 %v3287_v23, %v3288_v3  ;;  %v3296_v47 = vmax.f32 %v3294_v10, %v3295_v9 }
 0x485   : > { %v3216_v20 = vmax.f32 %v3214_v6, %v3215_v24  ;;  %v3602_v44 = vpack.c.bf16 %v3244_v28, %v3244_v28  ;;  %v3603_v60 = vpack.c.bf16 %v3251_v0, %v3251_v0  ;;  %v3265_v30 = vmax.f32 %v3263_v46, %v3264_v38 }
 0x486   : > { %v3223_v51 = vmax.f32 %v3221_v58, %v3222_v22  ;;  %v3604_v54 = vpack.c.bf16 %v3258_v50, %v3258_v50  ;;  %v3283_v42 = vrot.slane %v3282_v52, 2  ;;  %v3303_v63 = vmax.f32 %v3301_v32, %v3302_v19 }
 0x487   : > { %v3597_v31 = vpack.c.bf16 %v3209_v16, %v3209_v16  ;;  %v3725_v14 = vperm.slane %v3596_v4, 0  ;;  %v3229_v40 = vrot.slane %v3228_v7, 1  ;;  %v3236_v33 = vrot.slane %v3235_v29, 1 }
 0x488   : > { %v3272_v59 = vmax.f32 %v3270_v36, %v3271_v5  ;;  %v3278_v15 = vrot.slane %v3277_v18, 1  ;;  %v3290_v37 = vrot.slane %v3289_v1, 2  ;;  %v3297_v45 = vrot.slane %v3296_v47, 2 }
 0x489   : > { %v3598_v21 = vpack.c.bf16 %v3216_v20, %v3216_v20  ;;  %v3731_v53 = vperm.slane %v3602_v44, 0  ;;  %v3732_v17 = vperm.slane %v3603_v60, 0  ;;  %v3605_v8 = vpack.c.bf16 %v3265_v30, %v3265_v30 }
 0x48a   : > { %v3599_v6 = vpack.c.bf16 %v3223_v51, %v3223_v51  ;;  %v3733_v23 = vperm.slane %v3604_v54, 0  ;;  %v3284_v10 = vmax.f32 %v3282_v52, %v3283_v42  ;;  %v3304_v46 = vrot.slane %v3303_v63, 2 }
 0x48b   : > { %v3726_v41 = vperm.slane %v3597_v31, 0  ;;  %v3789_v58 = vunpack.c.l.b16 %v3725_v14  ;;  %v3230_v39 = vmax.f32 %v3228_v7, %v3229_v40  ;;  %v3237_v61 = vmax.f32 %v3235_v29, %v3236_v33 }
 0x48c   : > { %v3279_v34 = vmax.f32 %v3277_v18, %v3278_v15  ;;  %v3606_v11 = vpack.c.bf16 %v3272_v59, %v3272_v59  ;;  %v3291_v26 = vmax.f32 %v3289_v1, %v3290_v37  ;;  %v3298_v32 = vmax.f32 %v3296_v47, %v3297_v45 }
 0x48d   : > { %v3727_v36 = vperm.slane %v3598_v21, 0  ;;  %v3795_v56 = vunpack.c.l.b16 %v3731_v53  ;;  %v3796_v3 = vunpack.c.l.b16 %v3732_v17  ;;  %v3734_v9 = vperm.slane %v3605_v8, 0 }
 0x48e   : > { %v3850_v24 = vsel %vm2504_vm6, %v3788_v57, %v3787_v2  ;;  %v3797_v28 = vunpack.c.l.b16 %v3733_v23  ;;  %v3285_v0 = vrot.slane %v3284_v10, 1  ;;  %v3305_v38 = vmax.f32 %v3303_v63, %v3304_v46 }
 0x48f   : > { %v3790_v22 = vunpack.c.l.b16 %v3726_v41  ;;  %v3851_v50 = vsel %vm2506_vm9, %v3789_v58, %v3850_v24  ;;  %v3600_v52 = vpack.c.bf16 %v3230_v39, %v3230_v39  ;;  %v3601_v19 = vpack.c.bf16 %v3237_v61, %v3237_v61 }
 0x490   : > { %v3607_v16 = vpack.c.bf16 %v3279_v34, %v3279_v34  ;;  %v3735_v4 = vperm.slane %v3606_v11, 0  ;;  %v3292_v7 = vrot.slane %v3291_v26, 1  ;;  %v3299_v29 = vrot.slane %v3298_v32, 1 }
 0x491   : > { %v3728_v5 = vperm.slane %v3599_v6, 0  ;;  %v3791_v18 = vunpack.c.l.b16 %v3727_v36  ;;  %v3798_v1 = vunpack.c.l.b16 %v3734_v9  ;;  %v3857_v27 = vsel %vm2504_vm6, %v3796_v3, %v3795_v56 }
 0x492   : > { %v3858_v25 = vsel %vm2506_vm9, %v3797_v28, %v3857_v27  ;;  %v3286_v2 = vmax.f32 %v3284_v10, %v3285_v0  ;;  %v3306_v57 = vrot.slane %v3305_v38, 1  ;;  %v3847_v47 = vsel %vm2498_vm10, %v3784_v48, %v13047_v55 }
 0x493   : > { %v3852_v20 = vsel %vm2494_vm7, %v3790_v22, %v3851_v50  ;;  %v3729_v44 = vperm.slane %v3600_v52, 0  ;;  %v3730_v60 = vperm.slane %v3601_v19, 0  ;;  %v3848_v30 = vsel %vm2500_vm11, %v3785_v49, %v3847_v47 }
 0x494   : > { %v3736_v51 = vperm.slane %v3607_v16, 0  ;;  %v3799_v54 = vunpack.c.l.b16 %v3735_v4  ;;  %v3293_v42 = vmax.f32 %v3291_v26, %v3292_v7  ;;  %v3300_v63 = vmax.f32 %v3298_v32, %v3299_v29 }
 0x495   : > { %v3859_v14 = vsel %vm2494_vm7, %v3798_v1, %v3858_v25  ;;  %v3792_v13 = vunpack.c.l.b16 %v3728_v5  ;;  %v3853_v48 = vsel %vm2496_vm8, %v3791_v18, %v3852_v20  ;;  %v3307_v55 = vmax.f32 %v3305_v38, %v3306_v57 }
 0x496   : > { %v3608_v33 = vpack.c.bf16 %v3286_v2, %v3286_v2  ;;  %v3793_v59 = vunpack.c.l.b16 %v3729_v44  ;;  %v3794_v15 = vunpack.c.l.b16 %v3730_v60  ;;  %v13096_v43 = vsel %vm16748_vm12, %v3786_v35, %v3848_v30  ;;  %vm16751_vm12 = vmmov %vm16749_vm3 }
 0x497   : > { %v3800_v49 = vunpack.c.l.b16 %v3736_v51  ;;  %v3860_v45 = vsel %vm2496_vm8, %v3799_v54, %v3859_v14  ;;  %v3609_v21 = vpack.c.bf16 %v3293_v42, %v3293_v42  ;;  %v3610_v53 = vpack.c.bf16 %v3300_v63, %v3300_v63 }
 0x498   : > { %v3611_v10 = vpack.c.bf16 %v3307_v55, %v3307_v55  ;;  %v13100_v46 = vperm.slane %v3608_v33, 0  ;;  %v3854_v58 = vsel %vm2498_vm10, %v3792_v13, %v3853_v48 }
 0x499   : > { %v3855_v61 = vsel %vm2500_vm11, %v3793_v59, %v3854_v58  ;;  %v3861_v56 = vsel %vm2498_vm10, %v3800_v49, %v3860_v45  ;;  %v13108_v3 = vperm.slane %v3609_v21, 0  ;;  %v13110_v9 = vperm.slane %v3610_v53, 0 }
 0x49a   : > { %v13113_v50 = vperm.slane %v3611_v10, 0  ;;  %v3801_v52 = vunpack.c.l.b16 %v13100_v46  ;;  %v3856_v16 = vsel %vm16749_vm3, %v3794_v15, %v3855_v61  ;;  %vm16752_vm3 = vsmask.f32 6400 }
 0x49b   : > { %v3900_v14 = vpack.c.b16 %v3856_v16, %v13096_v43  ;;  %v3802_v33 = vunpack.c.l.b16 %v13108_v3  ;;  %v3803_v58 = vunpack.c.l.b16 %v13110_v9 }
 0x4a1   : > { %v2967_v31 = vpop.f32.mrf.mxu0 }
 0x4a2   : > { %v3001_v40 = vadd.f32 %v13002_v62, %v2967_v31 }
 0x4a4   : > { %v3017_v37 = vmax.f32 %v3001_v40, 0.0 }
 0x4a6   : > { %v3061_v17 = vrot.slane %v3017_v37, 2  ;;  %v3062_v8 = vrot.slane %v3017_v37, 4  ;;  %v3063_v6 = vrot.slane %v3017_v37, 6  ;;  %v3308_v23 = vsel %vm3139_vm1, %v3017_v37, -inf }
 0x4a7   : > { %v3309_v41 = vrot.slane %v3308_v23, 4 }
 0x4a8   : > { %v3315_v12 = vsel %vm3139_vm1, %v3061_v17, -inf  ;;  %v3322_v35 = vsel %vm3139_vm1, %v3062_v8, -inf  ;;  %v3329_v39 = vsel %vm3139_vm1, %v3063_v6, -inf }
 0x4a9   : > { %v3310_v34 = vmax.f32 %v3308_v23, %v3309_v41  ;;  %v3316_v11 = vrot.slane %v3315_v12, 4  ;;  %v3323_v26 = vrot.slane %v3322_v35, 4  ;;  %v3330_v32 = vrot.slane %v3329_v39, 4  ;;  %v2969_v36 = vpop.f32.mrf.mxu0 }
 0x4aa   : > { %v3002_v24 = vadd.f32 %v13002_v62, %v2969_v36  ;;  %v13124_v23 = vsel %vm2621_vm13, 0, %v3900_v14 }
 0x4ab   : > { %v3311_v28 = vrot.slane %v3310_v34, 2  ;;  %v3317_v0 = vmax.f32 %v3315_v12, %v3316_v11  ;;  %v3324_v38 = vmax.f32 %v3322_v35, %v3323_v26  ;;  %v3331_v22 = vmax.f32 %v3329_v39, %v3330_v32 }
 0x4ac   : > { %v3018_v19 = vmax.f32 %v3002_v24, 0.0  ;;  %v3804_v12 = vunpack.c.l.b16 %v13113_v50  ;;  %v13129_v35 = vsel %vm2500_vm11, %v3801_v52, %v3861_v56  ;;  %v3953_v52 = vrot.slane %v13124_v23, 1 }
 0x4ad   : > { %v3312_v4 = vmax.f32 %v3310_v34, %v3311_v28  ;;  %v3318_v7 = vrot.slane %v3317_v0, 2  ;;  %v3325_v29 = vrot.slane %v3324_v38, 2  ;;  %v3332_v5 = vrot.slane %v3331_v22, 2 }
 0x4ae   : > { %v3064_v18 = vrot.slane %v3018_v19, 2  ;;  %v3065_v1 = vrot.slane %v3018_v19, 4  ;;  %v3066_v27 = vrot.slane %v3018_v19, 6  ;;  %v3336_v25 = vsel %vm3139_vm1, %v3018_v19, -inf }
 0x4af   : > { %v3313_v2 = vrot.slane %v3312_v4, 1  ;;  %v3319_v57 = vmax.f32 %v3317_v0, %v3318_v7  ;;  %v3326_v47 = vmax.f32 %v3324_v38, %v3325_v29  ;;  %v3333_v20 = vmax.f32 %v3331_v22, %v3332_v5 }
 0x4b0   : > { %v3337_v44 = vrot.slane %v3336_v25, 4  ;;  %v3343_v60 = vsel %vm3139_vm1, %v3064_v18, -inf  ;;  %v3350_v30 = vsel %vm3139_vm1, %v3065_v1, -inf  ;;  %v3357_v51 = vsel %vm3139_vm1, %v3066_v27, -inf }
 0x4b1   : > { %v3314_v54 = vmax.f32 %v3312_v4, %v3313_v2  ;;  %v3320_v42 = vrot.slane %v3319_v57, 1  ;;  %v3327_v63 = vrot.slane %v3326_v47, 1  ;;  %v2972_v31 = vpop.f32.mrf.mxu0  ;;  %v3344_v13 = vrot.slane %v3343_v60, 4 }
 0x4b2   : > { %v3338_v40 = vmax.f32 %v3336_v25, %v3337_v44  ;;  %v3351_v48 = vrot.slane %v3350_v30, 4  ;;  %v3358_v55 = vrot.slane %v3357_v51, 4  ;;  %v3334_v15 = vrot.slane %v3333_v20, 1 }
 0x4b3   : > { %v3321_v59 = vmax.f32 %v3319_v57, %v3320_v42  ;;  %v3612_v37 = vpack.c.bf16 %v3314_v54, %v3314_v54  ;;  %v3345_v45 = vmax.f32 %v3343_v60, %v3344_v13  ;;  %v3328_v17 = vmax.f32 %v3326_v47, %v3327_v63 }
 0x4b4   : > { %v3339_v49 = vrot.slane %v3338_v40, 2  ;;  %v3352_v21 = vmax.f32 %v3350_v30, %v3351_v48  ;;  %v3359_v53 = vmax.f32 %v3357_v51, %v3358_v55  ;;  %v3335_v39 = vmax.f32 %v3333_v20, %v3334_v15 }
 0x4b5   : > { %v3613_v8 = vpack.c.bf16 %v3321_v59, %v3321_v59  ;;  %v3741_v6 = vperm.slane %v3612_v37, 0  ;;  %v3346_v10 = vrot.slane %v3345_v45, 2  ;;  %v3614_v32 = vpack.c.bf16 %v3328_v17, %v3328_v17 }
 0x4b6   : > { %v3340_v43 = vmax.f32 %v3338_v40, %v3339_v49  ;;  %v3353_v46 = vrot.slane %v3352_v21, 2  ;;  %v3360_v41 = vrot.slane %v3359_v53, 2  ;;  %v3911_v0 = vshll.u32 %v13124_v23, 16 }
 0x4b7   : > { %v3347_v34 = vmax.f32 %v3345_v45, %v3346_v10  ;;  %v3742_v36 = vperm.slane %v3613_v8, 0  ;;  %v3805_v24 = vunpack.c.l.b16 %v3741_v6  ;;  %v3864_v50 = vsel %vm2504_vm6, %v3804_v12, %v3803_v58 }
 0x4b8   : > { %v3341_v61 = vrot.slane %v3340_v43, 1  ;;  %v3354_v11 = vmax.f32 %v3352_v21, %v3353_v46  ;;  %v3361_v26 = vmax.f32 %v3359_v53, %v3360_v41  ;;  %v3003_v56 = vadd.f32 %v13002_v62, %v2972_v31 }
 0x4b9   : > { %v2974_v28 = vpop.f32.mrf.mxu0  ;;  %v3348_v22 = vrot.slane %v3347_v34, 1  ;;  %v3909_v16 = vshrl.u32 %v13124_v23, 16  ;;  %v3615_v4 = vpack.c.bf16 %v3335_v39, %v3335_v39  ;;  %v13137_v18 = vperm.slane %v3614_v32, 0 }
 0x4ba   : > { %v3342_v38 = vmax.f32 %v3340_v43, %v3341_v61  ;;  %v3355_v19 = vrot.slane %v3354_v11, 1  ;;  %v3362_v9 = vrot.slane %v3361_v26, 1  ;;  %v3004_v5 = vadd.f32 %v13002_v62, %v2974_v28 }
 0x4bb   : > { %v3019_v1 = vmax.f32 %v3003_v56, 0.0  ;;  %v13141_v27 = vrot.slane %v3911_v0, 1  ;;  %v3999_v25 = vrot.slane %v13124_v23, 2  ;;  %v3806_v2 = vunpack.c.l.b16 %v3742_v36 }
 0x4bc   : > { %v3356_v7 = vmax.f32 %v3354_v11, %v3355_v19  ;;  %v3363_v29 = vmax.f32 %v3361_v26, %v3362_v9  ;;  %v3865_v57 = vsel %vm2506_vm9, %v3805_v24, %v3864_v50  ;;  %v13145_v47 = vmax.f32 %v3347_v34, %v3348_v22 }
 0x4bd   : > { %v3616_v20 = vpack.c.bf16 %v3342_v38, %v3342_v38  ;;  %v3067_v60 = vrot.slane %v3019_v1, 2  ;;  %v3068_v30 = vrot.slane %v3019_v1, 4  ;;  %v3069_v51 = vrot.slane %v3019_v1, 6 }
 0x4be   : > { %v3618_v44 = vpack.c.bf16 %v3356_v7, %v3356_v7  ;;  %v13147_v54 = vperm.slane %v3615_v4, 0  ;;  %v3619_v42 = vpack.c.bf16 %v3363_v29, %v3363_v29  ;;  %v3364_v63 = vsel %vm3139_vm1, %v3019_v1, -inf }
 0x4bf   : > { %v3020_v31 = vmax.f32 %v3004_v5, 0.0  ;;  %v3807_v14 = vunpack.c.l.b16 %v13137_v18  ;;  %v3365_v40 = vrot.slane %v3364_v63, 4  ;;  %v3371_v13 = vsel %vm3139_vm1, %v3067_v60, -inf }
 0x4c0   : > { %v3378_v48 = vsel %vm3139_vm1, %v3068_v30, -inf  ;;  %v3866_v55 = vsel %vm2494_vm7, %v3806_v2, %v3865_v57  ;;  %v3617_v59 = vpack.c.bf16 %v13145_v47, %v13145_v47  ;;  %v13156_v15 = vperm.slane %v3616_v20, 0 }
 0x4c1   : > { %v3372_v37 = vrot.slane %v3371_v13, 4  ;;  %v13158_v49 = vperm.slane %v3618_v44, 0  ;;  %v3366_v45 = vmax.f32 %v3364_v63, %v3365_v40  ;;  %v3379_v21 = vrot.slane %v3378_v48, 4  ;;  %v2977_v30 = vpop.f32.mrf.mxu0 }
 0x4c2   : > { %v3385_v53 = vsel %vm3139_vm1, %v3069_v51, -inf  ;;  %v13161_v17 = vperm.slane %v3619_v42, 0  ;;  %v3070_v43 = vrot.slane %v3020_v31, 2  ;;  %v3071_v41 = vrot.slane %v3020_v31, 4 }
 0x4c3   : > { %v3373_v8 = vmax.f32 %v3371_v13, %v3372_v37  ;;  %v3386_v6 = vrot.slane %v3385_v53, 4  ;;  %v3367_v10 = vrot.slane %v3366_v45, 2  ;;  %v3380_v46 = vmax.f32 %v3378_v48, %v3379_v21 }
 0x4c4   : > { %v3072_v58 = vrot.slane %v3020_v31, 6  ;;  %v3392_v61 = vsel %vm3139_vm1, %v3020_v31, -inf  ;;  %v3399_v34 = vsel %vm3139_vm1, %v3070_v43, -inf  ;;  %v3406_v38 = vsel %vm3139_vm1, %v3071_v41, -inf }
 0x4c5   : > { %v3374_v12 = vrot.slane %v3373_v8, 2  ;;  %v3387_v39 = vmax.f32 %v3385_v53, %v3386_v6  ;;  %v3368_v11 = vmax.f32 %v3366_v45, %v3367_v10  ;;  %v3381_v26 = vrot.slane %v3380_v46, 2 }
 0x4c6   : > { %v3393_v32 = vrot.slane %v3392_v61, 4  ;;  %v3400_v36 = vrot.slane %v3399_v34, 4  ;;  %v3413_v22 = vsel %vm3139_vm1, %v3072_v58, -inf  ;;  %v3407_v29 = vrot.slane %v3406_v38, 4 }
 0x4c7   : > { %v3375_v24 = vmax.f32 %v3373_v8, %v3374_v12  ;;  %v3388_v28 = vrot.slane %v3387_v39, 2  ;;  %v3369_v19 = vrot.slane %v3368_v11, 1  ;;  %v3382_v9 = vmax.f32 %v3380_v46, %v3381_v26 }
 0x4c8   : > { %v3394_v50 = vmax.f32 %v3392_v61, %v3393_v32  ;;  %v3401_v56 = vmax.f32 %v3399_v34, %v3400_v36  ;;  %v3414_v5 = vrot.slane %v3413_v22, 4  ;;  %v3408_v44 = vmax.f32 %v3406_v38, %v3407_v29 }
 0x4c9   : > { %v3376_v4 = vrot.slane %v3375_v24, 1  ;;  %v3389_v7 = vmax.f32 %v3387_v39, %v3388_v28  ;;  %v3370_v18 = vmax.f32 %v3368_v11, %v3369_v19  ;;  %v3383_v1 = vrot.slane %v3382_v9, 1 }
 0x4ca   : > { %v3395_v2 = vrot.slane %v3394_v50, 2  ;;  %v3402_v57 = vrot.slane %v3401_v56, 2  ;;  %v3415_v60 = vmax.f32 %v3413_v22, %v3414_v5  ;;  %v3409_v48 = vrot.slane %v3408_v44, 2 }
 0x4cb   : > { %v3377_v47 = vmax.f32 %v3375_v24, %v3376_v4  ;;  %v3390_v20 = vrot.slane %v3389_v7, 1  ;;  %v3384_v51 = vmax.f32 %v3382_v9, %v3383_v1  ;;  %v3620_v42 = vpack.c.bf16 %v3370_v18, %v3370_v18 }
 0x4cc   : > { %v3396_v63 = vmax.f32 %v3394_v50, %v3395_v2  ;;  %v3403_v31 = vmax.f32 %v3401_v56, %v3402_v57  ;;  %v3416_v37 = vrot.slane %v3415_v60, 2  ;;  %v3867_v45 = vsel %vm2496_vm8, %v3807_v14, %v3866_v55  ;;  %v2979_v56 = vpop.f32.mrf.mxu0  ;;  %v13211_v57 = vld [vmem:[%s16747_s4] ss:$0 sm:$0xff] }
 0x4cd   : > { %v3391_v40 = vmax.f32 %v3389_v7, %v3390_v20  ;;  %v3621_v13 = vpack.c.bf16 %v3377_v47, %v3377_v47  ;;  %v3746_v21 = vperm.slane %v3617_v59, 0  ;;  %v3809_v53 = vunpack.c.l.b16 %v13156_v15 }
 0x4ce   : > { %v3622_v8 = vpack.c.bf16 %v3384_v51, %v3384_v51  ;;  %v3749_v6 = vperm.slane %v3620_v42, 0  ;;  %v3397_v43 = vrot.slane %v3396_v63, 1  ;;  %v3410_v10 = vmax.f32 %v3408_v44, %v3409_v48 }
 0x4cf   : > { %v3417_v46 = vmax.f32 %v3415_v60, %v3416_v37  ;;  %v3808_v41 = vunpack.c.l.b16 %v13147_v54  ;;  %v3811_v58 = vunpack.c.l.b16 %v13158_v49  ;;  %v3812_v12 = vunpack.c.l.b16 %v13161_v17 }
 0x4d0   : > { %v3404_v39 = vrot.slane %v3403_v31, 1  ;;  %v3623_v61 = vpack.c.bf16 %v3391_v40, %v3391_v40  ;;  %v3750_v34 = vperm.slane %v3621_v13, 0  ;;  %v3411_v11 = vrot.slane %v3410_v10, 1 }
 0x4d1   : > { %v3418_v26 = vrot.slane %v3417_v46, 1  ;;  %v3868_v14 = vsel %vm2498_vm10, %v3808_v41, %v3867_v45  ;;  %v3810_v55 = vunpack.c.l.b16 %v3746_v21  ;;  %v13173_v59 = vperm.slane %v3622_v8, 0 }
 0x4d2   : > { %v13177_v15 = vrot.slane %v3909_v16, 1  ;;  %v3869_v54 = vsel %vm2500_vm11, %v3809_v53, %v3868_v14  ;;  %v3813_v32 = vunpack.c.l.b16 %v3749_v6  ;;  %v13180_v49 = vmax.f32 %v3396_v63, %v3397_v43 }
 0x4d3   : > { %v3412_v17 = vmax.f32 %v3410_v10, %v3411_v11  ;;  %v3871_v36 = vsel %vm2504_vm6, %v3812_v12, %v3811_v58  ;;  %v3005_v24 = vadd.f32 %v13002_v62, %v2977_v30  ;;  %v13187_v28 = vor.u32 %v13141_v27, %v3909_v16 }
 0x4d4   : > { %v13191_v38 = vrot.slane %v3911_v0, 2  ;;  %v13193_v22 = vperm.slane %v3623_v61, 0  ;;  %v3814_v19 = vunpack.c.l.b16 %v3750_v34  ;;  %v13195_v9 = vmax.f32 %v3403_v31, %v3404_v39 }
 0x4d5   : > { %v3419_v50 = vmax.f32 %v3417_v46, %v3418_v26  ;;  %v3815_v4 = vunpack.c.l.b16 %v13173_v59  ;;  %v3021_v7 = vmax.f32 %v3005_v24, 0.0  ;;  %v3863_v62 = vsel %vm16750_vm5, %v3802_v33, %v13129_v35 }
 0x4d6   : > { %v3870_v16 = vsel %vm16751_vm12, %v3810_v55, %v3869_v54  ;;  %v3872_v0 = vsel %vm2506_vm9, %v3813_v32, %v3871_v36  ;;  %v3624_v27 = vpack.c.bf16 %v13180_v49, %v13180_v49  ;;  %v3626_v29 = vpack.c.bf16 %v3412_v17, %v3412_v17  ;;  %vm16753_vm12 = vmmov %vm16750_vm5 }
 0x4d7   : > { %v13206_v5 = vpack.c.b16 %v3870_v16, %v3863_v62  ;;  %v3073_v18 = vrot.slane %v3021_v7, 2  ;;  %v3074_v1 = vrot.slane %v3021_v7, 4  ;;  %v3075_v2 = vrot.slane %v3021_v7, 6 }
 0x4d8   : > { %v3006_v3 = vadd.f32 %v13211_v57, %v2979_v56  ;;  %v3625_v33 = vpack.c.bf16 %v13195_v9, %v13195_v9  ;;  %v3627_v35 = vpack.c.bf16 %v3419_v50, %v3419_v50  ;;  %v3420_v47 = vsel %vm3139_vm1, %v3021_v7, -inf }
 0x4d9   : > { %v3954_v20 = vrot.slane %v13206_v5, 1  ;;  %v3421_v44 = vrot.slane %v3420_v47, 4  ;;  %v3427_v60 = vsel %vm3139_vm1, %v3073_v18, -inf  ;;  %v3434_v30 = vsel %vm3139_vm1, %v3074_v1, -inf  ;;  %v2982_v1 = vpop.f32.mrf.mxu0 }
 0x4da   : > { %v3441_v51 = vsel %vm3139_vm1, %v3075_v2, -inf  ;;  %v13222_v42 = vsel %vm2494_vm7, %v3814_v19, %v3872_v0  ;;  %v3428_v63 = vrot.slane %v3427_v60, 4  ;;  %v3435_v31 = vrot.slane %v3434_v30, 4 }
 0x4db   : > { %v3442_v40 = vrot.slane %v3441_v51, 4  ;;  %v13224_v13 = vperm.slane %v3626_v29, 0  ;;  %v3422_v48 = vmax.f32 %v3420_v47, %v3421_v44  ;;  %v3955_v37 = vsel %vm2712_vm14, %v3953_v52, %v3954_v20 }
 0x4dc   : > { %v3022_v45 = vmax.f32 %v3006_v3, 0.0  ;;  %v13231_v21 = vperm.slane %v3627_v35, 0  ;;  %v3429_v53 = vmax.f32 %v3427_v60, %v3428_v63  ;;  %v3436_v8 = vmax.f32 %v3434_v30, %v3435_v31  ;;  %3962 = vrot.lane.b32.xlu0 %v3955_v37, %s11901_s0 }
 0x4dd   : > { %v3443_v6 = vmax.f32 %v3441_v51, %v3442_v40  ;;  %v3423_v43 = vrot.slane %v3422_v48, 2  ;;  %v13263_v49 = vperm.slane %v3625_v33, 0 }
 0x4de   : > { %v3076_v10 = vrot.slane %v3022_v45, 2  ;;  %v3077_v46 = vrot.slane %v3022_v45, 4  ;;  %v3078_v41 = vrot.slane %v3022_v45, 6  ;;  %v3430_v58 = vrot.slane %v3429_v53, 2 }
 0x4df   : > { %v3437_v12 = vrot.slane %v3436_v8, 2  ;;  %v3444_v39 = vrot.slane %v3443_v6, 2  ;;  %v3448_v61 = vsel %vm3139_vm1, %v3022_v45, -inf  ;;  %v3424_v34 = vmax.f32 %v3422_v48, %v3423_v43 }
 0x4e0   : > { %v3449_v11 = vrot.slane %v3448_v61, 4  ;;  %v3455_v52 = vsel %vm3139_vm1, %v3076_v10, -inf  ;;  %v3462_v26 = vsel %vm3139_vm1, %v3077_v46, -inf  ;;  %v3431_v14 = vmax.f32 %v3429_v53, %v3430_v58 }
 0x4e1   : > { %v3438_v55 = vmax.f32 %v3436_v8, %v3437_v12  ;;  %v3445_v54 = vmax.f32 %v3443_v6, %v3444_v39  ;;  %v3456_v32 = vrot.slane %v3455_v52, 4  ;;  %v3425_v17 = vrot.slane %v3424_v34, 1  ;;  %v2984_v9 = vpop.f32.mrf.mxu0 }
 0x4e2   : > { %v3450_v36 = vmax.f32 %v3448_v61, %v3449_v11  ;;  %v3463_v24 = vrot.slane %v3462_v26, 4  ;;  %v3469_v19 = vsel %vm3139_vm1, %v3078_v41, -inf  ;;  %v3432_v50 = vrot.slane %v3431_v14, 1 }
 0x4e3   : > { %v3439_v56 = vrot.slane %v3438_v55, 1  ;;  %v3446_v7 = vrot.slane %v3445_v54, 1  ;;  %v3457_v62 = vmax.f32 %v3455_v52, %v3456_v32  ;;  %v3426_v16 = vmax.f32 %v3424_v34, %v3425_v17 }
 0x4e4   : > { %v3451_v0 = vrot.slane %v3450_v36, 2  ;;  %v3464_v29 = vmax.f32 %v3462_v26, %v3463_v24  ;;  %v3470_v18 = vrot.slane %v3469_v19, 4  ;;  %v3433_v2 = vmax.f32 %v3431_v14, %v3432_v50 }
 0x4e5   : > { %v3440_v3 = vmax.f32 %v3438_v55, %v3439_v56  ;;  %v3447_v35 = vmax.f32 %v3445_v54, %v3446_v7  ;;  %v3458_v47 = vrot.slane %v3457_v62, 2  ;;  %v3628_v44 = vpack.c.bf16 %v3426_v16, %v3426_v16 }
 0x4e6   : > { %v3452_v60 = vmax.f32 %v3450_v36, %v3451_v0  ;;  %v3465_v30 = vrot.slane %v3464_v29, 2  ;;  %v3471_v51 = vmax.f32 %v3469_v19, %v3470_v18  ;;  %v3629_v63 = vpack.c.bf16 %v3433_v2, %v3433_v2 }
 0x4e7   : > { %v3630_v31 = vpack.c.bf16 %v3440_v3, %v3440_v3  ;;  %v3631_v40 = vpack.c.bf16 %v3447_v35, %v3447_v35  ;;  %v3459_v48 = vmax.f32 %v3457_v62, %v3458_v47  ;;  %v3757_v37 = vperm.slane %v3628_v44, 0 }
 0x4e8   : > { %v3453_v45 = vrot.slane %v3452_v60, 1  ;;  %v3466_v53 = vmax.f32 %v3464_v29, %v3465_v30  ;;  %v3472_v8 = vrot.slane %v3471_v51, 2  ;;  %v3819_v6 = vunpack.c.l.b16 %v13224_v13 }
 0x4e9   : > { %v3820_v43 = vunpack.c.l.b16 %v13231_v21  ;;  %v3916_v10 = vshll.u32 %v13206_v5, 16  ;;  %v4000_v46 = vrot.slane %v13206_v5, 2  ;;  %v3758_v41 = vperm.slane %v3629_v63, 0 }
 0x4ea   : > { %v3460_v58 = vrot.slane %v3459_v48, 1  ;;  %v3467_v12 = vrot.slane %v3466_v53, 1  ;;  %v3473_v39 = vmax.f32 %v3471_v51, %v3472_v8  ;;  %v3816_v61 = vunpack.c.l.b16 %v13193_v22 }
 0x4eb   : > { %v13246_v34 = vperm.slane %v3624_v27, 0  ;;  %v3821_v11 = vunpack.c.l.b16 %v3757_v37  ;;  %v3972_v13 = vor.u32 %v13191_v38, %v13177_v15  ;;  %v13254_v21 = vsel %vm2496_vm8, %v3815_v4, %v13222_v42 }
 0x4ec   : > { %v13256_v52 = vperm.slane %v3630_v31, 0  ;;  %v13258_v26 = vperm.slane %v3631_v40, 0  ;;  %v3454_v14 = vmax.f32 %v3452_v60, %v3453_v45  ;;  %v3474_v27 = vrot.slane %v3473_v39, 1 }
 0x4ed   : > { %v13265_v55 = vrot.slane %v3916_v10, 1  ;;  %v4001_v59 = vsel %vm2800_vm15, %v3999_v25, %v4000_v46  ;;  %v3822_v15 = vunpack.c.l.b16 %v3758_v41  ;;  %v3878_v38 = vsel %vm2504_vm6, %v3820_v43, %v3819_v6 }
 0x4ee   : > { %v13273_v4 = vmax.f32 %v3459_v48, %v3460_v58  ;;  %v3468_v42 = vmax.f32 %v3466_v53, %v3467_v12  ;;  %4008 = vrot.lane.b32.xlu0 %v4001_v59, %s16683_s27  ;;  %v3817_v33 = vunpack.c.l.b16 %v13246_v34  ;;  %v3879_v54 = vsel %vm2506_vm9, %v3821_v11, %v3878_v38 }
 0x4ef   : > { %v3919_v32 = vsel %vm2627_vm0, %v13187_v28, %v13265_v55  ;;  %v3007_v25 = vadd.f32 %v13211_v57, %v2982_v1  ;;  %v3823_v17 = vunpack.c.l.b16 %v13256_v52  ;;  %v3824_v36 = vunpack.c.l.b16 %v13258_v26 }
 0x4f0   : > { %v3632_v24 = vpack.c.bf16 %v3454_v14, %v3454_v14  ;;  %3943 = vrot.lane.b32.xlu1 %v3919_v32, %s11900_s22  ;;  %v3920_v19 = vshrl.u32 %v13206_v5, 16  ;;  %v3475_v50 = vmax.f32 %v3473_v39, %v3474_v27  ;;  %v3974_v7 = vrot.slane %v3916_v10, 2 }
 0x4f1   : > { %v3023_v56 = vmax.f32 %v3007_v25, 0.0  ;;  %v3008_v62 = vadd.f32 %v13211_v57, %v2984_v9  ;;  %v13288_v16 = vsel %vm2494_vm7, %v3822_v15, %v3879_v54  ;;  %v3633_v28 = vpack.c.bf16 %v13273_v4, %v13273_v4 }
 0x4f2   : > { %v3634_v0 = vpack.c.bf16 %v3468_v42, %v3468_v42  ;;  %v3973_v29 = vrot.slane %v3920_v19, 1  ;;  %v13295_v35 = vperm.slane %v3632_v24, 0  ;;  %v3635_v30 = vpack.c.bf16 %v3475_v50, %v3475_v50 }
 0x4f3   : > { %v3079_v18 = vrot.slane %v3023_v56, 2  ;;  %v3080_v1 = vrot.slane %v3023_v56, 4  ;;  %v3081_v2 = vrot.slane %v3023_v56, 6  ;;  %v3476_v3 = vsel %vm3139_vm1, %v3023_v56, -inf }
 0x4f4   : > { %v3477_v47 = vrot.slane %v3476_v3, 4  ;;  %v13297_v44 = vor.u32 %v3974_v7, %v3973_v29  ;;  %v3024_v60 = vmax.f32 %v3008_v62, 0.0  ;;  %v13302_v53 = vperm.slane %v3634_v0, 0 }
 0x4f5   : > { %v3483_v51 = vsel %vm3139_vm1, %v3079_v18, -inf  ;;  %v3490_v63 = vsel %vm3139_vm1, %v3080_v1, -inf  ;;  %v3497_v31 = vsel %vm3139_vm1, %v3081_v2, -inf  ;;  %v3764_v18 = vperm.slane %v3635_v30, 0 }
 0x4f6   : > { %v3478_v40 = vmax.f32 %v3476_v3, %v3477_v47  ;;  %v3484_v48 = vrot.slane %v3483_v51, 4  ;;  %v3491_v37 = vrot.slane %v3490_v63, 4  ;;  %v3498_v45 = vrot.slane %v3497_v31, 4 }
 0x4f7   : > { %v3976_v8 = vsel %vm16752_vm3, %v3972_v13, %v13297_v44  ;;  %v3082_v6 = vrot.slane %v3024_v60, 2  ;;  %v3083_v43 = vrot.slane %v3024_v60, 4  ;;  %v3084_v39 = vrot.slane %v3024_v60, 6 }
 0x4f8   : > { %v3479_v10 = vrot.slane %v3478_v40, 2  ;;  %v3485_v41 = vmax.f32 %v3483_v51, %v3484_v48  ;;  %v3492_v58 = vmax.f32 %v3490_v63, %v3491_v37  ;;  %v3499_v12 = vmax.f32 %v3497_v31, %v3498_v45  ;;  %3991 = vrot.lane.b32.xlu1 %v3976_v8, %s11905_s28 }
 0x4f9   : > { %v3504_v11 = vsel %vm3139_vm1, %v3024_v60, -inf  ;;  %v3511_v14 = vsel %vm3139_vm1, %v3082_v6, -inf  ;;  %v3518_v27 = vsel %vm3139_vm1, %v3083_v43, -inf  ;;  %v3525_v32 = vsel %vm3139_vm1, %v3084_v39, -inf }
 0x4fa   : > { %v3480_v59 = vmax.f32 %v3478_v40, %v3479_v10  ;;  %v3486_v15 = vrot.slane %v3485_v41, 2  ;;  %v3493_v38 = vrot.slane %v3492_v58, 2  ;;  %v3500_v13 = vrot.slane %v3499_v12, 2  ;;  %v2987_v10 = vpop.f32.mrf.mxu0 }
 0x4fb   : > { %v3505_v42 = vrot.slane %v3504_v11, 4  ;;  %v3512_v9 = vrot.slane %v3511_v14, 4  ;;  %v3519_v54 = vrot.slane %v3518_v27, 4  ;;  %v3526_v29 = vrot.slane %v3525_v32, 4 }
 0x4fc   : > { %v3481_v25 = vrot.slane %v3480_v59, 1  ;;  %v3487_v24 = vmax.f32 %v3485_v41, %v3486_v15  ;;  %v3494_v50 = vmax.f32 %v3492_v58, %v3493_v38  ;;  %v3501_v56 = vmax.f32 %v3499_v12, %v3500_v13 }
 0x4fd   : > { %v3506_v7 = vmax.f32 %v3504_v11, %v3505_v42  ;;  %v3513_v62 = vmax.f32 %v3511_v14, %v3512_v9  ;;  %v3520_v0 = vmax.f32 %v3518_v27, %v3519_v54  ;;  %v3527_v63 = vmax.f32 %v3525_v32, %v3526_v29 }
 0x4fe   : > { %v3482_v1 = vmax.f32 %v3480_v59, %v3481_v25  ;;  %v3488_v2 = vrot.slane %v3487_v24, 1  ;;  %v3495_v3 = vrot.slane %v3494_v50, 1  ;;  %v3502_v48 = vrot.slane %v3501_v56, 1 }
 0x4ff   : > { %v3507_v47 = vrot.slane %v3506_v7, 2  ;;  %v3514_v60 = vrot.slane %v3513_v62, 2  ;;  %v3521_v51 = vrot.slane %v3520_v0, 2  ;;  %v3528_v43 = vrot.slane %v3527_v63, 2 }
 0x500   : > { %v3489_v31 = vmax.f32 %v3487_v24, %v3488_v2  ;;  %v3496_v40 = vmax.f32 %v3494_v50, %v3495_v3  ;;  %v3636_v37 = vpack.c.bf16 %v3482_v1, %v3482_v1  ;;  %v3881_v30 = vsel %vm2496_vm8, %v3823_v17, %v13288_v16 }
 0x501   : > { %v3508_v45 = vmax.f32 %v3506_v7, %v3507_v47  ;;  %v3515_v8 = vmax.f32 %v3513_v62, %v3514_v60  ;;  %v3522_v6 = vmax.f32 %v3520_v0, %v3521_v51  ;;  %v3762_v41 = vperm.slane %v3633_v28, 0 }
 0x502   : > { %v3825_v58 = vunpack.c.l.b16 %v13295_v35  ;;  %v3637_v12 = vpack.c.bf16 %v3489_v31, %v3489_v31  ;;  %v3638_v39 = vpack.c.bf16 %v3496_v40, %v3496_v40  ;;  %v3765_v11 = vperm.slane %v3636_v37, 0 }
 0x503   : > { %v3523_v14 = vrot.slane %v3522_v6, 1  ;;  %v3529_v27 = vmax.f32 %v3527_v63, %v3528_v43  ;;  %v3827_v59 = vunpack.c.l.b16 %v13302_v53  ;;  %v3828_v15 = vunpack.c.l.b16 %v3764_v18 }
 0x504   : > { %v3509_v38 = vrot.slane %v3508_v45, 1  ;;  %v3009_v13 = vadd.f32 %v13211_v57, %v2987_v10  ;;  %v13321_v52 = vmax.f32 %v3501_v56, %v3502_v48  ;;  %v3516_v17 = vrot.slane %v3515_v8, 1 }
 0x505   : > { %v3524_v16 = vmax.f32 %v3522_v6, %v3523_v14  ;;  %v3530_v42 = vrot.slane %v3529_v27, 1  ;;  %v3875_v4 = vsel %vm2498_vm10, %v3816_v61, %v13254_v21  ;;  %v3818_v28 = vunpack.c.l.b16 %v13263_v49 }
 0x506   : > { %v3882_v35 = vsel %vm2498_vm10, %v3824_v36, %v3881_v30  ;;  %v13331_v53 = vperm.slane %v3637_v12, 0  ;;  %v3826_v9 = vunpack.c.l.b16 %v3762_v41  ;;  %v13333_v54 = vperm.slane %v3638_v39, 0 }
 0x507   : > { %v3829_v32 = vunpack.c.l.b16 %v3765_v11  ;;  %v3531_v25 = vmax.f32 %v3529_v27, %v3530_v42  ;;  %v3876_v24 = vsel %vm2500_vm11, %v3817_v33, %v3875_v4  ;;  %v3883_v22 = vsel %vm2500_vm11, %v3825_v58, %v3882_v35 }
 0x508   : > { %v13339_v61 = vmax.f32 %v3508_v45, %v3509_v38  ;;  %v3025_v21 = vmax.f32 %v3009_v13, 0.0  ;;  %v3639_v26 = vpack.c.bf16 %v13321_v52, %v13321_v52  ;;  %v3885_v49 = vsel %vm2504_vm6, %v3828_v15, %v3827_v59 }
 0x509   : > { %v13344_v36 = vmax.f32 %v3515_v8, %v3516_v17  ;;  %v3642_v50 = vpack.c.bf16 %v3524_v16, %v3524_v16  ;;  %v3830_v56 = vunpack.c.l.b16 %v13331_v53  ;;  %v3643_v7 = vpack.c.bf16 %v3531_v25, %v3531_v25  ;;  %v2989_v8 = vpop.f32.mrf.mxu0 }
 0x50a   : > { %v3085_v62 = vrot.slane %v3025_v21, 2  ;;  %v3086_v34 = vrot.slane %v3025_v21, 4  ;;  %v3831_v33 = vunpack.c.l.b16 %v13333_v54  ;;  %v13349_v0 = vsel %vm2506_vm9, %v3829_v32, %v3885_v49 }
 0x50b   : > { %v3087_v29 = vrot.slane %v3025_v21, 6  ;;  %v3884_v18 = vsel %vm16750_vm5, %v3826_v9, %v3883_v22  ;;  %v3640_v1 = vpack.c.bf16 %v13339_v61, %v13339_v61  ;;  %v3532_v2 = vsel %vm3139_vm1, %v3025_v21, -inf }
 0x50c   : > { %v3539_v3 = vsel %vm3139_vm1, %v3085_v62, -inf  ;;  %v3546_v47 = vsel %vm3139_vm1, %v3086_v34, -inf  ;;  %v13357_v60 = vperm.slane %v3642_v50, 0  ;;  %v3533_v51 = vrot.slane %v3532_v2, 4 }
 0x50d   : > { %v3540_v63 = vrot.slane %v3539_v3, 4  ;;  %v3877_v31 = vsel %vm16753_vm12, %v3818_v28, %v3876_v24  ;;  %v13360_v40 = vperm.slane %v3643_v7, 0  ;;  %v3547_v48 = vrot.slane %v3546_v47, 4  ;;  %vm16757_vm12 = vmmov %vm16752_vm3 }
 0x50e   : > { %v3553_v37 = vsel %vm3139_vm1, %v3087_v29, -inf  ;;  %v13363_v45 = vpack.c.b16 %v3884_v18, %v3877_v31  ;;  %v3534_v6 = vmax.f32 %v3532_v2, %v3533_v51  ;;  %v3922_v30 = vor.u32 %v3920_v19, %v13265_v55 }
 0x50f   : > { %v3541_v43 = vmax.f32 %v3539_v3, %v3540_v63  ;;  %v3554_v10 = vrot.slane %v3553_v37, 4  ;;  %v3548_v41 = vmax.f32 %v3546_v47, %v3547_v48  ;;  %v3010_v59 = vadd.f32 %v13211_v57, %v2989_v8 }
 0x510   : > { %v3956_v58 = vrot.slane %v13363_v45, 1  ;;  %v3924_v12 = vshll.u32 %v13363_v45, 16  ;;  %v3928_v39 = vshrl.u32 %v13363_v45, 16  ;;  %v3535_v11 = vrot.slane %v3534_v6, 2 }
 0x511   : > { %v3542_v14 = vrot.slane %v3541_v43, 2  ;;  %v3555_v27 = vmax.f32 %v3553_v37, %v3554_v10  ;;  %v3549_v15 = vrot.slane %v3548_v41, 2  ;;  %v3835_v57 = vunpack.c.l.b16 %v13357_v60 }
 0x512   : > { %v3957_v38 = vsel %vm2712_vm14, %v3954_v20, %v3956_v58  ;;  %v13377_v55 = vrot.slane %v3924_v12, 1  ;;  %v3977_v19 = vrot.slane %v3928_v39, 1  ;;  %v3536_v13 = vmax.f32 %v3534_v6, %v3535_v11 }
 0x513   : > { %v3543_v17 = vmax.f32 %v3541_v43, %v3542_v14  ;;  %v3556_v16 = vrot.slane %v3555_v27, 2  ;;  %3964 = vrot.lane.b32.xlu2 %v3957_v38, %s11901_s0  ;;  %v3978_v42 = vrot.slane %v3924_v12, 2  ;;  %v3550_v4 = vmax.f32 %v3548_v41, %v3549_v15 }
 0x514   : > { %v3927_v28 = vsel %vm2627_vm0, %v3922_v30, %v13377_v55  ;;  %v3026_v35 = vmax.f32 %v3010_v59, 0.0  ;;  %v3537_v9 = vrot.slane %v3536_v13, 1  ;;  %v3836_v47 = vunpack.c.l.b16 %v13360_v40 }
 0x515   : > { %v3544_v20 = vrot.slane %v3543_v17, 1  ;;  %v3557_v32 = vmax.f32 %v3555_v27, %v3556_v16  ;;  %3945 = vrot.lane.b32.xlu1 %v3927_v28, %s11900_s22  ;;  %v13386_v25 = vor.u32 %v3978_v42, %v3977_v19  ;;  %v3551_v24 = vrot.slane %v3550_v4, 1 }
 0x516   : > { %v3088_v22 = vrot.slane %v3026_v35, 2  ;;  %v3089_v21 = vrot.slane %v3026_v35, 4  ;;  %v3090_v49 = vrot.slane %v3026_v35, 6  ;;  %v3538_v50 = vmax.f32 %v3536_v13, %v3537_v9 }
 0x517   : > { %v3545_v7 = vmax.f32 %v3543_v17, %v3544_v20  ;;  %v3558_v62 = vrot.slane %v3557_v32, 1  ;;  %v3980_v34 = vsel %vm16752_vm3, %v13297_v44, %v13386_v25  ;;  %v3552_v29 = vmax.f32 %v3550_v4, %v3551_v24 }
 0x518   : > { %3993 = vrot.lane.b32.xlu0 %v3980_v34, %s11905_s28  ;;  %v3560_v18 = vsel %vm3139_vm1, %v3026_v35, -inf  ;;  %v3567_v2 = vsel %vm3139_vm1, %v3088_v22, -inf  ;;  %v3574_v3 = vsel %vm3139_vm1, %v3089_v21, -inf  ;;  %v3644_v60 = vpack.c.bf16 %v3538_v50, %v3538_v50 }
 0x519   : > { %v3645_v51 = vpack.c.bf16 %v3545_v7, %v3545_v7  ;;  %v3561_v63 = vrot.slane %v3560_v18, 4  ;;  %v3568_v31 = vrot.slane %v3567_v2, 4  ;;  %v3575_v48 = vrot.slane %v3574_v3, 4 }
 0x51a   : > { %v3581_v37 = vsel %vm3139_vm1, %v3090_v49, -inf  ;;  %v4002_v44 = vrot.slane %v13363_v45, 2  ;;  %v3559_v8 = vmax.f32 %v3557_v32, %v3558_v62  ;;  %v3646_v6 = vpack.c.bf16 %v3552_v29, %v3552_v29  ;;  %vm16755_vm1 = vmmov %vm16750_vm5 }
 0x51b   : > { %v3773_v43 = vperm.slane %v3644_v60, 0  ;;  %v3562_v10 = vmax.f32 %v3560_v18, %v3561_v63  ;;  %v3774_v30 = vperm.slane %v3645_v51, 0  ;;  %v3569_v41 = vmax.f32 %v3567_v2, %v3568_v31  ;;  %v11281_v2 = vld [vmem:[%s16754_s5 + $0x18] sm:$0xff]  ;;  %vm16756_vm5 = vmmov %vm16755_vm1 }
 0x51c   : > { %v3576_v12 = vmax.f32 %v3574_v3, %v3575_v48  ;;  %v3582_v11 = vrot.slane %v3581_v37, 4  ;;  %v3887_v40 = vsel %vm2494_vm7, %v3830_v56, %v13349_v0  ;;  %v3641_v14 = vpack.c.bf16 %v13344_v36, %v13344_v36 }
 0x51d   : > { %v3837_v27 = vunpack.c.l.b16 %v3773_v43  ;;  %v3563_v59 = vrot.slane %v3562_v10, 2  ;;  %v3892_v15 = vsel %vm2504_vm6, %v3836_v47, %v3835_v57  ;;  %v3570_v38 = vrot.slane %v3569_v41, 2 }
 0x51e   : > { %v3577_v19 = vrot.slane %v3576_v12, 2  ;;  %v3583_v13 = vmax.f32 %v3581_v37, %v3582_v11  ;;  %v3647_v17 = vpack.c.bf16 %v3559_v8, %v3559_v8  ;;  %v3775_v16 = vperm.slane %v3646_v6, 0 }
 0x51f   : > { %v3564_v42 = vmax.f32 %v3562_v10, %v3563_v59  ;;  %v4003_v53 = vsel %vm2800_vm15, %v4000_v46, %v4002_v44  ;;  %v3838_v56 = vunpack.c.l.b16 %v3774_v30  ;;  %v3571_v0 = vmax.f32 %v3569_v41, %v3570_v38 }
 0x520   : > { %v3578_v4 = vmax.f32 %v3576_v12, %v3577_v19  ;;  %v3584_v36 = vrot.slane %v3583_v13, 2  ;;  %4010 = vrot.lane.b32.xlu1 %v4003_v53, %s16683_s27  ;;  %v3768_v57 = vperm.slane %v3639_v26, 0  ;;  %v3769_v28 = vperm.slane %v3640_v1, 0  ;;  %v11282_v1 = vld [vmem:[%s16754_s5 + $0x20] sm:$0xff] }
 0x521   : > { %v3893_v35 = vsel %vm2506_vm9, %v3837_v27, %v3892_v15  ;;  %v3565_v9 = vrot.slane %v3564_v42, 1  ;;  %v3888_v46 = vsel %vm2496_vm8, %v3831_v33, %v3887_v40  ;;  %v3572_v20 = vrot.slane %v3571_v0, 1  ;;  %4102 = vmatpush.bf16.msra.mxu1 %v11282_v1 }
 0x522   : > { %v3579_v32 = vrot.slane %v3578_v4, 1  ;;  %v3585_v24 = vmax.f32 %v3583_v13, %v3584_v36  ;;  %v3770_v22 = vperm.slane %v3641_v14, 0  ;;  %v3776_v21 = vperm.slane %v3647_v17, 0  ;;  %v11280_v17 = vld [vmem:[%s16754_s5 + $0x10] sm:$0xff] }
 0x523   : > { %v3839_v49 = vunpack.c.l.b16 %v3775_v16  ;;  %v3566_v50 = vmax.f32 %v3564_v42, %v3565_v9  ;;  %v3894_v52 = vsel %vm2494_vm7, %v3838_v56, %v3893_v35  ;;  %v3573_v26 = vmax.f32 %v3571_v0, %v3572_v20 }
 0x524   : > { %v3580_v7 = vmax.f32 %v3578_v4, %v3579_v32  ;;  %v3586_v61 = vrot.slane %v3585_v24, 1  ;;  %v3832_v62 = vunpack.c.l.b16 %v3768_v57  ;;  %v3833_v54 = vunpack.c.l.b16 %v3769_v28 }
 0x525   : > { %v3648_v34 = vpack.c.bf16 %v3566_v50, %v3566_v50  ;;  %v3649_v29 = vpack.c.bf16 %v3573_v26, %v3573_v26  ;;  %v3834_v47 = vunpack.c.l.b16 %v3770_v22  ;;  %v3895_v60 = vsel %vm2496_vm8, %v3839_v49, %v3894_v52  ;;  %4103 = vmatpush.bf16.msra.mxu1 %v11281_v2  ;;  %v11278_v26 = vld [vmem:[%s16754_s5] sm:$0xff] }
 0x526   : > { %v3587_v33 = vmax.f32 %v3585_v24, %v3586_v61  ;;  %v3650_v18 = vpack.c.bf16 %v3580_v7, %v3580_v7  ;;  %v3889_v3 = vsel %vm2498_vm10, %v3832_v62, %v3888_v46  ;;  %v3840_v63 = vunpack.c.l.b16 %v3776_v21 }
 0x527   : > { %v3777_v51 = vperm.slane %v3648_v34, 0  ;;  %v3778_v48 = vperm.slane %v3649_v29, 0  ;;  %v3890_v8 = vsel %vm2500_vm11, %v3833_v54, %v3889_v3  ;;  %v3930_v16 = vor.u32 %v3928_v39, %v13377_v55 }
 0x528   : > { %v3651_v31 = vpack.c.bf16 %v3587_v33, %v3587_v33  ;;  %v3779_v37 = vperm.slane %v3650_v18, 0  ;;  %v3896_v43 = vsel %vm2498_vm10, %v3840_v63, %v3895_v60  ;;  %v3891_v40 = vsel %vm16755_vm1, %v3834_v47, %v3890_v8 }
 0x529   : > { %v3841_v6 = vunpack.c.l.b16 %v3777_v51  ;;  %v3842_v30 = vunpack.c.l.b16 %v3778_v48  ;;  %4104 = vmatpush.bf16.msra.mxu1 %v11280_v17  ;;  %vm4032_vm1 = vcmask 392192  }
 0x52a   : > { %v3780_v10 = vperm.slane %v3651_v31, 0  ;;  %v3843_v41 = vunpack.c.l.b16 %v3779_v37 }
 0x52b   : > { %v3897_v12 = vsel %vm2500_vm11, %v3841_v6, %v3896_v43 }
 0x52c   : > { %v3844_v11 = vunpack.c.l.b16 %v3780_v10  ;;  %v3898_v14 = vsel %vm16756_vm5, %v3842_v30, %v3897_v12  ;;  %vm4041_vm5 = vcmask 523264  }
 0x52d   : > { %v13435_v27 = vpack.c.b16 %v3898_v14, %v3891_v40 }
 0x52e   : > { %v3899_v59 = vsel %vm2504_vm6, %v3844_v11, %v3843_v41 }
 0x52f   : > { %v3958_v15 = vrot.slane %v13435_v27, 1  ;;  %v3932_v38 = vshll.u32 %v13435_v27, 16  ;;  %v3936_v19 = vshrl.u32 %v13435_v27, 16  ;;  %v3904_v13 = vpack.c.b16 %v3899_v59, %v3899_v59 }
 0x531   : > { %v3959_v42 = vsel %vm2712_vm14, %v3956_v58, %v3958_v15  ;;  %v3934_v53 = vrot.slane %v3932_v38, 1  ;;  %v3981_v56 = vrot.slane %v3936_v19, 1  ;;  %v3982_v0 = vrot.slane %v3932_v38, 2 }
 0x532   : > { %3966 = vrot.lane.b32.xlu0 %v3959_v42, %s11901_s0  ;;  %v3908_v4 = vsel %vm2621_vm13, %v3904_v13, 0  ;;  %v4004_v58 = vrot.slane %v13435_v27, 2 }
 0x533   : > { %v3935_v36 = vsel %vm2627_vm0, %v3930_v16, %v3934_v53  ;;  %v3983_v57 = vor.u32 %v3982_v0, %v3981_v56  ;;  %v3939_v28 = vshll.u32 %v3908_v4, 16  ;;  %v3938_v55 = vor.u32 %v3936_v19, %v3934_v53 }
 0x534   : > { %3947 = vrot.lane.b32.xlu2 %v3935_v36, %s11900_s22  ;;  %v3985_v9 = vshrl.u32 %v3908_v4, 16  ;;  %v3960_v20 = vrot.slane %v3908_v4, 1  ;;  %v4005_v32 = vsel %vm2800_vm15, %v4002_v44, %v4004_v58  ;;  %v4006_v21 = vrot.slane %v3908_v4, 2  ;;  %v11279_v44 = vld [vmem:[%s16754_s5 + $0x8] sm:$0xff] }
 0x535   : > { %v3984_v39 = vsel %vm16757_vm12, %v13386_v25, %v3983_v57  ;;  %v3941_v35 = vrot.slane %v3939_v28, 1  ;;  %v3988_v22 = vrot.slane %v3939_v28, 2  ;;  %4105 = vmatpush.bf16.msra.mxu1 %v11279_v44  ;;  %vm4090_vm12 = vcmask 654336  }
 0x536   : > { %3995 = vrot.lane.b32.xlu1 %v3984_v39, %s11905_s28  ;;  %v3987_v24 = vrot.slane %v3985_v9, 1  ;;  %v3961_v25 = vsel %vm2712_vm14, %v3958_v15, %v3960_v20  ;;  %v4007_v50 = vsel %vm2800_vm15, %v4004_v58, %v4006_v21  ;;  %v13503_v15 = vld [vmem:[%s16758_s6] ss:$0 sm:$0xff] }
 0x537   : > { %v3942_v46 = vsel %vm2627_vm0, %v3938_v55, %v3941_v35 }
 0x538   : > { %v3989_v49 = vor.u32 %v3988_v22, %v3987_v24 }
 0x539   : > { %4106 = vmatpush.bf16.msra.mxu1 %v11278_v26 }
 0x53a   : > { %3949 = vrot.lane.b32.xlu0 %v3942_v46, %s11900_s22  ;;  %v3990_v52 = vsel %vm16752_vm3, %v3983_v57, %v3989_v49  ;;  %vm16759_vm3 = vcmask 1047559  }
 0x53c   : > { %4012 = vrot.lane.b32.xlu2 %v4005_v32, %s16683_s27 }
 0x53e   : > { %3968 = vrot.lane.b32.xlu1 %v3961_v25, %s11901_s0 }
 0x542   : > { %4014 = vrot.lane.b32.xlu0 %v4007_v50, %s16683_s27 }
 0x544   : > { %3997 = vrot.lane.b32.xlu2 %v3990_v52, %s11905_s28  ;;  %s11906_s28 = smov 96  }
 0x54e   : > { %v3963_v7 = vpop.permute.xlu0 %3962 }
 0x560   : > { %v4009_v34 = vpop.permute.xlu0 %4008 }
 0x562   : > { %v3944_v61 = vpop.permute.xlu1 %3943 }
 0x563   : > { %v4017_v1 = vsel %vm2851_vm4, %v13124_v23, %v3944_v61 }
 0x564   : > { %v4025_v54 = vsel %vm2885_vm2, %v4017_v1, %v3963_v7 }
 0x56a   : > { %v3992_v62 = vpop.permute.xlu1 %3991 }
 0x56b   : > { %v4034_v33 = vsel %vm4032_vm1, %v4025_v54, %v3992_v62 }
 0x56c   : > { %v4043_v29 = vsel %vm4041_vm5, %v4034_v33, %v4009_v34 }
 0x56d   : > { %9328 = vmatmul.msk.bf16.vlgmr.msra.gmra.mxu1 %vm4090_vm12, %v4043_v29  ;;  %v3965_v3 = vpop.permute.xlu2 %3964 }
 0x587   : > { %v3946_v18 = vpop.permute.xlu1 %3945 }
 0x588   : > { %v4019_v2 = vsel %vm2851_vm4, %v13206_v5, %v3946_v18 }
 0x589   : > { %v4027_v23 = vsel %vm2885_vm2, %v4019_v2, %v3965_v3 }
 0x58a   : > { %v3994_v47 = vpop.permute.xlu0 %3993 }
 0x58b   : > { %v4036_v60 = vsel %vm4032_vm1, %v4027_v23, %v3994_v47 }
 0x58e   : > { %v3948_v31 = vpop.permute.xlu2 %3947 }
 0x58f   : > { %v4021_v37 = vsel %vm2851_vm4, %v13363_v45, %v3948_v31 }
 0x592   : > { %v4011_v51 = vpop.permute.xlu1 %4010 }
 0x593   : > { %v4045_v63 = vsel %vm4041_vm5, %v4036_v60, %v4011_v51 }
 0x594   : > { %9329 = vmatmul.msk.bf16.gmra.mxu1 %vm4090_vm12, %v4045_v63 }
 0x596   : > { %v4013_v5 = vpop.permute.xlu2 %4012 }
 0x59e   : > { %v3998_v14 = vpop.permute.xlu2 %3997 }
 0x5a4   : > { %v3967_v48 = vpop.permute.xlu0 %3966 }
 0x5a5   : > { %v4029_v8 = vsel %vm2885_vm2, %v4021_v37, %v3967_v48 }
 0x5a8   : > { %v3996_v6 = vpop.permute.xlu1 %3995 }
 0x5a9   : > { %v4038_v43 = vsel %vm4032_vm1, %v4029_v8, %v3996_v6 }
 0x5aa   : > { %v4047_v10 = vsel %vm4041_vm5, %v4038_v43, %v4013_v5 }
 0x5ab   : > { %9330 = vmatmul.msk.bf16.gmra.mxu1 %vm4090_vm12, %v4047_v10 }
 0x5ac   : > { %v3950_v30 = vpop.permute.xlu0 %3949 }
 0x5ad   : > { %v4023_v12 = vsel %vm2851_vm4, %v13435_v27, %v3950_v30  ;;  %vm4203_vm4 = vcmask 254976  }
 0x5b0   : > { %v3969_v41 = vpop.permute.xlu1 %3968 }
 0x5b1   : > { %v4031_v11 = vsel %vm2885_vm2, %v4023_v12, %v3969_v41 }
 0x5b2   : > { %v4040_v45 = vsel %vm4032_vm1, %v4031_v11, %v3998_v14  ;;  %vm16760_vm1 = vmmov %vm16759_vm3 }
 0x5b4   : > { %v4015_v40 = vpop.permute.xlu0 %4014 }
 0x5b5   : > { %v4049_v59 = vsel %vm4041_vm5, %v4040_v45, %v4015_v40 }
 0x5bb   : > { %9331 = vmatmul.msk.bf16.gmra.mxu1 %vm4090_vm12, %v4049_v59  ;;  %vm16761_vm12 = vmmov %vm16760_vm1 }
 0x5ea   : > { %v4108_v38 = vpop.f32.mrf.mxu1 }
 0x5eb   : > { %v4131_v19 = vadd.f32 %v13503_v15, %v4108_v38 }
 0x5ed   : > { %v4139_v13 = vmax.f32 %v4131_v19, 0.0 }
 0x5ef   : > { %v4155_v27 = vrot.slane %v4139_v13, 2  ;;  %v4156_v17 = vrot.slane %v4139_v13, 4  ;;  %v4157_v16 = vrot.slane %v4139_v13, 6  ;;  %v4204_v0 = vsel %vm4203_vm4, %v4139_v13, -inf }
 0x5f0   : > { %v4205_v39 = vrot.slane %v4204_v0, 4 }
 0x5f1   : > { %v4211_v42 = vsel %vm4203_vm4, %v4155_v27, -inf  ;;  %v4218_v57 = vsel %vm4203_vm4, %v4156_v17, -inf  ;;  %v4225_v28 = vsel %vm4203_vm4, %v4157_v16, -inf }
 0x5f2   : > { %v4110_v53 = vpop.f32.mrf.mxu1  ;;  %v4212_v4 = vrot.slane %v4211_v42, 4  ;;  %v4219_v58 = vrot.slane %v4218_v57, 4  ;;  %v4226_v9 = vrot.slane %v4225_v28, 4  ;;  %v4206_v32 = vmax.f32 %v4204_v0, %v4205_v39 }
 0x5f3   : > { %v4132_v56 = vadd.f32 %v13503_v15, %v4110_v53 }
 0x5f4   : > { %v4213_v35 = vmax.f32 %v4211_v42, %v4212_v4  ;;  %v4220_v21 = vmax.f32 %v4218_v57, %v4219_v58  ;;  %v4227_v49 = vmax.f32 %v4225_v28, %v4226_v9  ;;  %v4207_v44 = vrot.slane %v4206_v32, 2 }
 0x5f5   : > { %v4140_v36 = vmax.f32 %v4132_v56, 0.0 }
 0x5f6   : > { %v4214_v25 = vrot.slane %v4213_v35, 2  ;;  %v4221_v62 = vrot.slane %v4220_v21, 2  ;;  %v4228_v54 = vrot.slane %v4227_v49, 2  ;;  %v4208_v33 = vmax.f32 %v4206_v32, %v4207_v44 }
 0x5f7   : > { %v4159_v55 = vrot.slane %v4140_v36, 4  ;;  %v4160_v46 = vrot.slane %v4140_v36, 6  ;;  %v4158_v20 = vrot.slane %v4140_v36, 2  ;;  %v4232_v24 = vsel %vm4203_vm4, %v4140_v36, -inf }
 0x5f8   : > { %v4233_v26 = vrot.slane %v4232_v24, 4  ;;  %v4215_v1 = vmax.f32 %v4213_v35, %v4214_v25  ;;  %v4222_v23 = vmax.f32 %v4220_v21, %v4221_v62  ;;  %v4229_v47 = vmax.f32 %v4227_v49, %v4228_v54 }
 0x5f9   : > { %v4246_v22 = vsel %vm4203_vm4, %v4159_v55, -inf  ;;  %v4253_v50 = vsel %vm4203_vm4, %v4160_v46, -inf  ;;  %v4239_v52 = vsel %vm4203_vm4, %v4158_v20, -inf  ;;  %v4209_v51 = vrot.slane %v4208_v33, 1 }
 0x5fa   : > { %v4247_v7 = vrot.slane %v4246_v22, 4  ;;  %v4254_v61 = vrot.slane %v4253_v50, 4  ;;  %v4240_v34 = vrot.slane %v4239_v52, 4  ;;  %v4234_v29 = vmax.f32 %v4232_v24, %v4233_v26 }
 0x5fb   : > { %v4216_v3 = vrot.slane %v4215_v1, 1  ;;  %v4223_v8 = vrot.slane %v4222_v23, 1  ;;  %v4230_v6 = vrot.slane %v4229_v47, 1  ;;  %v4210_v43 = vmax.f32 %v4208_v33, %v4209_v51 }
 0x5fc   : > { %v4248_v18 = vmax.f32 %v4246_v22, %v4247_v7  ;;  %v4255_v2 = vmax.f32 %v4253_v50, %v4254_v61  ;;  %v4241_v60 = vmax.f32 %v4239_v52, %v4240_v34  ;;  %v4235_v63 = vrot.slane %v4234_v29, 2 }
 0x5fd   : > { %v4217_v37 = vmax.f32 %v4215_v1, %v4216_v3  ;;  %v4224_v12 = vmax.f32 %v4222_v23, %v4223_v8  ;;  %v4231_v11 = vmax.f32 %v4229_v47, %v4230_v6  ;;  %v4428_v45 = vpack.c.bf16 %v4210_v43, %v4210_v43 }
 0x5fe   : > { %v4249_v31 = vrot.slane %v4248_v18, 2  ;;  %v4256_v48 = vrot.slane %v4255_v2, 2  ;;  %v4242_v5 = vrot.slane %v4241_v60, 2  ;;  %v4236_v10 = vmax.f32 %v4234_v29, %v4235_v63 }
 0x5ff   : > { %v4429_v40 = vpack.c.bf16 %v4217_v37, %v4217_v37  ;;  %v4430_v13 = vpack.c.bf16 %v4224_v12, %v4224_v12  ;;  %v4431_v27 = vpack.c.bf16 %v4231_v11, %v4231_v11  ;;  %v4493_v56 = vperm.slane %v4428_v45, 0 }
 0x600   : > { %v4250_v30 = vmax.f32 %v4248_v18, %v4249_v31  ;;  %v4257_v41 = vmax.f32 %v4255_v2, %v4256_v48  ;;  %v4243_v14 = vmax.f32 %v4241_v60, %v4242_v5  ;;  %v4237_v59 = vrot.slane %v4236_v10, 1 }
 0x601   : > { %v4494_v17 = vperm.slane %v4429_v40, 0  ;;  %v13516_v28 = vperm.slane %v4430_v13, 0  ;;  %v13518_v39 = vperm.slane %v4431_v27, 0  ;;  %v4525_v32 = vunpack.c.l.b16 %v4493_v56 }
 0x602   : > { %v4251_v38 = vrot.slane %v4250_v30, 1  ;;  %v4258_v19 = vrot.slane %v4257_v41, 1  ;;  %v4244_v16 = vrot.slane %v4243_v14, 1  ;;  %v4238_v0 = vmax.f32 %v4236_v10, %v4237_v59 }
 0x603   : > { %v4526_v55 = vunpack.c.l.b16 %v4494_v17  ;;  %v4527_v62 = vunpack.c.l.b16 %v13516_v28 }
 0x604   : > { %v4252_v4 = vmax.f32 %v4250_v30, %v4251_v38  ;;  %v4259_v36 = vmax.f32 %v4257_v41, %v4258_v19  ;;  %v13520_v35 = vmax.f32 %v4243_v14, %v4244_v16  ;;  %v4432_v24 = vpack.c.bf16 %v4238_v0, %v4238_v0 }
 0x605   : > { %v4557_v54 = vsel %vm2494_vm7, %v4526_v55, %v4525_v32 }
 0x606   : > { %v4434_v22 = vpack.c.bf16 %v4252_v4, %v4252_v4  ;;  %v4435_v21 = vpack.c.bf16 %v4259_v36, %v4259_v36  ;;  %v4433_v34 = vpack.c.bf16 %v13520_v35, %v13520_v35  ;;  %v13531_v23 = vperm.slane %v4432_v24, 0 }
 0x608   : > { %v13533_v47 = vperm.slane %v4434_v22, 0  ;;  %v13535_v60 = vperm.slane %v4435_v21, 0  ;;  %v4498_v21 = vperm.slane %v4433_v34, 0 }
 0x611   : > { %v4113_v42 = vpop.f32.mrf.mxu1 }
 0x612   : > { %v4133_v53 = vadd.f32 %v13503_v15, %v4113_v42 }
 0x614   : > { %v4141_v57 = vmax.f32 %v4133_v53, 0.0 }
 0x616   : > { %v4161_v58 = vrot.slane %v4141_v57, 2  ;;  %v4162_v9 = vrot.slane %v4141_v57, 4  ;;  %v4163_v46 = vrot.slane %v4141_v57, 6  ;;  %v4260_v20 = vsel %vm4203_vm4, %v4141_v57, -inf }
 0x617   : > { %v4261_v25 = vrot.slane %v4260_v20, 4 }
 0x618   : > { %v4267_v49 = vsel %vm4203_vm4, %v4161_v58, -inf  ;;  %v4274_v50 = vsel %vm4203_vm4, %v4162_v9, -inf  ;;  %v4281_v52 = vsel %vm4203_vm4, %v4163_v46, -inf }
 0x619   : > { %v4262_v44 = vmax.f32 %v4260_v20, %v4261_v25  ;;  %v4268_v26 = vrot.slane %v4267_v49, 4  ;;  %v4275_v7 = vrot.slane %v4274_v50, 4  ;;  %v4282_v61 = vrot.slane %v4281_v52, 4  ;;  %v4115_v1 = vpop.f32.mrf.mxu1 }
 0x61a   : > { %v4134_v33 = vadd.f32 %v13503_v15, %v4115_v1 }
 0x61b   : > { %v4263_v29 = vrot.slane %v4262_v44, 2  ;;  %v4269_v18 = vmax.f32 %v4267_v49, %v4268_v26  ;;  %v4276_v2 = vmax.f32 %v4274_v50, %v4275_v7  ;;  %v4283_v3 = vmax.f32 %v4281_v52, %v4282_v61 }
 0x61c   : > { %v4142_v51 = vmax.f32 %v4134_v33, 0.0  ;;  %v4531_v49 = vunpack.c.l.b16 %v13533_v47  ;;  %v4532_v50 = vunpack.c.l.b16 %v13535_v60  ;;  %v4528_v33 = vunpack.c.l.b16 %v13518_v39 }
 0x61d   : > { %v4264_v63 = vmax.f32 %v4262_v44, %v4263_v29  ;;  %v4270_v31 = vrot.slane %v4269_v18, 2  ;;  %v4277_v48 = vrot.slane %v4276_v2, 2  ;;  %v4284_v37 = vrot.slane %v4283_v3, 2 }
 0x61e   : > { %v4164_v8 = vrot.slane %v4142_v51, 2  ;;  %v4165_v6 = vrot.slane %v4142_v51, 4  ;;  %v4166_v5 = vrot.slane %v4142_v51, 6  ;;  %v4288_v43 = vsel %vm4203_vm4, %v4142_v51, -inf }
 0x61f   : > { %v4265_v10 = vrot.slane %v4264_v63, 1  ;;  %v4271_v30 = vmax.f32 %v4269_v18, %v4270_v31  ;;  %v4278_v41 = vmax.f32 %v4276_v2, %v4277_v48  ;;  %v4285_v12 = vmax.f32 %v4283_v3, %v4284_v37 }
 0x620   : > { %v4289_v11 = vrot.slane %v4288_v43, 4  ;;  %v4295_v40 = vsel %vm4203_vm4, %v4164_v8, -inf  ;;  %v4302_v14 = vsel %vm4203_vm4, %v4165_v6, -inf  ;;  %v4309_v45 = vsel %vm4203_vm4, %v4166_v5, -inf }
 0x621   : > { %v4266_v59 = vmax.f32 %v4264_v63, %v4265_v10  ;;  %v4272_v38 = vrot.slane %v4271_v30, 1  ;;  %v4279_v19 = vrot.slane %v4278_v41, 1  ;;  %v4286_v13 = vrot.slane %v4285_v12, 1 }
 0x622   : > { %v4290_v27 = vmax.f32 %v4288_v43, %v4289_v11  ;;  %v4296_v17 = vrot.slane %v4295_v40, 4  ;;  %v4303_v16 = vrot.slane %v4302_v14, 4  ;;  %v4310_v42 = vrot.slane %v4309_v45, 4 }
 0x623   : > { %v4273_v53 = vmax.f32 %v4271_v30, %v4272_v38  ;;  %v4280_v56 = vmax.f32 %v4278_v41, %v4279_v19  ;;  %v4287_v0 = vmax.f32 %v4285_v12, %v4286_v13  ;;  %v4436_v4 = vpack.c.bf16 %v4266_v59, %v4266_v59 }
 0x624   : > { %v4291_v36 = vrot.slane %v4290_v27, 2  ;;  %v4297_v57 = vmax.f32 %v4295_v40, %v4296_v17  ;;  %v4304_v55 = vmax.f32 %v4302_v14, %v4303_v16  ;;  %v4311_v35 = vmax.f32 %v4309_v45, %v4310_v42 }
 0x625   : > { %v4437_v58 = vpack.c.bf16 %v4273_v53, %v4273_v53  ;;  %v4438_v9 = vpack.c.bf16 %v4280_v56, %v4280_v56  ;;  %v4439_v46 = vpack.c.bf16 %v4287_v0, %v4287_v0  ;;  %v4501_v20 = vperm.slane %v4436_v4, 0 }
 0x626   : > { %v4292_v32 = vmax.f32 %v4290_v27, %v4291_v36  ;;  %v4298_v24 = vrot.slane %v4297_v57, 2  ;;  %v4305_v22 = vrot.slane %v4304_v55, 2  ;;  %v4312_v25 = vrot.slane %v4311_v35, 2 }
 0x627   : > { %v4502_v52 = vperm.slane %v4437_v58, 0  ;;  %v4533_v44 = vunpack.c.l.b16 %v4501_v20  ;;  %v4558_v29 = vsel %vm2496_vm8, %v4527_v62, %v4557_v54  ;;  %v4503_v18 = vperm.slane %v4438_v9, 0 }
 0x628   : > { %v4299_v26 = vmax.f32 %v4297_v57, %v4298_v24  ;;  %v4306_v7 = vmax.f32 %v4304_v55, %v4305_v22  ;;  %v4313_v61 = vmax.f32 %v4311_v35, %v4312_v25  ;;  %v4118_v1 = vpop.f32.mrf.mxu1  ;;  %v4293_v2 = vrot.slane %v4292_v32, 1 }
 0x629   : > { %v13547_v3 = vperm.slane %v4439_v46, 0  ;;  %v4529_v60 = vunpack.c.l.b16 %v13531_v23  ;;  %v4534_v63 = vunpack.c.l.b16 %v4502_v52  ;;  %v4562_v31 = vsel %vm2504_vm6, %v4532_v50, %v4531_v49 }
 0x62a   : > { %v4300_v34 = vrot.slane %v4299_v26, 1  ;;  %v4307_v47 = vrot.slane %v4306_v7, 1  ;;  %v4314_v51 = vrot.slane %v4313_v61, 1  ;;  %v4135_v48 = vadd.f32 %v13503_v15, %v4118_v1 }
 0x62b   : > { %v4530_v37 = vunpack.c.l.b16 %v4498_v21  ;;  %v4563_v39 = vsel %vm2506_vm9, %v4533_v44, %v4562_v31  ;;  %v4535_v62 = vunpack.c.l.b16 %v4503_v18  ;;  %v4294_v54 = vmax.f32 %v4292_v32, %v4293_v2 }
 0x62c   : > { %v4308_v28 = vmax.f32 %v4306_v7, %v4307_v47  ;;  %v4315_v8 = vmax.f32 %v4313_v61, %v4314_v51  ;;  %v4143_v6 = vmax.f32 %v4135_v48, 0.0  ;;  %v4559_v5 = vsel %vm2498_vm10, %v4528_v33, %v4558_v29 }
 0x62d   : > { %v4536_v43 = vunpack.c.l.b16 %v13547_v3  ;;  %v4301_v10 = vmax.f32 %v4299_v26, %v4300_v34  ;;  %v4564_v41 = vsel %vm2494_vm7, %v4534_v63, %v4563_v39  ;;  %v4560_v19 = vsel %vm2500_vm11, %v4529_v60, %v4559_v5 }
 0x62e   : > { %v4442_v30 = vpack.c.bf16 %v4308_v28, %v4308_v28  ;;  %v4443_v23 = vpack.c.bf16 %v4315_v8, %v4315_v8  ;;  %v4167_v12 = vrot.slane %v4143_v6, 2  ;;  %v4168_v11 = vrot.slane %v4143_v6, 4 }
 0x62f   : > { %v4169_v40 = vrot.slane %v4143_v6, 6  ;;  %v4316_v59 = vsel %vm4203_vm4, %v4143_v6, -inf  ;;  %v4440_v13 = vpack.c.bf16 %v4294_v54, %v4294_v54  ;;  %v4441_v42 = vpack.c.bf16 %v4301_v10, %v4301_v10 }
 0x630   : > { %v4507_v14 = vperm.slane %v4442_v30, 0  ;;  %v4508_v45 = vperm.slane %v4443_v23, 0  ;;  %v4120_v38 = vpop.f32.mrf.mxu1  ;;  %v4317_v27 = vrot.slane %v4316_v59, 4  ;;  %v4323_v17 = vsel %vm4203_vm4, %v4167_v12, -inf }
 0x631   : > { %v4330_v16 = vsel %vm4203_vm4, %v4168_v11, -inf  ;;  %v4324_v0 = vrot.slane %v4323_v17, 4  ;;  %v4337_v57 = vsel %vm4203_vm4, %v4169_v40, -inf  ;;  %v4136_v55 = vadd.f32 %v13503_v15, %v4120_v38 }
 0x632   : > { %v4539_v53 = vunpack.c.l.b16 %v4507_v14  ;;  %v4540_v56 = vunpack.c.l.b16 %v4508_v45  ;;  %v4318_v4 = vmax.f32 %v4316_v59, %v4317_v27  ;;  %v4331_v36 = vrot.slane %v4330_v16, 4 }
 0x633   : > { %v13563_v35 = vsel %vm2496_vm8, %v4535_v62, %v4564_v41  ;;  %v4325_v58 = vmax.f32 %v4323_v17, %v4324_v0  ;;  %v4338_v9 = vrot.slane %v4337_v57, 4  ;;  %v13566_v46 = vsel %vm16759_vm3, %v4530_v37, %v4560_v19 }
 0x634   : > { %v13568_v20 = vperm.slane %v4440_v13, 0  ;;  %v4319_v32 = vrot.slane %v4318_v4, 2  ;;  %v4332_v24 = vmax.f32 %v4330_v16, %v4331_v36  ;;  %v4144_v22 = vmax.f32 %v4136_v55, 0.0 }
 0x635   : > { %v13570_v25 = vperm.slane %v4441_v42, 0  ;;  %v4326_v21 = vrot.slane %v4325_v58, 2  ;;  %v4339_v49 = vmax.f32 %v4337_v57, %v4338_v9  ;;  %v4569_v50 = vsel %vm2504_vm6, %v4540_v56, %v4539_v53 }
 0x636   : > { %v4320_v52 = vmax.f32 %v4318_v4, %v4319_v32  ;;  %v4333_v44 = vrot.slane %v4332_v24, 2  ;;  %v4170_v26 = vrot.slane %v4144_v22, 2  ;;  %v4171_v7 = vrot.slane %v4144_v22, 4 }
 0x637   : > { %v4327_v61 = vmax.f32 %v4325_v58, %v4326_v21  ;;  %v4340_v1 = vrot.slane %v4339_v49, 2  ;;  %v4172_v33 = vrot.slane %v4144_v22, 6  ;;  %v4344_v29 = vsel %vm4203_vm4, %v4144_v22, -inf  ;;  %v11292_v58 = vld [vmem:[%s16643_s7 + $0x48] sm:$0xff] }
 0x638   : > { %v4321_v18 = vrot.slane %v4320_v52, 1  ;;  %v4334_v2 = vmax.f32 %v4332_v24, %v4333_v44  ;;  %v4345_v34 = vrot.slane %v4344_v29, 4  ;;  %v4351_v47 = vsel %vm4203_vm4, %v4170_v26, -inf  ;;  %v4123_v51 = vpop.f32.mrf.mxu1  ;;  %4772 = vmatpush.bf16.msra.mxu3 %v11292_v58 }
 0x639   : > { %v4328_v60 = vrot.slane %v4327_v61, 1  ;;  %v4341_v63 = vmax.f32 %v4339_v49, %v4340_v1  ;;  %v4352_v31 = vrot.slane %v4351_v47, 4  ;;  %v4358_v48 = vsel %vm4203_vm4, %v4171_v7, -inf  ;;  %v11291_v7 = vld [vmem:[%s16643_s7 + $0x40] sm:$0xff] }
 0x63a   : > { %v4322_v37 = vmax.f32 %v4320_v52, %v4321_v18  ;;  %v4335_v39 = vrot.slane %v4334_v2, 1  ;;  %v4346_v28 = vmax.f32 %v4344_v29, %v4345_v34  ;;  %v4359_v8 = vrot.slane %v4358_v48, 4 }
 0x63b   : > { %v4329_v62 = vmax.f32 %v4327_v61, %v4328_v60  ;;  %v4342_v54 = vrot.slane %v4341_v63, 1  ;;  %v4353_v6 = vmax.f32 %v4351_v47, %v4352_v31  ;;  %v4365_v5 = vsel %vm4203_vm4, %v4172_v33, -inf }
 0x63c   : > { %v4336_v10 = vmax.f32 %v4334_v2, %v4335_v39  ;;  %v4444_v30 = vpack.c.bf16 %v4322_v37, %v4322_v37  ;;  %v4347_v23 = vrot.slane %v4346_v28, 2  ;;  %v4360_v41 = vmax.f32 %v4358_v48, %v4359_v8  ;;  %4773 = vmatpush.bf16.msra.mxu3 %v11291_v7 }
 0x63d   : > { %v4343_v12 = vmax.f32 %v4341_v63, %v4342_v54  ;;  %v4445_v11 = vpack.c.bf16 %v4329_v62, %v4329_v62  ;;  %v4354_v40 = vrot.slane %v4353_v6, 2  ;;  %v4366_v14 = vrot.slane %v4365_v5, 4 }
 0x63e   : > { %v4446_v45 = vpack.c.bf16 %v4336_v10, %v4336_v10  ;;  %v4509_v59 = vperm.slane %v4444_v30, 0  ;;  %v4348_v38 = vmax.f32 %v4346_v28, %v4347_v23  ;;  %v4361_v19 = vrot.slane %v4360_v41, 2 }
 0x63f   : > { %v4447_v13 = vpack.c.bf16 %v4343_v12, %v4343_v12  ;;  %v4510_v27 = vperm.slane %v4445_v11, 0  ;;  %v4355_v17 = vmax.f32 %v4353_v6, %v4354_v40  ;;  %v4367_v16 = vmax.f32 %v4365_v5, %v4366_v14 }
 0x640   : > { %v4511_v42 = vperm.slane %v4446_v45, 0  ;;  %v4541_v53 = vunpack.c.l.b16 %v4509_v59  ;;  %v4349_v56 = vrot.slane %v4348_v38, 1  ;;  %v4362_v0 = vmax.f32 %v4360_v41, %v4361_v19  ;;  %v4125_v21 = vpop.f32.mrf.mxu1 }
 0x641   : > { %v4512_v4 = vperm.slane %v4447_v13, 0  ;;  %v4542_v36 = vunpack.c.l.b16 %v4510_v27  ;;  %v4356_v57 = vrot.slane %v4355_v17, 1  ;;  %v4368_v55 = vrot.slane %v4367_v16, 2 }
 0x642   : > { %v4543_v9 = vunpack.c.l.b16 %v4511_v42  ;;  %v4570_v32 = vsel %vm2506_vm9, %v4541_v53, %v4569_v50  ;;  %v4350_v24 = vmax.f32 %v4348_v38, %v4349_v56  ;;  %v4363_v22 = vrot.slane %v4362_v0, 1 }
 0x643   : > { %v4537_v49 = vunpack.c.l.b16 %v13568_v20  ;;  %v4571_v52 = vsel %vm2494_vm7, %v4542_v36, %v4570_v32  ;;  %v4357_v44 = vmax.f32 %v4355_v17, %v4356_v57  ;;  %v4369_v26 = vmax.f32 %v4367_v16, %v4368_v55 }
 0x644   : > { %v4572_v61 = vsel %vm2496_vm8, %v4543_v9, %v4571_v52  ;;  %v4364_v1 = vmax.f32 %v4362_v0, %v4363_v22  ;;  %v4448_v33 = vpack.c.bf16 %v4350_v24, %v4350_v24  ;;  %v4137_v50 = vadd.f32 %v13503_v15, %v4123_v51 }
 0x645   : > { %v4544_v29 = vunpack.c.l.b16 %v4512_v4  ;;  %v4370_v18 = vrot.slane %v4369_v26, 1  ;;  %v4449_v2 = vpack.c.bf16 %v4357_v44, %v4357_v44  ;;  %v4138_v20 = vadd.f32 %v13503_v15, %v4125_v21 }
 0x646   : > { %v4538_v34 = vunpack.c.l.b16 %v13570_v25  ;;  %v4450_v47 = vpack.c.bf16 %v4364_v1, %v4364_v1  ;;  %v13590_v60 = vperm.slane %v4448_v33, 0  ;;  %v4145_v63 = vmax.f32 %v4137_v50, 0.0 }
 0x647   : > { %v13593_v31 = vsel %vm2498_vm10, %v4544_v29, %v4572_v61  ;;  %v4371_v48 = vmax.f32 %v4369_v26, %v4370_v18  ;;  %v13595_v37 = vperm.slane %v4449_v2, 0  ;;  %v4566_v51 = vsel %vm2498_vm10, %v4536_v43, %v13563_v35 }
 0x648   : > { %v4515_v39 = vperm.slane %v4450_v47, 0  ;;  %v4173_v15 = vrot.slane %v4145_v63, 2  ;;  %v4174_v28 = vrot.slane %v4145_v63, 4  ;;  %v4146_v8 = vmax.f32 %v4138_v20, 0.0 }
 0x649   : > { %v4451_v62 = vpack.c.bf16 %v4371_v48, %v4371_v48  ;;  %v4175_v54 = vrot.slane %v4145_v63, 6  ;;  %v4372_v6 = vsel %vm4203_vm4, %v4145_v63, -inf  ;;  %v13603_v5 = vsel %vm2500_vm11, %v4537_v49, %v4566_v51 }
 0x64a   : > { %v4545_v10 = vunpack.c.l.b16 %v13590_v60  ;;  %v4547_v30 = vunpack.c.l.b16 %v4515_v39  ;;  %v4373_v23 = vrot.slane %v4372_v6, 4  ;;  %v4379_v41 = vsel %vm4203_vm4, %v4173_v15, -inf }
 0x64b   : > { %v4516_v3 = vperm.slane %v4451_v62, 0  ;;  %v4380_v12 = vrot.slane %v4379_v41, 4  ;;  %v4386_v43 = vsel %vm4203_vm4, %v4174_v28, -inf  ;;  %v4393_v35 = vsel %vm4203_vm4, %v4175_v54, -inf }
 0x64c   : > { %v4374_v11 = vmax.f32 %v4372_v6, %v4373_v23  ;;  %v4387_v40 = vrot.slane %v4386_v43, 4  ;;  %v4394_v14 = vrot.slane %v4393_v35, 4  ;;  %v4176_v45 = vrot.slane %v4146_v8, 2 }
 0x64d   : > { %v4548_v59 = vunpack.c.l.b16 %v4516_v3  ;;  %v4381_v38 = vmax.f32 %v4379_v41, %v4380_v12  ;;  %v4177_v19 = vrot.slane %v4146_v8, 4  ;;  %v4178_v13 = vrot.slane %v4146_v8, 6  ;;  %v11290_v3 = vld [vmem:[%s16643_s7 + $0x38] sm:$0xff] }
 0x64e   : > { %v4375_v27 = vrot.slane %v4374_v11, 2  ;;  %v4388_v17 = vmax.f32 %v4386_v43, %v4387_v40  ;;  %v4395_v16 = vmax.f32 %v4393_v35, %v4394_v14  ;;  %v4400_v42 = vsel %vm4203_vm4, %v4146_v8, -inf  ;;  %4747 = vmatpush.bf16.msra.mxu2 %v11290_v3 }
 0x64f   : > { %v4382_v53 = vrot.slane %v4381_v38, 2  ;;  %v4576_v56 = vsel %vm2504_vm6, %v4548_v59, %v4547_v30  ;;  %v4401_v0 = vrot.slane %v4400_v42, 4  ;;  %v4407_v4 = vsel %vm4203_vm4, %v4176_v45, -inf }
 0x650   : > { %v4376_v36 = vmax.f32 %v4374_v11, %v4375_v27  ;;  %v4389_v57 = vrot.slane %v4388_v17, 2  ;;  %v4396_v55 = vrot.slane %v4395_v16, 2  ;;  %v4408_v58 = vrot.slane %v4407_v4, 4 }
 0x651   : > { %v4383_v9 = vmax.f32 %v4381_v38, %v4382_v53  ;;  %v4402_v32 = vmax.f32 %v4400_v42, %v4401_v0  ;;  %v4414_v24 = vsel %vm4203_vm4, %v4177_v19, -inf  ;;  %v4421_v22 = vsel %vm4203_vm4, %v4178_v13, -inf  ;;  %vm16762_vm4 = vmmov %vm16760_vm1 }
 0x652   : > { %v4377_v21 = vrot.slane %v4376_v36, 1  ;;  %v4390_v49 = vmax.f32 %v4388_v17, %v4389_v57  ;;  %v4397_v52 = vmax.f32 %v4395_v16, %v4396_v55  ;;  %v4409_v44 = vmax.f32 %v4407_v4, %v4408_v58 }
 0x653   : > { %v4384_v26 = vrot.slane %v4383_v9, 1  ;;  %v4403_v7 = vrot.slane %v4402_v32, 2  ;;  %v4415_v61 = vrot.slane %v4414_v24, 4  ;;  %v4422_v1 = vrot.slane %v4421_v22, 4 }
 0x654   : > { %v4378_v33 = vmax.f32 %v4376_v36, %v4377_v21  ;;  %v4391_v50 = vrot.slane %v4390_v49, 1  ;;  %v4398_v29 = vrot.slane %v4397_v52, 1  ;;  %v4410_v18 = vrot.slane %v4409_v44, 2 }
 0x655   : > { %v4385_v2 = vmax.f32 %v4383_v9, %v4384_v26  ;;  %v4404_v20 = vmax.f32 %v4402_v32, %v4403_v7  ;;  %v4416_v47 = vmax.f32 %v4414_v24, %v4415_v61  ;;  %v4423_v63 = vmax.f32 %v4421_v22, %v4422_v1 }
 0x656   : > { %v4392_v48 = vmax.f32 %v4390_v49, %v4391_v50  ;;  %v4399_v51 = vmax.f32 %v4397_v52, %v4398_v29  ;;  %v4452_v39 = vpack.c.bf16 %v4378_v33, %v4378_v33  ;;  %v4411_v15 = vmax.f32 %v4409_v44, %v4410_v18 }
 0x657   : > { %v4453_v28 = vpack.c.bf16 %v4385_v2, %v4385_v2  ;;  %v4405_v8 = vrot.slane %v4404_v20, 1  ;;  %v4417_v62 = vrot.slane %v4416_v47, 2  ;;  %v4424_v54 = vrot.slane %v4423_v63, 2 }
 0x658   : > { %v4454_v6 = vpack.c.bf16 %v4392_v48, %v4392_v48  ;;  %v4455_v30 = vpack.c.bf16 %v4399_v51, %v4399_v51  ;;  %v4517_v23 = vperm.slane %v4452_v39, 0  ;;  %v4412_v41 = vrot.slane %v4411_v15, 1 }
 0x659   : > { %v4518_v12 = vperm.slane %v4453_v28, 0  ;;  %v4406_v43 = vmax.f32 %v4404_v20, %v4405_v8  ;;  %v4418_v35 = vmax.f32 %v4416_v47, %v4417_v62  ;;  %v4425_v11 = vmax.f32 %v4423_v63, %v4424_v54 }
 0x65a   : > { %v4519_v40 = vperm.slane %v4454_v6, 0  ;;  %v4520_v14 = vperm.slane %v4455_v30, 0  ;;  %v4549_v45 = vunpack.c.l.b16 %v4517_v23  ;;  %v4413_v59 = vmax.f32 %v4411_v15, %v4412_v41 }
 0x65b   : > { %v4550_v38 = vunpack.c.l.b16 %v4518_v12  ;;  %v4419_v19 = vrot.slane %v4418_v35, 1  ;;  %v4426_v13 = vrot.slane %v4425_v11, 1  ;;  %v4456_v27 = vpack.c.bf16 %v4406_v43, %v4406_v43 }
 0x65c   : > { %v4546_v17 = vunpack.c.l.b16 %v13595_v37  ;;  %v4551_v16 = vunpack.c.l.b16 %v4519_v40  ;;  %v4577_v42 = vsel %vm2506_vm9, %v4549_v45, %v4576_v56  ;;  %v4457_v53 = vpack.c.bf16 %v4413_v59, %v4413_v59 }
 0x65d   : > { %v4578_v0 = vsel %vm2494_vm7, %v4550_v38, %v4577_v42  ;;  %v4420_v4 = vmax.f32 %v4418_v35, %v4419_v19  ;;  %v4427_v36 = vmax.f32 %v4425_v11, %v4426_v13  ;;  %v4521_v57 = vperm.slane %v4456_v27, 0  ;;  %v11288_v42 = vld [vmem:[%s16643_s7 + $0x28] sm:$0xff] }
 0x65e   : > { %v4552_v55 = vunpack.c.l.b16 %v4520_v14  ;;  %v4579_v58 = vsel %vm2496_vm8, %v4551_v16, %v4578_v0  ;;  %v4522_v9 = vperm.slane %v4457_v53, 0  ;;  %v4568_v32 = vsel %vm16760_vm1, %v4538_v34, %v13603_v5  ;;  %v11289_v16 = vld [vmem:[%s16643_s7 + $0x30] sm:$0xff]  ;;  %v11287_v53 = vld [vmem:[%s16643_s7 + $0x20] sm:$0xff]  ;;  %v11286_v0 = vld [vmem:[%s16643_s7 + $0x18] sm:$0xff] }
 0x65f   : > { %v4574_v37 = vsel %vm2500_vm11, %v4545_v10, %v13593_v31  ;;  %v4458_v56 = vpack.c.bf16 %v4420_v4, %v4420_v4  ;;  %v4459_v24 = vpack.c.bf16 %v4427_v36, %v4427_v36  ;;  %v4553_v22 = vunpack.c.l.b16 %v4521_v57  ;;  %4748 = vmatpush.bf16.msra.mxu2 %v11289_v16  ;;  %v11285_v4 = vld [vmem:[%s16643_s7 + $0x10] sm:$0xff]  ;;  %v11284_v36 = vld [vmem:[%s16643_s7 + $0x8] sm:$0xff]  ;;  %v11283_v57 = vld [vmem:[%s16643_s7] sm:$0xff] }
 0x660   : > { %v4580_v21 = vsel %vm2498_vm10, %v4552_v55, %v4579_v58  ;;  %v4554_v49 = vunpack.c.l.b16 %v4522_v9  ;;  %v4584_v52 = vpack.c.b16 %v4568_v32, %v13566_v46  ;;  %v4575_v25 = vsel %vm16761_vm12, %v4546_v17, %v4574_v37 }
 0x661   : > { %v4581_v44 = vsel %vm2500_vm11, %v4553_v22, %v4580_v21  ;;  %v4523_v26 = vperm.slane %v4458_v56, 0  ;;  %v4524_v7 = vperm.slane %v4459_v24, 0  ;;  %vm16763_vm3 = vsmask.f32 6400 }
 0x662   : > { %v4582_v34 = vsel %vm16762_vm4, %v4554_v49, %v4581_v44  ;;  %v13635_v60 = vsel %vm2621_vm13, 0, %v4584_v52  ;;  %vm16764_vm1 = vmmov %vm16763_vm3  ;;  %vm4654_vm12 = vcmask 785408   ;;  %vm4824_vm4 = vcmask 517120  }
 0x663   : > { %v13637_v31 = vpack.c.b16 %v4582_v34, %v4575_v25  ;;  %v4641_v5 = vrot.slane %v13635_v60, 2  ;;  %v4591_v10 = vshrl.u32 %v13635_v60, 16  ;;  %v4615_v61 = vrot.slane %v13635_v60, 1  ;;  %4749 = vmatpush.bf16.msra.mxu2 %v11288_v42 }
 0x664   : > { %v4593_v46 = vshll.u32 %v13635_v60, 16  ;;  %v4555_v1 = vunpack.c.l.b16 %v4523_v26  ;;  %v4556_v33 = vunpack.c.l.b16 %v4524_v7  ;;  %v13693_v7 = vld [vmem:[%s16644_s8] ss:$0 sm:$0xff] }
 0x665   : > { %v4642_v50 = vrot.slane %v13637_v31, 2  ;;  %v4616_v29 = vrot.slane %v13637_v31, 1  ;;  %v4598_v18 = vshll.u32 %v13637_v31, 16  ;;  %v4602_v2 = vshrl.u32 %v13637_v31, 16 }
 0x666   : > { %v4595_v20 = vrot.slane %v4593_v46, 1  ;;  %v4624_v47 = vrot.slane %v4591_v10, 1  ;;  %v4625_v63 = vrot.slane %v4593_v46, 2  ;;  %v4583_v48 = vsel %vm2504_vm6, %v4556_v33, %v4555_v1 }
 0x667   : > { %v4643_v51 = vsel %vm2800_vm15, %v4641_v5, %v4642_v50  ;;  %v4617_v39 = vsel %vm2712_vm14, %v4615_v61, %v4616_v29  ;;  %v4600_v15 = vrot.slane %v4598_v18, 1  ;;  %v4627_v28 = vrot.slane %v4602_v2, 1  ;;  %4750 = vmatpush.bf16.msra.mxu2 %v11287_v53 }
 0x668   : > { %9372 = vmatmul.msk.bf16.vlgmr.msra.gmra.mxu3 %vm2885_vm2, %v4643_v51  ;;  %4620 = vrot.lane.b32.xlu2 %v4617_v39, %s16683_s27  ;;  %v4596_v8 = vor.u32 %v4595_v20, %v4591_v10  ;;  %v4628_v62 = vrot.slane %v4598_v18, 2  ;;  %v4586_v54 = vpack.c.b16 %v4583_v48, %v4583_v48  ;;  %v4626_v30 = vor.u32 %v4625_v63, %v4624_v47 }
 0x669   : > { %v4604_v14 = vor.u32 %v4602_v2, %v4600_v15 }
 0x66a   : > { %v4601_v6 = vsel %vm2627_vm0, %v4596_v8, %v4600_v15  ;;  %v4629_v23 = vor.u32 %v4628_v62, %v4627_v28  ;;  %v4590_v41 = vsel %vm2621_vm13, %v4586_v54, 0 }
 0x66b   : > { %4609 = vrot.lane.b32.xlu1 %v4601_v6, %s11901_s0  ;;  %v4618_v3 = vrot.slane %v4590_v41, 1  ;;  %v4605_v12 = vshll.u32 %v4590_v41, 16  ;;  %v4631_v43 = vshrl.u32 %v4590_v41, 16  ;;  %v4644_v13 = vrot.slane %v4590_v41, 2  ;;  %4751 = vmatpush.bf16.msra.mxu2 %v11286_v0 }
 0x66c   : > { %v4630_v35 = vsel %vm16763_vm3, %v4626_v30, %v4629_v23  ;;  %vm16768_vm3 = vmmov %vm16764_vm1 }
 0x66d   : > { %4637 = vrot.lane.b32.xlu0 %v4630_v35, %s11906_s28  ;;  %v4633_v11 = vrot.slane %v4631_v43, 1  ;;  %v4634_v40 = vrot.slane %v4605_v12, 2  ;;  %v4607_v45 = vrot.slane %v4605_v12, 1  ;;  %v4619_v59 = vsel %vm2712_vm14, %v4616_v29, %v4618_v3 }
 0x66e   : > { %v4645_v17 = vsel %vm2800_vm15, %v4642_v50, %v4644_v13 }
 0x66f   : > { %v4635_v38 = vor.u32 %v4634_v40, %v4633_v11  ;;  %v4608_v19 = vsel %vm2627_vm0, %v4604_v14, %v4607_v45  ;;  %4752 = vmatpush.bf16.msra.mxu2 %v11285_v4 }
 0x670   : > { %4622 = vrot.lane.b32.xlu2 %v4619_v59, %s16683_s27  ;;  %s592_s27 = scalar_lea.vmem [#allocation2], %s591_s2 }
 0x671   : > { %v4636_v27 = vsel %vm16764_vm1, %v4629_v23, %v4635_v38  ;;  %s9226_s23 = sshll.u32 %s592_s27, 4  ;;  %s9227_s23 = int_to_ptr.vmem [resolvable:$true] %s9226_s23 }
 0x673   : > { %4611 = vrot.lane.b32.xlu1 %v4608_v19, %s11901_s0  ;;  %4753 = vmatpush.bf16.msra.mxu2 %v11284_v36  ;;  %s16767_s0 = smov 64  }
 0x675   : > { %4639 = vrot.lane.b32.xlu0 %v4636_v27, %s11906_s28 }
 0x677   : > { %4754 = vmatpush.bf16.msra.mxu2 %v11283_v57 }
 0x678   : > { %9373 = vmatmul.msk.bf16.gmra.mxu3 %vm2885_vm2, %v4645_v17 }
 0x6c2   : > { %v4621_v58 = vpop.permute.xlu2 %4620 }
 0x6ca   : > { %v4623_v21 = vpop.permute.xlu2 %4622 }
 0x6dd   : > { %v4610_v55 = vpop.permute.xlu1 %4609 }
 0x6de   : > { %v4647_v9 = vsel %vm2885_vm2, %v13635_v60, %v4610_v55 }
 0x6df   : > { %v4638_v32 = vpop.permute.xlu0 %4637  ;;  %v4651_v37 = vsel %vm4041_vm5, %v4647_v9, %v4621_v58 }
 0x6e0   : > { %v4656_v56 = vsel %vm4654_vm12, %v4651_v37, %v4638_v32 }
 0x6e1   : > { %4755 = vmatmul.bf16.vlgmr.msra.gmra.mxu2 %v4656_v56 }
 0x6e5   : > { %v4612_v24 = vpop.permute.xlu1 %4611 }
 0x6e6   : > { %v4649_v22 = vsel %vm2885_vm2, %v13637_v31, %v4612_v24 }
 0x6e7   : > { %v4640_v49 = vpop.permute.xlu0 %4639  ;;  %v4653_v52 = vsel %vm4041_vm5, %v4649_v22, %v4623_v21 }
 0x6e8   : > { %v4659_v44 = vsel %vm4654_vm12, %v4653_v52, %v4640_v49 }
 0x6eb   : > { %v4775_v26 = vpop.f32.mrf.mxu3 }
 0x6f1   : > { %4760 = vmatmul.bf16.gmra.mxu2 %v4659_v44 }
 0x6f3   : > { %v4777_v10 = vpop.f32.mrf.mxu3 }
 0x6fb   : > { %v4780_v38 = vpop.f32.mrf.mxu3 }
 0x764   : > { %v4756_v25 = vpop.f32.mrf.mxu2 }
 0x765   : > { %v4776_v34 = vadd.f32 %v4775_v26, %v4756_v25 }
 0x767   : > { %v4788_v60 = vadd.f32 %v13693_v7, %v4776_v34 }
 0x769   : > { %v4792_v5 = vmax.f32 %v4788_v60, 0.0 }
 0x76b   : > { %v4800_v31 = vrot.slane %v4792_v5, 2  ;;  %v4801_v61 = vrot.slane %v4792_v5, 4  ;;  %v4802_v46 = vrot.slane %v4792_v5, 6  ;;  %v4825_v1 = vsel %vm4824_vm4, %v4792_v5, -inf }
 0x76c   : > { %v4826_v33 = vrot.slane %v4825_v1, 4  ;;  %v4758_v50 = vpop.f32.mrf.mxu2 }
 0x76d   : > { %v4832_v29 = vsel %vm4824_vm4, %v4800_v31, -inf  ;;  %v4839_v18 = vsel %vm4824_vm4, %v4801_v61, -inf  ;;  %v4846_v2 = vsel %vm4824_vm4, %v4802_v46, -inf  ;;  %v4778_v20 = vadd.f32 %v4777_v10, %v4758_v50 }
 0x76e   : > { %v4827_v47 = vmax.f32 %v4825_v1, %v4826_v33  ;;  %v4833_v63 = vrot.slane %v4832_v29, 4  ;;  %v4840_v48 = vrot.slane %v4839_v18, 4  ;;  %v4847_v51 = vrot.slane %v4846_v2, 4 }
 0x76f   : > { %v4789_v39 = vadd.f32 %v13693_v7, %v4778_v20  ;;  %v4782_v20 = vpop.f32.mrf.mxu3 }
 0x770   : > { %v4828_v15 = vrot.slane %v4827_v47, 2  ;;  %v4834_v28 = vmax.f32 %v4832_v29, %v4833_v63  ;;  %v4841_v8 = vmax.f32 %v4839_v18, %v4840_v48  ;;  %v4848_v62 = vmax.f32 %v4846_v2, %v4847_v51 }
 0x771   : > { %v4793_v54 = vmax.f32 %v4789_v39, 0.0 }
 0x772   : > { %v4829_v6 = vmax.f32 %v4827_v47, %v4828_v15  ;;  %v4835_v30 = vrot.slane %v4834_v28, 2  ;;  %v4842_v23 = vrot.slane %v4841_v8, 2  ;;  %v4849_v41 = vrot.slane %v4848_v62, 2 }
 0x773   : > { %v4803_v3 = vrot.slane %v4793_v54, 2  ;;  %v4804_v12 = vrot.slane %v4793_v54, 4  ;;  %v4805_v43 = vrot.slane %v4793_v54, 6  ;;  %v4853_v35 = vsel %vm4824_vm4, %v4793_v54, -inf }
 0x774   : > { %v4830_v11 = vrot.slane %v4829_v6, 1  ;;  %v4836_v40 = vmax.f32 %v4834_v28, %v4835_v30  ;;  %v4843_v14 = vmax.f32 %v4841_v8, %v4842_v23  ;;  %v4850_v45 = vmax.f32 %v4848_v62, %v4849_v41  ;;  %v4761_v59 = vpop.f32.mrf.mxu2 }
 0x775   : > { %v4854_v19 = vrot.slane %v4853_v35, 4  ;;  %v4860_v13 = vsel %vm4824_vm4, %v4803_v3, -inf  ;;  %v4867_v27 = vsel %vm4824_vm4, %v4804_v12, -inf  ;;  %v4874_v17 = vsel %vm4824_vm4, %v4805_v43, -inf }
 0x776   : > { %v4831_v16 = vmax.f32 %v4829_v6, %v4830_v11  ;;  %v4837_v42 = vrot.slane %v4836_v40, 1  ;;  %v4844_v53 = vrot.slane %v4843_v14, 1  ;;  %v4851_v0 = vrot.slane %v4850_v45, 1 }
 0x777   : > { %v4855_v4 = vmax.f32 %v4853_v35, %v4854_v19  ;;  %v4861_v36 = vrot.slane %v4860_v13, 4  ;;  %v4868_v57 = vrot.slane %v4867_v27, 4  ;;  %v4875_v55 = vrot.slane %v4874_v17, 4 }
 0x778   : > { %v4838_v58 = vmax.f32 %v4836_v40, %v4837_v42  ;;  %v4845_v9 = vmax.f32 %v4843_v14, %v4844_v53  ;;  %v4852_v32 = vmax.f32 %v4850_v45, %v4851_v0  ;;  %v4937_v37 = vpack.c.bf16 %v4831_v16, %v4831_v16 }
 0x779   : > { %v4856_v56 = vrot.slane %v4855_v4, 2  ;;  %v4862_v24 = vmax.f32 %v4860_v13, %v4861_v36  ;;  %v4869_v22 = vmax.f32 %v4867_v27, %v4868_v57  ;;  %v4876_v21 = vmax.f32 %v4874_v17, %v4875_v55 }
 0x77a   : > { %v4938_v49 = vpack.c.bf16 %v4838_v58, %v4838_v58  ;;  %v4939_v52 = vpack.c.bf16 %v4845_v9, %v4845_v9  ;;  %v4940_v44 = vpack.c.bf16 %v4852_v32, %v4852_v32  ;;  %v4970_v5 = vperm.slane %v4937_v37, 0 }
 0x77b   : > { %v4857_v26 = vmax.f32 %v4855_v4, %v4856_v56  ;;  %v4863_v25 = vrot.slane %v4862_v24, 2  ;;  %v4870_v34 = vrot.slane %v4869_v22, 2  ;;  %v4877_v60 = vrot.slane %v4876_v21, 2 }
 0x77c   : > { %v4971_v10 = vperm.slane %v4938_v49, 0  ;;  %v4763_v33 = vpop.f32.mrf.mxu2  ;;  %v4972_v50 = vperm.slane %v4939_v52, 0  ;;  %v13705_v29 = vperm.slane %v4940_v44, 0  ;;  %v4781_v2 = vadd.f32 %v4780_v38, %v4761_v59 }
 0x77d   : > { %v4858_v31 = vrot.slane %v4857_v26, 1  ;;  %v4864_v61 = vmax.f32 %v4862_v24, %v4863_v25  ;;  %v4871_v46 = vmax.f32 %v4869_v22, %v4870_v34  ;;  %v4878_v1 = vmax.f32 %v4876_v21, %v4877_v60 }
 0x77e   : > { %v4987_v18 = vunpack.c.l.b16 %v4971_v10  ;;  %v4790_v39 = vadd.f32 %v13693_v7, %v4781_v2  ;;  %v4783_v15 = vadd.f32 %v4782_v20, %v4763_v33  ;;  %v4986_v28 = vunpack.c.l.b16 %v4970_v5  ;;  %v11308_v20 = vld [vmem:[%s16645_s9 + $0x78] sm:$0xff] }
 0x77f   : > { %v4859_v47 = vmax.f32 %v4857_v26, %v4858_v31  ;;  %v4865_v63 = vrot.slane %v4864_v61, 1  ;;  %v4872_v48 = vrot.slane %v4871_v46, 1  ;;  %v4879_v51 = vrot.slane %v4878_v1, 1  ;;  %5236 = vmatpush.bf16.msrb.mxu2 %v11308_v20 }
 0x780   : > { %v4988_v6 = vunpack.c.l.b16 %v4972_v50  ;;  %v4989_v30 = vunpack.c.l.b16 %v13705_v29  ;;  %v4794_v41 = vmax.f32 %v4790_v39, 0.0  ;;  %v5002_v3 = vsel %vm2494_vm7, %v4987_v18, %v4986_v28 }
 0x781   : > { %v4866_v8 = vmax.f32 %v4864_v61, %v4865_v63  ;;  %v4873_v62 = vmax.f32 %v4871_v46, %v4872_v48  ;;  %v4880_v54 = vmax.f32 %v4878_v1, %v4879_v51  ;;  %v4941_v23 = vpack.c.bf16 %v4859_v47, %v4859_v47 }
 0x782   : > { %v4806_v11 = vrot.slane %v4794_v41, 2  ;;  %v4807_v40 = vrot.slane %v4794_v41, 4  ;;  %v4808_v14 = vrot.slane %v4794_v41, 6  ;;  %v4791_v45 = vadd.f32 %v13693_v7, %v4783_v15 }
 0x783   : > { %v4942_v12 = vpack.c.bf16 %v4866_v8, %v4866_v8  ;;  %v4943_v43 = vpack.c.bf16 %v4873_v62, %v4873_v62  ;;  %v4944_v35 = vpack.c.bf16 %v4880_v54, %v4880_v54  ;;  %v13711_v59 = vperm.slane %v4941_v23, 0  ;;  %v11307_v62 = vld [vmem:[%s16645_s9 + $0x70] sm:$0xff]  ;;  %v11300_v54 = vld [vmem:[%s16645_s9 + $0x38] sm:$0xff] }
 0x784   : > { %v4881_v13 = vsel %vm4824_vm4, %v4794_v41, -inf  ;;  %v13715_v27 = vsel %vm2496_vm8, %v4988_v6, %v5002_v3  ;;  %v4888_v16 = vsel %vm4824_vm4, %v4806_v11, -inf  ;;  %v4895_v42 = vsel %vm4824_vm4, %v4807_v40, -inf  ;;  %5222 = vmatpush.bf16.msrb.mxu3 %v11300_v54  ;;  %v11299_v40 = vld [vmem:[%s16645_s9 + $0x30] sm:$0xff]  ;;  %5237 = vmatpush.bf16.msrb.mxu2 %v11307_v62 }
 0x785   : > { %v4976_v38 = vperm.slane %v4943_v43, 0  ;;  %v4977_v19 = vperm.slane %v4944_v35, 0  ;;  %v4882_v17 = vrot.slane %v4881_v13, 4  ;;  %v13719_v53 = vperm.slane %v4942_v12, 0 }
 0x786   : > { %v4889_v36 = vrot.slane %v4888_v16, 4  ;;  %v4896_v57 = vrot.slane %v4895_v42, 4  ;;  %v4902_v55 = vsel %vm4824_vm4, %v4808_v14, -inf  ;;  %v4795_v58 = vmax.f32 %v4791_v45, 0.0 }
 0x787   : > { %v4992_v0 = vunpack.c.l.b16 %v4976_v38  ;;  %v4993_v4 = vunpack.c.l.b16 %v4977_v19  ;;  %v4883_v7 = vmax.f32 %v4881_v13, %v4882_v17  ;;  %v4990_v9 = vunpack.c.l.b16 %v13711_v59 }
 0x788   : > { %v4890_v32 = vmax.f32 %v4888_v16, %v4889_v36  ;;  %v4903_v37 = vrot.slane %v4902_v55, 4  ;;  %v4897_v22 = vmax.f32 %v4895_v42, %v4896_v57  ;;  %v4809_v21 = vrot.slane %v4795_v58, 2  ;;  %5223 = vmatpush.bf16.msrb.mxu3 %v11299_v40 }
 0x789   : > { %v13724_v56 = vsel %vm2504_vm6, %v4993_v4, %v4992_v0  ;;  %v4884_v24 = vrot.slane %v4883_v7, 2  ;;  %v4810_v49 = vrot.slane %v4795_v58, 4  ;;  %v4811_v26 = vrot.slane %v4795_v58, 6  ;;  %v11306_v0 = vld [vmem:[%s16645_s9 + $0x68] sm:$0xff] }
 0x78a   : > { %v4891_v52 = vrot.slane %v4890_v32, 2  ;;  %v4904_v44 = vmax.f32 %v4902_v55, %v4903_v37  ;;  %v4909_v25 = vsel %vm4824_vm4, %v4795_v58, -inf  ;;  %v4898_v60 = vrot.slane %v4897_v22, 2  ;;  %5238 = vmatpush.bf16.msrb.mxu2 %v11306_v0 }
 0x78b   : > { %v4885_v34 = vmax.f32 %v4883_v7, %v4884_v24  ;;  %v4910_v5 = vrot.slane %v4909_v25, 4  ;;  %v4916_v10 = vsel %vm4824_vm4, %v4809_v21, -inf  ;;  %v4923_v1 = vsel %vm4824_vm4, %v4810_v49, -inf }
 0x78c   : > { %v4892_v31 = vmax.f32 %v4890_v32, %v4891_v52  ;;  %v4905_v61 = vrot.slane %v4904_v44, 2  ;;  %v4917_v46 = vrot.slane %v4916_v10, 4  ;;  %v4899_v50 = vmax.f32 %v4897_v22, %v4898_v60 }
 0x78d   : > { %v4886_v33 = vrot.slane %v4885_v34, 1  ;;  %v4911_v18 = vmax.f32 %v4909_v25, %v4910_v5  ;;  %v4924_v2 = vrot.slane %v4923_v1, 4  ;;  %v4930_v51 = vsel %vm4824_vm4, %v4811_v26, -inf }
 0x78e   : > { %v4893_v47 = vrot.slane %v4892_v31, 1  ;;  %v4906_v63 = vmax.f32 %v4904_v44, %v4905_v61  ;;  %v4918_v48 = vmax.f32 %v4916_v10, %v4917_v46  ;;  %v4900_v15 = vrot.slane %v4899_v50, 1 }
 0x78f   : > { %v4887_v39 = vmax.f32 %v4885_v34, %v4886_v33  ;;  %v4912_v28 = vrot.slane %v4911_v18, 2  ;;  %v4925_v8 = vmax.f32 %v4923_v1, %v4924_v2  ;;  %v4931_v3 = vrot.slane %v4930_v51, 4  ;;  %v11305_v34 = vld [vmem:[%s16645_s9 + $0x60] sm:$0xff] }
 0x790   : > { %v4894_v6 = vmax.f32 %v4892_v31, %v4893_v47  ;;  %v4907_v23 = vrot.slane %v4906_v63, 1  ;;  %v4919_v41 = vrot.slane %v4918_v48, 2  ;;  %v4901_v12 = vmax.f32 %v4899_v50, %v4900_v15  ;;  %5239 = vmatpush.bf16.msrb.mxu2 %v11305_v34 }
 0x791   : > { %v4945_v43 = vpack.c.bf16 %v4887_v39, %v4887_v39  ;;  %v4913_v35 = vmax.f32 %v4911_v18, %v4912_v28  ;;  %v4926_v11 = vrot.slane %v4925_v8, 2  ;;  %v4932_v19 = vmax.f32 %v4930_v51, %v4931_v3 }
 0x792   : > { %v4908_v14 = vmax.f32 %v4906_v63, %v4907_v23  ;;  %v4946_v45 = vpack.c.bf16 %v4894_v6, %v4894_v6  ;;  %v4920_v38 = vmax.f32 %v4918_v48, %v4919_v41  ;;  %v4947_v13 = vpack.c.bf16 %v4901_v12, %v4901_v12  ;;  %v11304_v63 = vld [vmem:[%s16645_s9 + $0x58] sm:$0xff]  ;;  %v11302_v41 = vld [vmem:[%s16645_s9 + $0x48] sm:$0xff] }
 0x793   : > { %v4978_v17 = vperm.slane %v4945_v43, 0  ;;  %v4914_v16 = vrot.slane %v4913_v35, 1  ;;  %v4927_v42 = vmax.f32 %v4925_v8, %v4926_v11  ;;  %v4933_v57 = vrot.slane %v4932_v19, 2 }
 0x794   : > { %v4948_v4 = vpack.c.bf16 %v4908_v14, %v4908_v14  ;;  %v4979_v36 = vperm.slane %v4946_v45, 0  ;;  %v4921_v7 = vrot.slane %v4920_v38, 1  ;;  %v4980_v55 = vperm.slane %v4947_v13, 0  ;;  %5240 = vmatpush.bf16.msrb.mxu2 %v11304_v63  ;;  %v11301_v45 = vld [vmem:[%s16645_s9 + $0x40] sm:$0xff] }
 0x795   : > { %v4994_v58 = vunpack.c.l.b16 %v4978_v17  ;;  %v4915_v32 = vmax.f32 %v4913_v35, %v4914_v16  ;;  %v4928_v37 = vrot.slane %v4927_v42, 1  ;;  %v4934_v49 = vmax.f32 %v4932_v19, %v4933_v57  ;;  %v11295_v57 = vld [vmem:[%s16645_s9 + $0x10] sm:$0xff] }
 0x796   : > { %v4981_v24 = vperm.slane %v4948_v4, 0  ;;  %v4995_v22 = vunpack.c.l.b16 %v4979_v36  ;;  %v4922_v21 = vmax.f32 %v4920_v38, %v4921_v7  ;;  %v4996_v52 = vunpack.c.l.b16 %v4980_v55  ;;  %v11298_v4 = vld [vmem:[%s16645_s9 + $0x28] sm:$0xff]  ;;  %v11297_v36 = vld [vmem:[%s16645_s9 + $0x20] sm:$0xff]  ;;  %v11296_v7 = vld [vmem:[%s16645_s9 + $0x18] sm:$0xff] }
 0x797   : > { %v5008_v44 = vsel %vm2506_vm9, %v4994_v58, %v13724_v56  ;;  %v4929_v26 = vmax.f32 %v4927_v42, %v4928_v37  ;;  %v4949_v25 = vpack.c.bf16 %v4915_v32, %v4915_v32  ;;  %v4935_v5 = vrot.slane %v4934_v49, 1  ;;  %5224 = vmatpush.bf16.msrb.mxu3 %v11298_v4  ;;  %v11294_v55 = vld [vmem:[%s16645_s9 + $0x8] sm:$0xff]  ;;  %v11293_v58 = vld [vmem:[%s16645_s9] sm:$0xff]  ;;  %v11312_v32 = vld [vmem:[%s16645_s9 + $0x98] sm:$0xff] }
 0x798   : > { %v5009_v60 = vsel %vm2494_vm7, %v4995_v22, %v5008_v44  ;;  %v4950_v10 = vpack.c.bf16 %v4922_v21, %v4922_v21  ;;  %v5004_v56 = vsel %vm2498_vm10, %v4989_v30, %v13715_v27  ;;  %v4991_v1 = vunpack.c.l.b16 %v13719_v53  ;;  %v11311_v37 = vld [vmem:[%s16645_s9 + $0x90] sm:$0xff]  ;;  %v11310_v21 = vld [vmem:[%s16645_s9 + $0x88] sm:$0xff] }
 0x799   : > { %v5010_v31 = vsel %vm2496_vm8, %v4996_v52, %v5009_v60  ;;  %v4951_v61 = vpack.c.bf16 %v4929_v26, %v4929_v26  ;;  %v4982_v46 = vperm.slane %v4949_v25, 0  ;;  %v4997_v33 = vunpack.c.l.b16 %v4981_v24  ;;  %v11309_v26 = vld [vmem:[%s16645_s9 + $0x80] sm:$0xff] }
 0x79a   : > { %v4936_v50 = vmax.f32 %v4934_v49, %v4935_v5  ;;  %v4983_v18 = vperm.slane %v4950_v10, 0  ;;  %v5005_v47 = vsel %vm2500_vm11, %v4990_v9, %v5004_v56  ;;  %vm16765_vm9 = vcmask 1047559   ;;  %v11303_v9 = vld [vmem:[%s16645_s9 + $0x50] sm:$0xff] }
 0x79b   : > { %v4998_v2 = vunpack.c.l.b16 %v4982_v46  ;;  %v4984_v20 = vperm.slane %v4951_v61, 0  ;;  %v5011_v30 = vsel %vm2498_vm10, %v4997_v33, %v5010_v31  ;;  %v5006_v39 = vsel %vm16765_vm9, %v4991_v1, %v5005_v47  ;;  %vm16766_vm2 = vmmov %vm16765_vm9  ;;  %5241 = vmatpush.bf16.msrb.mxu2 %v11303_v9  ;;  %5225 = vmatpush.bf16.msrb.mxu3 %v11297_v36  ;;  %v11825_v1 = vld [vmem:[%s16646_s10] ss:$0 sm:$0xff] }
 0x79c   : > { %v4952_v48 = vpack.c.bf16 %v4936_v50, %v4936_v50  ;;  %v4999_v29 = vunpack.c.l.b16 %v4983_v18 }
 0x79d   : > { %v5012_v27 = vsel %vm2500_vm11, %v4998_v2, %v5011_v30  ;;  %v5000_v51 = vunpack.c.l.b16 %v4984_v20  ;;  %v11332_v2 = vld [vmem:[%s16647_s11 + $0x98] sm:$0xff] }
 0x79e   : > { %v4985_v53 = vperm.slane %v4952_v48, 0  ;;  %v5013_v15 = vsel %vm16766_vm2, %v4999_v29, %v5012_v27  ;;  %v11331_v48 = vld [vmem:[%s16647_s11 + $0x90] sm:$0xff] }
 0x79f   : > { %v5015_v59 = vpack.c.b16 %v5013_v15, %v5006_v39  ;;  %5242 = vmatpush.bf16.msrb.mxu2 %v11302_v41  ;;  %5226 = vmatpush.bf16.msrb.mxu3 %v11296_v7 }
 0x7a0   : > { %v5001_v28 = vunpack.c.l.b16 %v4985_v53 }
 0x7a1   : > { %v5018_v8 = vsel %vm2621_vm13, 0, %v5015_v59 }
 0x7a2   : > { %v5014_v62 = vsel %vm2504_vm6, %v5001_v28, %v5000_v51  ;;  %v5021_v54 = vshrl.u32 %v5018_v8, 16  ;;  %v5023_v6 = vshll.u32 %v5018_v8, 16  ;;  %v5035_v24 = vrot.slane %v5018_v8, 1 }
 0x7a3   : > { %v5016_v23 = vpack.c.b16 %v5014_v62, %v5014_v62  ;;  %5243 = vmatpush.bf16.msrb.mxu2 %v11301_v45  ;;  %5227 = vmatpush.bf16.msrb.mxu3 %v11295_v57  ;;  %v5049_v60 = vrot.slane %v5018_v8, 2  ;;  %v11320_v57 = vld [vmem:[%s16647_s11 + $0x38] sm:$0xff] }
 0x7a4   : > { %v5038_v3 = vrot.slane %v5021_v54, 1  ;;  %v5039_v12 = vrot.slane %v5023_v6, 2  ;;  %v5025_v43 = vrot.slane %v5023_v6, 1  ;;  %5571 = vmatpush.bf16.msrb.mxu1 %v11320_v57 }
 0x7a5   : > { %v5020_v35 = vsel %vm2621_vm13, %v5016_v23, 0  ;;  %v11330_v23 = vld [vmem:[%s16647_s11 + $0x88] sm:$0xff] }
 0x7a6   : > { %v5027_v11 = vshll.u32 %v5020_v35, 16  ;;  %v5041_v40 = vshrl.u32 %v5020_v35, 16  ;;  %v5026_v14 = vor.u32 %v5025_v43, %v5021_v54  ;;  %v5040_v38 = vor.u32 %v5039_v12, %v5038_v3 }
 0x7a7   : > { %5228 = vmatpush.bf16.msrb.mxu3 %v11294_v55  ;;  %v5036_v22 = vrot.slane %v5020_v35, 1  ;;  %v5050_v5 = vrot.slane %v5020_v35, 2  ;;  %5601 = vmatpush.bf16.msra.mxu2 %v11332_v2  ;;  %v11328_v55 = vld [vmem:[%s16647_s11 + $0x78] sm:$0xff] }
 0x7a8   : > { %v5043_v19 = vrot.slane %v5041_v40, 1  ;;  %v5044_v13 = vrot.slane %v5027_v11, 2  ;;  %v5029_v17 = vrot.slane %v5027_v11, 1 }
 0x7a9   : > { %v5037_v52 = vsel %vm2712_vm14, %v5035_v24, %v5036_v22  ;;  %v5051_v10 = vsel %vm2800_vm15, %v5049_v60, %v5050_v5  ;;  %v11327_v5 = vld [vmem:[%s16647_s11 + $0x70] sm:$0xff]  ;;  %vm16769_vm14 = vmmov %vm16766_vm2  ;;  %vm5383_vm15 = vcmask 1044480  }
 0x7aa   : > { %v5045_v16 = vor.u32 %v5044_v13, %v5043_v19  ;;  %v5030_v42 = vsel %vm2627_vm0, %v5026_v14, %v5029_v17  ;;  %v11329_v19 = vld [vmem:[%s16647_s11 + $0x80] sm:$0xff] }
 0x7ab   : > { %5031 = vrot.lane.b32.xlu1 %v5030_v42, %s16767_s0  ;;  %5229 = vmatpush.bf16.msrb.mxu3 %v11293_v58 }
 0x7ac   : > { %v5046_v0 = vsel %vm16768_vm3, %v5040_v38, %v5045_v16  ;;  %5602 = vmatpush.bf16.msra.mxu2 %v11331_v48 }
 0x7ad   : > { %5047 = vrot.lane.b32.xlu2 %v5046_v0, %s16767_s0 }
 0x7af   : > { %5254 = vmatpush.bf16.msra.mxu3 %v11312_v32 }
 0x7b0   : > { %5603 = vmatpush.bf16.msra.mxu2 %v11330_v23 }
 0x7b3   : > { %5255 = vmatpush.bf16.msra.mxu3 %v11311_v37 }
 0x7b4   : > { %5604 = vmatpush.bf16.msra.mxu2 %v11329_v19  ;;  %v11316_v19 = vld [vmem:[%s16647_s11 + $0x18] sm:$0xff] }
 0x7b7   : > { %5256 = vmatpush.bf16.msra.mxu3 %v11310_v21 }
 0x7bb   : > { %5257 = vmatpush.bf16.msra.mxu3 %v11309_v26 }
 0x807   : > { %v5048_v49 = vpop.permute.xlu2 %5047 }
 0x808   : > { %v5057_v44 = vsel %vm4041_vm5, %v5037_v52, %v5048_v49 }
 0x809   : > { %5244 = vmatmul.bf16.vlgmr.msrb.gmra.mxu2 %v5057_v44  ;;  %v11319_v44 = vld [vmem:[%s16647_s11 + $0x30] sm:$0xff] }
 0x80a   : > { %5572 = vmatpush.bf16.msrb.mxu1 %v11319_v44 }
 0x81d   : > { %v5032_v25 = vpop.permute.xlu1 %5031 }
 0x81e   : > { %v5053_v34 = vsel %vm4041_vm5, %v5018_v8, %v5032_v25 }
 0x81f   : > { %5230 = vmatmul.bf16.vlgmr.msrb.gmra.mxu3 %v5053_v34 }
 0x820   : > { %5584 = vmatpush.bf16.msrb.mxu3 %v11328_v55 }
 0x824   : > { %5585 = vmatpush.bf16.msrb.mxu3 %v11327_v5 }
 0x82f   : > { %9454 = vmatmul.msk.bf16.vlgmr.msra.gmra.mxu3 %vm4041_vm5, %v5051_v10 }
 0x88c   : > { %v5245_v46 = vpop.f32.mrf.mxu2 }
 0x894   : > { %v5247_v20 = vpop.f32.mrf.mxu2 }
 0x8a2   : > { %v5231_v31 = vpop.f32.mrf.mxu3 }
 0x8a3   : > { %v5246_v56 = vadd.f32 %v5245_v46, %v5231_v31 }
 0x8aa   : > { %v5233_v61 = vpop.f32.mrf.mxu3 }
 0x8ab   : > { %v5248_v63 = vadd.f32 %v5247_v20, %v5233_v61 }
 0x8b2   : > { %v5259_v33 = vpop.f32.mrf.mxu3 }
 0x8b3   : > { %v5260_v50 = vadd.f32 %v5259_v33, %v5246_v56 }
 0x8b5   : > { %v5267_v18 = vadd.f32 %v11825_v1, %v5260_v50 }
 0x8b7   : > { %v5269_v47 = vmax.f32 %v5267_v18, 0.0 }
 0x8b9   : > { %v5273_v29 = vrot.slane %v5269_v47, 2  ;;  %v5274_v30 = vrot.slane %v5269_v47, 4  ;;  %v5275_v27 = vrot.slane %v5269_v47, 6  ;;  %v5285_v53 = vsel %vm4824_vm4, %v5269_v47, -inf  ;;  %v11318_v47 = vld [vmem:[%s16647_s11 + $0x28] sm:$0xff] }
 0x8ba   : > { %v5286_v51 = vrot.slane %v5285_v53, 4  ;;  %v5261_v39 = vpop.f32.mrf.mxu3  ;;  %5573 = vmatpush.bf16.msrb.mxu1 %v11318_v47  ;;  %v9594_v47 = vld [vmem:[%s16649_s13 + $0x70] sm:$0xf] }
 0x8bb   : > { %v5292_v15 = vsel %vm4824_vm4, %v5273_v29, -inf  ;;  %v5299_v59 = vsel %vm4824_vm4, %v5274_v30, -inf  ;;  %v5306_v9 = vsel %vm4824_vm4, %v5275_v27, -inf  ;;  %v5262_v28 = vadd.f32 %v5261_v39, %v5248_v63  ;;  %v11326_v27 = vld [vmem:[%s16647_s11 + $0x68] sm:$0xff] }
 0x8bc   : > { %v5287_v8 = vmax.f32 %v5285_v53, %v5286_v51  ;;  %v5293_v62 = vrot.slane %v5292_v15, 4  ;;  %v5300_v54 = vrot.slane %v5299_v59, 4  ;;  %v5307_v6 = vrot.slane %v5306_v9, 4  ;;  %5586 = vmatpush.bf16.msrb.mxu3 %v11326_v27  ;;  %v9658_v27 = vld [vmem:[%s16649_s13 + $0xf0] sm:$0xf] }
 0x8bd   : > { %v5268_v41 = vadd.f32 %v11825_v1, %v5262_v28 }
 0x8be   : > { %v5288_v3 = vrot.slane %v5287_v8, 2  ;;  %v5294_v12 = vmax.f32 %v5292_v15, %v5293_v62  ;;  %v5301_v43 = vmax.f32 %v5299_v59, %v5300_v54  ;;  %v5308_v35 = vmax.f32 %v5306_v9, %v5307_v6  ;;  %v11317_v54 = vld [vmem:[%s16647_s11 + $0x20] sm:$0xff] }
 0x8bf   : > { %v5270_v11 = vmax.f32 %v5268_v41, 0.0  ;;  %5574 = vmatpush.bf16.msrb.mxu1 %v11317_v54  ;;  %v9570_v54 = vld [vmem:[%s16649_s13 + $0x40] sm:$0xf] }
 0x8c0   : > { %v5289_v40 = vmax.f32 %v5287_v8, %v5288_v3  ;;  %v5295_v14 = vrot.slane %v5294_v12, 2  ;;  %v5302_v45 = vrot.slane %v5301_v43, 2  ;;  %v5309_v38 = vrot.slane %v5308_v35, 2 }
 0x8c1   : > { %v5276_v13 = vrot.slane %v5270_v11, 2  ;;  %v5277_v17 = vrot.slane %v5270_v11, 4  ;;  %v5278_v16 = vrot.slane %v5270_v11, 6  ;;  %v5313_v42 = vsel %vm4824_vm4, %v5270_v11, -inf }
 0x8c2   : > { %v5290_v0 = vrot.slane %v5289_v40, 1  ;;  %v5296_v4 = vmax.f32 %v5294_v12, %v5295_v14  ;;  %v5303_v36 = vmax.f32 %v5301_v43, %v5302_v45  ;;  %v5310_v7 = vmax.f32 %v5308_v35, %v5309_v38  ;;  %v11325_v12 = vld [vmem:[%s16647_s11 + $0x60] sm:$0xff] }
 0x8c3   : > { %v5314_v58 = vrot.slane %v5313_v42, 4  ;;  %v5320_v32 = vsel %vm4824_vm4, %v5276_v13, -inf  ;;  %v5327_v37 = vsel %vm4824_vm4, %v5277_v17, -inf  ;;  %v5334_v24 = vsel %vm4824_vm4, %v5278_v16, -inf  ;;  %5587 = vmatpush.bf16.msrb.mxu3 %v11325_v12  ;;  %5575 = vmatpush.bf16.msrb.mxu1 %v11316_v19 }
 0x8c4   : > { %v5291_v22 = vmax.f32 %v5289_v40, %v5290_v0  ;;  %v5297_v21 = vrot.slane %v5296_v4, 1  ;;  %v5304_v49 = vrot.slane %v5303_v36, 1  ;;  %v5311_v52 = vrot.slane %v5310_v7, 1 }
 0x8c5   : > { %v5315_v26 = vmax.f32 %v5313_v42, %v5314_v58  ;;  %v5321_v25 = vrot.slane %v5320_v32, 4  ;;  %v5328_v34 = vrot.slane %v5327_v37, 4  ;;  %v5335_v60 = vrot.slane %v5334_v24, 4  ;;  %v11324_v42 = vld [vmem:[%s16647_s11 + $0x58] sm:$0xff] }
 0x8c6   : > { %v5298_v10 = vmax.f32 %v5296_v4, %v5297_v21  ;;  %v5305_v31 = vmax.f32 %v5303_v36, %v5304_v49  ;;  %v5312_v61 = vmax.f32 %v5310_v7, %v5311_v52  ;;  %v5341_v46 = vpack.c.bf16 %v5291_v22, %v5291_v22  ;;  %v11323_v49 = vld [vmem:[%s16647_s11 + $0x50] sm:$0xff] }
 0x8c7   : > { %v5316_v56 = vrot.slane %v5315_v26, 2  ;;  %v5322_v1 = vmax.f32 %v5320_v32, %v5321_v25  ;;  %v5329_v33 = vmax.f32 %v5327_v37, %v5328_v34  ;;  %v5336_v50 = vmax.f32 %v5334_v24, %v5335_v60  ;;  %v11315_v32 = vld [vmem:[%s16647_s11 + $0x10] sm:$0xff]  ;;  %5588 = vmatpush.bf16.msrb.mxu3 %v11324_v42  ;;  %v11314_v34 = vld [vmem:[%s16647_s11 + $0x8] sm:$0xff] }
 0x8c8   : > { %v5342_v18 = vpack.c.bf16 %v5298_v10, %v5298_v10  ;;  %v5343_v2 = vpack.c.bf16 %v5305_v31, %v5305_v31  ;;  %v5358_v20 = vperm.slane %v5341_v46, 0  ;;  %v5344_v53 = vpack.c.bf16 %v5312_v61, %v5312_v61  ;;  %5576 = vmatpush.bf16.msrb.mxu1 %v11315_v32  ;;  %v11322_v60 = vld [vmem:[%s16647_s11 + $0x48] sm:$0xff] }
 0x8c9   : > { %v5317_v63 = vmax.f32 %v5315_v26, %v5316_v56  ;;  %v5323_v48 = vrot.slane %v5322_v1, 2  ;;  %v5330_v29 = vrot.slane %v5329_v33, 2  ;;  %v5337_v30 = vrot.slane %v5336_v50, 2  ;;  %v11313_v56 = vld [vmem:[%s16647_s11] sm:$0xff]  ;;  %v11378_v32 = vld [vmem:[%s16649_s13 + $0x164] sm:$0xf0] }
 0x8ca   : > { %v5359_v51 = vperm.slane %v5342_v18, 0  ;;  %v5360_v39 = vperm.slane %v5343_v2, 0  ;;  %v5366_v8 = vunpack.c.l.b16 %v5358_v20  ;;  %v5361_v43 = vperm.slane %v5344_v53, 0  ;;  %v11364_v53 = vld [vmem:[%s16649_s13 + $0xf4] sm:$0xf0] }
 0x8cb   : > { %v5318_v15 = vrot.slane %v5317_v63, 1  ;;  %v5324_v59 = vmax.f32 %v5322_v1, %v5323_v48  ;;  %v5331_v9 = vmax.f32 %v5329_v33, %v5330_v29  ;;  %v5338_v28 = vmax.f32 %v5336_v50, %v5337_v30  ;;  %5589 = vmatpush.bf16.msrb.mxu3 %v11323_v49  ;;  %v11321_v1 = vld [vmem:[%s16647_s11 + $0x40] sm:$0xff]  ;;  %v11346_v30 = vld [vmem:[%s16649_s13 + $0x64] sm:$0xf0] }
 0x8cc   : > { %v5367_v62 = vunpack.c.l.b16 %v5359_v51  ;;  %v5368_v35 = vunpack.c.l.b16 %v5360_v39  ;;  %v5369_v36 = vunpack.c.l.b16 %v5361_v43  ;;  %5577 = vmatpush.bf16.msrb.mxu1 %v11314_v34  ;;  %v9586_v48 = vld [vmem:[%s16649_s13 + $0x60] sm:$0xf]  ;;  %v9659_v51 = vor.u32 %v11364_v53, %v9658_v27  ;;  %v11336_v34 = vld [vmem:[%s16649_s13 + $0x14] sm:$0xf0]  ;;  %v9850_v27 = vld [vmem:[%s16649_s13 + $0x270] sm:$0xf] }
 0x8cd   : > { %v5319_v6 = vmax.f32 %v5317_v63, %v5318_v15  ;;  %v5325_v23 = vrot.slane %v5324_v59, 1  ;;  %v5332_v41 = vrot.slane %v5331_v9, 1  ;;  %v5339_v3 = vrot.slane %v5338_v28, 1  ;;  %v11348_v63 = vld [vmem:[%s16649_s13 + $0x74] sm:$0xf0] }
 0x8ce   : > { %v5374_v11 = vsel %vm2494_vm7, %v5367_v62, %v5366_v8  ;;  %v9595_v29 = vor.u32 %v11348_v63, %v9594_v47  ;;  %v9650_v39 = vld [vmem:[%s16649_s13 + $0xe0] sm:$0xf]  ;;  %v9587_v15 = vor.u32 %v11346_v30, %v9586_v48  ;;  %v11374_v63 = vld [vmem:[%s16649_s13 + $0x144] sm:$0xf0]  ;;  %v9770_v48 = vld [vmem:[%s16649_s13 + $0x1d0] sm:$0xf] }
 0x8cf   : > { %v5326_v40 = vmax.f32 %v5324_v59, %v5325_v23  ;;  %v5333_v14 = vmax.f32 %v5331_v9, %v5332_v41  ;;  %v5340_v45 = vmax.f32 %v5338_v28, %v5339_v3  ;;  %v5345_v38 = vpack.c.bf16 %v5319_v6, %v5319_v6  ;;  %5590 = vmatpush.bf16.msrb.mxu3 %v11322_v60  ;;  %v11362_v59 = vld [vmem:[%s16649_s13 + $0xe4] sm:$0xf0]  ;;  %v9578_v9 = vld [vmem:[%s16649_s13 + $0x50] sm:$0xf]  ;;  %v11344_v28 = vld [vmem:[%s16649_s13 + $0x54] sm:$0xf0] }
 0x8d0   : > { %v5375_v0 = vsel %vm2496_vm8, %v5368_v35, %v5374_v11  ;;  %5578 = vmatpush.bf16.msrb.mxu1 %v11313_v56  ;;  %6173 = vmatpush.bf16.msrb.mxu2 %v9595_v29  ;;  %v9651_v8 = vor.u32 %v11362_v59, %v9650_v39  ;;  %v9579_v62 = vor.u32 %v11344_v28, %v9578_v9  ;;  %v11342_v6 = vld [vmem:[%s16649_s13 + $0x44] sm:$0xf0]  ;;  %v9706_v60 = vld [vmem:[%s16649_s13 + $0x150] sm:$0xf]  ;;  %v9618_v56 = vld [vmem:[%s16649_s13 + $0xa0] sm:$0xf] }
 0x8d1   : > { %v5346_v13 = vpack.c.bf16 %v5326_v40, %v5326_v40  ;;  %v5347_v17 = vpack.c.bf16 %v5333_v14, %v5333_v14  ;;  %v5348_v16 = vpack.c.bf16 %v5340_v45, %v5340_v45  ;;  %v5362_v4 = vperm.slane %v5345_v38, 0  ;;  %v9642_v14 = vld [vmem:[%s16649_s13 + $0xd0] sm:$0xf]  ;;  %v11360_v45 = vld [vmem:[%s16649_s13 + $0xd4] sm:$0xf0] }
 0x8d2   : > { %v5376_v37 = vsel %vm2498_vm10, %v5369_v36, %v5375_v0  ;;  %v9571_v12 = vor.u32 %v11342_v6, %v9570_v54  ;;  %v9562_v38 = vld [vmem:[%s16649_s13 + $0x30] sm:$0xf]  ;;  %v9643_v19 = vor.u32 %v11360_v45, %v9642_v14  ;;  %v11358_v36 = vld [vmem:[%s16649_s13 + $0xc4] sm:$0xf0]  ;;  %v9698_v47 = vld [vmem:[%s16649_s13 + $0x140] sm:$0xf] }
 0x8d3   : > { %v5363_v7 = vperm.slane %v5346_v13, 0  ;;  %v5364_v57 = vperm.slane %v5347_v17, 0  ;;  %v5365_v55 = vperm.slane %v5348_v16, 0  ;;  %v5370_v58 = vunpack.c.l.b16 %v5362_v4  ;;  %5591 = vmatpush.bf16.msrb.mxu3 %v11321_v1  ;;  %v11340_v13 = vld [vmem:[%s16649_s13 + $0x34] sm:$0xf0] }
 0x8d4   : > { %6186 = vmatpush.bf16.msra.mxu1 %v9659_v51  ;;  %6174 = vmatpush.bf16.msrb.mxu2 %v9587_v15  ;;  %v9722_v17 = vld [vmem:[%s16649_s13 + $0x170] sm:$0xf]  ;;  %v11380_v16 = vld [vmem:[%s16649_s13 + $0x174] sm:$0xf0]  ;;  %v9563_v42 = vor.u32 %v11340_v13, %v9562_v38  ;;  %v9634_v4 = vld [vmem:[%s16649_s13 + $0xc0] sm:$0xf]  ;;  %v9699_v29 = vor.u32 %v11374_v63, %v9698_v47 }
 0x8d5   : > { %v5371_v24 = vunpack.c.l.b16 %v5363_v7  ;;  %v5372_v22 = vunpack.c.l.b16 %v5364_v57  ;;  %v5373_v21 = vunpack.c.l.b16 %v5365_v55  ;;  %v5377_v52 = vsel %vm2500_vm11, %v5370_v58, %v5376_v37  ;;  %v9554_v7 = vld [vmem:[%s16649_s13 + $0x20] sm:$0xf]  ;;  %v11338_v55 = vld [vmem:[%s16649_s13 + $0x24] sm:$0xf0]  ;;  %v11392_v30 = vld [vmem:[%s16649_s13 + $0x1d4] sm:$0xf0] }
 0x8d6   : > { %v9723_v0 = vor.u32 %v11380_v16, %v9722_v17  ;;  %v9635_v57 = vor.u32 %v11358_v36, %v9634_v4  ;;  %v9714_v58 = vld [vmem:[%s16649_s13 + $0x160] sm:$0xf]  ;;  %v9555_v37 = vor.u32 %v11338_v55, %v9554_v7  ;;  %v11412_v53 = vld [vmem:[%s16649_s13 + $0x274] sm:$0xf0]  ;;  %v9771_v39 = vor.u32 %v11392_v30, %v9770_v48  ;;  %v9610_v59 = vld [vmem:[%s16649_s13 + $0x90] sm:$0xf] }
 0x8d7   : > { %v5378_v44 = vsel %vm16769_vm14, %v5371_v24, %v5377_v52  ;;  %v5379_v26 = vsel %vm2504_vm6, %v5373_v21, %v5372_v22  ;;  %v9715_v24 = vor.u32 %v11378_v32, %v9714_v58  ;;  %v9786_v22 = vld [vmem:[%s16649_s13 + $0x1f0] sm:$0xf]  ;;  %v11396_v21 = vld [vmem:[%s16649_s13 + $0x1f4] sm:$0xf0]  ;;  %v9851_v15 = vor.u32 %v11412_v53, %v9850_v27  ;;  %v9762_v54 = vld [vmem:[%s16649_s13 + $0x1c0] sm:$0xf] }
 0x8d8   : > { %v5380_v25 = vpack.c.b16 %v5379_v26, %v5378_v44  ;;  %6187 = vmatpush.bf16.msra.mxu1 %v9651_v8  ;;  %6175 = vmatpush.bf16.msrb.mxu2 %v9579_v62  ;;  %v9787_v49 = vor.u32 %v11396_v21, %v9786_v22  ;;  %v9626_v52 = vld [vmem:[%s16649_s13 + $0xb0] sm:$0xf]  ;;  %v11356_v44 = vld [vmem:[%s16649_s13 + $0xb4] sm:$0xf0]  ;;  %v11390_v6 = vld [vmem:[%s16649_s13 + $0x1c4] sm:$0xf0] }
 0x8d9   : > { %6199 = vmatpush.bf16.msra.mxu3 %v9723_v0  ;;  %v9546_v26 = vld [vmem:[%s16649_s13 + $0x10] sm:$0xf]  ;;  %v11352_v9 = vld [vmem:[%s16649_s13 + $0x94] sm:$0xf0]  ;;  %v9682_v14 = vld [vmem:[%s16649_s13 + $0x120] sm:$0xf] }
 0x8da   : > { %v5382_v5 = vsel %vm2621_vm13, 0, %v5380_v25  ;;  %6212 = vmatpush.bf16.msrb.mxu0 %v9787_v49  ;;  %v9627_v25 = vor.u32 %v11356_v44, %v9626_v52  ;;  %v9690_v28 = vld [vmem:[%s16649_s13 + $0x130] sm:$0xf]  ;;  %v9611_v8 = vor.u32 %v11352_v9, %v9610_v59  ;;  %v11372_v62 = vld [vmem:[%s16649_s13 + $0x134] sm:$0xf0]  ;;  %vm5622_vm6 = vcmask 1041408  }
 0x8db   : > { %v5384_v10 = vsel %vm5383_vm15, %v5382_v5, 0  ;;  %v11376_v5 = vld [vmem:[%s16649_s13 + $0x154] sm:$0xf0]  ;;  %v11370_v45 = vld [vmem:[%s16649_s13 + $0x124] sm:$0xf0]  ;;  %vm5674_vm11 = vcmask 1042432  }
 0x8dc   : > { %v5400_v31 = vrot.slane %v5384_v10, 2  ;;  %v5385_v61 = vshrl.u32 %v5384_v10, 16  ;;  %v5387_v46 = vshll.u32 %v5384_v10, 16  ;;  %v5394_v23 = vrot.slane %v5384_v10, 1  ;;  %6176 = vmatpush.bf16.msrb.mxu2 %v9571_v12  ;;  %6188 = vmatpush.bf16.msra.mxu1 %v9643_v19  ;;  %v9602_v12 = vld [vmem:[%s16649_s13 + $0x80] sm:$0xf] }
 0x8dd   : > { %6200 = vmatpush.bf16.msra.mxu3 %v9715_v24  ;;  %v9754_v38 = vld [vmem:[%s16649_s13 + $0x1b0] sm:$0xf]  ;;  %v11388_v19 = vld [vmem:[%s16649_s13 + $0x1b4] sm:$0xf0]  ;;  %v11347_v13 = vld [vmem:[%s16649_s13 + $0x74] sm:$0xf]  ;;  %v9683_v7 = vor.u32 %v11370_v45, %v9682_v14 }
 0x8de   : > { %9535 = vmatmul.msk.bf16.vlgmr.msra.gmra.mxu2 %vm4041_vm5, %v5400_v31  ;;  %v5395_v33 = vrot.slane %v5385_v61, 1  ;;  %v5396_v50 = vrot.slane %v5387_v46, 2  ;;  %v5389_v18 = vrot.slane %v5387_v46, 1  ;;  %v9707_v31 = vor.u32 %v11376_v5, %v9706_v60  ;;  %v11394_v46 = vld [vmem:[%s16649_s13 + $0x1e4] sm:$0xf0] }
 0x8df   : > { %v11826_v17 = vld [vmem:[%s16648_s12] ss:$0 sm:$0xff]  ;;  %v9834_v0 = vld [vmem:[%s16649_s13 + $0x250] sm:$0xf]  ;;  %v11408_v4 = vld [vmem:[%s16649_s13 + $0x254] sm:$0xf0] }
 0x8e0   : > { %v5397_v2 = vor.u32 %v5396_v50, %v5395_v33  ;;  %v5390_v20 = vor.u32 %v5389_v18, %v5385_v61  ;;  %6177 = vmatpush.bf16.msrb.mxu2 %v9563_v42  ;;  %6189 = vmatpush.bf16.msra.mxu1 %v9635_v57  ;;  %v9778_v61 = vld [vmem:[%s16649_s13 + $0x1e0] sm:$0xf]  ;;  %v11354_v33 = vld [vmem:[%s16649_s13 + $0xa4] sm:$0xf0]  ;;  %v9596_v42 = vld [vmem:[%s16649_s13 + $0x78] sm:$0xf0]  ;;  %v9835_v24 = vor.u32 %v11408_v4, %v9834_v0 }
 0x8e1   : > { %v9779_v1 = vor.u32 %v11394_v46, %v9778_v61  ;;  %v9538_v50 = vld [vmem:[%s16649_s13] sm:$0xf]  ;;  %v11334_v18 = vld [vmem:[%s16649_s13 + $0x4] sm:$0xf0]  ;;  %6201 = vmatpush.bf16.msra.mxu3 %v9707_v31  ;;  %v9599_v57 = vor.u32 %v11347_v13, %v9596_v42  ;;  %v9674_v55 = vld [vmem:[%s16649_s13 + $0x110] sm:$0xf] }
 0x8e2   : > { %5398 = vrot.lane.b32.xlu0 %v5397_v2, %s16767_s0  ;;  %5391 = vrot.lane.b32.xlu1 %v5390_v20, %s16767_s0  ;;  %v9619_v2 = vor.u32 %v11354_v33, %v9618_v56  ;;  %v9539_v20 = vor.u32 %v11334_v18, %v9538_v50  ;;  %v11368_v58 = vld [vmem:[%s16649_s13 + $0x114] sm:$0xf0]  ;;  %v9746_v22 = vld [vmem:[%s16649_s13 + $0x1a0] sm:$0xf]  ;;  %s11844_s0 = sshra.s32 %s9229_s24, 4  ;;  %s11845_s0 = int_to_ptr.hbm [resolvable:$true] %s11844_s0 }
 0x8e3   : > { %6213 = vmatpush.bf16.msrb.mxu0 %v9779_v1  ;;  %v11345_v21 = vld [vmem:[%s16649_s13 + $0x64] sm:$0xf]  ;;  %v9588_v49 = vld [vmem:[%s16649_s13 + $0x68] sm:$0xf0]  ;;  %v11386_v44 = vld [vmem:[%s16649_s13 + $0x1a4] sm:$0xf0]  ;;  %v9675_v31 = vor.u32 %v11368_v58, %v9674_v55  ;;  %p11851_p0 = scmp.lt.s32.totalorder %s11845_s0, %s16655_s19 }
 0x8e4   : > { %6178 = vmatpush.bf16.msrb.mxu2 %v9555_v37  ;;  %6190 = vmatpush.bf16.msra.mxu1 %v9627_v25  ;;  %v9755_v37 = vor.u32 %v11388_v19, %v9754_v38  ;;  %v11406_v25 = vld [vmem:[%s16649_s13 + $0x244] sm:$0xf0]  ;;  %v9666_v60 = vld [vmem:[%s16649_s13 + $0x100] sm:$0xf]  ;;  %v9591_v61 = vor.u32 %v11345_v21, %v9588_v49  ;;  %v11343_v46 = vld [vmem:[%s16649_s13 + $0x54] sm:$0xf]  ;;  %v9747_v33 = vor.u32 %v11386_v44, %v9746_v22 }
 0x8e5   : > { %6202 = vmatpush.bf16.msra.mxu3 %v9699_v29  ;;  %v11366_v5 = vld [vmem:[%s16649_s13 + $0x104] sm:$0xf0]  ;;  %v9580_v56 = vld [vmem:[%s16649_s13 + $0x58] sm:$0xf0]  ;;  %v9818_v18 = vld [vmem:[%s16649_s13 + $0x230] sm:$0xf] }
 0x8e6   : > { %v9660_v47 = vld [vmem:[%s16649_s13 + $0xf8] sm:$0xf0]  ;;  %v14150_v63 = vld [vmem:[%s16649_s13 + $0x180] sm:$0xf]  ;;  %v14155_v48 = vld [vmem:[%s16649_s13 + $0x184] sm:$0xf0]  ;;  %v9667_v30 = vor.u32 %v11366_v5, %v9666_v60 }
 0x8e7   : > { %6214 = vmatpush.bf16.msrb.mxu0 %v9771_v39  ;;  %v11341_v27 = vld [vmem:[%s16649_s13 + $0x44] sm:$0xf]  ;;  %v9572_v53 = vld [vmem:[%s16649_s13 + $0x48] sm:$0xf0]  ;;  %v9810_v9 = vld [vmem:[%s16649_s13 + $0x220] sm:$0xf] }
 0x8e8   : > { %6191 = vmatpush.bf16.msra.mxu1 %v9619_v2  ;;  %v11404_v2 = vld [vmem:[%s16649_s13 + $0x234] sm:$0xf0]  ;;  %v9575_v19 = vor.u32 %v11341_v27, %v9572_v53  ;;  %v11339_v13 = vld [vmem:[%s16649_s13 + $0x34] sm:$0xf]  ;;  %v9564_v4 = vld [vmem:[%s16649_s13 + $0x38] sm:$0xf0] }
 0x8e9   : > { %v9819_v59 = vor.u32 %v11404_v2, %v9818_v18  ;;  %v9802_v55 = vld [vmem:[%s16649_s13 + $0x210] sm:$0xf]  ;;  %v11400_v58 = vld [vmem:[%s16649_s13 + $0x214] sm:$0xf0]  ;;  %v9644_v49 = vld [vmem:[%s16649_s13 + $0xd8] sm:$0xf0] }
 0x8ea   : > { %v9716_v44 = vld [vmem:[%s16649_s13 + $0x168] sm:$0xf0]  ;;  %s11846_s28 = scalar_lea.hbm %s11845_s0, 1 }
 0x8eb   : > { %p11847_p11 = scmp.ne.s32.totalorder %s11845_s0, %s11846_s28  ;;  %p11852_p1 = scmp.lt.s32.totalorder %s11850_s25, %s11846_s28 }
 0x8ec   : > { %6192 = vmatpush.bf16.msra.mxu1 %v9611_v8  ;;  %v11361_v8 = vld [vmem:[%s16649_s13 + $0xe4] sm:$0xf] }
 0x8ed   : > { %p11848_p12 = pnand %p11847_p11, %p12045_p5  ;;  %p11853_p2 = por %p11852_p1, %p11851_p0 }
 0x8ef   : > { %p11849_p13 = pneg %p11848_p12 }
 0x8f1   : > { %p11854_p3 = pnand %p11853_p2, %p11849_p13 }
 0x954   : > { %v5399_v41 = vpop.permute.xlu0 %5398  ;;  %v5392_v3 = vpop.permute.xlu1 %5391 }
 0x955   : > { %v5406_v43 = vsel %vm4041_vm5, %v5394_v23, %v5399_v41  ;;  %v5402_v35 = vsel %vm4041_vm5, %v5384_v10, %v5392_v3  ;;  %v9547_v10 = vor.u32 %v11336_v34, %v9546_v26  ;;  %v9691_v23 = vor.u32 %v11372_v62, %v9690_v28  ;;  %v9842_v41 = vld [vmem:[%s16649_s13 + $0x260] sm:$0xf]  ;;  %v11410_v3 = vld [vmem:[%s16649_s13 + $0x264] sm:$0xf0] }
 0x956   : > { %5579 = vmatmul.bf16.vlgmr.msrb.gmra.mxu1 %v5402_v35  ;;  %5592 = vmatmul.bf16.vlgmr.msrb.gmra.mxu3 %v5406_v43  ;;  %v9763_v43 = vor.u32 %v11390_v6, %v9762_v54  ;;  %v9843_v35 = vor.u32 %v11410_v3, %v9842_v41  ;;  %v9826_v26 = vld [vmem:[%s16649_s13 + $0x240] sm:$0xf]  ;;  %v11402_v28 = vld [vmem:[%s16649_s13 + $0x224] sm:$0xf0]  ;;  %v9652_v41 = vld [vmem:[%s16649_s13 + $0xe8] sm:$0xf0] }
 0x957   : > { %6179 = vmatpush.bf16.msrb.mxu2 %v9547_v10  ;;  %6203 = vmatpush.bf16.msra.mxu3 %v9691_v23  ;;  %v9738_v10 = vld [vmem:[%s16649_s13 + $0x190] sm:$0xf]  ;;  %v9827_v50 = vor.u32 %v11406_v25, %v9826_v26  ;;  %v11337_v26 = vld [vmem:[%s16649_s13 + $0x24] sm:$0xf]  ;;  %v9556_v25 = vld [vmem:[%s16649_s13 + $0x28] sm:$0xf0] }
 0x958   : > { %6215 = vmatpush.bf16.msrb.mxu0 %v9763_v43  ;;  %v9731_v43 = vor.u32 %v14155_v48, %v14150_v63  ;;  %v9708_v63 = vld [vmem:[%s16649_s13 + $0x158] sm:$0xf0]  ;;  %v9559_v27 = vor.u32 %v11337_v26, %v9556_v25  ;;  %v11351_v26 = vld [vmem:[%s16649_s13 + $0x94] sm:$0xf] }
 0x95b   : > { %6180 = vmatpush.bf16.msrb.mxu2 %v9539_v20  ;;  %6204 = vmatpush.bf16.msra.mxu3 %v9683_v7  ;;  %v11363_v20 = vld [vmem:[%s16649_s13 + $0xf4] sm:$0xf]  ;;  %v9655_v7 = vor.u32 %v11361_v8, %v9652_v41  ;;  %v9628_v41 = vld [vmem:[%s16649_s13 + $0xb8] sm:$0xf0] }
 0x95c   : > { %6216 = vmatpush.bf16.msrb.mxu0 %v9755_v37 }
 0x95f   : > { %6225 = vmatpush.bf16.msra.mxu2 %v9851_v15  ;;  %6205 = vmatpush.bf16.msra.mxu3 %v9675_v31  ;;  %v9583_v15 = vor.u32 %v11343_v46, %v9580_v56  ;;  %v9794_v31 = vld [vmem:[%s16649_s13 + $0x200] sm:$0xf] }
 0x960   : > { %6217 = vmatpush.bf16.msrb.mxu0 %v9747_v33  ;;  %v9636_v33 = vld [vmem:[%s16649_s13 + $0xc8] sm:$0xf0] }
 0x961   : > { %v13937_v11 = vpop.f32.mrf.mxu2 }
 0x963   : > { %6226 = vmatpush.bf16.msra.mxu2 %v9843_v35  ;;  %v11379_v35 = vld [vmem:[%s16649_s13 + $0x174] sm:$0xf]  ;;  %6206 = vmatpush.bf16.msra.mxu3 %v9667_v30 }
 0x967   : > { %6227 = vmatpush.bf16.msra.mxu2 %v9835_v24 }
 0x969   : > { %v5608_v40 = vpop.f32.mrf.mxu2 }
 0x96a   : > { %v11350_v40 = vld [vmem:[%s16649_s13 + $0x84] sm:$0xf0] }
 0x96b   : > { %v9603_v16 = vor.u32 %v11350_v40, %v9602_v12  ;;  %6228 = vmatpush.bf16.msra.mxu2 %v9827_v50  ;;  %v9663_v12 = vor.u32 %v11363_v20, %v9660_v47  ;;  %v9724_v40 = vld [vmem:[%s16649_s13 + $0x178] sm:$0xf0]  ;;  %v11375_v47 = vld [vmem:[%s16649_s13 + $0x154] sm:$0xf] }
 0x96d   : > { %6193 = vmatpush.bf16.msra.mxu1 %v9603_v16  ;;  %6251 = vmatpush.bf16.msrb.mxu3 %v9663_v12  ;;  %v9700_v12 = vld [vmem:[%s16649_s13 + $0x148] sm:$0xf0] }
 0x96f   : > { %6229 = vmatpush.bf16.msra.mxu2 %v9819_v59  ;;  %v9711_v59 = vor.u32 %v11375_v47, %v9708_v63  ;;  %v11411_v63 = vld [vmem:[%s16649_s13 + $0x274] sm:$0xf] }
 0x971   : > { %6238 = vmatpush.bf16.msrb.mxu1 %v9599_v57  ;;  %v9727_v57 = vor.u32 %v11379_v35, %v9724_v40  ;;  %6252 = vmatpush.bf16.msrb.mxu3 %v9655_v7  ;;  %v11371_v7 = vld [vmem:[%s16649_s13 + $0x134] sm:$0xf] }
 0x975   : > { %6239 = vmatpush.bf16.msrb.mxu1 %v9591_v61  ;;  %v11398_v61 = vld [vmem:[%s16649_s13 + $0x204] sm:$0xf0] }
 0x979   : > { %6240 = vmatpush.bf16.msrb.mxu1 %v9583_v15 }
 0x97d   : > { %6241 = vmatpush.bf16.msrb.mxu1 %v9575_v19  ;;  %v9540_v19 = vld [vmem:[%s16649_s13 + $0x8] sm:$0xf0] }
 0x9d3   : > { %v5580_v51 = vpop.f32.mrf.mxu1 }
 0x9d9   : > { %v5593_v36 = vpop.f32.mrf.mxu3 }
 0x9da   : > { %v5594_v32 = vadd.f32 %v5593_v36, %v5580_v51  ;;  %v9811_v36 = vor.u32 %v11402_v28, %v9810_v9  ;;  %v11335_v9 = vld [vmem:[%s16649_s13 + $0x14] sm:$0xf]  ;;  %v9548_v28 = vld [vmem:[%s16649_s13 + $0x18] sm:$0xf0] }
 0x9db   : > { %v5582_v52 = vpop.f32.mrf.mxu1 }
 0x9dc   : > { %v5607_v34 = vadd.f32 %v13937_v11, %v5594_v32  ;;  %v11384_v11 = vld [vmem:[%s16649_s13 + $0x194] sm:$0xf0]  ;;  %v11359_v32 = vld [vmem:[%s16649_s13 + $0xd4] sm:$0xf]  ;;  %v11377_v52 = vld [vmem:[%s16649_s13 + $0x164] sm:$0xf]  ;;  %6230 = vmatpush.bf16.msra.mxu2 %v9811_v36 }
 0x9dd   : > { %v9739_v39 = vor.u32 %v11384_v11, %v9738_v10  ;;  %v9567_v10 = vor.u32 %v11339_v13, %v9564_v4  ;;  %v9803_v11 = vor.u32 %v11400_v58, %v9802_v55  ;;  %v9647_v46 = vor.u32 %v11359_v32, %v9644_v49  ;;  %v9620_v4 = vld [vmem:[%s16649_s13 + $0xa8] sm:$0xf0]  ;;  %v9788_v49 = vld [vmem:[%s16649_s13 + $0x1f8] sm:$0xf0] }
 0x9de   : > { %v5613_v1 = vadd.f32 %v11826_v17, %v5607_v34  ;;  %v9719_v20 = vor.u32 %v11377_v52, %v9716_v44 }
 0x9df   : > { %6218 = vmatpush.bf16.msrb.mxu0 %v9739_v39  ;;  %6242 = vmatpush.bf16.msrb.mxu1 %v9567_v10  ;;  %v9795_v39 = vor.u32 %v11398_v61, %v9794_v31 }
 0x9e0   : > { %v5614_v29 = vmax.f32 %v5613_v1, 0.0  ;;  %v11357_v1 = vld [vmem:[%s16649_s13 + $0xc4] sm:$0xf]  ;;  %6231 = vmatpush.bf16.msra.mxu2 %v9803_v11  ;;  %6253 = vmatpush.bf16.msrb.mxu3 %v9647_v46  ;;  %v9780_v46 = vld [vmem:[%s16649_s13 + $0x1e8] sm:$0xf0] }
 0x9e1   : > { %v5595_v51 = vpop.f32.mrf.mxu3  ;;  %v9639_v15 = vor.u32 %v11357_v1, %v9636_v33  ;;  %v11393_v11 = vld [vmem:[%s16649_s13 + $0x1e4] sm:$0xf] }
 0x9e2   : > { %v5616_v62 = vrot.slane %v5614_v29, 2  ;;  %v5617_v54 = vrot.slane %v5614_v29, 4  ;;  %v5618_v6 = vrot.slane %v5614_v29, 6  ;;  %v5623_v23 = vsel %vm5622_vm6, %v5614_v29, -inf  ;;  %v11349_v33 = vld [vmem:[%s16649_s13 + $0x84] sm:$0xf] }
 0x9e3   : > { %v5624_v3 = vrot.slane %v5623_v23, 4  ;;  %6219 = vmatpush.bf16.msrb.mxu0 %v9731_v43  ;;  %6243 = vmatpush.bf16.msrb.mxu1 %v9559_v27 }
 0x9e4   : > { %v5630_v14 = vsel %vm5622_vm6, %v5616_v62, -inf  ;;  %v5637_v45 = vsel %vm5622_vm6, %v5617_v54, -inf  ;;  %v5644_v38 = vsel %vm5622_vm6, %v5618_v6, -inf  ;;  %v11355_v6 = vld [vmem:[%s16649_s13 + $0xb4] sm:$0xf]  ;;  %6232 = vmatpush.bf16.msra.mxu2 %v9795_v39  ;;  %6254 = vmatpush.bf16.msrb.mxu3 %v9639_v15 }
 0x9e5   : > { %v5625_v17 = vmax.f32 %v5623_v23, %v5624_v3  ;;  %v5631_v16 = vrot.slane %v5630_v14, 4  ;;  %v5638_v42 = vrot.slane %v5637_v45, 4  ;;  %v5645_v0 = vrot.slane %v5644_v38, 4  ;;  %v11373_v3 = vld [vmem:[%s16649_s13 + $0x144] sm:$0xf] }
 0x9e6   : > { %v9772_v39 = vld [vmem:[%s16649_s13 + $0x1d8] sm:$0xf0] }
 0x9e7   : > { %v5626_v37 = vrot.slane %v5625_v17, 2  ;;  %v5632_v24 = vmax.f32 %v5630_v14, %v5631_v16  ;;  %v5639_v22 = vmax.f32 %v5637_v45, %v5638_v42  ;;  %v5646_v21 = vmax.f32 %v5644_v38, %v5645_v0  ;;  %6264 = vmatpush.bf16.msra.mxu0 %v9727_v57  ;;  %v11333_v38 = vld [vmem:[%s16649_s13 + $0x4] sm:$0xf]  ;;  %v9692_v57 = vld [vmem:[%s16649_s13 + $0x138] sm:$0xf0] }
 0x9e8   : > { %v9551_v14 = vor.u32 %v11335_v9, %v9548_v28  ;;  %v9631_v16 = vor.u32 %v11355_v6, %v9628_v41  ;;  %v9703_v42 = vor.u32 %v11373_v3, %v9700_v12  ;;  %v11353_v0 = vld [vmem:[%s16649_s13 + $0xa4] sm:$0xf]  ;;  %v9695_v44 = vor.u32 %v11371_v7, %v9692_v57 }
 0x9e9   : > { %v5627_v34 = vmax.f32 %v5625_v17, %v5626_v37  ;;  %v5633_v60 = vrot.slane %v5632_v24, 2  ;;  %v5640_v5 = vrot.slane %v5639_v22, 2  ;;  %v5647_v56 = vrot.slane %v5646_v21, 2  ;;  %v11365_v9 = vld [vmem:[%s16649_s13 + $0x104] sm:$0xf] }
 0x9ea   : > { %6244 = vmatpush.bf16.msrb.mxu1 %v9551_v14  ;;  %v9543_v37 = vor.u32 %v11333_v38, %v9540_v19  ;;  %6255 = vmatpush.bf16.msrb.mxu3 %v9631_v16  ;;  %v9623_v52 = vor.u32 %v11353_v0, %v9620_v4  ;;  %v11409_v12 = vld [vmem:[%s16649_s13 + $0x264] sm:$0xf]  ;;  %v11407_v19 = vld [vmem:[%s16649_s13 + $0x254] sm:$0xf]  ;;  %v9756_v16 = vld [vmem:[%s16649_s13 + $0x1b8] sm:$0xf0] }
 0x9eb   : > { %v5628_v50 = vrot.slane %v5627_v34, 1  ;;  %v5634_v18 = vmax.f32 %v5632_v24, %v5633_v60  ;;  %v5641_v2 = vmax.f32 %v5639_v22, %v5640_v5  ;;  %v5648_v48 = vmax.f32 %v5646_v21, %v5647_v56  ;;  %6265 = vmatpush.bf16.msra.mxu0 %v9719_v20  ;;  %v11395_v21 = vld [vmem:[%s16649_s13 + $0x1f4] sm:$0xf]  ;;  %v11369_v60 = vld [vmem:[%s16649_s13 + $0x124] sm:$0xf] }
 0x9ec   : > { %v9684_v5 = vld [vmem:[%s16649_s13 + $0x128] sm:$0xf0]  ;;  %v9791_v61 = vor.u32 %v11395_v21, %v9788_v49  ;;  %v9676_v20 = vld [vmem:[%s16649_s13 + $0x118] sm:$0xf0]  ;;  %v11405_v4 = vld [vmem:[%s16649_s13 + $0x244] sm:$0xf] }
 0x9ed   : > { %v5629_v29 = vmax.f32 %v5627_v34, %v5628_v50  ;;  %v5635_v30 = vrot.slane %v5634_v18, 1  ;;  %v5642_v53 = vrot.slane %v5641_v2, 1  ;;  %v5649_v51 = vrot.slane %v5648_v48, 1  ;;  %v9612_v34 = vld [vmem:[%s16649_s13 + $0x98] sm:$0xf0] }
 0x9ee   : > { %6245 = vmatpush.bf16.msrb.mxu1 %v9543_v37  ;;  %6256 = vmatpush.bf16.msrb.mxu3 %v9623_v52  ;;  %v9615_v56 = vor.u32 %v11351_v26, %v9612_v34  ;;  %v9687_v1 = vor.u32 %v11369_v60, %v9684_v5  ;;  %v9604_v50 = vld [vmem:[%s16649_s13 + $0x88] sm:$0xf0]  ;;  %v11385_v57 = vld [vmem:[%s16649_s13 + $0x1a4] sm:$0xf]  ;;  %v11403_v37 = vld [vmem:[%s16649_s13 + $0x234] sm:$0xf] }
 0x9ef   : > { %v5636_v8 = vmax.f32 %v5634_v18, %v5635_v30  ;;  %v5643_v62 = vmax.f32 %v5641_v2, %v5642_v53  ;;  %v5651_v54 = vpack.c.bf16 %v5629_v29, %v5629_v29  ;;  %v5650_v23 = vmax.f32 %v5648_v48, %v5649_v51  ;;  %6266 = vmatpush.bf16.msra.mxu0 %v9711_v59  ;;  %v11367_v2 = vld [vmem:[%s16649_s13 + $0x114] sm:$0xf]  ;;  %v9852_v53 = vld [vmem:[%s16649_s13 + $0x278] sm:$0xf0]  ;;  %v9812_v26 = vld [vmem:[%s16649_s13 + $0x228] sm:$0xf0] }
 0x9f0   : > { %v9783_v29 = vor.u32 %v11393_v11, %v9780_v46  ;;  %v11391_v51 = vld [vmem:[%s16649_s13 + $0x1d4] sm:$0xf]  ;;  %v9607_v15 = vor.u32 %v11349_v33, %v9604_v50  ;;  %v9679_v59 = vor.u32 %v11367_v2, %v9676_v20  ;;  %v9855_v6 = vor.u32 %v11411_v63, %v9852_v53  ;;  %v9740_v21 = vld [vmem:[%s16649_s13 + $0x198] sm:$0xf0]  ;;  %v9732_v34 = vld [vmem:[%s16649_s13 + $0x188] sm:$0xf0] }
 0x9f1   : > { %v5652_v43 = vpack.c.bf16 %v5636_v8, %v5636_v8  ;;  %v5653_v35 = vpack.c.bf16 %v5643_v62, %v5643_v62  ;;  %v5660_v40 = vperm.slane %v5651_v54, 0  ;;  %v5654_v45 = vpack.c.bf16 %v5650_v23, %v5650_v23  ;;  %v9668_v54 = vld [vmem:[%s16649_s13 + $0x108] sm:$0xf0]  ;;  %v11397_v11 = vld [vmem:[%s16649_s13 + $0x204] sm:$0xf] }
 0x9f2   : > { %6257 = vmatpush.bf16.msrb.mxu3 %v9615_v56  ;;  %v9775_v3 = vor.u32 %v11391_v51, %v9772_v39  ;;  %v9671_v14 = vor.u32 %v11365_v9, %v9668_v54  ;;  %v9796_v46 = vld [vmem:[%s16649_s13 + $0x208] sm:$0xf0]  ;;  %v11443_v33 = vld [vmem:[%s16651_s15 + $0xec] sm:$0xf0]  ;;  %v10100_v50 = vld [vmem:[%s16651_s15 + $0x1e0] sm:$0xf] }
 0x9f3   : > { %v5661_v13 = vperm.slane %v5652_v43, 0  ;;  %v5662_v17 = vperm.slane %v5653_v35, 0  ;;  %v5663_v36 = vperm.slane %v5654_v45, 0  ;;  %v5664_v55 = vunpack.c.l.b16 %v5660_v40  ;;  %6267 = vmatpush.bf16.msra.mxu0 %v9703_v42  ;;  %v9844_v43 = vld [vmem:[%s16649_s13 + $0x268] sm:$0xf0] }
 0x9f4   : > { %v11389_v35 = vld [vmem:[%s16649_s13 + $0x1c4] sm:$0xf]  ;;  %v9764_v40 = vld [vmem:[%s16649_s13 + $0x1c8] sm:$0xf0]  ;;  %v9847_v45 = vor.u32 %v11409_v12, %v9844_v43  ;;  %v9799_v56 = vor.u32 %v11397_v11, %v9796_v46  ;;  %v11475_v2 = vld [vmem:[%s16651_s15 + $0x1ec] sm:$0xf0] }
 0x9f5   : > { %v5665_v58 = vunpack.c.l.b16 %v5661_v13  ;;  %v5666_v32 = vunpack.c.l.b16 %v5662_v17  ;;  %v5667_v24 = vunpack.c.l.b16 %v5663_v36  ;;  %v9767_v38 = vor.u32 %v11389_v35, %v9764_v40  ;;  %v9836_v13 = vld [vmem:[%s16649_s13 + $0x258] sm:$0xf0]  ;;  %v11387_v17 = vld [vmem:[%s16649_s13 + $0x1b4] sm:$0xf]  ;;  %v9828_v36 = vld [vmem:[%s16649_s13 + $0x248] sm:$0xf0] }
 0x9f6   : > { %6258 = vmatpush.bf16.msrb.mxu3 %v9607_v15  ;;  %v9839_v42 = vor.u32 %v11407_v19, %v9836_v13  ;;  %v9759_v0 = vor.u32 %v11387_v17, %v9756_v16  ;;  %v9956_v20 = vld [vmem:[%s16651_s15 + $0xc0] sm:$0xf]  ;;  %v10101_v63 = vor.u32 %v11475_v2, %v10100_v50  ;;  %v11507_v51 = vld [vmem:[%s16651_s15 + $0x2ec] sm:$0xf0] }
 0x9f7   : > { %v5668_v22 = vsel %vm2494_vm7, %v5665_v58, %v5664_v55  ;;  %6268 = vmatpush.bf16.msra.mxu0 %v9695_v44  ;;  %v9748_v55 = vld [vmem:[%s16649_s13 + $0x1a8] sm:$0xf0]  ;;  %v9831_v58 = vor.u32 %v11405_v4, %v9828_v36  ;;  %v11401_v44 = vld [vmem:[%s16649_s13 + $0x224] sm:$0xf]  ;;  %v10228_v53 = vld [vmem:[%s16651_s15 + $0x2e0] sm:$0xf] }
 0x9f8   : > { %v5669_v25 = vsel %vm2496_vm8, %v5666_v32, %v5668_v22  ;;  %v9751_v32 = vor.u32 %v11385_v57, %v9748_v55  ;;  %v11383_v22 = vld [vmem:[%s16649_s13 + $0x194] sm:$0xf]  ;;  %v9815_v60 = vor.u32 %v11401_v44, %v9812_v26  ;;  %v10356_v39 = vld [vmem:[%s16651_s15 + $0x3e0] sm:$0xf]  ;;  %v10229_v15 = vor.u32 %v11507_v51, %v10228_v53  ;;  %v11535_v35 = vld [vmem:[%s16651_s15 + $0x3cc] sm:$0xf0] }
 0x9f9   : > { %v5670_v10 = vsel %vm2498_vm10, %v5667_v24, %v5669_v25  ;;  %v9820_v24 = vld [vmem:[%s16649_s13 + $0x238] sm:$0xf0]  ;;  %v9743_v52 = vor.u32 %v11383_v22, %v9740_v21  ;;  %v11381_v25 = vld [vmem:[%s16649_s13 + $0x184] sm:$0xf]  ;;  %v10340_v43 = vld [vmem:[%s16651_s15 + $0x3c0] sm:$0xf] }
 0x9fa   : > { %v5671_v31 = vpack.c.b16 %v5670_v10, %v5670_v10  ;;  %v9823_v49 = vor.u32 %v11403_v37, %v9820_v24  ;;  %v9735_v5 = vor.u32 %v11381_v25, %v9732_v34  ;;  %v11399_v10 = vld [vmem:[%s16649_s13 + $0x214] sm:$0xf]  ;;  %v9924_v40 = vld [vmem:[%s16651_s15 + $0x80] sm:$0xf]  ;;  %v11463_v19 = vld [vmem:[%s16651_s15 + $0x18c] sm:$0xf0] }
 0x9fb   : > { %6269 = vmatpush.bf16.msra.mxu0 %v9687_v1  ;;  %v9972_v1 = vld [vmem:[%s16651_s15 + $0xe0] sm:$0xf]  ;;  %v11531_v22 = vld [vmem:[%s16651_s15 + $0x3ac] sm:$0xf0]  ;;  %vm6316_vm8 = vcmask 1043458  }
 0x9fc   : > { %v14305_v18 = vsel %vm2621_vm13, 0, %v5671_v31  ;;  %v9804_v31 = vld [vmem:[%s16649_s13 + $0x218] sm:$0xf0]  ;;  %v10324_v37 = vld [vmem:[%s16651_s15 + $0x3a0] sm:$0xf] }
 0x9fd   : > { %v14315_v47 = vsel %vm5674_vm11, %v14305_v18, 0  ;;  %9856 = vmatmul.msk.bf16.vlgmr.msrb.gmra.mxu2 %vm5674_vm11, %v14305_v18  ;;  %v9908_v21 = vld [vmem:[%s16651_s15 + $0x60] sm:$0xf]  ;;  %v10325_v44 = vor.u32 %v11531_v22, %v10324_v37  ;;  %v11459_v34 = vld [vmem:[%s16651_s15 + $0x16c] sm:$0xf0] }
 0x9fe   : > { %6277 = vmatpush.bf16.msrb.mxu2 %v9791_v61  ;;  %v5685_v48 = vrot.slane %v14315_v47, 1  ;;  %v5677_v30 = vshrl.u32 %v14315_v47, 16  ;;  %v5679_v27 = vshll.u32 %v14315_v47, 16  ;;  %v5691_v7 = vrot.slane %v14315_v47, 2  ;;  %v11439_v47 = vld [vmem:[%s16651_s15 + $0xcc] sm:$0xf0] }
 0x9ff   : > { %6270 = vmatpush.bf16.msra.mxu0 %v9679_v59  ;;  %v9807_v61 = vor.u32 %v11399_v10, %v9804_v31  ;;  %v11539_v59 = vld [vmem:[%s16651_s15 + $0x3ec] sm:$0xf0]  ;;  %v10036_v25 = vld [vmem:[%s16651_s15 + $0x160] sm:$0xf] }
 0xa00   : > { %6207 = vmatmul.bf16.vlgmr.msra.gmra.mxu3 %v5685_v48  ;;  %v5681_v28 = vrot.slane %v5679_v27, 1  ;;  %v5687_v8 = vrot.slane %v5677_v30, 1  ;;  %v5688_v62 = vrot.slane %v5679_v27, 2  ;;  %v10357_v9 = vor.u32 %v11539_v59, %v10356_v39  ;;  %v10308_v11 = vld [vmem:[%s16651_s15 + $0x380] sm:$0xf] }
 0xa01   : > { %v10037_v31 = vor.u32 %v11459_v34, %v10036_v25  ;;  %v11527_v46 = vld [vmem:[%s16651_s15 + $0x38c] sm:$0xf0]  ;;  %v9876_v53 = vld [vmem:[%s16651_s15 + $0x20] sm:$0xf] }
 0xa02   : > { %6278 = vmatpush.bf16.msrb.mxu2 %v9783_v29  ;;  %v5682_v23 = vor.u32 %v5681_v28, %v5677_v30  ;;  %v5689_v41 = vor.u32 %v5688_v62, %v5687_v8  ;;  %v11471_v29 = vld [vmem:[%s16651_s15 + $0x1cc] sm:$0xf0]  ;;  %v9957_v30 = vor.u32 %v11439_v47, %v9956_v20  ;;  %v9940_v28 = vld [vmem:[%s16651_s15 + $0xa0] sm:$0xf] }
 0xa03   : > { %6271 = vmatpush.bf16.msra.mxu0 %v9671_v14  ;;  %v11435_v8 = vld [vmem:[%s16651_s15 + $0xac] sm:$0xf0]  ;;  %v10068_v62 = vld [vmem:[%s16651_s15 + $0x1a0] sm:$0xf]  ;;  %v10341_v14 = vor.u32 %v11535_v35, %v10340_v43 }
 0xa04   : > { %6194 = vmatmul.bf16.vlgmr.msra.gmra.mxu1 %v5682_v23  ;;  %6220 = vmatmul.bf16.vlgmr.msrb.gmra.mxu0 %v5689_v41  ;;  %v9941_v54 = vor.u32 %v11435_v8, %v9940_v28  ;;  %v11423_v50 = vld [vmem:[%s16651_s15 + $0x4c] sm:$0xf0]  ;;  %v10148_v8 = vld [vmem:[%s16651_s15 + $0x240] sm:$0xf] }
 0xa05   : > { %6290 = vmatpush.bf16.msra.mxu1 %v9855_v6  ;;  %v11467_v6 = vld [vmem:[%s16651_s15 + $0x1ac] sm:$0xf0] }
 0xa06   : > { %6279 = vmatpush.bf16.msrb.mxu2 %v9775_v3  ;;  %v10069_v3 = vor.u32 %v11467_v6, %v10068_v62  ;;  %v11455_v47 = vld [vmem:[%s16651_s15 + $0x14c] sm:$0xf0]  ;;  %v14583_v6 = vld [vmem:[%s16650_s14] sm:$0x3] }
 0xa07   : > { %8348 = vmatpush.bf16.msrb.mxu0 %v10101_v63  ;;  %v10164_v63 = vld [vmem:[%s16651_s15 + $0x260] sm:$0xf]  ;;  %v11419_v39 = vld [vmem:[%s16651_s15 + $0x2c] sm:$0xf0] }
 0xa08   : > { %v11451_v28 = vld [vmem:[%s16651_s15 + $0x12c] sm:$0xf0] }
 0xa09   : > { %6291 = vmatpush.bf16.msra.mxu1 %v9847_v45  ;;  %v11431_v45 = vld [vmem:[%s16651_s15 + $0x8c] sm:$0xf0] }
 0xa0a   : > { %6280 = vmatpush.bf16.msrb.mxu2 %v9767_v38  ;;  %v10052_v38 = vld [vmem:[%s16651_s15 + $0x180] sm:$0xf]  ;;  %v9925_v17 = vor.u32 %v11431_v45, %v9924_v40  ;;  %v11487_v62 = vld [vmem:[%s16651_s15 + $0x24c] sm:$0xf0] }
 0xa0b   : > { %v11415_v35 = vld [vmem:[%s16651_s15 + $0xc] sm:$0xf0]  ;;  %v9988_v40 = vld [vmem:[%s16651_s15 + $0x100] sm:$0xf] }
 0xa0c   : > { %v11567_v25 = vld [vmem:[%s16651_s15 + $0x4cc] sm:$0xf0] }
 0xa0d   : > { %6233 = vmatmul.bf16.vlgmr.msra.gmra.mxu2 %v5691_v7  ;;  %6292 = vmatpush.bf16.msra.mxu1 %v9839_v42 }
 0xa0e   : > { %6281 = vmatpush.bf16.msrb.mxu2 %v9759_v0  ;;  %v10053_v0 = vor.u32 %v11463_v19, %v10052_v38  ;;  %v10149_v19 = vor.u32 %v11487_v62, %v10148_v8  ;;  %v10724_v62 = vld [vmem:[%s16651_s15 + $0x6c0] sm:$0xf] }
 0xa10   : > { %6259 = vmatmul.bf16.vlgmr.msrb.gmra.mxu3 %v5682_v23  ;;  %v10212_v23 = vld [vmem:[%s16651_s15 + $0x2c0] sm:$0xf] }
 0xa11   : > { %6293 = vmatpush.bf16.msra.mxu1 %v9831_v58  ;;  %v10196_v58 = vld [vmem:[%s16651_s15 + $0x2a0] sm:$0xf] }
 0xa12   : > { %6282 = vmatpush.bf16.msrb.mxu2 %v9751_v32  ;;  %v11499_v32 = vld [vmem:[%s16651_s15 + $0x2ac] sm:$0xf0] }
 0xa13   : > { %v10197_v24 = vor.u32 %v11499_v32, %v10196_v58 }
 0xa14   : > { %9857 = vmatmul.msk.bf16.vlgmr.msrb.gmra.mxu1 %vm5674_vm11, %v14305_v18  ;;  %6272 = vmatmul.bf16.vlgmr.msra.gmra.mxu0 %v5685_v48  ;;  %v9973_v18 = vor.u32 %v11443_v33, %v9972_v1  ;;  %v10084_v48 = vld [vmem:[%s16651_s15 + $0x1c0] sm:$0xf]  ;;  %v10309_v1 = vor.u32 %v11527_v46, %v10308_v11  ;;  %v11479_v11 = vld [vmem:[%s16651_s15 + $0x20c] sm:$0xf0] }
 0xa15   : > { %6294 = vmatpush.bf16.msra.mxu1 %v9823_v49  ;;  %v10085_v27 = vor.u32 %v11471_v29, %v10084_v48  ;;  %v11427_v49 = vld [vmem:[%s16651_s15 + $0x6c] sm:$0xf0]  ;;  %v9892_v33 = vld [vmem:[%s16651_s15 + $0x40] sm:$0xf] }
 0xa16   : > { %6283 = vmatpush.bf16.msrb.mxu2 %v9743_v52  ;;  %8335 = vmatpush.bf16.msra.mxu3 %v9973_v18  ;;  %v9909_v26 = vor.u32 %v11427_v49, %v9908_v21  ;;  %v10020_v18 = vld [vmem:[%s16651_s15 + $0x140] sm:$0xf]  ;;  %v9893_v20 = vor.u32 %v11423_v50, %v9892_v33  ;;  %v11491_v48 = vld [vmem:[%s16651_s15 + $0x26c] sm:$0xf0] }
 0xa17   : > { %8349 = vmatpush.bf16.msrb.mxu0 %v10085_v27  ;;  %v10021_v29 = vor.u32 %v11455_v47, %v10020_v18  ;;  %v11523_v27 = vld [vmem:[%s16651_s15 + $0x36c] sm:$0xf0]  ;;  %v10165_v51 = vor.u32 %v11491_v48, %v10164_v63  ;;  %v10260_v21 = vld [vmem:[%s16651_s15 + $0x320] sm:$0xf] }
 0xa18   : > { %v11515_v49 = vld [vmem:[%s16651_s15 + $0x32c] sm:$0xf0]  ;;  %v10244_v46 = vld [vmem:[%s16651_s15 + $0x300] sm:$0xf] }
 0xa19   : > { %6295 = vmatpush.bf16.msra.mxu1 %v9815_v60  ;;  %v10180_v60 = vld [vmem:[%s16651_s15 + $0x280] sm:$0xf]  ;;  %v11563_v48 = vld [vmem:[%s16651_s15 + $0x4ac] sm:$0xf0] }
 0xa1a   : > { %6284 = vmatpush.bf16.msrb.mxu2 %v9735_v5  ;;  %8336 = vmatpush.bf16.msra.mxu3 %v9957_v30  ;;  %v10292_v30 = vld [vmem:[%s16651_s15 + $0x360] sm:$0xf] }
 0xa1b   : > { %8350 = vmatpush.bf16.msrb.mxu0 %v10069_v3  ;;  %v10293_v59 = vor.u32 %v11523_v27, %v10292_v30  ;;  %v11519_v3 = vld [vmem:[%s16651_s15 + $0x34c] sm:$0xf0]  ;;  %v10740_v18 = vld [vmem:[%s16651_s15 + $0x6e0] sm:$0xf] }
 0xa1c   : > { %v10452_v63 = vld [vmem:[%s16651_s15 + $0x4a0] sm:$0xf] }
 0xa1d   : > { %6285 = vmatmul.bf16.vlgmr.msrb.gmra.mxu2 %v5689_v41  ;;  %6296 = vmatpush.bf16.msra.mxu1 %v9807_v61  ;;  %v11503_v41 = vld [vmem:[%s16651_s15 + $0x2cc] sm:$0xf0]  ;;  %v10453_v8 = vor.u32 %v11563_v48, %v10452_v63  ;;  %v10388_v48 = vld [vmem:[%s16651_s15 + $0x420] sm:$0xf] }
 0xa1e   : > { %8361 = vmatpush.bf16.msra.mxu2 %v10229_v15  ;;  %v10213_v12 = vor.u32 %v11503_v41, %v10212_v23  ;;  %8337 = vmatpush.bf16.msra.mxu3 %v9941_v54  ;;  %v11495_v61 = vld [vmem:[%s16651_s15 + $0x28c] sm:$0xf0]  ;;  %v10004_v15 = vld [vmem:[%s16651_s15 + $0x120] sm:$0xf] }
 0xa1f   : > { %8351 = vmatpush.bf16.msrb.mxu0 %v10053_v0  ;;  %v10005_v23 = vor.u32 %v11451_v28, %v10004_v15  ;;  %v10276_v41 = vld [vmem:[%s16651_s15 + $0x340] sm:$0xf]  ;;  %v11595_v15 = vld [vmem:[%s16651_s15 + $0x5ac] sm:$0xf0] }
 0xa20   : > { %v10277_v0 = vor.u32 %v11519_v3, %v10276_v41  ;;  %v11663_v41 = vld [vmem:[%s16651_s15 + $0x7cc] sm:$0xf0]  ;;  %v10436_v3 = vld [vmem:[%s16651_s15 + $0x480] sm:$0xf] }
 0xa21   : > { %6297 = vmatpush.bf16.msra.mxu1 %v9799_v56  ;;  %v10181_v56 = vor.u32 %v11495_v61, %v10180_v60  ;;  %v10596_v60 = vld [vmem:[%s16651_s15 + $0x5c0] sm:$0xf]  ;;  %v10261_v61 = vor.u32 %v11515_v49, %v10260_v21  ;;  %v11587_v21 = vld [vmem:[%s16651_s15 + $0x56c] sm:$0xf0] }
 0xa22   : > { %8362 = vmatpush.bf16.msra.mxu2 %v10213_v12  ;;  %8338 = vmatpush.bf16.msra.mxu3 %v9925_v17  ;;  %v9860_v12 = vld [vmem:[%s16651_s15] sm:$0xf]  ;;  %v11571_v17 = vld [vmem:[%s16651_s15 + $0x4ec] sm:$0xf0] }
 0xa23   : > { %8352 = vmatpush.bf16.msrb.mxu0 %v10037_v31  ;;  %v10116_v31 = vld [vmem:[%s16651_s15 + $0x200] sm:$0xf] }
 0xa24   : > { %6298 = vmatmul.bf16.vlgmr.msra.gmra.mxu1 %v5691_v7 }
 0xa25   : > { %8374 = vmatpush.bf16.msrb.mxu1 %v10357_v9  ;;  %v9877_v9 = vor.u32 %v11419_v39, %v9876_v53  ;;  %v6305_v53 = vperm.slane %v14583_v6, 1  ;;  %v10580_v39 = vld [vmem:[%s16651_s15 + $0x5a0] sm:$0xf] }
 0xa26   : > { %8363 = vmatpush.bf16.msra.mxu2 %v10197_v24  ;;  %8339 = vmatpush.bf16.msra.mxu3 %v9909_v26 }
 0xa27   : > { %8353 = vmatpush.bf16.msrb.mxu0 %v10021_v29 }
 0xa29   : > { %8375 = vmatpush.bf16.msrb.mxu1 %v10341_v14  ;;  %v11447_v14 = vld [vmem:[%s16651_s15 + $0x10c] sm:$0xf0] }
 0xa2a   : > { %8364 = vmatpush.bf16.msra.mxu2 %v10181_v56  ;;  %8340 = vmatpush.bf16.msra.mxu3 %v9893_v20  ;;  %v9989_v24 = vor.u32 %v11447_v14, %v9988_v40  ;;  %v11511_v56 = vld [vmem:[%s16651_s15 + $0x30c] sm:$0xf0]  ;;  %v10868_v20 = vld [vmem:[%s16651_s15 + $0x7e0] sm:$0xf] }
 0xa2b   : > { %8354 = vmatpush.bf16.msrb.mxu0 %v10005_v23  ;;  %v10581_v23 = vor.u32 %v11595_v15, %v10580_v39  ;;  %v10564_v40 = vld [vmem:[%s16651_s15 + $0x580] sm:$0xf]  ;;  %v11591_v14 = vld [vmem:[%s16651_s15 + $0x58c] sm:$0xf0] }
 0xa2c   : > { %v10788_v15 = vld [vmem:[%s16651_s15 + $0x740] sm:$0xf] }
 0xa2d   : > { %8376 = vmatpush.bf16.msrb.mxu1 %v10325_v44  ;;  %v6304_v44 = vperm.slane %v14583_v6, 0  ;;  %v10852_v6 = vld [vmem:[%s16651_s15 + $0x7c0] sm:$0xf] }
 0xa2e   : > { %8365 = vmatpush.bf16.msra.mxu2 %v10165_v51  ;;  %8341 = vmatpush.bf16.msra.mxu3 %v9877_v9  ;;  %v10117_v51 = vor.u32 %v11479_v11, %v10116_v31  ;;  %v11655_v31 = vld [vmem:[%s16651_s15 + $0x78c] sm:$0xf0] }
 0xa2f   : > { %8355 = vmatpush.bf16.msrb.mxu0 %v9989_v24 }
 0xa31   : > { %8377 = vmatpush.bf16.msrb.mxu1 %v10309_v1 }
 0xa32   : > { %8366 = vmatpush.bf16.msra.mxu2 %v10149_v19  ;;  %v11627_v19 = vld [vmem:[%s16651_s15 + $0x6ac] sm:$0xf0] }
 0xa35   : > { %8378 = vmatpush.bf16.msrb.mxu1 %v10293_v59  ;;  %v10245_v59 = vor.u32 %v11511_v56, %v10244_v46  ;;  %v11551_v56 = vld [vmem:[%s16651_s15 + $0x44c] sm:$0xf0] }
 0xa39   : > { %8379 = vmatpush.bf16.msrb.mxu1 %v10277_v0  ;;  %v10836_v0 = vld [vmem:[%s16651_s15 + $0x7a0] sm:$0xf] }
 0xa3d   : > { %8380 = vmatpush.bf16.msrb.mxu1 %v10261_v61  ;;  %v10404_v61 = vld [vmem:[%s16651_s15 + $0x440] sm:$0xf] }
 0xa41   : > { %8381 = vmatpush.bf16.msrb.mxu1 %v10245_v59  ;;  %v11647_v59 = vld [vmem:[%s16651_s15 + $0x74c] sm:$0xf0] }
 0xa80   : > { %v14491_v13 = vpop.f32.mrf.mxu2 }
 0xa81   : > { %v6195_v16 = vpop.f32.mrf.mxu1  ;;  %v14493_v42 = vpop.f32.mrf.mxu0 }
 0xa82   : > { %v6196_v54 = vadd.f32 %v6195_v16, %v14491_v13  ;;  %v10484_v13 = vld [vmem:[%s16651_s15 + $0x4e0] sm:$0xf] }
 0xa83   : > { %v14495_v4 = vpop.f32.mrf.mxu3  ;;  %v10612_v16 = vld [vmem:[%s16651_s15 + $0x5e0] sm:$0xf]  ;;  %v10485_v22 = vor.u32 %v11571_v17, %v10484_v13  ;;  %v10853_v17 = vor.u32 %v11663_v41, %v10852_v6  ;;  %v11575_v41 = vld [vmem:[%s16651_s15 + $0x50c] sm:$0xf0] }
 0xa84   : > { %v6209_v58 = vadd.f32 %v14495_v4, %v6196_v54  ;;  %v10468_v4 = vld [vmem:[%s16651_s15 + $0x4c0] sm:$0xf]  ;;  %v11631_v54 = vld [vmem:[%s16651_s15 + $0x6cc] sm:$0xf0] }
 0xa85   : > { %v10469_v50 = vor.u32 %v11567_v25, %v10468_v4  ;;  %v11623_v4 = vld [vmem:[%s16651_s15 + $0x68c] sm:$0xf0] }
 0xa86   : > { %v6222_v1 = vadd.f32 %v14493_v42, %v6209_v58  ;;  %v11555_v58 = vld [vmem:[%s16651_s15 + $0x46c] sm:$0xf0] }
 0xa88   : > { %v6184_v36 = vpop.f32.mrf.mxu2 }
 0xa89   : > { %v6197_v7 = vpop.f32.mrf.mxu1  ;;  %v6223_v57 = vpop.f32.mrf.mxu0  ;;  %v9861_v36 = vor.u32 %v11415_v35, %v9860_v12  ;;  %v11559_v12 = vld [vmem:[%s16651_s15 + $0x48c] sm:$0xf0] }
 0xa8a   : > { %v11603_v7 = vld [vmem:[%s16651_s15 + $0x5ec] sm:$0xf0]  ;;  %v10132_v57 = vld [vmem:[%s16651_s15 + $0x220] sm:$0xf] }
 0xa8b   : > { %v6210_v55 = vpop.f32.mrf.mxu3  ;;  %v10613_v26 = vor.u32 %v11603_v7, %v10612_v16  ;;  %8342 = vmatpush.bf16.msra.mxu3 %v9861_v36  ;;  %v10437_v16 = vor.u32 %v11559_v12, %v10436_v3  ;;  %v11659_v36 = vld [vmem:[%s16651_s15 + $0x7ac] sm:$0xf0] }
 0xa8c   : > { %v11483_v55 = vld [vmem:[%s16651_s15 + $0x22c] sm:$0xf0] }
 0xa8d   : > { %v10133_v34 = vor.u32 %v11483_v55, %v10132_v57  ;;  %8400 = vmatpush.bf16.msra.mxu0 %v10613_v26  ;;  %v10565_v57 = vor.u32 %v11591_v14, %v10564_v40  ;;  %v10420_v55 = vld [vmem:[%s16651_s15 + $0x460] sm:$0xf] }
 0xa8e   : > { %v10692_v26 = vld [vmem:[%s16651_s15 + $0x680] sm:$0xf] }
 0xa8f   : > { %8387 = vmatpush.bf16.msrb.mxu3 %v10485_v22  ;;  %8367 = vmatpush.bf16.msra.mxu2 %v10133_v34  ;;  %v10548_v22 = vld [vmem:[%s16651_s15 + $0x560] sm:$0xf] }
 0xa90   : > { %v14515_v52 = vpop.f32.mrf.mxu2  ;;  %v10549_v46 = vor.u32 %v11587_v21, %v10548_v22 }
 0xa91   : > { %v6247_v5 = vpop.f32.mrf.mxu1  ;;  %v14526_v10 = vpop.f32.mrf.mxu0  ;;  %v6235_v29 = vadd.f32 %v14515_v52, %v6222_v1  ;;  %v10532_v1 = vld [vmem:[%s16651_s15 + $0x540] sm:$0xf] }
 0xa93   : > { %v6260_v2 = vpop.f32.mrf.mxu3  ;;  %8388 = vmatpush.bf16.msrb.mxu3 %v10469_v50  ;;  %8368 = vmatpush.bf16.msra.mxu2 %v10117_v51  ;;  %v10693_v50 = vor.u32 %v11623_v4, %v10692_v26  ;;  %v11615_v51 = vld [vmem:[%s16651_s15 + $0x64c] sm:$0xf0] }
 0xa94   : > { %v6261_v32 = vadd.f32 %v6260_v2, %v6247_v5  ;;  %v11599_v5 = vld [vmem:[%s16651_s15 + $0x5cc] sm:$0xf0] }
 0xa95   : > { %v11635_v2 = vld [vmem:[%s16651_s15 + $0x6ec] sm:$0xf0]  ;;  %v10597_v42 = vor.u32 %v11599_v5, %v10596_v60  ;;  %v10421_v60 = vor.u32 %v11555_v58, %v10420_v55  ;;  %v10820_v5 = vld [vmem:[%s16651_s15 + $0x780] sm:$0xf] }
 0xa96   : > { %v6274_v33 = vadd.f32 %v14526_v10, %v6261_v32  ;;  %v11667_v10 = vld [vmem:[%s16651_s15 + $0x7ec] sm:$0xf0]  ;;  %v10741_v9 = vor.u32 %v11635_v2, %v10740_v18  ;;  %v10676_v18 = vld [vmem:[%s16651_s15 + $0x660] sm:$0xf]  ;;  %v10821_v2 = vor.u32 %v11655_v31, %v10820_v5 }
 0xa97   : > { %v10869_v52 = vor.u32 %v11667_v10, %v10868_v20  ;;  %8401 = vmatpush.bf16.msra.mxu0 %v10597_v42  ;;  %8389 = vmatpush.bf16.msrb.mxu3 %v10453_v8  ;;  %v10405_v20 = vor.u32 %v11551_v56, %v10404_v61  ;;  %v10804_v42 = vld [vmem:[%s16651_s15 + $0x760] sm:$0xf]  ;;  %v11651_v10 = vld [vmem:[%s16651_s15 + $0x76c] sm:$0xf0] }
 0xa98   : > { %v6236_v43 = vpop.f32.mrf.mxu2  ;;  %8413 = vmatpush.bf16.msrb.mxu2 %v10741_v9  ;;  %v10372_v9 = vld [vmem:[%s16651_s15 + $0x400] sm:$0xf] }
 0xa99   : > { %v6249_v45 = vpop.f32.mrf.mxu1  ;;  %v6275_v38 = vpop.f32.mrf.mxu0  ;;  %v6308_v43 = vadd.f32 %v6304_v44, %v6235_v29  ;;  %8426 = vmatpush.bf16.msra.mxu1 %v10869_v52  ;;  %v10837_v44 = vor.u32 %v11659_v36, %v10836_v0  ;;  %v11547_v29 = vld [vmem:[%s16651_s15 + $0x42c] sm:$0xf0]  ;;  %v10805_v52 = vor.u32 %v11651_v10, %v10804_v42  ;;  %v10644_v36 = vld [vmem:[%s16651_s15 + $0x620] sm:$0xf] }
 0xa9a   : > { %v10725_v45 = vor.u32 %v11631_v54, %v10724_v62  ;;  %v10708_v38 = vld [vmem:[%s16651_s15 + $0x6a0] sm:$0xf]  ;;  %v10389_v8 = vor.u32 %v11547_v29, %v10388_v48 }
 0xa9b   : > { %v6262_v37 = vpop.f32.mrf.mxu3  ;;  %8402 = vmatpush.bf16.msra.mxu0 %v10581_v23  ;;  %v6310_v32 = vmax.f32 %v6308_v43, 0.0  ;;  %v10709_v49 = vor.u32 %v11627_v19, %v10708_v38  ;;  %8390 = vmatpush.bf16.msrb.mxu3 %v10437_v16  ;;  %v10500_v23 = vld [vmem:[%s16651_s15 + $0x500] sm:$0xf] }
 0xa9c   : > { %8414 = vmatpush.bf16.msrb.mxu2 %v10725_v45  ;;  %v10756_v61 = vld [vmem:[%s16651_s15 + $0x700] sm:$0xf] }
 0xa9d   : > { %8427 = vmatpush.bf16.msra.mxu1 %v10853_v17 }
 0xa9f   : > { %8403 = vmatpush.bf16.msra.mxu0 %v10565_v57  ;;  %8391 = vmatpush.bf16.msrb.mxu3 %v10421_v60  ;;  %v10501_v57 = vor.u32 %v11575_v41, %v10500_v23  ;;  %v11607_v60 = vld [vmem:[%s16651_s15 + $0x60c] sm:$0xf0] }
 0xaa0   : > { %v6286_v47 = vpop.f32.mrf.mxu2  ;;  %8415 = vmatpush.bf16.msrb.mxu2 %v10709_v49 }
 0xaa1   : > { %v6287_v30 = vadd.f32 %v6286_v47, %v6274_v33  ;;  %v6299_v27 = vpop.f32.mrf.mxu1  ;;  %v11583_v33 = vld [vmem:[%s16651_s15 + $0x54c] sm:$0xf0]  ;;  %8428 = vmatpush.bf16.msra.mxu1 %v10837_v44 }
 0xaa2   : > { %v11619_v47 = vld [vmem:[%s16651_s15 + $0x66c] sm:$0xf0]  ;;  %v10533_v63 = vor.u32 %v11583_v33, %v10532_v1 }
 0xaa3   : > { %v6300_v28 = vadd.f32 %v6299_v27, %v6287_v30  ;;  %8404 = vmatpush.bf16.msra.mxu0 %v10549_v46  ;;  %v10516_v30 = vld [vmem:[%s16651_s15 + $0x520] sm:$0xf]  ;;  %v11579_v27 = vld [vmem:[%s16651_s15 + $0x52c] sm:$0xf0]  ;;  %v10677_v39 = vor.u32 %v11619_v47, %v10676_v18  ;;  %8392 = vmatpush.bf16.msrb.mxu3 %v10405_v20 }
 0xaa4   : > { %8416 = vmatpush.bf16.msrb.mxu2 %v10693_v50  ;;  %v10517_v6 = vor.u32 %v11579_v27, %v10516_v30 }
 0xaa5   : > { %v6309_v35 = vadd.f32 %v6305_v53, %v6300_v28  ;;  %v10660_v53 = vld [vmem:[%s16651_s15 + $0x640] sm:$0xf]  ;;  %v11543_v28 = vld [vmem:[%s16651_s15 + $0x40c] sm:$0xf0]  ;;  %8429 = vmatpush.bf16.msra.mxu1 %v10821_v2 }
 0xaa6   : > { %v10661_v43 = vor.u32 %v11615_v51, %v10660_v53  ;;  %v10373_v17 = vor.u32 %v11543_v28, %v10372_v9 }
 0xaa7   : > { %v6311_v13 = vmax.f32 %v6309_v35, 0.0  ;;  %8405 = vmatpush.bf16.msra.mxu0 %v10533_v63  ;;  %8393 = vmatpush.bf16.msrb.mxu3 %v10389_v8  ;;  %v11124_v8 = vld [vmem:[%s16651_s15 + $0x9e0] sm:$0xf] }
 0xaa8   : > { %v6288_v7 = vpop.f32.mrf.mxu2  ;;  %8417 = vmatpush.bf16.msrb.mxu2 %v10677_v39  ;;  %v10996_v39 = vld [vmem:[%s16651_s15 + $0x8e0] sm:$0xf] }
 0xaa9   : > { %v6314_v37 = vrot.slane %v6311_v13, 6  ;;  %v6301_v24 = vpop.f32.mrf.mxu1  ;;  %8430 = vmatpush.bf16.msra.mxu1 %v10805_v52  ;;  %v10789_v13 = vor.u32 %v11647_v59, %v10788_v15  ;;  %v11611_v7 = vld [vmem:[%s16651_s15 + $0x62c] sm:$0xf0] }
 0xaaa   : > { %v10645_v44 = vor.u32 %v11611_v7, %v10644_v36  ;;  %v11699_v52 = vld [vmem:[%s16651_s15 + $0x8ec] sm:$0xf0]  ;;  %v10102_v36 = vld [vmem:[%s16651_s15 + $0x1f0] sm:$0xf0] }
 0xaab   : > { %v6315_v25 = vsel %vm5622_vm6, %v6310_v32, %v6314_v37  ;;  %v6317_v34 = vsel %vm6316_vm8, %v6310_v32, %v6314_v37  ;;  %8406 = vmatpush.bf16.msra.mxu0 %v10517_v6  ;;  %v10772_v32 = vld [vmem:[%s16651_s15 + $0x720] sm:$0xf]  ;;  %v11643_v37 = vld [vmem:[%s16651_s15 + $0x72c] sm:$0xf0]  ;;  %8394 = vmatpush.bf16.msrb.mxu3 %v10373_v17 }
 0xaac   : > { %v6318_v11 = vrot.slane %v6317_v34, 2  ;;  %6319 = vst [vmem:[#allocation1] ss:$4 sm:$0xff] %v6315_v25  ;;  %8418 = vmatpush.bf16.msrb.mxu2 %v10661_v43  ;;  %v10773_v25 = vor.u32 %v11643_v37, %v10772_v32  ;;  %v10628_v34 = vld [vmem:[%s16651_s15 + $0x600] sm:$0xf] }
 0xaad   : > { %8431 = vmatpush.bf16.msra.mxu1 %v10789_v13  ;;  %v10629_v50 = vor.u32 %v11607_v60, %v10628_v34  ;;  %v10980_v43 = vld [vmem:[%s16651_s15 + $0x8c0] sm:$0xf]  ;;  %v9974_v13 = vld [vmem:[%s16651_s15 + $0xf0] sm:$0xf0]  ;;  %v11691_v37 = vld [vmem:[%s16651_s15 + $0x8ac] sm:$0xf0] }
 0xaae   : > { %6323 = vst [vmem:[#allocation1 + $0x20] ss:$4 sm:$0xff] %v6318_v11  ;;  %v11639_v11 = vld [vmem:[%s16651_s15 + $0x70c] sm:$0xf0]  ;;  %v10964_v32 = vld [vmem:[%s16651_s15 + $0x8a0] sm:$0xf] }
 0xaaf   : > { %8407 = vmatpush.bf16.msra.mxu0 %v10501_v57  ;;  %v10757_v20 = vor.u32 %v11639_v11, %v10756_v61  ;;  %v10965_v34 = vor.u32 %v11691_v37, %v10964_v32  ;;  %v11437_v60 = vld [vmem:[%s16651_s15 + $0xc4] sm:$0xf] }
 0xab0   : > { %8419 = vmatpush.bf16.msrb.mxu2 %v10645_v44 }
 0xab1   : > { %8432 = vmatpush.bf16.msra.mxu1 %v10773_v25 }
 0xab3   : > { %v6320_v62 = vld.sshfl [vmem:[#allocation1] sm:$0xff pattern:$0x73625140]  ;;  %v6321_v54 = vld.sshfl [vmem:[#allocation1 + $0x8] sm:$0xff pattern:$0x73625140] }
 0xab4   : > { %v6330_v3 = vsel %vm5622_vm6, %v6320_v62, -inf  ;;  %v6337_v12 = vsel %vm5622_vm6, %v6321_v54, -inf  ;;  %8420 = vmatpush.bf16.msrb.mxu2 %v10629_v50  ;;  %v11731_v62 = vld [vmem:[%s16651_s15 + $0x9ec] sm:$0xf0]  ;;  %v11076_v50 = vld [vmem:[%s16651_s15 + $0x980] sm:$0xf] }
 0xab5   : > { %v6324_v35 = vld.sshfl [vmem:[#allocation1 + $0x20] sm:$0xff pattern:$0x73625140]  ;;  %v6325_v40 = vld.sshfl [vmem:[#allocation1 + $0x28] sm:$0xff pattern:$0x73625140]  ;;  %8433 = vmatpush.bf16.msra.mxu1 %v10757_v20 }
 0xab6   : > { %v6331_v14 = vrot.slane %v6330_v3, 4  ;;  %v6338_v45 = vrot.slane %v6337_v12, 4  ;;  %v6344_v38 = vsel %vm5622_vm6, %v6324_v35, -inf  ;;  %v6351_v19 = vsel %vm5622_vm6, %v6325_v40, -inf  ;;  %v11695_v35 = vld [vmem:[%s16651_s15 + $0x8cc] sm:$0xf0] }
 0xab7   : > { %v6345_v16 = vrot.slane %v6344_v38, 4  ;;  %v6352_v0 = vrot.slane %v6351_v19, 4  ;;  %v11108_v40 = vld [vmem:[%s16651_s15 + $0x9c0] sm:$0xf]  ;;  %v10981_v7 = vor.u32 %v11695_v35, %v10980_v43 }
 0xab8   : > { %v6332_v55 = vmax.f32 %v6330_v3, %v6331_v14  ;;  %v6339_v58 = vmax.f32 %v6337_v12, %v6338_v45  ;;  %v10997_v3 = vor.u32 %v11699_v52, %v10996_v39  ;;  %v11125_v12 = vor.u32 %v11731_v62, %v11124_v8  ;;  %v11727_v14 = vld [vmem:[%s16651_s15 + $0x9cc] sm:$0xf0]  ;;  %v10054_v52 = vld [vmem:[%s16651_s15 + $0x190] sm:$0xf0] }
 0xab9   : > { %v6346_v24 = vmax.f32 %v6344_v38, %v6345_v16  ;;  %v6353_v22 = vmax.f32 %v6351_v19, %v6352_v0  ;;  %v11441_v19 = vld [vmem:[%s16651_s15 + $0xe4] sm:$0xf]  ;;  %v11109_v57 = vor.u32 %v11727_v14, %v11108_v40  ;;  %v9910_v14 = vld [vmem:[%s16651_s15 + $0x70] sm:$0xf0] }
 0xaba   : > { %v6333_v21 = vrot.slane %v6332_v55, 2  ;;  %v6340_v49 = vrot.slane %v6339_v58, 2  ;;  %v11473_v0 = vld [vmem:[%s16651_s15 + $0x1e4] sm:$0xf] }
 0xabb   : > { %v6347_v26 = vrot.slane %v6346_v24, 2  ;;  %v6354_v4 = vrot.slane %v6353_v22, 2  ;;  %v10105_v25 = vor.u32 %v11473_v0, %v10102_v36  ;;  %v11425_v40 = vld [vmem:[%s16651_s15 + $0x64] sm:$0xf] }
 0xabc   : > { %v6334_v5 = vmax.f32 %v6332_v55, %v6333_v21  ;;  %v6341_v31 = vmax.f32 %v6339_v58, %v6340_v49 }
 0xabd   : > { %v6348_v46 = vmax.f32 %v6346_v24, %v6347_v26  ;;  %v6355_v56 = vmax.f32 %v6353_v22, %v6354_v4  ;;  %v11092_v24 = vld [vmem:[%s16651_s15 + $0x9a0] sm:$0xf]  ;;  %v11723_v22 = vld [vmem:[%s16651_s15 + $0x9ac] sm:$0xf0]  ;;  %v9977_v4 = vor.u32 %v11441_v19, %v9974_v13  ;;  %v11457_v19 = vld [vmem:[%s16651_s15 + $0x164] sm:$0xf] }
 0xabe   : > { %v6335_v1 = vrot.slane %v6334_v5, 1  ;;  %v6342_v33 = vrot.slane %v6341_v31, 1  ;;  %v11093_v11 = vor.u32 %v11723_v22, %v11092_v24  ;;  %v10900_v24 = vld [vmem:[%s16651_s15 + $0x820] sm:$0xf]  ;;  %v11707_v22 = vld [vmem:[%s16651_s15 + $0x92c] sm:$0xf0] }
 0xabf   : > { %v6349_v18 = vrot.slane %v6348_v46, 1  ;;  %v6356_v2 = vrot.slane %v6355_v56, 1 }
 0xac0   : > { %v6336_v47 = vmax.f32 %v6334_v5, %v6335_v1  ;;  %v6343_v42 = vmax.f32 %v6341_v31, %v6342_v33  ;;  %v9958_v5 = vld [vmem:[%s16651_s15 + $0xd0] sm:$0xf0]  ;;  %v10948_v1 = vld [vmem:[%s16651_s15 + $0x880] sm:$0xf]  ;;  %v11687_v33 = vld [vmem:[%s16651_s15 + $0x88c] sm:$0xf0] }
 0xac1   : > { %v6350_v10 = vmax.f32 %v6348_v46, %v6349_v18  ;;  %v6357_v63 = vmax.f32 %v6355_v56, %v6356_v2  ;;  %v11469_v46 = vld [vmem:[%s16651_s15 + $0x1c4] sm:$0xf]  ;;  %v10086_v56 = vld [vmem:[%s16651_s15 + $0x1d0] sm:$0xf0]  ;;  %v11719_v18 = vld [vmem:[%s16651_s15 + $0x98c] sm:$0xf0]  ;;  %v9961_v2 = vor.u32 %v11437_v60, %v9958_v5 }
 0xac2   : > { %v6358_v48 = vpack.c.bf16 %v6343_v42, %v6336_v47  ;;  %v10089_v20 = vor.u32 %v11469_v46, %v10086_v56  ;;  %v11433_v47 = vld [vmem:[%s16651_s15 + $0xa4] sm:$0xf]  ;;  %v10949_v42 = vor.u32 %v11687_v33, %v10948_v1  ;;  %v10022_v60 = vld [vmem:[%s16651_s15 + $0x150] sm:$0xf0]  ;;  %v10884_v46 = vld [vmem:[%s16651_s15 + $0x800] sm:$0xf] }
 0xac3   : > { %v6359_v29 = vpack.c.bf16 %v6357_v63, %v6350_v10  ;;  %v11077_v10 = vor.u32 %v11719_v18, %v11076_v50  ;;  %v9942_v63 = vld [vmem:[%s16651_s15 + $0xb0] sm:$0xf0]  ;;  %v11671_v56 = vld [vmem:[%s16651_s15 + $0x80c] sm:$0xf0]  ;;  %v11012_v1 = vld [vmem:[%s16651_s15 + $0x900] sm:$0xf] }
 0xac4   : > { %v6363_v30 = vperm.slane %v6358_v48, 0  ;;  %v6364_v27 = vperm.slane %v6358_v48, 4  ;;  %v11465_v48 = vld [vmem:[%s16651_s15 + $0x1a4] sm:$0xf]  ;;  %v9945_v39 = vor.u32 %v11433_v47, %v9942_v63  ;;  %v11703_v33 = vld [vmem:[%s16651_s15 + $0x90c] sm:$0xf0] }
 0xac5   : > { %v6365_v53 = vperm.slane %v6359_v29, 0  ;;  %v6366_v51 = vperm.slane %v6359_v29, 4  ;;  %v10070_v29 = vld [vmem:[%s16651_s15 + $0x1b0] sm:$0xf0]  ;;  %v11505_v50 = vld [vmem:[%s16651_s15 + $0x2e4] sm:$0xf] }
 0xac6   : > { %v6367_v15 = vunpack.c.l.b16 %v6363_v30  ;;  %v6368_v9 = vunpack.c.l.b16 %v6364_v27  ;;  %v10932_v30 = vld [vmem:[%s16651_s15 + $0x860] sm:$0xf]  ;;  %v11683_v27 = vld [vmem:[%s16651_s15 + $0x86c] sm:$0xf0]  ;;  %v10230_v18 = vld [vmem:[%s16651_s15 + $0x2f0] sm:$0xf0] }
 0xac7   : > { %v6369_v59 = vunpack.c.l.b16 %v6365_v53  ;;  %v6370_v28 = vunpack.c.l.b16 %v6366_v51  ;;  %v11060_v53 = vld [vmem:[%s16651_s15 + $0x960] sm:$0xf]  ;;  %v11715_v51 = vld [vmem:[%s16651_s15 + $0x96c] sm:$0xf0]  ;;  %v10933_v8 = vor.u32 %v11683_v27, %v10932_v30  ;;  %v11537_v47 = vld [vmem:[%s16651_s15 + $0x3e4] sm:$0xf]  ;;  %v10885_v30 = vor.u32 %v11671_v56, %v10884_v46 }
 0xac8   : > { %v11061_v62 = vor.u32 %v11715_v51, %v11060_v53  ;;  %v9878_v63 = vld [vmem:[%s16651_s15 + $0x30] sm:$0xf0]  ;;  %v11013_v27 = vor.u32 %v11703_v33, %v11012_v1  ;;  %v10233_v53 = vor.u32 %v11505_v50, %v10230_v18  ;;  %v11561_v46 = vld [vmem:[%s16651_s15 + $0x4a4] sm:$0xf] }
 0xac9   : > { %v6371_v54 = vsel %vm2494_vm7, %v6369_v59, %v6367_v15  ;;  %v6372_v6 = vsel %vm2494_vm7, %v6370_v28, %v6368_v9  ;;  %v10073_v15 = vor.u32 %v11465_v48, %v10070_v29  ;;  %v11429_v59 = vld [vmem:[%s16651_s15 + $0x84] sm:$0xf]  ;;  %v9926_v9 = vld [vmem:[%s16651_s15 + $0x90] sm:$0xf0]  ;;  %vm9213_vm7 = vcmask 8192  }
 0xaca   : > { %v6373_v23 = vpack.c.b16 %v6371_v54, %v6371_v54  ;;  %v6374_v41 = vpack.c.b16 %v6372_v6, %v6372_v6  ;;  %v11461_v28 = vld [vmem:[%s16651_s15 + $0x184] sm:$0xf]  ;;  %v10916_v54 = vld [vmem:[%s16651_s15 + $0x840] sm:$0xf]  ;;  %v11679_v6 = vld [vmem:[%s16651_s15 + $0x84c] sm:$0xf0]  ;;  %v9929_v43 = vor.u32 %v11429_v59, %v9926_v9 }
 0xacb   : > { %v10057_v35 = vor.u32 %v11461_v28, %v10054_v52  ;;  %v10917_v32 = vor.u32 %v11679_v6, %v10916_v54  ;;  %v11449_v48 = vld [vmem:[%s16651_s15 + $0x124] sm:$0xf]  ;;  %v10006_v29 = vld [vmem:[%s16651_s15 + $0x130] sm:$0xf0] }
 0xacc   : > { %v14858_v45 = vsel %vm2621_vm13, 0, %v6373_v23  ;;  %v14861_v38 = vsel %vm2621_vm13, 0, %v6374_v41  ;;  %v11533_v59 = vld [vmem:[%s16651_s15 + $0x3c4] sm:$0xf]  ;;  %v10009_v28 = vor.u32 %v11449_v48, %v10006_v29  ;;  %v10342_v52 = vld [vmem:[%s16651_s15 + $0x3d0] sm:$0xf0] }
 0xacd   : > { %v14871_v17 = vsel %vm5622_vm6, %v14858_v45, 0  ;;  %11138 = vmatmul.msk.bf16.vlgmr.msra.gmra.mxu3 %vm5622_vm6, %v14858_v45  ;;  %v14877_v16 = vsel %vm5622_vm6, %v14861_v38, 0  ;;  %11139 = vmatmul.msk.bf16.vlgmr.msrb.gmra.mxu0 %vm5622_vm6, %v14861_v38  ;;  %v11445_v54 = vld [vmem:[%s16651_s15 + $0x104] sm:$0xf]  ;;  %v9990_v6 = vld [vmem:[%s16651_s15 + $0x110] sm:$0xf0] }
 0xace   : > { %8439 = vmatpush.bf16.msra.mxu3 %v10997_v3  ;;  %8452 = vmatpush.bf16.msrb.mxu0 %v11125_v12  ;;  %v6385_v55 = vshll.u32 %v14871_v17, 16  ;;  %v6391_v58 = vshll.u32 %v14877_v16, 16  ;;  %v6383_v21 = vshrl.u32 %v14871_v17, 16  ;;  %v6389_v44 = vshrl.u32 %v14877_v16, 16  ;;  %v11044_v3 = vld [vmem:[%s16651_s15 + $0x940] sm:$0xf] }
 0xacf   : > { %v14984_v23 = vrot.slane %v14871_v17, 1  ;;  %v14987_v41 = vrot.slane %v14877_v16, 1  ;;  %v11711_v12 = vld [vmem:[%s16651_s15 + $0x94c] sm:$0xf0]  ;;  %v10454_v56 = vld [vmem:[%s16651_s15 + $0x4b0] sm:$0xf0] }
 0xad0   : > { %v6387_v49 = vrot.slane %v6385_v55, 1  ;;  %v6393_v26 = vrot.slane %v6391_v58, 1  ;;  %v6403_v13 = vrot.slane %v6383_v21, 1  ;;  %v6404_v0 = vrot.slane %v6385_v55, 2  ;;  %v11675_v55 = vld [vmem:[%s16651_s15 + $0x82c] sm:$0xf0] }
 0xad1   : > { %v6406_v36 = vrot.slane %v6389_v44, 1  ;;  %v11045_v37 = vor.u32 %v11711_v12, %v11044_v3  ;;  %v10901_v5 = vor.u32 %v11675_v55, %v10900_v24  ;;  %v11569_v3 = vld [vmem:[%s16651_s15 + $0x4e4] sm:$0xf]  ;;  %v10486_v12 = vld [vmem:[%s16651_s15 + $0x4f0] sm:$0xf0] }
 0xad2   : > { %8440 = vmatpush.bf16.msra.mxu3 %v10981_v7  ;;  %8453 = vmatpush.bf16.msrb.mxu0 %v11109_v57  ;;  %v14915_v31 = vor.u32 %v6387_v49, %v6383_v21  ;;  %v14919_v61 = vor.u32 %v6393_v26, %v6389_v44  ;;  %v6407_v7 = vrot.slane %v6391_v58, 2  ;;  %v10038_v57 = vld [vmem:[%s16651_s15 + $0x170] sm:$0xf0]  ;;  %v11028_v58 = vld [vmem:[%s16651_s15 + $0x920] sm:$0xf]  ;;  %v9913_v21 = vor.u32 %v11425_v40, %v9910_v14 }
 0xad3   : > { %v10041_v49 = vor.u32 %v11457_v19, %v10038_v57  ;;  %v11421_v44 = vld [vmem:[%s16651_s15 + $0x44] sm:$0xf]  ;;  %v15032_v26 = vor.u32 %v6404_v0, %v6403_v13  ;;  %v15120_v40 = vrot.slane %v14871_v17, 2  ;;  %v15123_v14 = vrot.slane %v14877_v16, 2  ;;  %v10198_v57 = vld [vmem:[%s16651_s15 + $0x2b0] sm:$0xf0] }
 0xad4   : > { %8369 = vmatmul.bf16.vlgmr.msra.gmra.mxu2 %v14915_v31  ;;  %8382 = vmatmul.bf16.vlgmr.msrb.gmra.mxu1 %v14919_v61  ;;  %v10345_v13 = vor.u32 %v11533_v59, %v10342_v52  ;;  %v11497_v0 = vld [vmem:[%s16651_s15 + $0x2a4] sm:$0xf]  ;;  %v10326_v16 = vld [vmem:[%s16651_s15 + $0x3b0] sm:$0xf0] }
 0xad5   : > { %8465 = vmatpush.bf16.msra.mxu2 %v9977_v4  ;;  %8478 = vmatpush.bf16.msrb.mxu1 %v10105_v25  ;;  %v15034_v4 = vor.u32 %v6407_v7, %v6406_v36  ;;  %v9894_v25 = vld [vmem:[%s16651_s15 + $0x50] sm:$0xf0]  ;;  %v9993_v7 = vor.u32 %v11445_v54, %v9990_v6  ;;  %v11529_v17 = vld [vmem:[%s16651_s15 + $0x3a4] sm:$0xf] }
 0xad6   : > { %8441 = vmatpush.bf16.msra.mxu3 %v10965_v34  ;;  %8454 = vmatpush.bf16.msrb.mxu0 %v11093_v11  ;;  %v11453_v34 = vld [vmem:[%s16651_s15 + $0x144] sm:$0xf]  ;;  %v11029_v11 = vor.u32 %v11707_v22, %v11028_v58  ;;  %v10470_v55 = vld [vmem:[%s16651_s15 + $0x4d0] sm:$0xf0] }
 0xad7   : > { %v11565_v24 = vld [vmem:[%s16651_s15 + $0x4c4] sm:$0xf]  ;;  %v10598_v22 = vld [vmem:[%s16651_s15 + $0x5d0] sm:$0xf0] }
 0xad8   : > { %v11597_v58 = vld [vmem:[%s16651_s15 + $0x5c4] sm:$0xf]  ;;  %v10582_v33 = vld [vmem:[%s16651_s15 + $0x5b0] sm:$0xf0] }
 0xad9   : > { %8466 = vmatpush.bf16.msra.mxu2 %v9961_v2  ;;  %8479 = vmatpush.bf16.msrb.mxu1 %v10089_v20  ;;  %v9897_v2 = vor.u32 %v11421_v44, %v9894_v25  ;;  %v10025_v20 = vor.u32 %v11453_v34, %v10022_v60  ;;  %v11493_v44 = vld [vmem:[%s16651_s15 + $0x284] sm:$0xf]  ;;  %v10182_v25 = vld [vmem:[%s16651_s15 + $0x290] sm:$0xf0] }
 0xada   : > { %8442 = vmatpush.bf16.msra.mxu3 %v10949_v42  ;;  %8455 = vmatpush.bf16.msrb.mxu0 %v11077_v10  ;;  %v10358_v42 = vld [vmem:[%s16651_s15 + $0x3f0] sm:$0xf0]  ;;  %v11417_v10 = vld [vmem:[%s16651_s15 + $0x24] sm:$0xf]  ;;  %v10185_v50 = vor.u32 %v11493_v44, %v10182_v25 }
 0xadb   : > { %v10361_v51 = vor.u32 %v11537_v47, %v10358_v42  ;;  %v9881_v9 = vor.u32 %v11417_v10, %v9878_v63  ;;  %v11525_v34 = vld [vmem:[%s16651_s15 + $0x384] sm:$0xf]  ;;  %v10310_v60 = vld [vmem:[%s16651_s15 + $0x390] sm:$0xf0]  ;;  %v10457_v10 = vor.u32 %v11561_v46, %v10454_v56 }
 0xadc   : > { %v11593_v1 = vld [vmem:[%s16651_s15 + $0x5a4] sm:$0xf]  ;;  %v10313_v18 = vor.u32 %v11525_v34, %v10310_v60  ;;  %v10294_v42 = vld [vmem:[%s16651_s15 + $0x370] sm:$0xf0] }
 0xadd   : > { %8467 = vmatpush.bf16.msra.mxu2 %v9945_v39  ;;  %8480 = vmatpush.bf16.msrb.mxu1 %v10073_v15  ;;  %v11501_v39 = vld [vmem:[%s16651_s15 + $0x2c4] sm:$0xf]  ;;  %v10214_v15 = vld [vmem:[%s16651_s15 + $0x2d0] sm:$0xf0]  ;;  %v10585_v63 = vor.u32 %v11593_v1, %v10582_v33 }
 0xade   : > { %8395 = vmatmul.bf16.vlgmr.msrb.gmra.mxu3 %v14984_v23  ;;  %8408 = vmatmul.bf16.vlgmr.msra.gmra.mxu0 %v14987_v41  ;;  %v10217_v19 = vor.u32 %v11501_v39, %v10214_v15  ;;  %v11521_v47 = vld [vmem:[%s16651_s15 + $0x364] sm:$0xf]  ;;  %v10438_v29 = vld [vmem:[%s16651_s15 + $0x490] sm:$0xf0] }
 0xadf   : > { %8443 = vmatpush.bf16.msra.mxu3 %v10933_v8  ;;  %8456 = vmatpush.bf16.msrb.mxu0 %v11061_v62  ;;  %v11413_v8 = vld [vmem:[%s16651_s15 + $0x4] sm:$0xf]  ;;  %v9862_v62 = vld [vmem:[%s16651_s15 + $0x10] sm:$0xf0] }
 0xae0   : > { %v9865_v36 = vor.u32 %v11413_v8, %v9862_v62  ;;  %v11557_v48 = vld [vmem:[%s16651_s15 + $0x484] sm:$0xf]  ;;  %v10150_v15 = vld [vmem:[%s16651_s15 + $0x250] sm:$0xf0] }
 0xae1   : > { %8468 = vmatpush.bf16.msra.mxu2 %v9929_v43  ;;  %8481 = vmatpush.bf16.msrb.mxu1 %v10057_v35  ;;  %v11601_v43 = vld [vmem:[%s16651_s15 + $0x5e4] sm:$0xf]  ;;  %v10614_v35 = vld [vmem:[%s16651_s15 + $0x5f0] sm:$0xf0] }
 0xae2   : > { %v11485_v39 = vld [vmem:[%s16651_s15 + $0x244] sm:$0xf]  ;;  %v10422_v62 = vld [vmem:[%s16651_s15 + $0x470] sm:$0xf0] }
 0xae3   : > { %8444 = vmatpush.bf16.msra.mxu3 %v10917_v32  ;;  %8457 = vmatpush.bf16.msrb.mxu0 %v11045_v37  ;;  %v10489_v32 = vor.u32 %v11569_v3, %v10486_v12  ;;  %v10617_v37 = vor.u32 %v11601_v43, %v10614_v35  ;;  %v11517_v59 = vld [vmem:[%s16651_s15 + $0x344] sm:$0xf]  ;;  %v10550_v6 = vld [vmem:[%s16651_s15 + $0x570] sm:$0xf0]  ;;  %v10153_v3 = vor.u32 %v11485_v39, %v10150_v15 }
 0xae4   : > { %8421 = vmatmul.bf16.vlgmr.msrb.gmra.mxu2 %v15032_v26  ;;  %8434 = vmatmul.bf16.vlgmr.msra.gmra.mxu1 %v15034_v4  ;;  %v11553_v8 = vld [vmem:[%s16651_s15 + $0x464] sm:$0xf]  ;;  %v10134_v35 = vld [vmem:[%s16651_s15 + $0x230] sm:$0xf0] }
 0xae5   : > { %8469 = vmatpush.bf16.msra.mxu2 %v9913_v21  ;;  %8482 = vmatpush.bf16.msrb.mxu1 %v10041_v49  ;;  %v10201_v21 = vor.u32 %v11497_v0, %v10198_v57  ;;  %v10329_v49 = vor.u32 %v11529_v17, %v10326_v16  ;;  %v11585_v54 = vld [vmem:[%s16651_s15 + $0x564] sm:$0xf]  ;;  %v10425_v0 = vor.u32 %v11553_v8, %v10422_v62  ;;  %v10406_v57 = vld [vmem:[%s16651_s15 + $0x450] sm:$0xf0] }
 0xae6   : > { %v11481_v43 = vld [vmem:[%s16651_s15 + $0x224] sm:$0xf]  ;;  %v10534_v16 = vld [vmem:[%s16651_s15 + $0x550] sm:$0xf0] }
 0xae7   : > { %8445 = vmatpush.bf16.msra.mxu3 %v10901_v5  ;;  %8458 = vmatpush.bf16.msrb.mxu0 %v11029_v11  ;;  %v10473_v5 = vor.u32 %v11565_v24, %v10470_v55  ;;  %v10601_v11 = vor.u32 %v11597_v58, %v10598_v22  ;;  %v11581_v17 = vld [vmem:[%s16651_s15 + $0x544] sm:$0xf]  ;;  %v10118_v55 = vld [vmem:[%s16651_s15 + $0x210] sm:$0xf0] }
 0xae8   : > { %v11477_v24 = vld [vmem:[%s16651_s15 + $0x204] sm:$0xf]  ;;  %v10246_v22 = vld [vmem:[%s16651_s15 + $0x310] sm:$0xf0]  ;;  %v10537_v25 = vor.u32 %v11581_v17, %v10534_v16 }
 0xae9   : > { %8470 = vmatpush.bf16.msra.mxu2 %v9897_v2  ;;  %8483 = vmatpush.bf16.msrb.mxu1 %v10025_v20  ;;  %v11489_v2 = vld [vmem:[%s16651_s15 + $0x264] sm:$0xf]  ;;  %v10166_v20 = vld [vmem:[%s16651_s15 + $0x270] sm:$0xf0]  ;;  %v10121_v1 = vor.u32 %v11477_v24, %v10118_v55 }
 0xaea   : > { %v11509_v58 = vld [vmem:[%s16651_s15 + $0x304] sm:$0xf]  ;;  %v10870_v60 = vld [vmem:[%s16651_s15 + $0x7f0] sm:$0xf0] }
 0xaeb   : > { %8446 = vmatpush.bf16.msra.mxu3 %v10885_v30  ;;  %8459 = vmatpush.bf16.msrb.mxu0 %v11013_v27  ;;  %v11589_v30 = vld [vmem:[%s16651_s15 + $0x584] sm:$0xf]  ;;  %v10566_v27 = vld [vmem:[%s16651_s15 + $0x590] sm:$0xf0]  ;;  %v10249_v33 = vor.u32 %v11509_v58, %v10246_v22 }
 0xaec   : > { %v10569_v52 = vor.u32 %v11589_v30, %v10566_v27  ;;  %v11665_v34 = vld [vmem:[%s16651_s15 + $0x7e4] sm:$0xf]  ;;  %v10518_v56 = vld [vmem:[%s16651_s15 + $0x530] sm:$0xf0] }
 0xaed   : > { %8471 = vmatpush.bf16.msra.mxu2 %v9881_v9  ;;  %8484 = vmatpush.bf16.msrb.mxu1 %v10009_v28  ;;  %v10278_v9 = vld [vmem:[%s16651_s15 + $0x350] sm:$0xf0]  ;;  %v10441_v28 = vor.u32 %v11557_v48, %v10438_v29  ;;  %v11577_v46 = vld [vmem:[%s16651_s15 + $0x524] sm:$0xf] }
 0xaee   : > { %8447 = vmatmul.bf16.vlgmr.msra.gmra.mxu3 %v15120_v40  ;;  %8460 = vmatmul.bf16.vlgmr.msrb.gmra.mxu0 %v15123_v14  ;;  %v10281_v12 = vor.u32 %v11517_v59, %v10278_v9  ;;  %v11541_v48 = vld [vmem:[%s16651_s15 + $0x404] sm:$0xf]  ;;  %v10374_v29 = vld [vmem:[%s16651_s15 + $0x410] sm:$0xf0] }
 0xaef   : > { %8491 = vmatpush.bf16.msrb.mxu3 %v10233_v53  ;;  %8504 = vmatpush.bf16.msra.mxu0 %v10361_v51  ;;  %v10169_v53 = vor.u32 %v11489_v2, %v10166_v20  ;;  %v10297_v51 = vor.u32 %v11521_v47, %v10294_v42  ;;  %v11629_v2 = vld [vmem:[%s16651_s15 + $0x6c4] sm:$0xf]  ;;  %v10726_v20 = vld [vmem:[%s16651_s15 + $0x6d0] sm:$0xf0] }
 0xaf0   : > { %v11661_v47 = vld [vmem:[%s16651_s15 + $0x7c4] sm:$0xf]  ;;  %v10502_v27 = vld [vmem:[%s16651_s15 + $0x510] sm:$0xf0]  ;;  %v10729_v59 = vor.u32 %v11629_v2, %v10726_v20 }
 0xaf1   : > { %8472 = vmatpush.bf16.msra.mxu2 %v9865_v36  ;;  %8485 = vmatpush.bf16.msrb.mxu1 %v9993_v7  ;;  %v10553_v36 = vor.u32 %v11585_v54, %v10550_v6  ;;  %v11549_v7 = vld [vmem:[%s16651_s15 + $0x444] sm:$0xf]  ;;  %v11126_v15 = vld [vmem:[%s16651_s15 + $0x9f0] sm:$0xf0] }
 0xaf2   : > { %v10409_v44 = vor.u32 %v11549_v7, %v10406_v57  ;;  %v11573_v30 = vld [vmem:[%s16651_s15 + $0x504] sm:$0xf]  ;;  %v10710_v62 = vld [vmem:[%s16651_s15 + $0x6b0] sm:$0xf0] }
 0xaf3   : > { %8492 = vmatpush.bf16.msrb.mxu3 %v10217_v19  ;;  %8505 = vmatpush.bf16.msra.mxu0 %v10345_v13  ;;  %v11513_v19 = vld [vmem:[%s16651_s15 + $0x324] sm:$0xf]  ;;  %v10262_v13 = vld [vmem:[%s16651_s15 + $0x330] sm:$0xf0]  ;;  %v10505_v8 = vor.u32 %v11573_v30, %v10502_v27 }
 0xaf4   : > { %11140 = vmatmul.msk.bf16.vlgmr.msra.gmra.mxu2 %vm5622_vm6, %v14858_v45  ;;  %11141 = vmatmul.msk.bf16.vlgmr.msrb.gmra.mxu1 %vm5622_vm6, %v14861_v38  ;;  %v11729_v39 = vld [vmem:[%s16651_s15 + $0x9e4] sm:$0xf]  ;;  %v10838_v6 = vld [vmem:[%s16651_s15 + $0x7b0] sm:$0xf0] }
 0xaf5   : > { %8517 = vmatpush.bf16.msrb.mxu2 %v10489_v32  ;;  %8530 = vmatpush.bf16.msra.mxu1 %v10617_v37  ;;  %v10137_v32 = vor.u32 %v11481_v43, %v10134_v35  ;;  %v10265_v37 = vor.u32 %v11513_v19, %v10262_v13  ;;  %v11657_v54 = vld [vmem:[%s16651_s15 + $0x7a4] sm:$0xf]  ;;  %v10982_v35 = vld [vmem:[%s16651_s15 + $0x8d0] sm:$0xf0] }
 0xaf6   : > { %v11693_v43 = vld [vmem:[%s16651_s15 + $0x8c4] sm:$0xf]  ;;  %v11110_v13 = vld [vmem:[%s16651_s15 + $0x9d0] sm:$0xf0] }
 0xaf7   : > { %8493 = vmatpush.bf16.msrb.mxu3 %v10201_v21  ;;  %8506 = vmatpush.bf16.msra.mxu0 %v10329_v49  ;;  %v11633_v21 = vld [vmem:[%s16651_s15 + $0x6e4] sm:$0xf]  ;;  %v10742_v49 = vld [vmem:[%s16651_s15 + $0x6f0] sm:$0xf0] }
 0xaf8   : > { %v11725_v19 = vld [vmem:[%s16651_s15 + $0x9c4] sm:$0xf]  ;;  %v10694_v57 = vld [vmem:[%s16651_s15 + $0x690] sm:$0xf0] }
 0xaf9   : > { %8518 = vmatpush.bf16.msrb.mxu2 %v10473_v5  ;;  %8531 = vmatpush.bf16.msra.mxu1 %v10601_v11  ;;  %v11545_v5 = vld [vmem:[%s16651_s15 + $0x424] sm:$0xf]  ;;  %v10390_v11 = vld [vmem:[%s16651_s15 + $0x430] sm:$0xf0] }
 0xafa   : > { %v10393_v42 = vor.u32 %v11545_v5, %v10390_v11  ;;  %v11621_v7 = vld [vmem:[%s16651_s15 + $0x684] sm:$0xf]  ;;  %v10822_v16 = vld [vmem:[%s16651_s15 + $0x790] sm:$0xf0] }
 0xafb   : > { %8494 = vmatpush.bf16.msrb.mxu3 %v10185_v50  ;;  %8507 = vmatpush.bf16.msra.mxu0 %v10313_v18  ;;  %v10745_v50 = vor.u32 %v11633_v21, %v10742_v49  ;;  %v10873_v18 = vor.u32 %v11665_v34, %v10870_v60  ;;  %v11653_v17 = vld [vmem:[%s16651_s15 + $0x784] sm:$0xf]  ;;  %v10966_v55 = vld [vmem:[%s16651_s15 + $0x8b0] sm:$0xf0]  ;;  %v10697_v21 = vor.u32 %v11621_v7, %v10694_v57 }
 0xafc   : > { %v11689_v24 = vld [vmem:[%s16651_s15 + $0x8a4] sm:$0xf]  ;;  %v11094_v22 = vld [vmem:[%s16651_s15 + $0x9b0] sm:$0xf0]  ;;  %v10825_v49 = vor.u32 %v11653_v17, %v10822_v16  ;;  %v10108_v17 = vld [vmem:[%s16651_s15 + $0x1e8] sm:$0xf] }
 0xafd   : > { %8519 = vmatpush.bf16.msrb.mxu2 %v10457_v10  ;;  %8532 = vmatpush.bf16.msra.mxu1 %v10585_v63  ;;  %v10521_v10 = vor.u32 %v11577_v46, %v10518_v56  ;;  %v10854_v63 = vld [vmem:[%s16651_s15 + $0x7d0] sm:$0xf0]  ;;  %v11721_v58 = vld [vmem:[%s16651_s15 + $0x9a4] sm:$0xf]  ;;  %v10969_v5 = vor.u32 %v11689_v24, %v10966_v55  ;;  %v11476_v16 = vld [vmem:[%s16651_s15 + $0x1f4] sm:$0xf0] }
 0xafe   : > { %v10857_v9 = vor.u32 %v11661_v47, %v10854_v63  ;;  %v11649_v34 = vld [vmem:[%s16651_s15 + $0x764] sm:$0xf]  ;;  %v10806_v60 = vld [vmem:[%s16651_s15 + $0x770] sm:$0xf0]  ;;  %v11097_v11 = vor.u32 %v11721_v58, %v11094_v22 }
 0xaff   : > { %8495 = vmatpush.bf16.msrb.mxu3 %v10169_v53  ;;  %8508 = vmatpush.bf16.msra.mxu0 %v10297_v51  ;;  %v11697_v53 = vld [vmem:[%s16651_s15 + $0x8e4] sm:$0xf]  ;;  %v10998_v51 = vld [vmem:[%s16651_s15 + $0x8f0] sm:$0xf0] }
 0xb00   : > { %v11685_v46 = vld [vmem:[%s16651_s15 + $0x884] sm:$0xf]  ;;  %v10950_v56 = vld [vmem:[%s16651_s15 + $0x890] sm:$0xf0] }
 0xb01   : > { %8520 = vmatpush.bf16.msrb.mxu2 %v10441_v28  ;;  %8533 = vmatpush.bf16.msra.mxu1 %v10569_v52  ;;  %v11625_v28 = vld [vmem:[%s16651_s15 + $0x6a4] sm:$0xf]  ;;  %v10377_v52 = vor.u32 %v11541_v48, %v10374_v29  ;;  %v10662_v20 = vld [vmem:[%s16651_s15 + $0x650] sm:$0xf0] }
 0xb02   : > { %v11613_v2 = vld [vmem:[%s16651_s15 + $0x644] sm:$0xf]  ;;  %v10934_v29 = vld [vmem:[%s16651_s15 + $0x870] sm:$0xf0] }
 0xb03   : > { %8496 = vmatpush.bf16.msrb.mxu3 %v10153_v3  ;;  %8509 = vmatpush.bf16.msra.mxu0 %v10281_v12  ;;  %v11001_v3 = vor.u32 %v11697_v53, %v10998_v51  ;;  %v11129_v12 = vor.u32 %v11729_v39, %v11126_v15  ;;  %v11645_v47 = vld [vmem:[%s16651_s15 + $0x744] sm:$0xf]  ;;  %v11062_v27 = vld [vmem:[%s16651_s15 + $0x970] sm:$0xf0]  ;;  %v10665_v53 = vor.u32 %v11613_v2, %v10662_v20  ;;  %v10364_v2 = vld [vmem:[%s16651_s15 + $0x3e8] sm:$0xf] }
 0xb04   : > { %v11681_v48 = vld [vmem:[%s16651_s15 + $0x864] sm:$0xf]  ;;  %v10646_v15 = vld [vmem:[%s16651_s15 + $0x630] sm:$0xf0]  ;;  %v11540_v20 = vld [vmem:[%s16651_s15 + $0x3f4] sm:$0xf0] }
 0xb05   : > { %8521 = vmatpush.bf16.msrb.mxu2 %v10425_v0  ;;  %8534 = vmatpush.bf16.msra.mxu1 %v10553_v36  ;;  %v10713_v0 = vor.u32 %v11625_v28, %v10710_v62  ;;  %v10841_v36 = vor.u32 %v11657_v54, %v10838_v6  ;;  %v11713_v30 = vld [vmem:[%s16651_s15 + $0x964] sm:$0xf]  ;;  %v10937_v28 = vor.u32 %v11681_v48, %v10934_v29  ;;  %v10918_v62 = vld [vmem:[%s16651_s15 + $0x850] sm:$0xf0]  ;;  %v11436_v29 = vld [vmem:[%s16651_s15 + $0xb4] sm:$0xf0] }
 0xb06   : > { %v11609_v39 = vld [vmem:[%s16651_s15 + $0x624] sm:$0xf]  ;;  %v11046_v6 = vld [vmem:[%s16651_s15 + $0x950] sm:$0xf0] }
 0xb07   : > { %8497 = vmatpush.bf16.msrb.mxu3 %v10137_v32  ;;  %8510 = vmatpush.bf16.msra.mxu0 %v10265_v37  ;;  %v10985_v32 = vor.u32 %v11693_v43, %v10982_v35  ;;  %v11113_v37 = vor.u32 %v11725_v19, %v11110_v13  ;;  %v11709_v54 = vld [vmem:[%s16651_s15 + $0x944] sm:$0xf]  ;;  %v10630_v35 = vld [vmem:[%s16651_s15 + $0x610] sm:$0xf0] }
 0xb08   : > { %v11605_v43 = vld [vmem:[%s16651_s15 + $0x604] sm:$0xf]  ;;  %v10758_v13 = vld [vmem:[%s16651_s15 + $0x710] sm:$0xf0]  ;;  %v11049_v57 = vor.u32 %v11709_v54, %v11046_v6  ;;  %v10060_v54 = vld [vmem:[%s16651_s15 + $0x188] sm:$0xf] }
 0xb09   : > { %8522 = vmatpush.bf16.msrb.mxu2 %v10409_v44  ;;  %8535 = vmatpush.bf16.msra.mxu1 %v10537_v25  ;;  %v11617_v44 = vld [vmem:[%s16651_s15 + $0x664] sm:$0xf]  ;;  %v10678_v25 = vld [vmem:[%s16651_s15 + $0x670] sm:$0xf0]  ;;  %v10633_v58 = vor.u32 %v11605_v43, %v10630_v35  ;;  %v11464_v6 = vld [vmem:[%s16651_s15 + $0x194] sm:$0xf0] }
 0xb0a   : > { %v11637_v19 = vld [vmem:[%s16651_s15 + $0x704] sm:$0xf]  ;;  %v11030_v55 = vld [vmem:[%s16651_s15 + $0x930] sm:$0xf0]  ;;  %v10204_v43 = vld [vmem:[%s16651_s15 + $0x2a8] sm:$0xf] }
 0xb0b   : > { %8498 = vmatpush.bf16.msrb.mxu3 %v10121_v1  ;;  %8511 = vmatpush.bf16.msra.mxu0 %v10249_v33  ;;  %v11717_v1 = vld [vmem:[%s16651_s15 + $0x984] sm:$0xf]  ;;  %v11078_v33 = vld [vmem:[%s16651_s15 + $0x990] sm:$0xf0]  ;;  %v10761_v22 = vor.u32 %v11637_v19, %v10758_v13  ;;  %v11500_v35 = vld [vmem:[%s16651_s15 + $0x2b4] sm:$0xf0] }
 0xb0c   : > { %v11081_v63 = vor.u32 %v11717_v1, %v11078_v33  ;;  %v11705_v24 = vld [vmem:[%s16651_s15 + $0x924] sm:$0xf]  ;;  %v11014_v33 = vld [vmem:[%s16651_s15 + $0x910] sm:$0xf0]  ;;  %v10332_v19 = vld [vmem:[%s16651_s15 + $0x3a8] sm:$0xf] }
 0xb0d   : > { %8523 = vmatpush.bf16.msrb.mxu2 %v10393_v42  ;;  %8536 = vmatpush.bf16.msra.mxu1 %v10521_v10  ;;  %v10790_v42 = vld [vmem:[%s16651_s15 + $0x750] sm:$0xf0]  ;;  %v10953_v10 = vor.u32 %v11685_v46, %v10950_v56  ;;  %v11669_v46 = vld [vmem:[%s16651_s15 + $0x804] sm:$0xf]  ;;  %v11532_v13 = vld [vmem:[%s16651_s15 + $0x3b4] sm:$0xf0] }
 0xb0e   : > { %8499 = vmatmul.bf16.vlgmr.msrb.gmra.mxu3 %v14915_v31  ;;  %8512 = vmatmul.bf16.vlgmr.msra.gmra.mxu0 %v14919_v61  ;;  %v10793_v51 = vor.u32 %v11645_v47, %v10790_v42  ;;  %v10886_v56 = vld [vmem:[%s16651_s15 + $0x810] sm:$0xf0]  ;;  %v11701_v1 = vld [vmem:[%s16651_s15 + $0x904] sm:$0xf] }
 0xb0f   : > { %8543 = vmatpush.bf16.msra.mxu3 %v10745_v50  ;;  %8556 = vmatpush.bf16.msrb.mxu0 %v10873_v18  ;;  %v10681_v50 = vor.u32 %v11617_v44, %v10678_v25  ;;  %v10809_v18 = vor.u32 %v11649_v34, %v10806_v60  ;;  %v9964_v44 = vld [vmem:[%s16651_s15 + $0xc8] sm:$0xf]  ;;  %v11440_v25 = vld [vmem:[%s16651_s15 + $0xd4] sm:$0xf0]  ;;  %v11017_v48 = vor.u32 %v11701_v1, %v11014_v33 }
 0xb10   : > { %v10092_v34 = vld [vmem:[%s16651_s15 + $0x1c8] sm:$0xf]  ;;  %v9965_v47 = vor.u32 %v11440_v25, %v9964_v44  ;;  %v11424_v25 = vld [vmem:[%s16651_s15 + $0x54] sm:$0xf0] }
 0xb11   : > { %8524 = vmatpush.bf16.msrb.mxu2 %v10377_v52  ;;  %8537 = vmatpush.bf16.msra.mxu1 %v10505_v8  ;;  %v11065_v52 = vor.u32 %v11713_v30, %v11062_v27  ;;  %v11677_v8 = vld [vmem:[%s16651_s15 + $0x844] sm:$0xf]  ;;  %v10076_v30 = vld [vmem:[%s16651_s15 + $0x1a8] sm:$0xf]  ;;  %v11468_v27 = vld [vmem:[%s16651_s15 + $0x1b4] sm:$0xf0] }
 0xb12   : > { %v10921_v7 = vor.u32 %v11677_v8, %v10918_v62  ;;  %v9932_v8 = vld [vmem:[%s16651_s15 + $0x88] sm:$0xf]  ;;  %v11432_v62 = vld [vmem:[%s16651_s15 + $0x94] sm:$0xf0] }
 0xb13   : > { %8544 = vmatpush.bf16.msra.mxu3 %v10729_v59  ;;  %8557 = vmatpush.bf16.msrb.mxu0 %v10857_v9  ;;  %v11641_v59 = vld [vmem:[%s16651_s15 + $0x724] sm:$0xf]  ;;  %v10774_v9 = vld [vmem:[%s16651_s15 + $0x730] sm:$0xf0]  ;;  %v9900_v44 = vld [vmem:[%s16651_s15 + $0x48] sm:$0xf] }
 0xb14   : > { %8525 = vmatmul.bf16.vlgmr.msrb.gmra.mxu2 %v14984_v23  ;;  %8538 = vmatmul.bf16.vlgmr.msra.gmra.mxu1 %v14987_v41  ;;  %v10300_v1 = vld [vmem:[%s16651_s15 + $0x368] sm:$0xf]  ;;  %v11524_v33 = vld [vmem:[%s16651_s15 + $0x374] sm:$0xf0] }
 0xb15   : > { %8569 = vmatpush.bf16.msra.mxu2 %v11001_v3  ;;  %8582 = vmatpush.bf16.msrb.mxu1 %v11129_v12  ;;  %v10649_v3 = vor.u32 %v11609_v39, %v10646_v15  ;;  %v10777_v12 = vor.u32 %v11641_v59, %v10774_v9  ;;  %v10220_v39 = vld [vmem:[%s16651_s15 + $0x2c8] sm:$0xf]  ;;  %v11504_v15 = vld [vmem:[%s16651_s15 + $0x2d4] sm:$0xf0] }
 0xb16   : > { %v10348_v59 = vld [vmem:[%s16651_s15 + $0x3c8] sm:$0xf]  ;;  %v11536_v9 = vld [vmem:[%s16651_s15 + $0x3d4] sm:$0xf0] }
 0xb17   : > { %8545 = vmatpush.bf16.msra.mxu3 %v10713_v0  ;;  %8558 = vmatpush.bf16.msrb.mxu0 %v10841_v36  ;;  %v9980_v0 = vld [vmem:[%s16651_s15 + $0xe8] sm:$0xf]  ;;  %v11444_v36 = vld [vmem:[%s16651_s15 + $0xf4] sm:$0xf0] }
 0xb19   : > { %8570 = vmatpush.bf16.msra.mxu2 %v10985_v32  ;;  %8583 = vmatpush.bf16.msrb.mxu1 %v11113_v37  ;;  %v11673_v32 = vld [vmem:[%s16651_s15 + $0x824] sm:$0xf]  ;;  %v10902_v37 = vld [vmem:[%s16651_s15 + $0x830] sm:$0xf0] }
 0xb1a   : > { %v10905_v60 = vor.u32 %v11673_v32, %v10902_v37  ;;  %v10205_v32 = vor.u32 %v11500_v35, %v10204_v43  ;;  %v10333_v37 = vor.u32 %v11532_v13, %v10332_v19  ;;  %v10268_v43 = vld [vmem:[%s16651_s15 + $0x328] sm:$0xf]  ;;  %v11516_v35 = vld [vmem:[%s16651_s15 + $0x334] sm:$0xf0] }
 0xb1b   : > { %8546 = vmatpush.bf16.msra.mxu3 %v10697_v21  ;;  %8559 = vmatpush.bf16.msrb.mxu0 %v10825_v49  ;;  %v9981_v21 = vor.u32 %v11444_v36, %v9980_v0  ;;  %v10109_v49 = vor.u32 %v11476_v16, %v10108_v17  ;;  %v9933_v0 = vor.u32 %v11432_v62, %v9932_v8  ;;  %v10044_v17 = vld [vmem:[%s16651_s15 + $0x168] sm:$0xf]  ;;  %v11460_v16 = vld [vmem:[%s16651_s15 + $0x174] sm:$0xf0] }
 0xb1c   : > { %v10061_v36 = vor.u32 %v11464_v6, %v10060_v54  ;;  %v10620_v54 = vld [vmem:[%s16651_s15 + $0x5e8] sm:$0xf]  ;;  %v11604_v6 = vld [vmem:[%s16651_s15 + $0x5f4] sm:$0xf0] }
 0xb1d   : > { %8571 = vmatpush.bf16.msra.mxu2 %v10969_v5  ;;  %8584 = vmatpush.bf16.msrb.mxu1 %v11097_v11  ;;  %v11033_v5 = vor.u32 %v11705_v24, %v11030_v55  ;;  %v11472_v11 = vld [vmem:[%s16651_s15 + $0x1d4] sm:$0xf0]  ;;  %v10188_v24 = vld [vmem:[%s16651_s15 + $0x288] sm:$0xf] }
 0xb1e   : > { %v10093_v42 = vor.u32 %v11472_v11, %v10092_v34  ;;  %v11496_v55 = vld [vmem:[%s16651_s15 + $0x294] sm:$0xf0]  ;;  %v10028_v34 = vld [vmem:[%s16651_s15 + $0x148] sm:$0xf] }
 0xb1f   : > { %8547 = vmatpush.bf16.msra.mxu3 %v10681_v50  ;;  %8560 = vmatpush.bf16.msrb.mxu0 %v10809_v18  ;;  %v10236_v50 = vld [vmem:[%s16651_s15 + $0x2e8] sm:$0xf]  ;;  %v11508_v18 = vld [vmem:[%s16651_s15 + $0x2f4] sm:$0xf0] }
 0xb21   : > { %8572 = vmatpush.bf16.msra.mxu2 %v10953_v10  ;;  %8585 = vmatpush.bf16.msrb.mxu1 %v11081_v63  ;;  %v9948_v10 = vld [vmem:[%s16651_s15 + $0xa8] sm:$0xf]  ;;  %v10889_v63 = vor.u32 %v11669_v46, %v10886_v56  ;;  %v11492_v56 = vld [vmem:[%s16651_s15 + $0x274] sm:$0xf0] }
 0xb22   : > { %v10172_v46 = vld [vmem:[%s16651_s15 + $0x268] sm:$0xf] }
 0xb23   : > { %8548 = vmatpush.bf16.msra.mxu3 %v10665_v53  ;;  %8561 = vmatpush.bf16.msrb.mxu0 %v10793_v51  ;;  %v10237_v53 = vor.u32 %v11508_v18, %v10236_v50  ;;  %v10365_v51 = vor.u32 %v11540_v20, %v10364_v2  ;;  %v9901_v50 = vor.u32 %v11424_v25, %v9900_v44  ;;  %v9884_v2 = vld [vmem:[%s16651_s15 + $0x28] sm:$0xf]  ;;  %v11420_v20 = vld [vmem:[%s16651_s15 + $0x34] sm:$0xf0] }
 0xb24   : > { %v10876_v44 = vld [vmem:[%s16651_s15 + $0x7e8] sm:$0xf]  ;;  %v11668_v25 = vld [vmem:[%s16651_s15 + $0x7f4] sm:$0xf0] }
 0xb25   : > { %8573 = vmatpush.bf16.msra.mxu2 %v10937_v28  ;;  %8586 = vmatpush.bf16.msrb.mxu1 %v11065_v52  ;;  %v9949_v28 = vor.u32 %v11436_v29, %v9948_v10  ;;  %v10077_v52 = vor.u32 %v11468_v27, %v10076_v30  ;;  %v10173_v10 = vor.u32 %v11492_v56, %v10172_v46  ;;  %v11488_v29 = vld [vmem:[%s16651_s15 + $0x254] sm:$0xf0]  ;;  %v10284_v30 = vld [vmem:[%s16651_s15 + $0x348] sm:$0xf] }
 0xb26   : > { %v11520_v27 = vld [vmem:[%s16651_s15 + $0x354] sm:$0xf0] }
 0xb27   : > { %8549 = vmatpush.bf16.msra.mxu3 %v10649_v3  ;;  %8562 = vmatpush.bf16.msrb.mxu0 %v10777_v12  ;;  %v10221_v3 = vor.u32 %v11504_v15, %v10220_v39  ;;  %v10349_v12 = vor.u32 %v11536_v9, %v10348_v59  ;;  %v9868_v39 = vld [vmem:[%s16651_s15 + $0x8] sm:$0xf]  ;;  %v11416_v15 = vld [vmem:[%s16651_s15 + $0x14] sm:$0xf0]  ;;  %v10285_v62 = vor.u32 %v11520_v27, %v10284_v30 }
 0xb28   : > { %v9996_v59 = vld [vmem:[%s16651_s15 + $0x108] sm:$0xf]  ;;  %v11448_v9 = vld [vmem:[%s16651_s15 + $0x114] sm:$0xf0]  ;;  %v9869_v19 = vor.u32 %v11416_v15, %v9868_v39 }
 0xb29   : > { %8574 = vmatpush.bf16.msra.mxu2 %v10921_v7  ;;  %8587 = vmatpush.bf16.msrb.mxu1 %v11049_v57  ;;  %v9916_v7 = vld [vmem:[%s16651_s15 + $0x68] sm:$0xf]  ;;  %v11428_v57 = vld [vmem:[%s16651_s15 + $0x74] sm:$0xf0]  ;;  %v9997_v13 = vor.u32 %v11448_v9, %v9996_v59 }
 0xb2a   : > { %v11564_v56 = vld [vmem:[%s16651_s15 + $0x4b4] sm:$0xf0]  ;;  %v10572_v30 = vld [vmem:[%s16651_s15 + $0x588] sm:$0xf] }
 0xb2b   : > { %8550 = vmatpush.bf16.msra.mxu3 %v10633_v58  ;;  %8563 = vmatpush.bf16.msrb.mxu0 %v10761_v22  ;;  %v10316_v58 = vld [vmem:[%s16651_s15 + $0x388] sm:$0xf]  ;;  %v11528_v22 = vld [vmem:[%s16651_s15 + $0x394] sm:$0xf0] }
 0xb2c   : > { %v10317_v11 = vor.u32 %v11528_v22, %v10316_v58  ;;  %v10252_v58 = vld [vmem:[%s16651_s15 + $0x308] sm:$0xf]  ;;  %v11512_v22 = vld [vmem:[%s16651_s15 + $0x314] sm:$0xf0] }
 0xb2d   : > { %8575 = vmatpush.bf16.msra.mxu2 %v10905_v60  ;;  %8588 = vmatpush.bf16.msrb.mxu1 %v11033_v5  ;;  %v11456_v60 = vld [vmem:[%s16651_s15 + $0x154] sm:$0xf0]  ;;  %v10189_v5 = vor.u32 %v11496_v55, %v10188_v24  ;;  %v10124_v24 = vld [vmem:[%s16651_s15 + $0x208] sm:$0xf]  ;;  %v10253_v46 = vor.u32 %v11512_v22, %v10252_v58 }
 0xb2e   : > { %8551 = vmatmul.bf16.vlgmr.msra.gmra.mxu3 %v15032_v26  ;;  %8564 = vmatmul.bf16.vlgmr.msrb.gmra.mxu0 %v15034_v4  ;;  %v10029_v18 = vor.u32 %v11456_v60, %v10028_v34  ;;  %v11480_v55 = vld [vmem:[%s16651_s15 + $0x214] sm:$0xf0]  ;;  %v10716_v39 = vld [vmem:[%s16651_s15 + $0x6a8] sm:$0xf] }
 0xb2f   : > { %8595 = vmatpush.bf16.msrb.mxu3 %v9981_v21  ;;  %8608 = vmatpush.bf16.msra.mxu0 %v10109_v49  ;;  %v9917_v21 = vor.u32 %v11428_v57, %v9916_v7  ;;  %v10045_v49 = vor.u32 %v11460_v16, %v10044_v17  ;;  %v10476_v7 = vld [vmem:[%s16651_s15 + $0x4c8] sm:$0xf]  ;;  %v11568_v57 = vld [vmem:[%s16651_s15 + $0x4d4] sm:$0xf0] }
 0xb30   : > { %v10604_v17 = vld [vmem:[%s16651_s15 + $0x5c8] sm:$0xf]  ;;  %v10477_v34 = vor.u32 %v11568_v57, %v10476_v7  ;;  %v11592_v27 = vld [vmem:[%s16651_s15 + $0x594] sm:$0xf0] }
 0xb31   : > { %8576 = vmatpush.bf16.msra.mxu2 %v10889_v63  ;;  %8589 = vmatpush.bf16.msrb.mxu1 %v11017_v48  ;;  %v10301_v63 = vor.u32 %v11524_v33, %v10300_v1  ;;  %v10156_v48 = vld [vmem:[%s16651_s15 + $0x248] sm:$0xf]  ;;  %v11596_v33 = vld [vmem:[%s16651_s15 + $0x5b4] sm:$0xf0] }
 0xb32   : > { %v10157_v8 = vor.u32 %v11488_v29, %v10156_v48  ;;  %v10588_v1 = vld [vmem:[%s16651_s15 + $0x5a8] sm:$0xf]  ;;  %v11560_v29 = vld [vmem:[%s16651_s15 + $0x494] sm:$0xf0] }
 0xb33   : > { %8596 = vmatpush.bf16.msrb.mxu3 %v9965_v47  ;;  %8609 = vmatpush.bf16.msra.mxu0 %v10093_v42  ;;  %v10012_v47 = vld [vmem:[%s16651_s15 + $0x128] sm:$0xf]  ;;  %v11452_v42 = vld [vmem:[%s16651_s15 + $0x134] sm:$0xf0] }
 0xb34   : > { %8577 = vmatmul.bf16.vlgmr.msra.gmra.mxu2 %v15120_v40  ;;  %8590 = vmatmul.bf16.vlgmr.msrb.gmra.mxu1 %v15123_v14  ;;  %v10444_v48 = vld [vmem:[%s16651_s15 + $0x488] sm:$0xf]  ;;  %v11628_v59 = vld [vmem:[%s16651_s15 + $0x6b4] sm:$0xf0] }
 0xb35   : > { %8621 = vmatpush.bf16.msrb.mxu2 %v10237_v53  ;;  %8634 = vmatpush.bf16.msra.mxu1 %v10365_v51  ;;  %v9885_v53 = vor.u32 %v11420_v20, %v9884_v2  ;;  %v10013_v51 = vor.u32 %v11452_v42, %v10012_v47  ;;  %v10732_v2 = vld [vmem:[%s16651_s15 + $0x6c8] sm:$0xf]  ;;  %v11632_v20 = vld [vmem:[%s16651_s15 + $0x6d4] sm:$0xf0] }
 0xb36   : > { %v10860_v47 = vld [vmem:[%s16651_s15 + $0x7c8] sm:$0xf]  ;;  %v11664_v42 = vld [vmem:[%s16651_s15 + $0x7d4] sm:$0xf0] }
 0xb37   : > { %8597 = vmatpush.bf16.msrb.mxu3 %v9949_v28  ;;  %8610 = vmatpush.bf16.msra.mxu0 %v10077_v52  ;;  %v10492_v28 = vld [vmem:[%s16651_s15 + $0x4e8] sm:$0xf]  ;;  %v11572_v52 = vld [vmem:[%s16651_s15 + $0x4f4] sm:$0xf0] }
 0xb38   : > { %v10844_v9 = vld [vmem:[%s16651_s15 + $0x7a8] sm:$0xf] }
 0xb39   : > { %8622 = vmatpush.bf16.msrb.mxu2 %v10221_v3  ;;  %8635 = vmatpush.bf16.msra.mxu1 %v10349_v12  ;;  %v10140_v3 = vld [vmem:[%s16651_s15 + $0x228] sm:$0xf]  ;;  %v11484_v12 = vld [vmem:[%s16651_s15 + $0x234] sm:$0xf0] }
 0xb3a   : > { %v10141_v16 = vor.u32 %v11484_v12, %v10140_v3  ;;  %v11588_v3 = vld [vmem:[%s16651_s15 + $0x574] sm:$0xf0]  ;;  %v10717_v12 = vor.u32 %v11628_v59, %v10716_v39  ;;  %v10412_v57 = vld [vmem:[%s16651_s15 + $0x448] sm:$0xf] }
 0xb3b   : > { %8598 = vmatpush.bf16.msrb.mxu3 %v9933_v0  ;;  %8611 = vmatpush.bf16.msra.mxu0 %v10061_v36  ;;  %v10493_v0 = vor.u32 %v11572_v52, %v10492_v28  ;;  %v10621_v36 = vor.u32 %v11604_v6, %v10620_v54  ;;  %v11660_v28 = vld [vmem:[%s16651_s15 + $0x7b4] sm:$0xf0]  ;;  %v10445_v52 = vor.u32 %v11560_v29, %v10444_v48  ;;  %v10556_v6 = vld [vmem:[%s16651_s15 + $0x568] sm:$0xf] }
 0xb3c   : > { %v11556_v54 = vld [vmem:[%s16651_s15 + $0x474] sm:$0xf0]  ;;  %v10557_v7 = vor.u32 %v11588_v3, %v10556_v6  ;;  %v10380_v48 = vld [vmem:[%s16651_s15 + $0x408] sm:$0xf] }
 0xb3d   : > { %8623 = vmatpush.bf16.msrb.mxu2 %v10205_v32  ;;  %8636 = vmatpush.bf16.msra.mxu1 %v10333_v37  ;;  %v10269_v32 = vor.u32 %v11516_v35, %v10268_v43  ;;  %v11600_v37 = vld [vmem:[%s16651_s15 + $0x5d4] sm:$0xf0]  ;;  %v10845_v43 = vor.u32 %v11660_v28, %v10844_v9  ;;  %v10700_v35 = vld [vmem:[%s16651_s15 + $0x688] sm:$0xf] }
 0xb3e   : > { %v10605_v60 = vor.u32 %v11600_v37, %v10604_v17  ;;  %v11584_v37 = vld [vmem:[%s16651_s15 + $0x554] sm:$0xf0]  ;;  %v11004_v39 = vld [vmem:[%s16651_s15 + $0x8e8] sm:$0xf] }
 0xb3f   : > { %8599 = vmatpush.bf16.msrb.mxu3 %v9917_v21  ;;  %8612 = vmatpush.bf16.msra.mxu0 %v10045_v49  ;;  %v10748_v21 = vld [vmem:[%s16651_s15 + $0x6e8] sm:$0xf]  ;;  %v11636_v49 = vld [vmem:[%s16651_s15 + $0x6f4] sm:$0xf0] }
 0xb40   : > { %v11544_v29 = vld [vmem:[%s16651_s15 + $0x414] sm:$0xf0]  ;;  %v10780_v3 = vld [vmem:[%s16651_s15 + $0x728] sm:$0xf] }
 0xb41   : > { %8624 = vmatpush.bf16.msrb.mxu2 %v10189_v5  ;;  %8637 = vmatpush.bf16.msra.mxu1 %v10317_v11  ;;  %v10460_v5 = vld [vmem:[%s16651_s15 + $0x4a8] sm:$0xf]  ;;  %v10125_v11 = vor.u32 %v11480_v55, %v10124_v24  ;;  %v11612_v6 = vld [vmem:[%s16651_s15 + $0x634] sm:$0xf0] }
 0xb43   : > { %8600 = vmatpush.bf16.msrb.mxu3 %v9901_v50  ;;  %8613 = vmatpush.bf16.msra.mxu0 %v10029_v18  ;;  %v10749_v50 = vor.u32 %v11636_v49, %v10748_v21  ;;  %v10877_v18 = vor.u32 %v11668_v25, %v10876_v44  ;;  %v10684_v21 = vld [vmem:[%s16651_s15 + $0x668] sm:$0xf]  ;;  %v11620_v44 = vld [vmem:[%s16651_s15 + $0x674] sm:$0xf0] }
 0xb44   : > { %v10812_v25 = vld [vmem:[%s16651_s15 + $0x768] sm:$0xf] }
 0xb45   : > { %8625 = vmatpush.bf16.msrb.mxu2 %v10173_v10  ;;  %8638 = vmatpush.bf16.msra.mxu1 %v10301_v63  ;;  %v10461_v10 = vor.u32 %v11564_v56, %v10460_v5  ;;  %v10589_v63 = vor.u32 %v11596_v33, %v10588_v1  ;;  %v10524_v56 = vld [vmem:[%s16651_s15 + $0x528] sm:$0xf]  ;;  %v11580_v1 = vld [vmem:[%s16651_s15 + $0x534] sm:$0xf0]  ;;  %v10685_v33 = vor.u32 %v11620_v44, %v10684_v21  ;;  %v11474_v44 = vld [vmem:[%s16651_s15 + $0x1ec] sm:$0xf] }
 0xb47   : > { %8601 = vmatpush.bf16.msrb.mxu3 %v9885_v53  ;;  %8614 = vmatpush.bf16.msra.mxu0 %v10013_v51  ;;  %v10733_v53 = vor.u32 %v11632_v20, %v10732_v2  ;;  %v10861_v51 = vor.u32 %v11664_v42, %v10860_v47  ;;  %v11616_v2 = vld [vmem:[%s16651_s15 + $0x654] sm:$0xf0]  ;;  %v10796_v20 = vld [vmem:[%s16651_s15 + $0x748] sm:$0xf] }
 0xb48   : > { %v11648_v47 = vld [vmem:[%s16651_s15 + $0x754] sm:$0xf0] }
 0xb49   : > { %8626 = vmatpush.bf16.msrb.mxu2 %v10157_v8  ;;  %8639 = vmatpush.bf16.msra.mxu1 %v10285_v62  ;;  %v10573_v8 = vor.u32 %v11592_v27, %v10572_v30  ;;  %v10428_v62 = vld [vmem:[%s16651_s15 + $0x468] sm:$0xf]  ;;  %v10797_v28 = vor.u32 %v11648_v47, %v10796_v20 }
 0xb4a   : > { %v8357_v15 = vpop.f32.mrf.mxu0  ;;  %v10508_v30 = vld [vmem:[%s16651_s15 + $0x508] sm:$0xf] }
 0xb4b   : > { %8602 = vmatpush.bf16.msrb.mxu3 %v9869_v19  ;;  %8615 = vmatpush.bf16.msra.mxu0 %v9997_v13  ;;  %v11624_v19 = vld [vmem:[%s16651_s15 + $0x694] sm:$0xf0]  ;;  %v10828_v13 = vld [vmem:[%s16651_s15 + $0x788] sm:$0xf] }
 0xb4c   : > { %v10701_v58 = vor.u32 %v11624_v19, %v10700_v35  ;;  %v10381_v35 = vor.u32 %v11544_v29, %v10380_v48  ;;  %v11470_v48 = vld [vmem:[%s16651_s15 + $0x1cc] sm:$0xf]  ;;  %v10094_v29 = vld [vmem:[%s16651_s15 + $0x1d8] sm:$0xf0] }
 0xb4d   : > { %8627 = vmatpush.bf16.msrb.mxu2 %v10141_v16  ;;  %8640 = vmatpush.bf16.msra.mxu1 %v10269_v32  ;;  %v11552_v16 = vld [vmem:[%s16651_s15 + $0x454] sm:$0xf0]  ;;  %v10540_v32 = vld [vmem:[%s16651_s15 + $0x548] sm:$0xf] }
 0xb4e   : > { %11142 = vmatmul.msk.bf16.vlgmr.msrb.gmra.mxu3 %vm5622_vm6, %v14858_v45  ;;  %11143 = vmatmul.msk.bf16.vlgmr.msra.gmra.mxu0 %vm5622_vm6, %v14861_v38  ;;  %v10541_v5 = vor.u32 %v11584_v37, %v10540_v32  ;;  %v11728_v32 = vld [vmem:[%s16651_s15 + $0x9d4] sm:$0xf0]  ;;  %v10636_v37 = vld [vmem:[%s16651_s15 + $0x608] sm:$0xf] }
 0xb4f   : > { %8647 = vmatpush.bf16.msra.mxu3 %v10493_v0  ;;  %8660 = vmatpush.bf16.msrb.mxu0 %v10621_v36  ;;  %v11656_v0 = vld [vmem:[%s16651_s15 + $0x794] sm:$0xf0]  ;;  %v10429_v36 = vor.u32 %v11556_v54, %v10428_v62  ;;  %v10652_v62 = vld [vmem:[%s16651_s15 + $0x628] sm:$0xf] }
 0xb50   : > { %v8344_v17 = vpop.f32.mrf.mxu3  ;;  %v10829_v22 = vor.u32 %v11656_v0, %v10828_v13 }
 0xb51   : > { %8628 = vmatpush.bf16.msrb.mxu2 %v10125_v11  ;;  %8641 = vmatpush.bf16.msra.mxu1 %v10253_v46  ;;  %v8358_v24 = vadd.f32 %v8357_v15, %v8344_v17  ;;  %v8383_v55 = vpop.f32.mrf.mxu1  ;;  %v10396_v11 = vld [vmem:[%s16651_s15 + $0x428] sm:$0xf]  ;;  %v11548_v46 = vld [vmem:[%s16651_s15 + $0x434] sm:$0xf0]  ;;  %v10653_v17 = vor.u32 %v11612_v6, %v10652_v62  ;;  %v9950_v62 = vld [vmem:[%s16651_s15 + $0xb8] sm:$0xf0] }
 0xb52   : > { %v8359_v49 = vpop.f32.mrf.mxu0  ;;  %v11700_v15 = vld [vmem:[%s16651_s15 + $0x8f4] sm:$0xf0]  ;;  %v10078_v6 = vld [vmem:[%s16651_s15 + $0x1b8] sm:$0xf0] }
 0xb53   : > { %8648 = vmatpush.bf16.msra.mxu3 %v10477_v34  ;;  %8661 = vmatpush.bf16.msrb.mxu0 %v10605_v60  ;;  %v11652_v34 = vld [vmem:[%s16651_s15 + $0x774] sm:$0xf0]  ;;  %v10413_v60 = vor.u32 %v11552_v16, %v10412_v57  ;;  %v11005_v13 = vor.u32 %v11700_v15, %v11004_v39  ;;  %v11116_v57 = vld [vmem:[%s16651_s15 + $0x9c8] sm:$0xf]  ;;  %v9982_v49 = vld [vmem:[%s16651_s15 + $0xf8] sm:$0xf0] }
 0xb54   : > { %8629 = vmatmul.bf16.vlgmr.msrb.gmra.mxu2 %v14915_v31  ;;  %8642 = vmatmul.bf16.vlgmr.msra.gmra.mxu1 %v14919_v61  ;;  %v11688_v39 = vld [vmem:[%s16651_s15 + $0x894] sm:$0xf0]  ;;  %v11084_v15 = vld [vmem:[%s16651_s15 + $0x988] sm:$0xf] }
 0xb55   : > { %8673 = vmatpush.bf16.msra.mxu2 %v10749_v50  ;;  %8686 = vmatpush.bf16.msrb.mxu1 %v10877_v18  ;;  %v10813_v50 = vor.u32 %v11652_v34, %v10812_v25  ;;  %v10668_v18 = vld [vmem:[%s16651_s15 + $0x648] sm:$0xf]  ;;  %v10110_v25 = vld [vmem:[%s16651_s15 + $0x1f8] sm:$0xf0] }
 0xb56   : > { %v10669_v9 = vor.u32 %v11616_v2, %v10668_v18  ;;  %v11724_v18 = vld [vmem:[%s16651_s15 + $0x9b4] sm:$0xf0]  ;;  %v10113_v47 = vor.u32 %v11474_v44, %v10110_v25  ;;  %v11052_v25 = vld [vmem:[%s16651_s15 + $0x948] sm:$0xf] }
 0xb57   : > { %8649 = vmatpush.bf16.msra.mxu3 %v10461_v10  ;;  %8662 = vmatpush.bf16.msrb.mxu0 %v10589_v63  ;;  %v8370_v42 = vpop.f32.mrf.mxu2  ;;  %v10397_v10 = vor.u32 %v11548_v46, %v10396_v11  ;;  %v10525_v63 = vor.u32 %v11580_v1, %v10524_v56  ;;  %v11680_v44 = vld [vmem:[%s16651_s15 + $0x854] sm:$0xf0] }
 0xb58   : > { %v8371_v27 = vadd.f32 %v8370_v42, %v8358_v24  ;;  %v11608_v24 = vld [vmem:[%s16651_s15 + $0x614] sm:$0xf0]  ;;  %v11438_v42 = vld [vmem:[%s16651_s15 + $0xcc] sm:$0xf] }
 0xb59   : > { %8674 = vmatpush.bf16.msra.mxu2 %v10733_v53  ;;  %8687 = vmatpush.bf16.msrb.mxu1 %v10861_v51  ;;  %v8346_v53 = vpop.f32.mrf.mxu3  ;;  %v11576_v51 = vld [vmem:[%s16651_s15 + $0x514] sm:$0xf0]  ;;  %v8385_v59 = vpop.f32.mrf.mxu1  ;;  %v10637_v56 = vor.u32 %v11608_v24, %v10636_v37  ;;  %v9934_v24 = vld [vmem:[%s16651_s15 + $0x98] sm:$0xf0] }
 0xb5a   : > { %v8384_v54 = vadd.f32 %v8383_v55, %v8371_v27  ;;  %v10509_v19 = vor.u32 %v11576_v51, %v10508_v30  ;;  %v10764_v55 = vld [vmem:[%s16651_s15 + $0x708] sm:$0xf]  ;;  %v11720_v59 = vld [vmem:[%s16651_s15 + $0x994] sm:$0xf0] }
 0xb5b   : > { %8650 = vmatpush.bf16.msra.mxu3 %v10445_v52  ;;  %8663 = vmatpush.bf16.msrb.mxu0 %v10573_v8  ;;  %v11132_v52 = vld [vmem:[%s16651_s15 + $0x9e8] sm:$0xf]  ;;  %v11732_v8 = vld [vmem:[%s16651_s15 + $0x9f4] sm:$0xf0] }
 0xb5c   : > { %v11133_v0 = vor.u32 %v11732_v8, %v11132_v52  ;;  %v10956_v51 = vld [vmem:[%s16651_s15 + $0x888] sm:$0xf]  ;;  %v11434_v52 = vld [vmem:[%s16651_s15 + $0xac] sm:$0xf] }
 0xb5d   : > { %8675 = vmatpush.bf16.msra.mxu2 %v10717_v12  ;;  %8688 = vmatpush.bf16.msrb.mxu1 %v10845_v43  ;;  %v11644_v12 = vld [vmem:[%s16651_s15 + $0x734] sm:$0xf0]  ;;  %v8409_v43 = vpop.f32.mrf.mxu0 }
 0xb5e   : > { %v10781_v16 = vor.u32 %v11644_v12, %v10780_v3  ;;  %v10957_v12 = vor.u32 %v11688_v39, %v10956_v51  ;;  %v9902_v51 = vld [vmem:[%s16651_s15 + $0x58] sm:$0xf0]  ;;  %v11454_v39 = vld [vmem:[%s16651_s15 + $0x14c] sm:$0xf] }
 0xb5f   : > { %8651 = vmatpush.bf16.msra.mxu3 %v10429_v36  ;;  %8664 = vmatpush.bf16.msrb.mxu0 %v10557_v7  ;;  %v10988_v36 = vld [vmem:[%s16651_s15 + $0x8c8] sm:$0xf]  ;;  %v11696_v7 = vld [vmem:[%s16651_s15 + $0x8d4] sm:$0xf0]  ;;  %v8372_v21 = vpop.f32.mrf.mxu2 }
 0xb60   : > { %v10989_v34 = vor.u32 %v11696_v7, %v10988_v36  ;;  %v11068_v36 = vld [vmem:[%s16651_s15 + $0x968] sm:$0xf]  ;;  %v11716_v7 = vld [vmem:[%s16651_s15 + $0x974] sm:$0xf0] }
 0xb61   : > { %8676 = vmatpush.bf16.msra.mxu2 %v10701_v58  ;;  %8689 = vmatpush.bf16.msrb.mxu1 %v10829_v22  ;;  %v11640_v58 = vld [vmem:[%s16651_s15 + $0x714] sm:$0xf0]  ;;  %v11442_v22 = vld [vmem:[%s16651_s15 + $0xec] sm:$0xf]  ;;  %v8396_v11 = vpop.f32.mrf.mxu3  ;;  %v8435_v46 = vpop.f32.mrf.mxu1  ;;  %v11069_v21 = vor.u32 %v11716_v7, %v11068_v36  ;;  %v10014_v7 = vld [vmem:[%s16651_s15 + $0x138] sm:$0xf0] }
 0xb62   : > { %v10765_v1 = vor.u32 %v11640_v58, %v10764_v55  ;;  %v8397_v2 = vadd.f32 %v8396_v11, %v8384_v54  ;;  %v9985_v20 = vor.u32 %v11442_v22, %v9982_v49  ;;  %v11466_v54 = vld [vmem:[%s16651_s15 + $0x1ac] sm:$0xf]  ;;  %v10062_v58 = vld [vmem:[%s16651_s15 + $0x198] sm:$0xf0]  ;;  %v10924_v49 = vld [vmem:[%s16651_s15 + $0x848] sm:$0xf] }
 0xb63   : > { %8652 = vmatpush.bf16.msra.mxu3 %v10413_v60  ;;  %8665 = vmatpush.bf16.msrb.mxu0 %v10541_v5  ;;  %v11117_v60 = vor.u32 %v11728_v32, %v11116_v57  ;;  %v10972_v5 = vld [vmem:[%s16651_s15 + $0x8a8] sm:$0xf]  ;;  %v9953_v57 = vor.u32 %v11434_v52, %v9950_v62  ;;  %v11430_v32 = vld [vmem:[%s16651_s15 + $0x8c] sm:$0xf] }
 0xb64   : > { %v8410_v53 = vadd.f32 %v8409_v43, %v8397_v2  ;;  %v11085_v43 = vor.u32 %v11720_v59, %v11084_v15  ;;  %v11462_v55 = vld [vmem:[%s16651_s15 + $0x18c] sm:$0xf]  ;;  %v10908_v2 = vld [vmem:[%s16651_s15 + $0x828] sm:$0xf]  ;;  %v10030_v15 = vld [vmem:[%s16651_s15 + $0x158] sm:$0xf0] }
 0xb65   : > { %8677 = vmatpush.bf16.msra.mxu2 %v10685_v33  ;;  %8690 = vmatpush.bf16.msrb.mxu1 %v10813_v50  ;;  %v11692_v33 = vld [vmem:[%s16651_s15 + $0x8b4] sm:$0xf0]  ;;  %v11100_v50 = vld [vmem:[%s16651_s15 + $0x9a8] sm:$0xf]  ;;  %v11426_v11 = vld [vmem:[%s16651_s15 + $0x6c] sm:$0xf] }
 0xb66   : > { %v10973_v30 = vor.u32 %v11692_v33, %v10972_v5  ;;  %v11101_v27 = vor.u32 %v11724_v18, %v11100_v50  ;;  %v10065_v5 = vor.u32 %v11462_v55, %v10062_v58  ;;  %v10046_v33 = vld [vmem:[%s16651_s15 + $0x178] sm:$0xf0]  ;;  %v10925_v50 = vor.u32 %v11680_v44, %v10924_v49  ;;  %v10892_v52 = vld [vmem:[%s16651_s15 + $0x808] sm:$0xf]  ;;  %v11450_v36 = vld [vmem:[%s16651_s15 + $0x12c] sm:$0xf] }
 0xb67   : > { %8653 = vmatpush.bf16.msra.mxu3 %v10397_v10  ;;  %8666 = vmatpush.bf16.msrb.mxu0 %v10525_v63  ;;  %v8411_v10 = vpop.f32.mrf.mxu0  ;;  %v9966_v63 = vld [vmem:[%s16651_s15 + $0xd8] sm:$0xf0]  ;;  %v8422_v8 = vpop.f32.mrf.mxu2  ;;  %v11020_v62 = vld [vmem:[%s16651_s15 + $0x908] sm:$0xf]  ;;  %v11502_v55 = vld [vmem:[%s16651_s15 + $0x2cc] sm:$0xf]  ;;  %v10017_v44 = vor.u32 %v11450_v36, %v10014_v7 }
 0xb68   : > { %v8423_v3 = vadd.f32 %v8422_v8, %v8410_v53  ;;  %v11708_v10 = vld [vmem:[%s16651_s15 + $0x934] sm:$0xf0]  ;;  %v10222_v58 = vld [vmem:[%s16651_s15 + $0x2d8] sm:$0xf0]  ;;  %v11490_v36 = vld [vmem:[%s16651_s15 + $0x26c] sm:$0xf] }
 0xb69   : > { %8678 = vmatpush.bf16.msra.mxu2 %v10669_v9  ;;  %8691 = vmatpush.bf16.msrb.mxu1 %v10797_v28  ;;  %v9969_v9 = vor.u32 %v11438_v42, %v9966_v63  ;;  %v10097_v28 = vor.u32 %v11470_v48, %v10094_v29  ;;  %v11036_v42 = vld [vmem:[%s16651_s15 + $0x928] sm:$0xf]  ;;  %v11672_v8 = vld [vmem:[%s16651_s15 + $0x814] sm:$0xf0]  ;;  %v10174_v7 = vld [vmem:[%s16651_s15 + $0x278] sm:$0xf0] }
 0xb6b   : > { %8654 = vmatpush.bf16.msra.mxu3 %v10381_v35  ;;  %8667 = vmatpush.bf16.msrb.mxu0 %v10509_v19  ;;  %v10940_v35 = vld [vmem:[%s16651_s15 + $0x868] sm:$0xf]  ;;  %v8398_v19 = vpop.f32.mrf.mxu3 }
 0xb6c   : > { %v10366_v19 = vld [vmem:[%s16651_s15 + $0x3f8] sm:$0xf0] }
 0xb6d   : > { %8679 = vmatpush.bf16.msra.mxu2 %v10653_v17  ;;  %8692 = vmatpush.bf16.msrb.mxu1 %v10781_v16  ;;  %v10081_v17 = vor.u32 %v11466_v54, %v10078_v6  ;;  %v8436_v16 = vadd.f32 %v8435_v46, %v8423_v3  ;;  %v11704_v54 = vld [vmem:[%s16651_s15 + $0x914] sm:$0xf0]  ;;  %v11506_v6 = vld [vmem:[%s16651_s15 + $0x2ec] sm:$0xf]  ;;  %v10238_v3 = vld [vmem:[%s16651_s15 + $0x2f8] sm:$0xf0] }
 0xb6e   : > { %8655 = vmatmul.bf16.vlgmr.msra.gmra.mxu3 %v14984_v23  ;;  %8668 = vmatmul.bf16.vlgmr.msrb.gmra.mxu0 %v14987_v41 }
 0xb6f   : > { %8699 = vmatpush.bf16.msrb.mxu3 %v11005_v13  ;;  %8712 = vmatpush.bf16.msra.mxu0 %v11133_v0  ;;  %v8437_v13 = vpop.f32.mrf.mxu1  ;;  %v11684_v0 = vld [vmem:[%s16651_s15 + $0x874] sm:$0xf0]  ;;  %v8461_v37 = vpop.f32.mrf.mxu0 }
 0xb70   : > { %v10941_v22 = vor.u32 %v11684_v0, %v10940_v35  ;;  %v8424_v46 = vpop.f32.mrf.mxu2  ;;  %v11538_v35 = vld [vmem:[%s16651_s15 + $0x3ec] sm:$0xf]  ;;  %v9886_v0 = vld [vmem:[%s16651_s15 + $0x38] sm:$0xf0] }
 0xb71   : > { %8680 = vmatpush.bf16.msra.mxu2 %v10637_v56  ;;  %8693 = vmatpush.bf16.msrb.mxu1 %v10765_v1  ;;  %v9918_v56 = vld [vmem:[%s16651_s15 + $0x78] sm:$0xf0]  ;;  %v11458_v1 = vld [vmem:[%s16651_s15 + $0x16c] sm:$0xf] }
 0xb72   : > { %v9921_v29 = vor.u32 %v11426_v11, %v9918_v56  ;;  %v11418_v13 = vld [vmem:[%s16651_s15 + $0x2c] sm:$0xf]  ;;  %v9998_v11 = vld [vmem:[%s16651_s15 + $0x118] sm:$0xf0] }
 0xb73   : > { %8700 = vmatpush.bf16.msrb.mxu3 %v10989_v34  ;;  %8713 = vmatpush.bf16.msra.mxu0 %v11117_v60  ;;  %v11712_v34 = vld [vmem:[%s16651_s15 + $0x954] sm:$0xf0]  ;;  %v9937_v60 = vor.u32 %v11430_v32, %v9934_v24  ;;  %v10369_v24 = vor.u32 %v11538_v35, %v10366_v19  ;;  %v9889_v49 = vor.u32 %v11418_v13, %v9886_v0  ;;  %v11570_v46 = vld [vmem:[%s16651_s15 + $0x4ec] sm:$0xf]  ;;  %v10494_v56 = vld [vmem:[%s16651_s15 + $0x4f8] sm:$0xf0] }
 0xb74   : > { %8681 = vmatmul.bf16.vlgmr.msra.gmra.mxu2 %v15032_v26  ;;  %8694 = vmatmul.bf16.vlgmr.msrb.gmra.mxu1 %v15034_v4  ;;  %v11053_v18 = vor.u32 %v11712_v34, %v11052_v25  ;;  %v10350_v25 = vld [vmem:[%s16651_s15 + $0x3d8] sm:$0xf0]  ;;  %v11414_v34 = vld [vmem:[%s16651_s15 + $0xc] sm:$0xf] }
 0xb75   : > { %8725 = vmatpush.bf16.msrb.mxu2 %v9985_v20  ;;  %8738 = vmatpush.bf16.msra.mxu1 %v10113_v47  ;;  %v8448_v20 = vpop.f32.mrf.mxu3  ;;  %v11676_v47 = vld [vmem:[%s16651_s15 + $0x834] sm:$0xf0]  ;;  %v11594_v35 = vld [vmem:[%s16651_s15 + $0x5ac] sm:$0xf]  ;;  %v10590_v19 = vld [vmem:[%s16651_s15 + $0x5b8] sm:$0xf0] }
 0xb76   : > { %v8449_v63 = vadd.f32 %v8448_v20, %v8436_v16  ;;  %v11021_v16 = vor.u32 %v11704_v54, %v11020_v62  ;;  %v11526_v62 = vld [vmem:[%s16651_s15 + $0x38c] sm:$0xf]  ;;  %v10318_v54 = vld [vmem:[%s16651_s15 + $0x398] sm:$0xf0] }
 0xb77   : > { %8701 = vmatpush.bf16.msrb.mxu3 %v10973_v30  ;;  %8714 = vmatpush.bf16.msra.mxu0 %v11101_v27  ;;  %v16025_v48 = vpop.f32.mrf.mxu1  ;;  %v10049_v30 = vor.u32 %v11458_v1, %v10046_v33  ;;  %v11422_v27 = vld [vmem:[%s16651_s15 + $0x4c] sm:$0xf]  ;;  %v8463_v53 = vpop.f32.mrf.mxu0  ;;  %v10622_v33 = vld [vmem:[%s16651_s15 + $0x5f8] sm:$0xf0]  ;;  %v10321_v0 = vor.u32 %v11526_v62, %v10318_v54 }
 0xb78   : > { %v16039_v59 = vadd.f32 %v8461_v37, %v8449_v63  ;;  %v10241_v37 = vor.u32 %v11506_v6, %v10238_v3  ;;  %v11602_v1 = vld [vmem:[%s16651_s15 + $0x5ec] sm:$0xf]  ;;  %v10334_v63 = vld [vmem:[%s16651_s15 + $0x3b8] sm:$0xf0] }
 0xb79   : > { %8726 = vmatpush.bf16.msrb.mxu2 %v9969_v9  ;;  %8739 = vmatpush.bf16.msra.mxu1 %v10097_v28  ;;  %v10909_v9 = vor.u32 %v11676_v47, %v10908_v2  ;;  %v11037_v28 = vor.u32 %v11708_v10, %v11036_v42  ;;  %v11498_v2 = vld [vmem:[%s16651_s15 + $0x2ac] sm:$0xf]  ;;  %v10206_v42 = vld [vmem:[%s16651_s15 + $0x2b8] sm:$0xf0] }
 0xb7a   : > { %v11530_v10 = vld [vmem:[%s16651_s15 + $0x3ac] sm:$0xf]  ;;  %v10254_v62 = vld [vmem:[%s16651_s15 + $0x318] sm:$0xf0] }
 0xb7b   : > { %8702 = vmatpush.bf16.msrb.mxu3 %v10957_v12  ;;  %8715 = vmatpush.bf16.msra.mxu0 %v11085_v43  ;;  %v9905_v12 = vor.u32 %v11422_v27, %v9902_v51  ;;  %v10033_v43 = vor.u32 %v11454_v39, %v10030_v15  ;;  %v11566_v27 = vld [vmem:[%s16651_s15 + $0x4cc] sm:$0xf]  ;;  %v10478_v51 = vld [vmem:[%s16651_s15 + $0x4d8] sm:$0xf0] }
 0xb7c   : > { %v11598_v39 = vld [vmem:[%s16651_s15 + $0x5cc] sm:$0xf]  ;;  %v10606_v15 = vld [vmem:[%s16651_s15 + $0x5d8] sm:$0xf0]  ;;  %v10481_v6 = vor.u32 %v11566_v27, %v10478_v51 }
 0xb7d   : > { %8727 = vmatpush.bf16.msrb.mxu2 %v9953_v57  ;;  %8740 = vmatpush.bf16.msra.mxu1 %v10081_v17  ;;  %v16077_v57 = vpop.f32.mrf.mxu2  ;;  %v10893_v17 = vor.u32 %v11672_v8, %v10892_v52  ;;  %v8450_v32 = vpop.f32.mrf.mxu3  ;;  %v11494_v52 = vld [vmem:[%s16651_s15 + $0x28c] sm:$0xf]  ;;  %v10190_v8 = vld [vmem:[%s16651_s15 + $0x298] sm:$0xf0]  ;;  %v10609_v3 = vor.u32 %v11598_v39, %v10606_v15 }
 0xb7e   : > { %v10193_v13 = vor.u32 %v11494_v52, %v10190_v8  ;;  %v11582_v51 = vld [vmem:[%s16651_s15 + $0x54c] sm:$0xf]  ;;  %v10542_v39 = vld [vmem:[%s16651_s15 + $0x558] sm:$0xf0] }
 0xb7f   : > { %8703 = vmatpush.bf16.msrb.mxu3 %v10941_v22  ;;  %8716 = vmatpush.bf16.msra.mxu0 %v11069_v21  ;;  %v11534_v22 = vld [vmem:[%s16651_s15 + $0x3cc] sm:$0xf]  ;;  %v8489_v21 = vpop.f32.mrf.mxu1  ;;  %v10126_v52 = vld [vmem:[%s16651_s15 + $0x218] sm:$0xf0] }
 0xb80   : > { %v11510_v8 = vld [vmem:[%s16651_s15 + $0x30c] sm:$0xf] }
 0xb81   : > { %8728 = vmatpush.bf16.msrb.mxu2 %v9937_v60  ;;  %8741 = vmatpush.bf16.msra.mxu1 %v10065_v5  ;;  %v9870_v60 = vld [vmem:[%s16651_s15 + $0x18] sm:$0xf0]  ;;  %v11446_v5 = vld [vmem:[%s16651_s15 + $0x10c] sm:$0xf] }
 0xb82   : > { %v9873_v20 = vor.u32 %v11414_v34, %v9870_v60  ;;  %v10001_v47 = vor.u32 %v11446_v5, %v9998_v11  ;;  %v10286_v34 = vld [vmem:[%s16651_s15 + $0x358] sm:$0xf0]  ;;  %v11554_v11 = vld [vmem:[%s16651_s15 + $0x46c] sm:$0xf] }
 0xb83   : > { %8704 = vmatpush.bf16.msrb.mxu3 %v10925_v50  ;;  %8717 = vmatpush.bf16.msra.mxu0 %v11053_v18  ;;  %v10225_v50 = vor.u32 %v11502_v55, %v10222_v58  ;;  %v10353_v18 = vor.u32 %v11534_v22, %v10350_v25  ;;  %v11590_v55 = vld [vmem:[%s16651_s15 + $0x58c] sm:$0xf]  ;;  %v10574_v58 = vld [vmem:[%s16651_s15 + $0x598] sm:$0xf0]  ;;  %v10177_v22 = vor.u32 %v11490_v36, %v10174_v7 }
 0xb84   : > { %v11518_v25 = vld [vmem:[%s16651_s15 + $0x34c] sm:$0xf]  ;;  %v10577_v5 = vor.u32 %v11590_v55, %v10574_v58  ;;  %v10526_v36 = vld [vmem:[%s16651_s15 + $0x538] sm:$0xf0] }
 0xb85   : > { %8729 = vmatpush.bf16.msrb.mxu2 %v9921_v29  ;;  %8742 = vmatpush.bf16.msra.mxu1 %v10049_v30  ;;  %v10497_v29 = vor.u32 %v11570_v46, %v10494_v56  ;;  %v10625_v30 = vor.u32 %v11602_v1, %v10622_v33  ;;  %v8476_v53 = vpop.f32.mrf.mxu2  ;;  %v10430_v46 = vld [vmem:[%s16651_s15 + $0x478] sm:$0xf0]  ;;  %v11586_v56 = vld [vmem:[%s16651_s15 + $0x56c] sm:$0xf] }
 0xb86   : > { %v10558_v1 = vld [vmem:[%s16651_s15 + $0x578] sm:$0xf0]  ;;  %v11634_v54 = vld [vmem:[%s16651_s15 + $0x6ec] sm:$0xf] }
 0xb87   : > { %8705 = vmatpush.bf16.msrb.mxu3 %v10909_v9  ;;  %8718 = vmatpush.bf16.msra.mxu0 %v11037_v28  ;;  %v10209_v9 = vor.u32 %v11498_v2, %v10206_v42  ;;  %v10337_v28 = vor.u32 %v11530_v10, %v10334_v63  ;;  %v10270_v42 = vld [vmem:[%s16651_s15 + $0x338] sm:$0xf0]  ;;  %v10433_v63 = vor.u32 %v11554_v11, %v10430_v46  ;;  %v11662_v58 = vld [vmem:[%s16651_s15 + $0x7cc] sm:$0xf] }
 0xb88   : > { %v10414_v53 = vld [vmem:[%s16651_s15 + $0x458] sm:$0xf0]  ;;  %v11698_v11 = vld [vmem:[%s16651_s15 + $0x8ec] sm:$0xf] }
 0xb89   : > { %8730 = vmatpush.bf16.msrb.mxu2 %v9905_v12  ;;  %8743 = vmatpush.bf16.msra.mxu1 %v10033_v43  ;;  %v11562_v12 = vld [vmem:[%s16651_s15 + $0x4ac] sm:$0xf]  ;;  %v10462_v43 = vld [vmem:[%s16651_s15 + $0x4b8] sm:$0xf0] }
 0xb8a   : > { %v10465_v32 = vor.u32 %v11562_v12, %v10462_v43  ;;  %v10545_v12 = vor.u32 %v11582_v51, %v10542_v39  ;;  %v11666_v43 = vld [vmem:[%s16651_s15 + $0x7ec] sm:$0xf]  ;;  %v10734_v55 = vld [vmem:[%s16651_s15 + $0x6d8] sm:$0xf0] }
 0xb8b   : > { %8706 = vmatpush.bf16.msrb.mxu3 %v10893_v17  ;;  %8719 = vmatpush.bf16.msra.mxu0 %v11021_v16  ;;  %v11522_v17 = vld [vmem:[%s16651_s15 + $0x36c] sm:$0xf]  ;;  %v10302_v16 = vld [vmem:[%s16651_s15 + $0x378] sm:$0xf0] }
 0xb8c   : > { %v10305_v21 = vor.u32 %v11522_v17, %v10302_v16  ;;  %v10257_v16 = vor.u32 %v11510_v8, %v10254_v62  ;;  %v11006_v46 = vld [vmem:[%s16651_s15 + $0x8f8] sm:$0xf0]  ;;  %v11654_v62 = vld [vmem:[%s16651_s15 + $0x78c] sm:$0xf] }
 0xb8d   : > { %8731 = vmatpush.bf16.msrb.mxu2 %v9889_v49  ;;  %8744 = vmatpush.bf16.msra.mxu1 %v10017_v44  ;;  %v11486_v49 = vld [vmem:[%s16651_s15 + $0x24c] sm:$0xf]  ;;  %v10158_v44 = vld [vmem:[%s16651_s15 + $0x258] sm:$0xf0] }
 0xb8e   : > { %8707 = vmatmul.bf16.vlgmr.msrb.gmra.mxu3 %v15120_v40  ;;  %8720 = vmatmul.bf16.vlgmr.msra.gmra.mxu0 %v15123_v14  ;;  %v10161_v33 = vor.u32 %v11486_v49, %v10158_v44  ;;  %v10862_v44 = vld [vmem:[%s16651_s15 + $0x7d8] sm:$0xf0] }
 0xb8f   : > { %8751 = vmatpush.bf16.msra.mxu3 %v10241_v37  ;;  %8764 = vmatpush.bf16.msrb.mxu0 %v10369_v24  ;;  %v10593_v37 = vor.u32 %v11594_v35, %v10590_v19  ;;  %v10446_v24 = vld [vmem:[%s16651_s15 + $0x498] sm:$0xf0]  ;;  %v11546_v19 = vld [vmem:[%s16651_s15 + $0x42c] sm:$0xf] }
 0xb90   : > { %v10878_v35 = vld [vmem:[%s16651_s15 + $0x7f8] sm:$0xf0] }
 0xb91   : > { %8732 = vmatpush.bf16.msrb.mxu2 %v9873_v20  ;;  %8745 = vmatpush.bf16.msra.mxu1 %v10001_v47  ;;  %v16222_v2 = vpop.f32.mrf.mxu3  ;;  %v10142_v20 = vld [vmem:[%s16651_s15 + $0x238] sm:$0xf0]  ;;  %v11514_v47 = vld [vmem:[%s16651_s15 + $0x32c] sm:$0xf]  ;;  %v16233_v10 = vpop.f32.mrf.mxu1 }
 0xb92   : > { %v10990_v39 = vld [vmem:[%s16651_s15 + $0x8d8] sm:$0xf0] }
 0xb93   : > { %8752 = vmatpush.bf16.msra.mxu3 %v10225_v50  ;;  %8765 = vmatpush.bf16.msrb.mxu0 %v10353_v18  ;;  %v10289_v50 = vor.u32 %v11518_v25, %v10286_v34  ;;  %v11482_v18 = vld [vmem:[%s16651_s15 + $0x22c] sm:$0xf]  ;;  %v10382_v34 = vld [vmem:[%s16651_s15 + $0x418] sm:$0xf0] }
 0xb94   : > { %11144 = vmatmul.msk.bf16.vlgmr.msrb.gmra.mxu2 %vm5622_vm6, %v14858_v45  ;;  %11145 = vmatmul.msk.bf16.vlgmr.msra.gmra.mxu1 %vm5622_vm6, %v14861_v38  ;;  %v11558_v45 = vld [vmem:[%s16651_s15 + $0x48c] sm:$0xf]  ;;  %v16184_v38 = vpop.f32.mrf.mxu0  ;;  %v10145_v15 = vor.u32 %v11482_v18, %v10142_v20  ;;  %v10702_v8 = vld [vmem:[%s16651_s15 + $0x698] sm:$0xf0] }
 0xb95   : > { %8777 = vmatpush.bf16.msra.mxu2 %v10497_v29  ;;  %8790 = vmatpush.bf16.msrb.mxu1 %v10625_v30  ;;  %v10449_v60 = vor.u32 %v11558_v45, %v10446_v24  ;;  %v10561_v29 = vor.u32 %v11586_v56, %v10558_v1  ;;  %v11550_v30 = vld [vmem:[%s16651_s15 + $0x44c] sm:$0xf]  ;;  %v10881_v45 = vor.u32 %v11666_v43, %v10878_v35  ;;  %v11134_v1 = vld [vmem:[%s16651_s15 + $0x9f8] sm:$0xf0] }
 0xb96   : > { %v11630_v24 = vld [vmem:[%s16651_s15 + $0x6cc] sm:$0xf]  ;;  %v11102_v35 = vld [vmem:[%s16651_s15 + $0x9b8] sm:$0xf0] }
 0xb97   : > { %8753 = vmatpush.bf16.msra.mxu3 %v10209_v9  ;;  %8766 = vmatpush.bf16.msrb.mxu0 %v10337_v28  ;;  %v10273_v9 = vor.u32 %v11514_v47, %v10270_v42  ;;  %v11478_v28 = vld [vmem:[%s16651_s15 + $0x20c] sm:$0xf]  ;;  %v16283_v7 = vpop.f32.mrf.mxu2  ;;  %v10718_v42 = vld [vmem:[%s16651_s15 + $0x6b8] sm:$0xf0] }
 0xb98   : > { %v10129_v17 = vor.u32 %v11478_v28, %v10126_v52  ;;  %v11542_v25 = vld [vmem:[%s16651_s15 + $0x40c] sm:$0xf]  ;;  %v8488_v52 = vadd.f32 %v16025_v48, %v16077_v57 }
 0xb99   : > { %8778 = vmatpush.bf16.msra.mxu2 %v10481_v6  ;;  %8791 = vmatpush.bf16.msrb.mxu1 %v10609_v3  ;;  %v10750_v6 = vld [vmem:[%s16651_s15 + $0x6f8] sm:$0xf0]  ;;  %v10417_v3 = vor.u32 %v11550_v30, %v10414_v53  ;;  %v11730_v56 = vld [vmem:[%s16651_s15 + $0x9ec] sm:$0xf]  ;;  %v10385_v20 = vor.u32 %v11542_v25, %v10382_v34  ;;  %v11009_v30 = vor.u32 %v11698_v11, %v11006_v46  ;;  %v16417_v34 = vld [vmem:[%s16652_s16] sm:$0xf] }
 0xb9a   : > { %v11626_v18 = vld [vmem:[%s16651_s15 + $0x6ac] sm:$0xf]  ;;  %v8501_v57 = vadd.f32 %v16222_v2, %v8488_v52  ;;  %v10798_v25 = vld [vmem:[%s16651_s15 + $0x758] sm:$0xf0] }
 0xb9b   : > { %8754 = vmatpush.bf16.msra.mxu3 %v10193_v13  ;;  %8767 = vmatpush.bf16.msrb.mxu0 %v10321_v0  ;;  %v10398_v13 = vld [vmem:[%s16651_s15 + $0x438] sm:$0xf0]  ;;  %v11578_v0 = vld [vmem:[%s16651_s15 + $0x52c] sm:$0xf] }
 0xb9c   : > { %v8515_v27 = vpop.f32.mrf.mxu0  ;;  %v10529_v49 = vor.u32 %v11578_v0, %v10526_v36  ;;  %v11694_v53 = vld [vmem:[%s16651_s15 + $0x8cc] sm:$0xf]  ;;  %v10686_v0 = vld [vmem:[%s16651_s15 + $0x678] sm:$0xf0] }
 0xb9d   : > { %8779 = vmatpush.bf16.msra.mxu2 %v10465_v32  ;;  %8792 = vmatpush.bf16.msrb.mxu1 %v10593_v37  ;;  %v8502_v32 = vpop.f32.mrf.mxu3  ;;  %v10753_v37 = vor.u32 %v11634_v54, %v10750_v6  ;;  %v11137_v27 = vor.u32 %v11730_v56, %v11134_v1  ;;  %v11622_v28 = vld [vmem:[%s16651_s15 + $0x68c] sm:$0xf]  ;;  %v10830_v54 = vld [vmem:[%s16651_s15 + $0x798] sm:$0xf0]  ;;  %v10993_v6 = vor.u32 %v11694_v53, %v10990_v39 }
 0xb9e   : > { %v11690_v48 = vld [vmem:[%s16651_s15 + $0x8ac] sm:$0xf]  ;;  %v10942_v11 = vld [vmem:[%s16651_s15 + $0x878] sm:$0xf0] }
 0xb9f   : > { %8755 = vmatpush.bf16.msra.mxu3 %v10177_v22  ;;  %8768 = vmatpush.bf16.msrb.mxu0 %v10305_v21  ;;  %v8541_v22 = vpop.f32.mrf.mxu1  ;;  %v10401_v21 = vor.u32 %v11546_v19, %v10398_v13  ;;  %v8528_v51 = vpop.f32.mrf.mxu2  ;;  %v11722_v43 = vld [vmem:[%s16651_s15 + $0x9ac] sm:$0xf]  ;;  %v10705_v19 = vor.u32 %v11622_v28, %v10702_v8  ;;  %v10833_v13 = vor.u32 %v11654_v62, %v10830_v54  ;;  %v11070_v56 = vld [vmem:[%s16651_s15 + $0x978] sm:$0xf0] }
 0xba0   : > { %v11618_v2 = vld [vmem:[%s16651_s15 + $0x66c] sm:$0xf]  ;;  %v11105_v32 = vor.u32 %v11722_v43, %v11102_v35  ;;  %v10638_v8 = vld [vmem:[%s16651_s15 + $0x618] sm:$0xf0] }
 0xba1   : > { %8780 = vmatpush.bf16.msra.mxu2 %v10449_v60  ;;  %8793 = vmatpush.bf16.msrb.mxu1 %v10577_v5  ;;  %v11574_v60 = vld [vmem:[%s16651_s15 + $0x50c] sm:$0xf]  ;;  %v10510_v5 = vld [vmem:[%s16651_s15 + $0x518] sm:$0xf0] }
 0xba2   : > { %v10513_v47 = vor.u32 %v11574_v60, %v10510_v5  ;;  %v11650_v36 = vld [vmem:[%s16651_s15 + $0x76c] sm:$0xf]  ;;  %v10766_v54 = vld [vmem:[%s16651_s15 + $0x718] sm:$0xf0] }
 0xba3   : > { %8756 = vmatpush.bf16.msra.mxu3 %v10161_v33  ;;  %8769 = vmatpush.bf16.msrb.mxu0 %v10289_v50  ;;  %v10737_v33 = vor.u32 %v11630_v24, %v10734_v55  ;;  %v10865_v50 = vor.u32 %v11662_v58, %v10862_v44  ;;  %v11718_v24 = vld [vmem:[%s16651_s15 + $0x98c] sm:$0xf]  ;;  %v11086_v55 = vld [vmem:[%s16651_s15 + $0x998] sm:$0xf0]  ;;  %v10689_v58 = vor.u32 %v11618_v2, %v10686_v0 }
 0xba4   : > { %v11646_v44 = vld [vmem:[%s16651_s15 + $0x74c] sm:$0xf]  ;;  %v11089_v60 = vor.u32 %v11718_v24, %v11086_v55  ;;  %v10910_v43 = vld [vmem:[%s16651_s15 + $0x838] sm:$0xf0] }
 0xba5   : > { %8781 = vmatpush.bf16.msra.mxu2 %v10433_v63  ;;  %8794 = vmatpush.bf16.msrb.mxu1 %v10561_v29  ;;  %v11658_v63 = vld [vmem:[%s16651_s15 + $0x7ac] sm:$0xf]  ;;  %v10846_v29 = vld [vmem:[%s16651_s15 + $0x7b8] sm:$0xf0] }
 0xba6   : > { %v11682_v5 = vld [vmem:[%s16651_s15 + $0x86c] sm:$0xf] }
 0xba7   : > { %8757 = vmatpush.bf16.msra.mxu3 %v10145_v15  ;;  %8770 = vmatpush.bf16.msrb.mxu0 %v10273_v9  ;;  %v11726_v15 = vld [vmem:[%s16651_s15 + $0x9cc] sm:$0xf]  ;;  %v10849_v9 = vor.u32 %v11658_v63, %v10846_v29  ;;  %v10782_v63 = vld [vmem:[%s16651_s15 + $0x738] sm:$0xf0]  ;;  %v8856_v29 = vperm.slane %v16417_v34, 0 }
 0xba8   : > { %v11714_v46 = vld [vmem:[%s16651_s15 + $0x96c] sm:$0xf] }
 0xba9   : > { %8782 = vmatpush.bf16.msra.mxu2 %v10417_v3  ;;  %8795 = vmatpush.bf16.msrb.mxu1 %v10545_v12  ;;  %v10974_v12 = vld [vmem:[%s16651_s15 + $0x8b8] sm:$0xf0]  ;;  %v11678_v53 = vld [vmem:[%s16651_s15 + $0x84c] sm:$0xf] }
 0xbaa   : > { %v11606_v52 = vld [vmem:[%s16651_s15 + $0x60c] sm:$0xf] }
 0xbab   : > { %8758 = vmatpush.bf16.msra.mxu3 %v10129_v17  ;;  %8771 = vmatpush.bf16.msrb.mxu0 %v10257_v16  ;;  %v10814_v17 = vld [vmem:[%s16651_s15 + $0x778] sm:$0xf0]  ;;  %v10977_v16 = vor.u32 %v11690_v48, %v10974_v12  ;;  %v11638_v62 = vld [vmem:[%s16651_s15 + $0x70c] sm:$0xf] }
 0xbac   : > { %v10817_v22 = vor.u32 %v11650_v36, %v10814_v17  ;;  %v11706_v35 = vld [vmem:[%s16651_s15 + $0x92c] sm:$0xf]  ;;  %v10769_v2 = vor.u32 %v11638_v62, %v10766_v54  ;;  %v8857_v36 = vperm.slane %v16417_v34, 1 }
 0xbad   : > { %8783 = vmatpush.bf16.msra.mxu2 %v10401_v21  ;;  %8796 = vmatpush.bf16.msrb.mxu1 %v10529_v49  ;;  %v10670_v49 = vld [vmem:[%s16651_s15 + $0x658] sm:$0xf0]  ;;  %v11670_v24 = vld [vmem:[%s16651_s15 + $0x80c] sm:$0xf] }
 0xbae   : > { %8759 = vmatmul.bf16.vlgmr.msra.gmra.mxu3 %v14915_v31  ;;  %8772 = vmatmul.bf16.vlgmr.msrb.gmra.mxu0 %v14919_v61  ;;  %v11118_v31 = vld [vmem:[%s16651_s15 + $0x9d8] sm:$0xf0]  ;;  %v10721_v61 = vor.u32 %v11626_v18, %v10718_v42  ;;  %v11642_v42 = vld [vmem:[%s16651_s15 + $0x72c] sm:$0xf] }
 0xbaf   : > { %8803 = vmatpush.bf16.msrb.mxu3 %v10753_v37  ;;  %8816 = vmatpush.bf16.msra.mxu0 %v10881_v45  ;;  %v11121_v3 = vor.u32 %v11726_v15, %v11118_v31  ;;  %v8565_v37 = vpop.f32.mrf.mxu0  ;;  %v10958_v45 = vld [vmem:[%s16651_s15 + $0x898] sm:$0xf0]  ;;  %v11710_v31 = vld [vmem:[%s16651_s15 + $0x94c] sm:$0xf]  ;;  %v10785_v28 = vor.u32 %v11642_v42, %v10782_v63 }
 0xbb0   : > { %v10926_v15 = vld [vmem:[%s16651_s15 + $0x858] sm:$0xf0] }
 0xbb1   : > { %8784 = vmatpush.bf16.msra.mxu2 %v10385_v20  ;;  %8797 = vmatpush.bf16.msrb.mxu1 %v10513_v47  ;;  %v8552_v20 = vpop.f32.mrf.mxu3  ;;  %v10654_v47 = vld [vmem:[%s16651_s15 + $0x638] sm:$0xf0] }
 0xbb2   : > { %v11736_v42 = vld [vmem:[%s16653_s17 + $0x18] sm:$0xff] }
 0xbb3   : > { %8804 = vmatpush.bf16.msrb.mxu3 %v10737_v33  ;;  %8817 = vmatpush.bf16.msra.mxu0 %v10865_v50  ;;  %v10801_v33 = vor.u32 %v11646_v44, %v10798_v25  ;;  %v11610_v50 = vld [vmem:[%s16651_s15 + $0x62c] sm:$0xf]  ;;  %v11747_v44 = vld [vmem:[%s16653_s17 + $0x70] sm:$0xff]  ;;  %v11744_v63 = vld [vmem:[%s16653_s17 + $0x58] sm:$0xff] }
 0xbb4   : > { %8785 = vmatmul.bf16.vlgmr.msra.gmra.mxu2 %v14984_v23  ;;  %8798 = vmatmul.bf16.vlgmr.msrb.gmra.mxu1 %v14987_v41  ;;  %v11686_v23 = vld [vmem:[%s16651_s15 + $0x88c] sm:$0xf]  ;;  %v8514_v41 = vadd.f32 %v16184_v38, %v8501_v57 }
 0xbb5   : > { %8829 = vmatpush.bf16.msrb.mxu2 %v11009_v30  ;;  %8842 = vmatpush.bf16.msra.mxu1 %v11137_v27  ;;  %v11614_v38 = vld [vmem:[%s16651_s15 + $0x64c] sm:$0xf]  ;;  %v8591_v30 = vpop.f32.mrf.mxu1  ;;  %v10945_v27 = vor.u32 %v11682_v5, %v10942_v11 }
 0xbb6   : > { %v8527_v21 = vadd.f32 %v16283_v7, %v8514_v41  ;;  %v10961_v7 = vor.u32 %v11686_v23, %v10958_v45  ;;  %v10673_v1 = vor.u32 %v11614_v38, %v10670_v49  ;;  %v11674_v57 = vld [vmem:[%s16651_s15 + $0x82c] sm:$0xf]  ;;  %v11022_v38 = vld [vmem:[%s16651_s15 + $0x918] sm:$0xf0]  ;;  %v11739_v49 = vld [vmem:[%s16653_s17 + $0x30] sm:$0xff] }
 0xbb7   : > { %8805 = vmatpush.bf16.msrb.mxu3 %v10721_v61  ;;  %8818 = vmatpush.bf16.msra.mxu0 %v10849_v9  ;;  %v8567_v39 = vpop.f32.mrf.mxu0  ;;  %v11054_v61 = vld [vmem:[%s16651_s15 + $0x958] sm:$0xf0]  ;;  %v10657_v9 = vor.u32 %v11610_v50, %v10654_v47 }
 0xbb8   : > { %v8540_v18 = vadd.f32 %v16233_v10, %v8527_v21  ;;  %v11073_v10 = vor.u32 %v11714_v46, %v11070_v56  ;;  %v11057_v48 = vor.u32 %v11710_v31, %v11054_v61  ;;  %v11738_v56 = vld [vmem:[%s16653_s17 + $0x28] sm:$0xff] }
 0xbb9   : > { %8830 = vmatpush.bf16.msrb.mxu2 %v10993_v6  ;;  %8843 = vmatpush.bf16.msra.mxu1 %v11121_v3  ;;  %v8864_v6 = vadd.f32 %v8856_v29, %v16039_v59  ;;  %v10929_v3 = vor.u32 %v11678_v53, %v10926_v15  ;;  %v11038_v59 = vld [vmem:[%s16651_s15 + $0x938] sm:$0xf0]  ;;  %v8554_v17 = vpop.f32.mrf.mxu3  ;;  %v11734_v15 = vld [vmem:[%s16653_s17 + $0x8] sm:$0xff] }
 0xbba   : > { %v8553_v51 = vadd.f32 %v8552_v20, %v8540_v18  ;;  %v11041_v45 = vor.u32 %v11706_v35, %v11038_v59  ;;  %v11742_v31 = vld [vmem:[%s16653_s17 + $0x48] sm:$0xff]  ;;  %v11755_v35 = vld [vmem:[%s16653_s17 + $0xb0] sm:$0xff] }
 0xbbb   : > { %8806 = vmatpush.bf16.msrb.mxu3 %v10705_v19  ;;  %8819 = vmatpush.bf16.msra.mxu0 %v10833_v13  ;;  %v8578_v19 = vpop.f32.mrf.mxu2  ;;  %v10641_v13 = vor.u32 %v11606_v52, %v10638_v8  ;;  %v8868_v23 = vmax.f32 %v8864_v6, 0.0  ;;  %v11733_v52 = vld [vmem:[%s16653_s17] sm:$0xff] }
 0xbbc   : > { %v8566_v12 = vadd.f32 %v8565_v37, %v8553_v51  ;;  %v10913_v37 = vor.u32 %v11674_v57, %v10910_v43  ;;  %v11741_v8 = vld [vmem:[%s16653_s17 + $0x40] sm:$0xff] }
 0xbbd   : > { %8831 = vmatpush.bf16.msrb.mxu2 %v10977_v16  ;;  %8844 = vmatpush.bf16.msra.mxu1 %v11105_v32  ;;  %v11740_v16 = vld [vmem:[%s16653_s17 + $0x38] sm:$0xff]  ;;  %v8593_v41 = vpop.f32.mrf.mxu1 }
 0xbbe   : > { %v8579_v0 = vadd.f32 %v8578_v19, %v8566_v12  ;;  %v11748_v32 = vld [vmem:[%s16653_s17 + $0x78] sm:$0xff] }
 0xbbf   : > { %8807 = vmatpush.bf16.msrb.mxu3 %v10689_v58  ;;  %8820 = vmatpush.bf16.msra.mxu0 %v10817_v22  ;;  %v10894_v58 = vld [vmem:[%s16651_s15 + $0x818] sm:$0xf0]  ;;  %v11702_v22 = vld [vmem:[%s16651_s15 + $0x90c] sm:$0xf] }
 0xbc0   : > { %v8592_v55 = vadd.f32 %v8591_v30, %v8579_v0  ;;  %v10897_v25 = vor.u32 %v11670_v24, %v10894_v58  ;;  %v11756_v12 = vld [vmem:[%s16653_s17 + $0xb8] sm:$0xff]  ;;  %v11753_v24 = vld [vmem:[%s16653_s17 + $0xa0] sm:$0xff] }
 0xbc1   : > { %8832 = vmatpush.bf16.msrb.mxu2 %v10961_v7  ;;  %8845 = vmatpush.bf16.msra.mxu1 %v11089_v60  ;;  %v11025_v7 = vor.u32 %v11702_v22, %v11022_v38  ;;  %v8872_v60 = vsel %vm5622_vm6, %v8868_v23, -inf  ;;  %v11752_v22 = vld [vmem:[%s16653_s17 + $0x98] sm:$0xff] }
 0xbc2   : > { %v8865_v21 = vadd.f32 %v8857_v36, %v8592_v55 }
 0xbc3   : > { %8808 = vmatpush.bf16.msrb.mxu3 %v10673_v1  ;;  %8821 = vmatpush.bf16.msra.mxu0 %v10801_v33  ;;  %v8580_v11 = vpop.f32.mrf.mxu2  ;;  %v11746_v1 = vld [vmem:[%s16653_s17 + $0x68] sm:$0xff]  ;;  %v8873_v33 = vrot.slane %v8872_v60, 4 }
 0xbc4   : > { %v8869_v5 = vmax.f32 %v8865_v21, 0.0  ;;  %v11751_v21 = vld [vmem:[%s16653_s17 + $0x90] sm:$0xff]  ;;  %v11750_v11 = vld [vmem:[%s16653_s17 + $0x88] sm:$0xff] }
 0xbc5   : > { %8833 = vmatpush.bf16.msrb.mxu2 %v10945_v27  ;;  %8846 = vmatpush.bf16.msra.mxu1 %v11073_v10  ;;  %v8874_v18 = vmax.f32 %v8872_v60, %v8873_v33 }
 0xbc6   : > { %v8879_v46 = vsel %vm5622_vm6, %v8869_v5, -inf }
 0xbc7   : > { %8809 = vmatpush.bf16.msrb.mxu3 %v10657_v9  ;;  %8822 = vmatpush.bf16.msra.mxu0 %v10785_v28  ;;  %v8880_v50 = vrot.slane %v8879_v46, 4  ;;  %v8875_v29 = vrot.slane %v8874_v18, 2 }
 0xbc9   : > { %8834 = vmatpush.bf16.msrb.mxu2 %v10929_v3  ;;  %8847 = vmatpush.bf16.msra.mxu1 %v11057_v48  ;;  %v8881_v20 = vmax.f32 %v8879_v46, %v8880_v50  ;;  %v8876_v27 = vmax.f32 %v8874_v18, %v8875_v29 }
 0xbcb   : > { %8810 = vmatpush.bf16.msrb.mxu3 %v10641_v13  ;;  %8823 = vmatpush.bf16.msra.mxu0 %v10769_v2  ;;  %v8617_v47 = vpop.f32.mrf.mxu0  ;;  %v8882_v30 = vrot.slane %v8881_v20, 2  ;;  %v8877_v61 = vrot.slane %v8876_v27, 1 }
 0xbcd   : > { %8835 = vmatpush.bf16.msrb.mxu2 %v10913_v37  ;;  %8848 = vmatpush.bf16.msra.mxu1 %v11041_v45  ;;  %v8883_v10 = vmax.f32 %v8881_v20, %v8882_v30  ;;  %v8878_v62 = vmax.f32 %v8876_v27, %v8877_v61  ;;  %v11754_v37 = vld [vmem:[%s16653_s17 + $0xa8] sm:$0xff] }
 0xbce   : > { %8811 = vmatmul.bf16.vlgmr.msrb.gmra.mxu3 %v15032_v26  ;;  %8824 = vmatmul.bf16.vlgmr.msra.gmra.mxu0 %v15034_v4  ;;  %v11737_v26 = vld [vmem:[%s16653_s17 + $0x20] sm:$0xff] }
 0xbcf   : > { %9161 = vmatpush.bf16.msra.mxu3 %v11740_v16  ;;  %9174 = vmatpush.bf16.msrb.mxu0 %v11748_v32  ;;  %v11745_v4 = vld [vmem:[%s16653_s17 + $0x60] sm:$0xff]  ;;  %v8884_v9 = vrot.slane %v8883_v10, 1  ;;  %v8900_v48 = vpack.c.bf16 %v8878_v62, %v8878_v62 }
 0xbd1   : > { %8836 = vmatpush.bf16.msrb.mxu2 %v10897_v25  ;;  %8849 = vmatpush.bf16.msra.mxu1 %v11025_v7  ;;  %v8604_v53 = vpop.f32.mrf.mxu3  ;;  %v8643_v51 = vpop.f32.mrf.mxu1  ;;  %v8885_v54 = vmax.f32 %v8883_v10, %v8884_v9  ;;  %v8858_v7 = vperm.slane %v16417_v34, 2  ;;  %v11764_v10 = vld [vmem:[%s16653_s17 + $0xf8] sm:$0xff] }
 0xbd2   : > { %v8618_v16 = vadd.f32 %v8617_v47, %v8604_v53 }
 0xbd3   : > { %9162 = vmatpush.bf16.msra.mxu3 %v11739_v49  ;;  %9175 = vmatpush.bf16.msrb.mxu0 %v11747_v44  ;;  %v8619_v39 = vpop.f32.mrf.mxu0  ;;  %v8901_v57 = vpack.c.bf16 %v8885_v54, %v8885_v54 }
 0xbd4   : > { %8837 = vmatmul.bf16.vlgmr.msrb.gmra.mxu2 %v15120_v40  ;;  %8850 = vmatmul.bf16.vlgmr.msra.gmra.mxu1 %v15123_v14  ;;  %v11735_v40 = vld [vmem:[%s16653_s17 + $0x10] sm:$0xff] }
 0xbd5   : > { %v11743_v14 = vld [vmem:[%s16653_s17 + $0x50] sm:$0xff]  ;;  %9187 = vmatpush.bf16.msra.mxu2 %v11756_v12  ;;  %9200 = vmatpush.bf16.msrb.mxu1 %v11764_v10 }
 0xbd7   : > { %9163 = vmatpush.bf16.msra.mxu3 %v11738_v56  ;;  %9176 = vmatpush.bf16.msrb.mxu0 %v11746_v1  ;;  %v8630_v28 = vpop.f32.mrf.mxu2  ;;  %v11749_v1 = vld [vmem:[%s16653_s17 + $0x80] sm:$0xff] }
 0xbd8   : > { %v8631_v32 = vadd.f32 %v8630_v28, %v8618_v16 }
 0xbd9   : > { %v8606_v6 = vpop.f32.mrf.mxu3  ;;  %v8645_v3 = vpop.f32.mrf.mxu1  ;;  %9188 = vmatpush.bf16.msra.mxu2 %v11755_v35  ;;  %v11760_v35 = vld [vmem:[%s16653_s17 + $0xd8] sm:$0xff] }
 0xbda   : > { %v8644_v41 = vadd.f32 %v8643_v51, %v8631_v32  ;;  %v11763_v51 = vld [vmem:[%s16653_s17 + $0xf0] sm:$0xff]  ;;  %v11762_v6 = vld [vmem:[%s16653_s17 + $0xe8] sm:$0xff] }
 0xbdb   : > { %9164 = vmatpush.bf16.msra.mxu3 %v11737_v26  ;;  %9177 = vmatpush.bf16.msrb.mxu0 %v11745_v4 }
 0xbdc   : > { %9201 = vmatpush.bf16.msrb.mxu1 %v11763_v51 }
 0xbdd   : > { %9189 = vmatpush.bf16.msra.mxu2 %v11754_v37 }
 0xbdf   : > { %9165 = vmatpush.bf16.msra.mxu3 %v11736_v42  ;;  %9178 = vmatpush.bf16.msrb.mxu0 %v11744_v63  ;;  %v8632_v43 = vpop.f32.mrf.mxu2 }
 0xbe0   : > { %9202 = vmatpush.bf16.msrb.mxu1 %v11762_v6 }
 0xbe1   : > { %9190 = vmatpush.bf16.msra.mxu2 %v11753_v24 }
 0xbe3   : > { %9166 = vmatpush.bf16.msra.mxu3 %v11735_v40  ;;  %9179 = vmatpush.bf16.msrb.mxu0 %v11743_v14 }
 0xbe5   : > { %9191 = vmatpush.bf16.msra.mxu2 %v11752_v22 }
 0xbe7   : > { %9167 = vmatpush.bf16.msra.mxu3 %v11734_v15  ;;  %9180 = vmatpush.bf16.msrb.mxu0 %v11742_v31 }
 0xbe9   : > { %9192 = vmatpush.bf16.msra.mxu2 %v11751_v21 }
 0xbeb   : > { %9168 = vmatpush.bf16.msra.mxu3 %v11733_v52  ;;  %9181 = vmatpush.bf16.msrb.mxu0 %v11741_v8  ;;  %v8669_v59 = vpop.f32.mrf.mxu0 }
 0xbed   : > { %9193 = vmatpush.bf16.msra.mxu2 %v11750_v11 }
 0xbee   : > { %9169 = vmatmul.bf16.vlgmr.msra.gmra.mxu3 %v8900_v48  ;;  %9182 = vmatmul.bf16.vlgmr.msrb.gmra.mxu0 %v8901_v57  ;;  %v11761_v48 = vld [vmem:[%s16653_s17 + $0xe0] sm:$0xff] }
 0xbef   : > { %9203 = vmatpush.bf16.msrb.mxu1 %v11761_v48 }
 0xbf1   : > { %v8656_v19 = vpop.f32.mrf.mxu3  ;;  %v8695_v13 = vpop.f32.mrf.mxu1  ;;  %9194 = vmatpush.bf16.msra.mxu2 %v11749_v1 }
 0xbf2   : > { %v8657_v45 = vadd.f32 %v8656_v19, %v8644_v41 }
 0xbf3   : > { %v8671_v2 = vpop.f32.mrf.mxu0  ;;  %9204 = vmatpush.bf16.msrb.mxu1 %v11760_v35 }
 0xbf4   : > { %v8670_v55 = vadd.f32 %v8669_v59, %v8657_v45  ;;  %v11757_v45 = vld [vmem:[%s16653_s17 + $0xc0] sm:$0xff] }
 0xbf7   : > { %v8682_v0 = vpop.f32.mrf.mxu2 }
 0xbf8   : > { %v8683_v38 = vadd.f32 %v8682_v0, %v8670_v55 }
 0xbf9   : > { %v8658_v36 = vpop.f32.mrf.mxu3  ;;  %v8697_v17 = vpop.f32.mrf.mxu1 }
 0xbfa   : > { %v8696_v49 = vadd.f32 %v8695_v13, %v8683_v38  ;;  %v11759_v13 = vld [vmem:[%s16653_s17 + $0xd0] sm:$0xff]  ;;  %v8859_v17 = vperm.slane %v16417_v34, 3 }
 0xbfb   : > { %9205 = vmatpush.bf16.msrb.mxu1 %v11759_v13 }
 0xbff   : > { %v8684_v23 = vpop.f32.mrf.mxu2 }
 0xc00   : > { %v11758_v23 = vld [vmem:[%s16653_s17 + $0xc8] sm:$0xff] }
 0xc01   : > { %9206 = vmatpush.bf16.msrb.mxu1 %v11758_v23 }
 0xc05   : > { %9207 = vmatpush.bf16.msrb.mxu1 %v11757_v45 }
 0xc0b   : > { %v8721_v58 = vpop.f32.mrf.mxu0 }
 0xc11   : > { %v8708_v44 = vpop.f32.mrf.mxu3  ;;  %v8747_v60 = vpop.f32.mrf.mxu1 }
 0xc12   : > { %v8709_v25 = vadd.f32 %v8708_v44, %v8696_v49 }
 0xc13   : > { %v8723_v5 = vpop.f32.mrf.mxu0 }
 0xc14   : > { %v8722_v46 = vadd.f32 %v8721_v58, %v8709_v25 }
 0xc16   : > { %v8866_v56 = vadd.f32 %v8858_v7, %v8722_v46  ;;  %v8968_v7 = vld [vmem:[%s16654_s18] sm:$0x1] }
 0xc17   : > { %v8734_v50 = vpop.f32.mrf.mxu2 }
 0xc18   : > { %v8870_v33 = vmax.f32 %v8866_v56, 0.0  ;;  %v8748_v52 = vadd.f32 %v8747_v60, %v8734_v50 }
 0xc19   : > { %v8710_v26 = vpop.f32.mrf.mxu3  ;;  %v8749_v18 = vpop.f32.mrf.mxu1 }
 0xc1a   : > { %v8886_v4 = vsel %vm5622_vm6, %v8870_v33, -inf }
 0xc1b   : > { %v8887_v20 = vrot.slane %v8886_v4, 4 }
 0xc1d   : > { %v8888_v47 = vmax.f32 %v8886_v4, %v8887_v20 }
 0xc1f   : > { %v8889_v42 = vrot.slane %v8888_v47, 2  ;;  %v8736_v63 = vpop.f32.mrf.mxu2 }
 0xc21   : > { %v8890_v29 = vmax.f32 %v8888_v47, %v8889_v42 }
 0xc23   : > { %v8891_v30 = vrot.slane %v8890_v29, 1 }
 0xc25   : > { %v8892_v40 = vmax.f32 %v8890_v29, %v8891_v30 }
 0xc27   : > { %v8902_v14 = vpack.c.bf16 %v8892_v40, %v8892_v40 }
 0xc29   : > { %9195 = vmatmul.bf16.vlgmr.msra.gmra.mxu2 %v8902_v14 }
 0xc2b   : > { %v8773_v27 = vpop.f32.mrf.mxu0 }
 0xc31   : > { %v8760_v53 = vpop.f32.mrf.mxu3  ;;  %v8799_v39 = vpop.f32.mrf.mxu1 }
 0xc32   : > { %v8761_v8 = vadd.f32 %v8760_v53, %v8748_v52 }
 0xc33   : > { %v8775_v15 = vpop.f32.mrf.mxu0 }
 0xc34   : > { %v8774_v62 = vadd.f32 %v8773_v27, %v8761_v8 }
 0xc37   : > { %v8786_v31 = vpop.f32.mrf.mxu2 }
 0xc38   : > { %v8787_v3 = vadd.f32 %v8786_v31, %v8774_v62 }
 0xc39   : > { %v8762_v61 = vpop.f32.mrf.mxu3  ;;  %v8801_v9 = vpop.f32.mrf.mxu1 }
 0xc3a   : > { %v8800_v57 = vadd.f32 %v8799_v39, %v8787_v3 }
 0xc3f   : > { %v8788_v28 = vpop.f32.mrf.mxu2 }
 0xc4b   : > { %v8825_v54 = vpop.f32.mrf.mxu0 }
 0xc51   : > { %v8812_v12 = vpop.f32.mrf.mxu3  ;;  %v8851_v43 = vpop.f32.mrf.mxu1 }
 0xc52   : > { %v8813_v59 = vadd.f32 %v8812_v12, %v8800_v57 }
 0xc53   : > { %v8827_v19 = vpop.f32.mrf.mxu0 }
 0xc54   : > { %v8826_v2 = vadd.f32 %v8825_v54, %v8813_v59 }
 0xc57   : > { %v8838_v0 = vpop.f32.mrf.mxu2 }
 0xc58   : > { %v8839_v36 = vadd.f32 %v8838_v0, %v8826_v2 }
 0xc59   : > { %v8814_v16 = vpop.f32.mrf.mxu3  ;;  %v8853_v32 = vpop.f32.mrf.mxu1 }
 0xc5a   : > { %v8852_v41 = vadd.f32 %v8851_v43, %v8839_v36 }
 0xc5c   : > { %v8867_v37 = vadd.f32 %v8859_v17, %v8852_v41 }
 0xc5e   : > { %v8871_v24 = vmax.f32 %v8867_v37, 0.0 }
 0xc5f   : > { %v8840_v55 = vpop.f32.mrf.mxu2 }
 0xc60   : > { %v8893_v58 = vsel %vm5622_vm6, %v8871_v24, -inf }
 0xc61   : > { %v8894_v22 = vrot.slane %v8893_v58, 4 }
 0xc63   : > { %v8895_v34 = vmax.f32 %v8893_v58, %v8894_v22 }
 0xc65   : > { %v8896_v38 = vrot.slane %v8895_v34, 2 }
 0xc67   : > { %v8897_v21 = vmax.f32 %v8895_v34, %v8896_v38 }
 0xc69   : > { %v8898_v44 = vrot.slane %v8897_v21, 1 }
 0xc6b   : > { %v9183_v49 = vpop.f32.mrf.mxu0  ;;  %v8899_v25 = vmax.f32 %v8897_v21, %v8898_v44 }
 0xc6d   : > { %v8903_v5 = vpack.c.bf16 %v8899_v25, %v8899_v25 }
 0xc6f   : > { %9208 = vmatmul.bf16.vlgmr.msrb.gmra.mxu1 %v8903_v5 }
 0xc71   : > { %v9170_v60 = vpop.f32.mrf.mxu3 }
 0xc72   : > { %v9171_v11 = vadd.f32 %v9170_v60, %v8968_v7 }
 0xc73   : > { %v9185_v46 = vpop.f32.mrf.mxu0 }
 0xc74   : > { %v9184_v56 = vadd.f32 %v9183_v49, %v9171_v11 }
 0xc79   : > { %v9172_v1 = vpop.f32.mrf.mxu3 }
 0xcac   : > { %v9196_v33 = vpop.f32.mrf.mxu2 }
 0xcad   : > { %v9197_v26 = vadd.f32 %v9196_v33, %v9184_v56 }
 0xcb4   : > { %v9198_v50 = vpop.f32.mrf.mxu2 }
 0xcec   : > { %v9209_v4 = vpop.f32.mrf.mxu1 }
 0xced   : > { %v9210_v18 = vadd.f32 %v9209_v4, %v9197_v26 }
 0xcef   : > { %9214 = vst.msk [vmem:[%s592_s27] sm:$0x1] %vm9213_vm7, %v9210_v18 }
 0xcf0   : > { %11857 = shalt.err (!%p11854_p3)
}
 0xcf1   : > { %11765 = dma.vmem_to_hbm [thread:$0]  (%p12045_p5), %s9227_s23, 16, %s9229_s24, %s9216_s20  }
 0xcf4   : > { %v9211_v20 = vpop.f32.mrf.mxu1 }
 0xcf5 PF: > { %s16771_s2 = sld [smem:[#allocation7_spill]] }
 0xcf6   : > { %s16772_s27 = sld [smem:[#allocation5_spill]] }
 0xcfb   : > { %p11771_p4 = scmp.ge.s32.totalorder %s16771_s2, 2 }
 0xcfc   : > { %s9240_s6 = sand.u32 1, %s16772_s27  }
 0xcfd   : > { %p11768_p7 = pnand %p11771_p4, %p12049_p6  ;;  %s9241_s1 = scalar_lea.sflag [#allocation3], %s9240_s6 }
 0xcff   : > { %p11769_p8 = pneg %p11768_p7 }
 0xd01   : > { %11875 = dma.done.wait (%p11769_p8), %s9241_s1, 16  }
 0xd02   : > { %11877 = vsyncadd (%p11769_p8), %s9241_s1, 4294967280  ;;  %s16774_s21 = sld [smem:[#allocation8_spill]]  ;;  %s16777_s0 = smov %s11884_s30 }
 0xd03   : > { %s16775_s28 = sld [smem:[#allocation6_spill]] }
 0xd04   : > { %s16776_s20 = sld [smem:[#allocation9_spill]] }
 0xd08   : > { %p29_p9 = scmp.ge.s32.totalorder %s16774_s21, 4  }
 0xd09   : > { %s16778_s30 = smov %s16775_s28 }
 0xd0a   :  { %31 = sbr.rel (!%p29_p9) target bundleno = 11 (0xb), region = 136 }
 0xd0f   :  { %9246 = vsyncpa [#allocation3], 1 }
 0xd10   :  { %9248 = vsyncpa [#allocation3 + $0x1], 1 }

</bundles_post_ra>
